<compile_context>
chip_gen: v5e
topology: v5e:2x2
jax: 0.10.0
libtpu: 0.0.40
codegen_flags: <defaults>
</compile_context>

<pallas_src>
import jax
import jax.numpy as jnp
from jax import lax
from jax.experimental import pallas as pl
from jax.experimental.pallas import tpu as pltpu


# ---------------------------------------------------------------------------
# Fused kernel: conv1(1x1)+bn1+relu -> conv2(3x3)+bn2+relu -> conv3(1x1)+bn3
#               + identity residual + relu, all inside one grid step.
# Grid: (batch, H row-tiles).  Intermediates live only in a VMEM scratch.
# ---------------------------------------------------------------------------
def _bottleneck_kernel(xc_ref, xt_ref, xb_ref,            # activations (bf16)
                       w1_ref, w2f_ref, w3_ref,           # BN-scaled weights (bf16)
                       b12_ref, b3_ref,                   # BN biases (f32)
                       o_ref,                             # output (bf16)
                       y1cat_ref):                        # VMEM scratch (bf16)
    t = pl.program_id(1)
    n_t = pl.num_programs(1)
    th = xc_ref.shape[1]
    W = xc_ref.shape[2]
    planes = w1_ref.shape[1]

    # ---- Stage 1: 1x1 conv (BN1 scale pre-folded) + bias + ReLU -----------
    # Halo rows are concatenated with the centre rows -> ONE matmul over
    # (th+2)*W rows instead of three.
    x_all = jnp.concatenate([xt_ref[0], xc_ref[0], xb_ref[0]], axis=0)
    acc1 = lax.dot_general(x_all, w1_ref[...], (((2,), (0,)), ((), ())),
                           preferred_element_type=jnp.float32)
    y1 = jnp.maximum(acc1 + b12_ref[0:1], 0.0).astype(y1cat_ref.dtype)

    # ---- kw-folded (im2col-in-channels) layout: (th+2, W, 3*planes) -------
    # group 0 = tap at w-1, group 1 = tap at w, group 2 = tap at w+1; the W
    # image borders are zero inside the cat value (conv2 zero-padding).
    zcol = jnp.zeros((th + 2, 1, planes), y1.dtype)
    left = jnp.concatenate([zcol, y1[:, :W - 1, :]], axis=1)     # value at w-1
    right = jnp.concatenate([y1[:, 1:, :], zcol], axis=1)        # value at w+1
    y1cat_ref[...] = jnp.concatenate([left, y1, right], axis=2)  # single write

    # Zero the halo rows that lie outside the image (conv2's H zero-padding):
    # only the 1-row border, only at the image borders.
    @pl.when(t == 0)
    def _():
        y1cat_ref[0] = jnp.zeros((W, 3 * planes), y1cat_ref.dtype)

    @pl.when(t == n_t - 1)
    def _():
        y1cat_ref[th + 1] = jnp.zeros((W, 3 * planes), y1cat_ref.dtype)

    # ---- Stage 2: 3x3 conv as 3 matmuls with K = 3*planes (kh offsets are
    # aligned leading-axis slices of the scratch). -------------------------
    acc2 = jnp.zeros((th, W, planes), jnp.float32)
    for kh in range(3):
        acc2 = acc2 + lax.dot_general(
            y1cat_ref[kh:kh + th], w2f_ref[kh],
            (((2,), (0,)), ((), ())), preferred_element_type=jnp.float32)
    y2 = jnp.maximum(acc2 + b12_ref[1:2], 0.0).astype(jnp.bfloat16)

    # ---- Stage 3: 1x1 conv + bias + identity residual + final ReLU --------
    acc3 = lax.dot_general(y2, w3_ref[...], (((2,), (0,)), ((), ())),
                           preferred_element_type=jnp.float32)
    res = xc_ref[0].astype(jnp.float32)          # identity (Cin == Cout)
    o_ref[0] = jnp.maximum(acc3 + b3_ref[...] + res, 0.0).astype(o_ref.dtype)


# ---------------------------------------------------------------------------
# Wrapper helpers
# ---------------------------------------------------------------------------
def bn_fold(gamma, beta, mean, var, eps=1e-5):
    scale = gamma / jnp.sqrt(var + eps)
    bias = beta - mean * scale
    return scale, bias


def _vmem_estimate(th, W, Cin, planes, Cout):
    """Rough per-step VMEM footprint in bytes (double-buffered activations,
    single-buffered weights, scratch and live values)."""
    bf16, f32 = 2, 4
    act = (2 * th * W * Cin * bf16          # centre block x2 buffers
           + 2 * 2 * W * Cin * bf16         # two halo rows x2 buffers
           + 2 * th * W * Cout * bf16)      # output block x2 buffers
    weights = (Cin * planes + 9 * planes * planes + planes * Cout) * bf16
    biases = (2 * planes + Cout) * f32
    scratch = (th + 2) * W * 3 * planes * bf16
    live = ((th + 2) * W * planes * (bf16 + f32)
            + th * W * planes * f32 + th * W * Cout * f32)
    return act + weights + biases + scratch + live


def _pick_tile_h(H, W, Cin, planes, Cout, budget):
    """Largest divisor of H (ideally H itself -> full image) within budget."""
    for th in range(H, 0, -1):
        if H % th == 0 and _vmem_estimate(th, W, Cin, planes, Cout) <= budget:
            return th
    return 1


def bottleneck_forward(x_nchw, params, *, tile_h=None):
    """NCHW in / NCHW out.
    params: w1 (Cin,planes), w2 (3,3,planes,planes) HWIO, w3 (planes,Cout),
    bn{1,2,3} = (gamma, beta, running_mean, running_var)."""
    x = jnp.transpose(x_nchw, (0, 2, 3, 1))              # NCHW -> NHWC boundary
    B, H, W, Cin = x.shape
    planes = params["w1"].shape[1]
    Cout = params["w3"].shape[1]
    assert Cout == Cin, "identity residual requires inplanes == planes*expansion"

    # Generation-aware VMEM budget (v5e/v6e: 128 MiB, v7x: 64 MiB physical).
    try:
        info = pltpu.get_tpu_info()
        phys_vmem = int(getattr(info, "vmem_capacity_bytes", 64 * 1024 * 1024))
    except Exception:
        phys_vmem = 64 * 1024 * 1024

    if tile_h is None:
        th = _pick_tile_h(H, W, Cin, planes, Cout, budget=phys_vmem // 2)
    else:
        th = max(1, min(int(tile_h), H))
        while H % th:
            th -= 1
    n_ht = H // th

    s1, b1 = bn_fold(*params["bn1"])
    s2, b2 = bn_fold(*params["bn2"])
    s3, b3 = bn_fold(*params["bn3"])

    # Fold BN scales into the conv weights (eval-mode BN); kernel adds bias only.
    xb = x.astype(jnp.bfloat16)
    w1 = (params["w1"] * s1[None, :]).astype(jnp.bfloat16)                  # (Cin, p)
    w2f = (params["w2"] * s2[None, None, None, :]).reshape(
        3, 3 * planes, planes).astype(jnp.bfloat16)                         # (3, 3p, p)
    w3 = (params["w3"] * s3[None, :]).astype(jnp.bfloat16)                  # (p, Cout)
    b12 = jnp.stack([b1, b2]).astype(jnp.float32)                           # (2, p)
    b3r = b3.reshape(1, Cout).astype(jnp.float32)                           # (1, Cout)

    need = _vmem_estimate(th, W, Cin, planes, Cout)
    vmem_limit = int(min(max(2 * need, 32 * 1024 * 1024),
                         int(0.85 * phys_vmem)))

    flops = 2 * B * H * W * (Cin * planes + 9 * planes * planes + planes * Cout)
    bytes_accessed = (B * H * W * (Cin + Cout) * 2              # x in + y out (bf16)
                      + B * n_ht * 2 * W * Cin * 2              # halo re-fetches
                      + (Cin * planes + 9 * planes * planes + planes * Cout) * 2
                      + (2 * planes + Cout) * 4)

    center_spec = pl.BlockSpec((1, th, W, Cin), lambda b, t: (b, t, 0, 0))
    # One-row halos above/below the tile (index clamped at the image border;
    # the kernel zeroes the border rows under pl.when).
    top_spec = pl.BlockSpec(
        (1, 1, W, Cin), lambda b, t: (b, jnp.maximum(t * th - 1, 0), 0, 0))
    bot_spec = pl.BlockSpec(
        (1, 1, W, Cin), lambda b, t: (b, jnp.minimum((t + 1) * th, H - 1), 0, 0))
    out_spec = pl.BlockSpec((1, th, W, Cout), lambda b, t: (b, t, 0, 0))

    def build(const_mode):
        kw = {} if const_mode is None else {"pipeline_mode": const_mode}

        def const_spec(shape):
            zeros = (0,) * len(shape)
            return pl.BlockSpec(shape, lambda b, t, _z=zeros: _z, **kw)

        return pl.pallas_call(
            _bottleneck_kernel,
            out_shape=jax.ShapeDtypeStruct((B, H, W, Cout), jnp.bfloat16),
            grid_spec=pltpu.PrefetchScalarGridSpec(
                num_scalar_prefetch=0,
                grid=(B, n_ht),
                in_specs=[center_spec, top_spec, bot_spec,
                          const_spec((Cin, planes)),
                          const_spec((3, 3 * planes, planes)),
                          const_spec((planes, Cout)),
                          const_spec((2, planes)),
                          const_spec((1, Cout))],
                out_specs=out_spec,
                scratch_shapes=[pltpu.VMEM((th + 2, W, 3 * planes),
                                           jnp.bfloat16)]),
            compiler_params=pltpu.CompilerParams(
                dimension_semantics=("parallel", "parallel"),
                vmem_limit_bytes=vmem_limit),
            cost_estimate=pl.CostEstimate(flops=flops, transcendentals=0,
                                          bytes_accessed=bytes_accessed),
        )

    args = (xb, xb, xb, w1, w2f, w3, b12, b3r)
    try:
        # Grid-invariant inputs single-buffered (halves constant VMEM).
        out = build(pl.Buffered(1))(*args)
    except Exception:
        # Fallback: default (double-buffered) constant blocks.
        out = build(None)(*args)

    return jnp.transpose(out, (0, 3, 1, 2)).astype(x_nchw.dtype)  # NHWC -> NCHW


# ---------------------------------------------------------------------------
# Pure-JAX reference (lax.conv) mirroring the kernel's mixed precision.
# ---------------------------------------------------------------------------
def reference_forward(x_nchw, params):
    dn = ("NHWC", "HWIO", "NHWC")
    x = jnp.transpose(x_nchw, (0, 2, 3, 1)).astype(jnp.bfloat16)

    s1, b1 = bn_fold(*params["bn1"])
    s2, b2 = bn_fold(*params["bn2"])
    s3, b3 = bn_fold(*params["bn3"])
    w1 = (params["w1"] * s1[None, :]).astype(jnp.bfloat16)
    w2 = (params["w2"] * s2[None, None, None, :]).astype(jnp.bfloat16)
    w3 = (params["w3"] * s3[None, :]).astype(jnp.bfloat16)

    def conv(inp, w):
        return lax.conv_general_dilated(
            inp, w, (1, 1), "SAME", dimension_numbers=dn,
            preferred_element_type=jnp.float32)

    out = jnp.maximum(conv(x, w1[None, None]) + b1, 0.0).astype(jnp.bfloat16)
    out = jnp.maximum(conv(out, w2) + b2, 0.0).astype(jnp.bfloat16)
    out = conv(out, w3[None, None]) + b3 + x.astype(jnp.float32)
    out = jnp.maximum(out, 0.0)
    return jnp.transpose(out, (0, 3, 1, 2))


if __name__ == "__main__":
    # Small but lane-friendly config: Cout = planes*expansion = 128 (lane-dense
    # output) and inplanes == Cout so the identity residual applies.
    B, inplanes, planes, H, W = 2, 128, 32, 24, 16
    expansion = 4
    Cout = planes * expansion  # == inplanes

    key = jax.random.PRNGKey(0)
    ks = jax.random.split(key, 16)

    def bn_params(kg, kb, km, kv, c):
        gamma = 0.5 + jax.random.uniform(kg, (c,), jnp.float32)
        beta = 0.1 * jax.random.normal(kb, (c,), jnp.float32)
        mean = 0.1 * jax.random.normal(km, (c,), jnp.float32)
        var = 0.5 + jax.random.uniform(kv, (c,), jnp.float32)
        return (gamma, beta, mean, var)

    params = {
        # 1x1 convs stored as (Cin, Cout); 3x3 stored as (kh, kw, Cin, Cout)
        "w1": 0.1 * jax.random.normal(ks[0], (inplanes, planes), jnp.float32),
        "w2": 0.1 * jax.random.normal(ks[1], (3, 3, planes, planes), jnp.float32),
        "w3": 0.1 * jax.random.normal(ks[2], (planes, Cout), jnp.float32),
        "bn1": bn_params(ks[3], ks[4], ks[5], ks[6], planes),
        "bn2": bn_params(ks[7], ks[8], ks[9], ks[10], planes),
        "bn3": bn_params(ks[11], ks[12], ks[13], ks[14], Cout),
    }

    x = jax.random.normal(ks[15], (B, inplanes, H, W), jnp.float32)  # NCHW

    out = jax.block_until_ready(bottleneck_forward(x, params))
    ref = jax.block_until_ready(reference_forward(x, params))

    assert out.shape == (B, Cout, H, W)
    err = jnp.max(jnp.abs(out.astype(jnp.float32) - ref))
    assert jnp.allclose(out.astype(jnp.float32), ref, atol=2e-2, rtol=2e-2), \
        f"max abs err {err}"
    print("KERNEL_OK")
</pallas_src>

<mosaic_0001>
module attributes {stable_mosaic.version = 11 : i64} {
  func.func @_bottleneck_kernel(%arg0: i32, %arg1: i32, %arg2: memref<1x24x16x128xbf16, #tpu.memory_space<vmem>>, %arg3: memref<1x1x16x128xbf16, #tpu.memory_space<vmem>>, %arg4: memref<1x1x16x128xbf16, #tpu.memory_space<vmem>>, %arg5: memref<128x32xbf16, #tpu.memory_space<vmem>>, %arg6: memref<3x96x32xbf16, #tpu.memory_space<vmem>>, %arg7: memref<32x128xbf16, #tpu.memory_space<vmem>>, %arg8: memref<2x32xf32, #tpu.memory_space<vmem>>, %arg9: memref<1x128xf32, #tpu.memory_space<vmem>>, %arg10: memref<1x24x16x128xbf16, #tpu.memory_space<vmem>>, %arg11: memref<26x16x96xbf16, #tpu.memory_space<vmem>>) attributes {dimension_semantics = [#tpu.dimension_semantics<parallel>, #tpu.dimension_semantics<parallel>], iteration_bounds = array<i64: 2, 1>, scalar_prefetch = 0 : i64, scratch_operands = 1 : i64, tpu.core_type = #tpu.core_type<tc>, window_params = [{transform_indices = @transform_0, window_bounds = array<i64: 1, 24, 16, 128>}, {transform_indices = @transform_1, window_bounds = array<i64: 1, 1, 16, 128>}, {transform_indices = @transform_2, window_bounds = array<i64: 1, 1, 16, 128>}, {pipeline_mode = #tpu.pipeline_mode<synchronous>, transform_indices = @transform_3, window_bounds = array<i64: 128, 32>}, {pipeline_mode = #tpu.pipeline_mode<synchronous>, transform_indices = @transform_4, window_bounds = array<i64: 3, 96, 32>}, {pipeline_mode = #tpu.pipeline_mode<synchronous>, transform_indices = @transform_5, window_bounds = array<i64: 32, 128>}, {pipeline_mode = #tpu.pipeline_mode<synchronous>, transform_indices = @transform_6, window_bounds = array<i64: 2, 32>}, {pipeline_mode = #tpu.pipeline_mode<synchronous>, transform_indices = @transform_7, window_bounds = array<i64: 1, 128>}, {transform_indices = @transform_8, window_bounds = array<i64: 1, 24, 16, 128>}]} {
    %c0 = arith.constant 0 : index
    %c0_0 = arith.constant 0 : index
    %c0_1 = arith.constant 0 : index
    %c0_2 = arith.constant 0 : index
    %0 = vector.load %arg3[%c0, %c0_0, %c0_1, %c0_2] : memref<1x1x16x128xbf16, #tpu.memory_space<vmem>>, vector<1x1x16x128xbf16>
    %1 = vector.shape_cast %0 : vector<1x1x16x128xbf16> to vector<1x16x128xbf16>
    %c0_3 = arith.constant 0 : index
    %c0_4 = arith.constant 0 : index
    %c0_5 = arith.constant 0 : index
    %c0_6 = arith.constant 0 : index
    %2 = vector.load %arg2[%c0_3, %c0_4, %c0_5, %c0_6] : memref<1x24x16x128xbf16, #tpu.memory_space<vmem>>, vector<1x24x16x128xbf16>
    %3 = vector.shape_cast %2 : vector<1x24x16x128xbf16> to vector<24x16x128xbf16>
    %c0_7 = arith.constant 0 : index
    %c0_8 = arith.constant 0 : index
    %c0_9 = arith.constant 0 : index
    %c0_10 = arith.constant 0 : index
    %4 = vector.load %arg4[%c0_7, %c0_8, %c0_9, %c0_10] : memref<1x1x16x128xbf16, #tpu.memory_space<vmem>>, vector<1x1x16x128xbf16>
    %5 = vector.shape_cast %4 : vector<1x1x16x128xbf16> to vector<1x16x128xbf16>
    %6 = tpu.concatenate %1, %3, %5 in 0 : vector<1x16x128xbf16>, vector<24x16x128xbf16>, vector<1x16x128xbf16> -> vector<26x16x128xbf16>
    %c0_11 = arith.constant 0 : index
    %c0_12 = arith.constant 0 : index
    %7 = vector.load %arg5[%c0_11, %c0_12] : memref<128x32xbf16, #tpu.memory_space<vmem>>, vector<128x32xbf16>
    %cst = arith.constant dense<0.000000e+00> : vector<26x16x32xf32>
    %8 = tpu.matmul %6, %7, %cst {dimension_numbers = #tpu.dot_dimension_numbers<[2], [0], [0, 1], [1], [0, 0, 0, 1, 1, 1], [], []>} : vector<26x16x128xbf16>, vector<128x32xbf16>, vector<26x16x32xf32> -> vector<26x16x32xf32>
    %c0_13 = arith.constant 0 : index
    %c0_14 = arith.constant 0 : index
    %9 = vector.load %arg8[%c0_13, %c0_14] : memref<2x32xf32, #tpu.memory_space<vmem>>, vector<1x32xf32>
    %10 = vector.shape_cast %9 : vector<1x32xf32> to vector<1x1x32xf32>
    %11 = vector.broadcast %10 : vector<1x1x32xf32> to vector<26x16x32xf32>
    %12 = arith.addf %8, %11 : vector<26x16x32xf32>
    %cst_15 = arith.constant 0.000000e+00 : f32
    %13 = vector.broadcast %cst_15 : f32 to vector<26x16x32xf32>
    %14 = arith.maximumf %12, %13 : vector<26x16x32xf32>
    %15 = arith.truncf %14 : vector<26x16x32xf32> to vector<26x16x32xbf16>
    %cst_16 = arith.constant 0.000000e+00 : bf16
    %16 = vector.broadcast %cst_16 : bf16 to vector<26x1x32xbf16>
    %17 = vector.extract_strided_slice %15 {offsets = [0, 0, 0], sizes = [26, 15, 32], strides = [1, 1, 1]} : vector<26x16x32xbf16> to vector<26x15x32xbf16>
    %18 = tpu.concatenate %16, %17 in 1 : vector<26x1x32xbf16>, vector<26x15x32xbf16> -> vector<26x16x32xbf16>
    %19 = vector.extract_strided_slice %15 {offsets = [0, 1, 0], sizes = [26, 15, 32], strides = [1, 1, 1]} : vector<26x16x32xbf16> to vector<26x15x32xbf16>
    %20 = tpu.concatenate %19, %16 in 1 : vector<26x15x32xbf16>, vector<26x1x32xbf16> -> vector<26x16x32xbf16>
    %21 = tpu.concatenate %18, %15, %20 in 2 : vector<26x16x32xbf16>, vector<26x16x32xbf16>, vector<26x16x32xbf16> -> vector<26x16x96xbf16>
    %c0_17 = arith.constant 0 : index
    %c0_18 = arith.constant 0 : index
    %c0_19 = arith.constant 0 : index
    %22 = vector.load %arg11[%c0_17, %c0_18, %c0_19] : memref<26x16x96xbf16, #tpu.memory_space<vmem>>, vector<26x16x96xbf16>
    tpu.vector_store %arg11[%c0_17, %c0_18, %c0_19], %21 {strides = array<i32>} : memref<26x16x96xbf16, #tpu.memory_space<vmem>>, vector<26x16x96xbf16>,
    %c0_i32 = arith.constant 0 : i32
    %23 = arith.cmpi eq, %arg1, %c0_i32 : i32
    %24 = arith.extui %23 : i1 to i32
    %c0_i32_20 = arith.constant 0 : i32
    %25 = arith.cmpi ne, %24, %c0_i32_20 : i32
    scf.if %25 {
      %cst_60 = arith.constant 0.000000e+00 : bf16
      %68 = vector.broadcast %cst_60 : bf16 to vector<16x96xbf16>
      %c0_61 = arith.constant 0 : index
      %c0_62 = arith.constant 0 : index
      %c0_63 = arith.constant 0 : index
      %69 = vector.load %arg11[%c0_61, %c0_62, %c0_63] : memref<26x16x96xbf16, #tpu.memory_space<vmem>>, vector<1x16x96xbf16>
      %70 = vector.shape_cast %69 : vector<1x16x96xbf16> to vector<16x96xbf16>
      %71 = vector.shape_cast %68 : vector<16x96xbf16> to vector<1x16x96xbf16>
      tpu.vector_store %arg11[%c0_61, %c0_62, %c0_63], %71 {strides = array<i32>} : memref<26x16x96xbf16, #tpu.memory_space<vmem>>, vector<1x16x96xbf16>,
    } else {
    }
    %c0_i32_21 = arith.constant 0 : i32
    %26 = arith.cmpi eq, %arg1, %c0_i32_21 : i32
    %27 = arith.extui %26 : i1 to i32
    %c0_i32_22 = arith.constant 0 : i32
    %28 = arith.cmpi ne, %27, %c0_i32_22 : i32
    scf.if %28 {
      %cst_60 = arith.constant 0.000000e+00 : bf16
      %68 = vector.broadcast %cst_60 : bf16 to vector<16x96xbf16>
      %c25 = arith.constant 25 : index
      %c0_61 = arith.constant 0 : index
      %c0_62 = arith.constant 0 : index
      %69 = vector.load %arg11[%c25, %c0_61, %c0_62] : memref<26x16x96xbf16, #tpu.memory_space<vmem>>, vector<1x16x96xbf16>
      %70 = vector.shape_cast %69 : vector<1x16x96xbf16> to vector<16x96xbf16>
      %71 = vector.shape_cast %68 : vector<16x96xbf16> to vector<1x16x96xbf16>
      tpu.vector_store %arg11[%c25, %c0_61, %c0_62], %71 {strides = array<i32>} : memref<26x16x96xbf16, #tpu.memory_space<vmem>>, vector<1x16x96xbf16>,
    } else {
    }
    %cst_23 = arith.constant 0.000000e+00 : f32
    %29 = vector.broadcast %cst_23 : f32 to vector<24x16x32xf32>
    %c0_24 = arith.constant 0 : index
    %c0_25 = arith.constant 0 : index
    %c0_26 = arith.constant 0 : index
    %30 = vector.load %arg11[%c0_24, %c0_25, %c0_26] : memref<26x16x96xbf16, #tpu.memory_space<vmem>>, vector<24x16x96xbf16>
    %c0_27 = arith.constant 0 : index
    %c0_28 = arith.constant 0 : index
    %c0_29 = arith.constant 0 : index
    %31 = vector.load %arg6[%c0_27, %c0_28, %c0_29] : memref<3x96x32xbf16, #tpu.memory_space<vmem>>, vector<1x96x32xbf16>
    %32 = vector.shape_cast %31 : vector<1x96x32xbf16> to vector<96x32xbf16>
    %cst_30 = arith.constant dense<0.000000e+00> : vector<24x16x32xf32>
    %33 = tpu.matmul %30, %32, %cst_30 {dimension_numbers = #tpu.dot_dimension_numbers<[2], [0], [0, 1], [1], [0, 0, 0, 1, 1, 1], [], []>} : vector<24x16x96xbf16>, vector<96x32xbf16>, vector<24x16x32xf32> -> vector<24x16x32xf32>
    %34 = arith.addf %29, %33 : vector<24x16x32xf32>
    %c1 = arith.constant 1 : index
    %c0_31 = arith.constant 0 : index
    %c0_32 = arith.constant 0 : index
    %35 = vector.load %arg11[%c1, %c0_31, %c0_32] : memref<26x16x96xbf16, #tpu.memory_space<vmem>>, vector<24x16x96xbf16>
    %c1_33 = arith.constant 1 : index
    %c0_34 = arith.constant 0 : index
    %c0_35 = arith.constant 0 : index
    %36 = vector.load %arg6[%c1_33, %c0_34, %c0_35] : memref<3x96x32xbf16, #tpu.memory_space<vmem>>, vector<1x96x32xbf16>
    %37 = vector.shape_cast %36 : vector<1x96x32xbf16> to vector<96x32xbf16>
    %cst_36 = arith.constant dense<0.000000e+00> : vector<24x16x32xf32>
    %38 = tpu.matmul %35, %37, %cst_36 {dimension_numbers = #tpu.dot_dimension_numbers<[2], [0], [0, 1], [1], [0, 0, 0, 1, 1, 1], [], []>} : vector<24x16x96xbf16>, vector<96x32xbf16>, vector<24x16x32xf32> -> vector<24x16x32xf32>
    %39 = arith.addf %34, %38 : vector<24x16x32xf32>
    %c2 = arith.constant 2 : index
    %c0_37 = arith.constant 0 : index
    %c0_38 = arith.constant 0 : index
    %40 = vector.load %arg11[%c2, %c0_37, %c0_38] : memref<26x16x96xbf16, #tpu.memory_space<vmem>>, vector<24x16x96xbf16>
    %c2_39 = arith.constant 2 : index
    %c0_40 = arith.constant 0 : index
    %c0_41 = arith.constant 0 : index
    %41 = vector.load %arg6[%c2_39, %c0_40, %c0_41] : memref<3x96x32xbf16, #tpu.memory_space<vmem>>, vector<1x96x32xbf16>
    %42 = vector.shape_cast %41 : vector<1x96x32xbf16> to vector<96x32xbf16>
    %cst_42 = arith.constant dense<0.000000e+00> : vector<24x16x32xf32>
    %43 = tpu.matmul %40, %42, %cst_42 {dimension_numbers = #tpu.dot_dimension_numbers<[2], [0], [0, 1], [1], [0, 0, 0, 1, 1, 1], [], []>} : vector<24x16x96xbf16>, vector<96x32xbf16>, vector<24x16x32xf32> -> vector<24x16x32xf32>
    %44 = arith.addf %39, %43 : vector<24x16x32xf32>
    %c1_43 = arith.constant 1 : index
    %c0_44 = arith.constant 0 : index
    %45 = vector.load %arg8[%c1_43, %c0_44] : memref<2x32xf32, #tpu.memory_space<vmem>>, vector<1x32xf32>
    %46 = vector.shape_cast %45 : vector<1x32xf32> to vector<1x1x32xf32>
    %47 = vector.broadcast %46 : vector<1x1x32xf32> to vector<24x16x32xf32>
    %48 = arith.addf %44, %47 : vector<24x16x32xf32>
    %cst_45 = arith.constant 0.000000e+00 : f32
    %49 = vector.broadcast %cst_45 : f32 to vector<24x16x32xf32>
    %50 = arith.maximumf %48, %49 : vector<24x16x32xf32>
    %51 = arith.truncf %50 : vector<24x16x32xf32> to vector<24x16x32xbf16>
    %c0_46 = arith.constant 0 : index
    %c0_47 = arith.constant 0 : index
    %52 = vector.load %arg7[%c0_46, %c0_47] : memref<32x128xbf16, #tpu.memory_space<vmem>>, vector<32x128xbf16>
    %cst_48 = arith.constant dense<0.000000e+00> : vector<24x16x128xf32>
    %53 = tpu.matmul %51, %52, %cst_48 {dimension_numbers = #tpu.dot_dimension_numbers<[2], [0], [0, 1], [1], [0, 0, 0, 1, 1, 1], [], []>} : vector<24x16x32xbf16>, vector<32x128xbf16>, vector<24x16x128xf32> -> vector<24x16x128xf32>
    %c0_49 = arith.constant 0 : index
    %c0_50 = arith.constant 0 : index
    %c0_51 = arith.constant 0 : index
    %c0_52 = arith.constant 0 : index
    %54 = vector.load %arg2[%c0_49, %c0_50, %c0_51, %c0_52] : memref<1x24x16x128xbf16, #tpu.memory_space<vmem>>, vector<1x24x16x128xbf16>
    %55 = vector.shape_cast %54 : vector<1x24x16x128xbf16> to vector<24x16x128xbf16>
    %56 = arith.extf %55 : vector<24x16x128xbf16> to vector<24x16x128xf32>
    %c0_53 = arith.constant 0 : index
    %c0_54 = arith.constant 0 : index
    %57 = vector.load %arg9[%c0_53, %c0_54] : memref<1x128xf32, #tpu.memory_space<vmem>>, vector<1x128xf32>
    %58 = vector.shape_cast %57 : vector<1x128xf32> to vector<1x1x128xf32>
    %59 = vector.broadcast %58 : vector<1x1x128xf32> to vector<24x16x128xf32>
    %60 = arith.addf %53, %59 : vector<24x16x128xf32>
    %61 = arith.addf %60, %56 : vector<24x16x128xf32>
    %cst_55 = arith.constant 0.000000e+00 : f32
    %62 = vector.broadcast %cst_55 : f32 to vector<24x16x128xf32>
    %63 = arith.maximumf %61, %62 : vector<24x16x128xf32>
    %64 = arith.truncf %63 : vector<24x16x128xf32> to vector<24x16x128xbf16>
    %c0_56 = arith.constant 0 : index
    %c0_57 = arith.constant 0 : index
    %c0_58 = arith.constant 0 : index
    %c0_59 = arith.constant 0 : index
    %65 = vector.load %arg10[%c0_56, %c0_57, %c0_58, %c0_59] : memref<1x24x16x128xbf16, #tpu.memory_space<vmem>>, vector<1x24x16x128xbf16>
    %66 = vector.shape_cast %65 : vector<1x24x16x128xbf16> to vector<24x16x128xbf16>
    %67 = vector.shape_cast %64 : vector<24x16x128xbf16> to vector<1x24x16x128xbf16>
    tpu.vector_store %arg10[%c0_56, %c0_57, %c0_58, %c0_59], %67 {strides = array<i32>} : memref<1x24x16x128xbf16, #tpu.memory_space<vmem>>, vector<1x24x16x128xbf16>,
    return
  }
  func.func @transform_0(%arg0: i32, %arg1: i32) -> (i32, i32, i32, i32) {
    %c0_i32 = arith.constant 0 : i32
    %c0_i32_0 = arith.constant 0 : i32
    %c0_i32_1 = arith.constant 0 : i32
    return %arg0, %arg1, %c0_i32, %c0_i32_0 : i32, i32, i32, i32
  }
  func.func @transform_1(%arg0: i32, %arg1: i32) -> (i32, i32, i32, i32) {
    %c24_i32 = arith.constant 24 : i32
    %0 = arith.muli %arg1, %c24_i32 : i32
    %c1_i32 = arith.constant 1 : i32
    %1 = arith.subi %0, %c1_i32 : i32
    %c0_i32 = arith.constant 0 : i32
    %2 = arith.maxsi %1, %c0_i32 : i32
    %c0_i32_0 = arith.constant 0 : i32
    %c0_i32_1 = arith.constant 0 : i32
    %c0_i32_2 = arith.constant 0 : i32
    return %arg0, %2, %c0_i32_0, %c0_i32_1 : i32, i32, i32, i32
  }
  func.func @transform_2(%arg0: i32, %arg1: i32) -> (i32, i32, i32, i32) {
    %c1_i32 = arith.constant 1 : i32
    %0 = arith.addi %arg1, %c1_i32 : i32
    %c24_i32 = arith.constant 24 : i32
    %1 = arith.muli %0, %c24_i32 : i32
    %c23_i32 = arith.constant 23 : i32
    %2 = arith.minsi %1, %c23_i32 : i32
    %c0_i32 = arith.constant 0 : i32
    %c0_i32_0 = arith.constant 0 : i32
    %c0_i32_1 = arith.constant 0 : i32
    return %arg0, %2, %c0_i32, %c0_i32_0 : i32, i32, i32, i32
  }
  func.func @transform_3(%arg0: i32, %arg1: i32) -> (i32, i32) {
    %c0_i32 = arith.constant 0 : i32
    %c0_i32_0 = arith.constant 0 : i32
    %c0_i32_1 = arith.constant 0 : i32
    return %c0_i32, %c0_i32_0 : i32, i32
  }
  func.func @transform_4(%arg0: i32, %arg1: i32) -> (i32, i32, i32) {
    %c0_i32 = arith.constant 0 : i32
    %c0_i32_0 = arith.constant 0 : i32
    %c0_i32_1 = arith.constant 0 : i32
    %c0_i32_2 = arith.constant 0 : i32
    return %c0_i32, %c0_i32_0, %c0_i32_1 : i32, i32, i32
  }
  func.func @transform_5(%arg0: i32, %arg1: i32) -> (i32, i32) {
    %c0_i32 = arith.constant 0 : i32
    %c0_i32_0 = arith.constant 0 : i32
    %c0_i32_1 = arith.constant 0 : i32
    return %c0_i32, %c0_i32_0 : i32, i32
  }
  func.func @transform_6(%arg0: i32, %arg1: i32) -> (i32, i32) {
    %c0_i32 = arith.constant 0 : i32
    %c0_i32_0 = arith.constant 0 : i32
    %c0_i32_1 = arith.constant 0 : i32
    return %c0_i32, %c0_i32_0 : i32, i32
  }
  func.func @transform_7(%arg0: i32, %arg1: i32) -> (i32, i32) {
    %c0_i32 = arith.constant 0 : i32
    %c0_i32_0 = arith.constant 0 : i32
    %c0_i32_1 = arith.constant 0 : i32
    return %c0_i32, %c0_i32_0 : i32, i32
  }
  func.func @transform_8(%arg0: i32, %arg1: i32) -> (i32, i32, i32, i32) {
    %c0_i32 = arith.constant 0 : i32
    %c0_i32_0 = arith.constant 0 : i32
    %c0_i32_1 = arith.constant 0 : i32
    return %arg0, %arg1, %c0_i32, %c0_i32_0 : i32, i32, i32, i32
  }
}

module attributes {stable_mosaic.version = 11 : i64} {
  func.func @_bottleneck_kernel(%arg0: i32, %arg1: i32, %arg2: memref<1x24x16x128xbf16, #tpu.memory_space<vmem>>, %arg3: memref<1x1x16x128xbf16, #tpu.memory_space<vmem>>, %arg4: memref<1x1x16x128xbf16, #tpu.memory_space<vmem>>, %arg5: memref<128x32xbf16, #tpu.memory_space<vmem>>, %arg6: memref<3x96x32xbf16, #tpu.memory_space<vmem>>, %arg7: memref<32x128xbf16, #tpu.memory_space<vmem>>, %arg8: memref<2x32xf32, #tpu.memory_space<vmem>>, %arg9: memref<1x128xf32, #tpu.memory_space<vmem>>, %arg10: memref<1x24x16x128xbf16, #tpu.memory_space<vmem>>, %arg11: memref<26x16x96xbf16, #tpu.memory_space<vmem>>) attributes {dimension_semantics = [#tpu.dimension_semantics<parallel>, #tpu.dimension_semantics<parallel>], iteration_bounds = array<i64: 2, 1>, scalar_prefetch = 0 : i64, scratch_operands = 1 : i64, tpu.core_type = #tpu.core_type<tc>, window_params = [{transform_indices = @transform_0, window_bounds = array<i64: 1, 24, 16, 128>}, {transform_indices = @transform_1, window_bounds = array<i64: 1, 1, 16, 128>}, {transform_indices = @transform_2, window_bounds = array<i64: 1, 1, 16, 128>}, {pipeline_mode = #tpu.pipeline_mode<synchronous>, transform_indices = @transform_3, window_bounds = array<i64: 128, 32>}, {pipeline_mode = #tpu.pipeline_mode<synchronous>, transform_indices = @transform_4, window_bounds = array<i64: 3, 96, 32>}, {pipeline_mode = #tpu.pipeline_mode<synchronous>, transform_indices = @transform_5, window_bounds = array<i64: 32, 128>}, {pipeline_mode = #tpu.pipeline_mode<synchronous>, transform_indices = @transform_6, window_bounds = array<i64: 2, 32>}, {pipeline_mode = #tpu.pipeline_mode<synchronous>, transform_indices = @transform_7, window_bounds = array<i64: 1, 128>}, {transform_indices = @transform_8, window_bounds = array<i64: 1, 24, 16, 128>}]} {
    %c0 = arith.constant 0 : index
    %c0_0 = arith.constant 0 : index
    %c0_1 = arith.constant 0 : index
    %c0_2 = arith.constant 0 : index
    %0 = vector.load %arg3[%c0, %c0_0, %c0_1, %c0_2] : memref<1x1x16x128xbf16, #tpu.memory_space<vmem>>, vector<1x1x16x128xbf16>
    %1 = vector.shape_cast %0 : vector<1x1x16x128xbf16> to vector<1x16x128xbf16>
    %c0_3 = arith.constant 0 : index
    %c0_4 = arith.constant 0 : index
    %c0_5 = arith.constant 0 : index
    %c0_6 = arith.constant 0 : index
    %2 = vector.load %arg2[%c0_3, %c0_4, %c0_5, %c0_6] : memref<1x24x16x128xbf16, #tpu.memory_space<vmem>>, vector<1x24x16x128xbf16>
    %3 = vector.shape_cast %2 : vector<1x24x16x128xbf16> to vector<24x16x128xbf16>
    %c0_7 = arith.constant 0 : index
    %c0_8 = arith.constant 0 : index
    %c0_9 = arith.constant 0 : index
    %c0_10 = arith.constant 0 : index
    %4 = vector.load %arg4[%c0_7, %c0_8, %c0_9, %c0_10] : memref<1x1x16x128xbf16, #tpu.memory_space<vmem>>, vector<1x1x16x128xbf16>
    %5 = vector.shape_cast %4 : vector<1x1x16x128xbf16> to vector<1x16x128xbf16>
    %6 = tpu.concatenate %1, %3, %5 in 0 : vector<1x16x128xbf16>, vector<24x16x128xbf16>, vector<1x16x128xbf16> -> vector<26x16x128xbf16>
    %c0_11 = arith.constant 0 : index
    %c0_12 = arith.constant 0 : index
    %7 = vector.load %arg5[%c0_11, %c0_12] : memref<128x32xbf16, #tpu.memory_space<vmem>>, vector<128x32xbf16>
    %cst = arith.constant dense<0.000000e+00> : vector<26x16x32xf32>
    %8 = tpu.matmul %6, %7, %cst {dimension_numbers = #tpu.dot_dimension_numbers<[2], [0], [0, 1], [1], [0, 0, 0, 1, 1, 1], [], []>} : vector<26x16x128xbf16>, vector<128x32xbf16>, vector<26x16x32xf32> -> vector<26x16x32xf32>
    %c0_13 = arith.constant 0 : index
    %c0_14 = arith.constant 0 : index
    %9 = vector.load %arg8[%c0_13, %c0_14] : memref<2x32xf32, #tpu.memory_space<vmem>>, vector<1x32xf32>
    %10 = vector.shape_cast %9 : vector<1x32xf32> to vector<1x1x32xf32>
    %11 = vector.broadcast %10 : vector<1x1x32xf32> to vector<26x16x32xf32>
    %12 = arith.addf %8, %11 : vector<26x16x32xf32>
    %cst_15 = arith.constant 0.000000e+00 : f32
    %13 = vector.broadcast %cst_15 : f32 to vector<26x16x32xf32>
    %14 = arith.maximumf %12, %13 : vector<26x16x32xf32>
    %15 = arith.truncf %14 : vector<26x16x32xf32> to vector<26x16x32xbf16>
    %cst_16 = arith.constant 0.000000e+00 : bf16
    %16 = vector.broadcast %cst_16 : bf16 to vector<26x1x32xbf16>
    %17 = vector.extract_strided_slice %15 {offsets = [0, 0, 0], sizes = [26, 15, 32], strides = [1, 1, 1]} : vector<26x16x32xbf16> to vector<26x15x32xbf16>
    %18 = tpu.concatenate %16, %17 in 1 : vector<26x1x32xbf16>, vector<26x15x32xbf16> -> vector<26x16x32xbf16>
    %19 = vector.extract_strided_slice %15 {offsets = [0, 1, 0], sizes = [26, 15, 32], strides = [1, 1, 1]} : vector<26x16x32xbf16> to vector<26x15x32xbf16>
    %20 = tpu.concatenate %19, %16 in 1 : vector<26x15x32xbf16>, vector<26x1x32xbf16> -> vector<26x16x32xbf16>
    %21 = tpu.concatenate %18, %15, %20 in 2 : vector<26x16x32xbf16>, vector<26x16x32xbf16>, vector<26x16x32xbf16> -> vector<26x16x96xbf16>
    %c0_17 = arith.constant 0 : index
    %c0_18 = arith.constant 0 : index
    %c0_19 = arith.constant 0 : index
    %22 = vector.load %arg11[%c0_17, %c0_18, %c0_19] : memref<26x16x96xbf16, #tpu.memory_space<vmem>>, vector<26x16x96xbf16>
    tpu.vector_store %arg11[%c0_17, %c0_18, %c0_19], %21 {strides = array<i32>} : memref<26x16x96xbf16, #tpu.memory_space<vmem>>, vector<26x16x96xbf16>,
    %c0_i32 = arith.constant 0 : i32
    %23 = arith.cmpi eq, %arg1, %c0_i32 : i32
    %24 = arith.extui %23 : i1 to i32
    %c0_i32_20 = arith.constant 0 : i32
    %25 = arith.cmpi ne, %24, %c0_i32_20 : i32
    scf.if %25 {
      %cst_60 = arith.constant 0.000000e+00 : bf16
      %68 = vector.broadcast %cst_60 : bf16 to vector<16x96xbf16>
      %c0_61 = arith.constant 0 : index
      %c0_62 = arith.constant 0 : index
      %c0_63 = arith.constant 0 : index
      %69 = vector.load %arg11[%c0_61, %c0_62, %c0_63] : memref<26x16x96xbf16, #tpu.memory_space<vmem>>, vector<1x16x96xbf16>
      %70 = vector.shape_cast %69 : vector<1x16x96xbf16> to vector<16x96xbf16>
      %71 = vector.shape_cast %68 : vector<16x96xbf16> to vector<1x16x96xbf16>
      tpu.vector_store %arg11[%c0_61, %c0_62, %c0_63], %71 {strides = array<i32>} : memref<26x16x96xbf16, #tpu.memory_space<vmem>>, vector<1x16x96xbf16>,
    } else {
    }
    %c0_i32_21 = arith.constant 0 : i32
    %26 = arith.cmpi eq, %arg1, %c0_i32_21 : i32
    %27 = arith.extui %26 : i1 to i32
    %c0_i32_22 = arith.constant 0 : i32
    %28 = arith.cmpi ne, %27, %c0_i32_22 : i32
    scf.if %28 {
      %cst_60 = arith.constant 0.000000e+00 : bf16
      %68 = vector.broadcast %cst_60 : bf16 to vector<16x96xbf16>
      %c25 = arith.constant 25 : index
      %c0_61 = arith.constant 0 : index
      %c0_62 = arith.constant 0 : index
      %69 = vector.load %arg11[%c25, %c0_61, %c0_62] : memref<26x16x96xbf16, #tpu.memory_space<vmem>>, vector<1x16x96xbf16>
      %70 = vector.shape_cast %69 : vector<1x16x96xbf16> to vector<16x96xbf16>
      %71 = vector.shape_cast %68 : vector<16x96xbf16> to vector<1x16x96xbf16>
      tpu.vector_store %arg11[%c25, %c0_61, %c0_62], %71 {strides = array<i32>} : memref<26x16x96xbf16, #tpu.memory_space<vmem>>, vector<1x16x96xbf16>,
    } else {
    }
    %cst_23 = arith.constant 0.000000e+00 : f32
    %29 = vector.broadcast %cst_23 : f32 to vector<24x16x32xf32>
    %c0_24 = arith.constant 0 : index
    %c0_25 = arith.constant 0 : index
    %c0_26 = arith.constant 0 : index
    %30 = vector.load %arg11[%c0_24, %c0_25, %c0_26] : memref<26x16x96xbf16, #tpu.memory_space<vmem>>, vector<24x16x96xbf16>
    %c0_27 = arith.constant 0 : index
    %c0_28 = arith.constant 0 : index
    %c0_29 = arith.constant 0 : index
    %31 = vector.load %arg6[%c0_27, %c0_28, %c0_29] : memref<3x96x32xbf16, #tpu.memory_space<vmem>>, vector<1x96x32xbf16>
    %32 = vector.shape_cast %31 : vector<1x96x32xbf16> to vector<96x32xbf16>
    %cst_30 = arith.constant dense<0.000000e+00> : vector<24x16x32xf32>
    %33 = tpu.matmul %30, %32, %cst_30 {dimension_numbers = #tpu.dot_dimension_numbers<[2], [0], [0, 1], [1], [0, 0, 0, 1, 1, 1], [], []>} : vector<24x16x96xbf16>, vector<96x32xbf16>, vector<24x16x32xf32> -> vector<24x16x32xf32>
    %34 = arith.addf %29, %33 : vector<24x16x32xf32>
    %c1 = arith.constant 1 : index
    %c0_31 = arith.constant 0 : index
    %c0_32 = arith.constant 0 : index
    %35 = vector.load %arg11[%c1, %c0_31, %c0_32] : memref<26x16x96xbf16, #tpu.memory_space<vmem>>, vector<24x16x96xbf16>
    %c1_33 = arith.constant 1 : index
    %c0_34 = arith.constant 0 : index
    %c0_35 = arith.constant 0 : index
    %36 = vector.load %arg6[%c1_33, %c0_34, %c0_35] : memref<3x96x32xbf16, #tpu.memory_space<vmem>>, vector<1x96x32xbf16>
    %37 = vector.shape_cast %36 : vector<1x96x32xbf16> to vector<96x32xbf16>
    %cst_36 = arith.constant dense<0.000000e+00> : vector<24x16x32xf32>
    %38 = tpu.matmul %35, %37, %cst_36 {dimension_numbers = #tpu.dot_dimension_numbers<[2], [0], [0, 1], [1], [0, 0, 0, 1, 1, 1], [], []>} : vector<24x16x96xbf16>, vector<96x32xbf16>, vector<24x16x32xf32> -> vector<24x16x32xf32>
    %39 = arith.addf %34, %38 : vector<24x16x32xf32>
    %c2 = arith.constant 2 : index
    %c0_37 = arith.constant 0 : index
    %c0_38 = arith.constant 0 : index
    %40 = vector.load %arg11[%c2, %c0_37, %c0_38] : memref<26x16x96xbf16, #tpu.memory_space<vmem>>, vector<24x16x96xbf16>
    %c2_39 = arith.constant 2 : index
    %c0_40 = arith.constant 0 : index
    %c0_41 = arith.constant 0 : index
    %41 = vector.load %arg6[%c2_39, %c0_40, %c0_41] : memref<3x96x32xbf16, #tpu.memory_space<vmem>>, vector<1x96x32xbf16>
    %42 = vector.shape_cast %41 : vector<1x96x32xbf16> to vector<96x32xbf16>
    %cst_42 = arith.constant dense<0.000000e+00> : vector<24x16x32xf32>
    %43 = tpu.matmul %40, %42, %cst_42 {dimension_numbers = #tpu.dot_dimension_numbers<[2], [0], [0, 1], [1], [0, 0, 0, 1, 1, 1], [], []>} : vector<24x16x96xbf16>, vector<96x32xbf16>, vector<24x16x32xf32> -> vector<24x16x32xf32>
    %44 = arith.addf %39, %43 : vector<24x16x32xf32>
    %c1_43 = arith.constant 1 : index
    %c0_44 = arith.constant 0 : index
    %45 = vector.load %arg8[%c1_43, %c0_44] : memref<2x32xf32, #tpu.memory_space<vmem>>, vector<1x32xf32>
    %46 = vector.shape_cast %45 : vector<1x32xf32> to vector<1x1x32xf32>
    %47 = vector.broadcast %46 : vector<1x1x32xf32> to vector<24x16x32xf32>
    %48 = arith.addf %44, %47 : vector<24x16x32xf32>
    %cst_45 = arith.constant 0.000000e+00 : f32
    %49 = vector.broadcast %cst_45 : f32 to vector<24x16x32xf32>
    %50 = arith.maximumf %48, %49 : vector<24x16x32xf32>
    %51 = arith.truncf %50 : vector<24x16x32xf32> to vector<24x16x32xbf16>
    %c0_46 = arith.constant 0 : index
    %c0_47 = arith.constant 0 : index
    %52 = vector.load %arg7[%c0_46, %c0_47] : memref<32x128xbf16, #tpu.memory_space<vmem>>, vector<32x128xbf16>
    %cst_48 = arith.constant dense<0.000000e+00> : vector<24x16x128xf32>
    %53 = tpu.matmul %51, %52, %cst_48 {dimension_numbers = #tpu.dot_dimension_numbers<[2], [0], [0, 1], [1], [0, 0, 0, 1, 1, 1], [], []>} : vector<24x16x32xbf16>, vector<32x128xbf16>, vector<24x16x128xf32> -> vector<24x16x128xf32>
    %c0_49 = arith.constant 0 : index
    %c0_50 = arith.constant 0 : index
    %c0_51 = arith.constant 0 : index
    %c0_52 = arith.constant 0 : index
    %54 = vector.load %arg2[%c0_49, %c0_50, %c0_51, %c0_52] : memref<1x24x16x128xbf16, #tpu.memory_space<vmem>>, vector<1x24x16x128xbf16>
    %55 = vector.shape_cast %54 : vector<1x24x16x128xbf16> to vector<24x16x128xbf16>
    %56 = arith.extf %55 : vector<24x16x128xbf16> to vector<24x16x128xf32>
    %c0_53 = arith.constant 0 : index
    %c0_54 = arith.constant 0 : index
    %57 = vector.load %arg9[%c0_53, %c0_54] : memref<1x128xf32, #tpu.memory_space<vmem>>, vector<1x128xf32>
    %58 = vector.shape_cast %57 : vector<1x128xf32> to vector<1x1x128xf32>
    %59 = vector.broadcast %58 : vector<1x1x128xf32> to vector<24x16x128xf32>
    %60 = arith.addf %53, %59 : vector<24x16x128xf32>
    %61 = arith.addf %60, %56 : vector<24x16x128xf32>
    %cst_55 = arith.constant 0.000000e+00 : f32
    %62 = vector.broadcast %cst_55 : f32 to vector<24x16x128xf32>
    %63 = arith.maximumf %61, %62 : vector<24x16x128xf32>
    %64 = arith.truncf %63 : vector<24x16x128xf32> to vector<24x16x128xbf16>
    %c0_56 = arith.constant 0 : index
    %c0_57 = arith.constant 0 : index
    %c0_58 = arith.constant 0 : index
    %c0_59 = arith.constant 0 : index
    %65 = vector.load %arg10[%c0_56, %c0_57, %c0_58, %c0_59] : memref<1x24x16x128xbf16, #tpu.memory_space<vmem>>, vector<1x24x16x128xbf16>
    %66 = vector.shape_cast %65 : vector<1x24x16x128xbf16> to vector<24x16x128xbf16>
    %67 = vector.shape_cast %64 : vector<24x16x128xbf16> to vector<1x24x16x128xbf16>
    tpu.vector_store %arg10[%c0_56, %c0_57, %c0_58, %c0_59], %67 {strides = array<i32>} : memref<1x24x16x128xbf16, #tpu.memory_space<vmem>>, vector<1x24x16x128xbf16>,
    return
  }
  func.func @transform_0(%arg0: i32, %arg1: i32) -> (i32, i32, i32, i32) {
    %c0_i32 = arith.constant 0 : i32
    %c0_i32_0 = arith.constant 0 : i32
    %c0_i32_1 = arith.constant 0 : i32
    return %arg0, %arg1, %c0_i32, %c0_i32_0 : i32, i32, i32, i32
  }
  func.func @transform_1(%arg0: i32, %arg1: i32) -> (i32, i32, i32, i32) {
    %c24_i32 = arith.constant 24 : i32
    %0 = arith.muli %arg1, %c24_i32 : i32
    %c1_i32 = arith.constant 1 : i32
    %1 = arith.subi %0, %c1_i32 : i32
    %c0_i32 = arith.constant 0 : i32
    %2 = arith.maxsi %1, %c0_i32 : i32
    %c0_i32_0 = arith.constant 0 : i32
    %c0_i32_1 = arith.constant 0 : i32
    %c0_i32_2 = arith.constant 0 : i32
    return %arg0, %2, %c0_i32_0, %c0_i32_1 : i32, i32, i32, i32
  }
  func.func @transform_2(%arg0: i32, %arg1: i32) -> (i32, i32, i32, i32) {
    %c1_i32 = arith.constant 1 : i32
    %0 = arith.addi %arg1, %c1_i32 : i32
    %c24_i32 = arith.constant 24 : i32
    %1 = arith.muli %0, %c24_i32 : i32
    %c23_i32 = arith.constant 23 : i32
    %2 = arith.minsi %1, %c23_i32 : i32
    %c0_i32 = arith.constant 0 : i32
    %c0_i32_0 = arith.constant 0 : i32
    %c0_i32_1 = arith.constant 0 : i32
    return %arg0, %2, %c0_i32, %c0_i32_0 : i32, i32, i32, i32
  }
  func.func @transform_3(%arg0: i32, %arg1: i32) -> (i32, i32) {
    %c0_i32 = arith.constant 0 : i32
    %c0_i32_0 = arith.constant 0 : i32
    %c0_i32_1 = arith.constant 0 : i32
    return %c0_i32, %c0_i32_0 : i32, i32
  }
  func.func @transform_4(%arg0: i32, %arg1: i32) -> (i32, i32, i32) {
    %c0_i32 = arith.constant 0 : i32
    %c0_i32_0 = arith.constant 0 : i32
    %c0_i32_1 = arith.constant 0 : i32
    %c0_i32_2 = arith.constant 0 : i32
    return %c0_i32, %c0_i32_0, %c0_i32_1 : i32, i32, i32
  }
  func.func @transform_5(%arg0: i32, %arg1: i32) -> (i32, i32) {
    %c0_i32 = arith.constant 0 : i32
    %c0_i32_0 = arith.constant 0 : i32
    %c0_i32_1 = arith.constant 0 : i32
    return %c0_i32, %c0_i32_0 : i32, i32
  }
  func.func @transform_6(%arg0: i32, %arg1: i32) -> (i32, i32) {
    %c0_i32 = arith.constant 0 : i32
    %c0_i32_0 = arith.constant 0 : i32
    %c0_i32_1 = arith.constant 0 : i32
    return %c0_i32, %c0_i32_0 : i32, i32
  }
  func.func @transform_7(%arg0: i32, %arg1: i32) -> (i32, i32) {
    %c0_i32 = arith.constant 0 : i32
    %c0_i32_0 = arith.constant 0 : i32
    %c0_i32_1 = arith.constant 0 : i32
    return %c0_i32, %c0_i32_0 : i32, i32
  }
  func.func @transform_8(%arg0: i32, %arg1: i32) -> (i32, i32, i32, i32) {
    %c0_i32 = arith.constant 0 : i32
    %c0_i32_0 = arith.constant 0 : i32
    %c0_i32_1 = arith.constant 0 : i32
    return %arg0, %arg1, %c0_i32, %c0_i32_0 : i32, i32, i32, i32
  }
}

</mosaic_0001>

<bundles_post_ra>
// kernel: tpu_custom_call.1
= control target key start
LH: loop header
LB: loop body
LE: loop exit
PB: predicated region body
PF: predicated region fallthrough
CT: control target
= control target key end

     0   :  { %s6832_s0 = inlined_call_operand.hbm [shape: bf16[2,24,16,128], index: 0, kind: input, shape index: {}]   ;;  %s6833_s1 = inlined_call_operand.hbm [shape: bf16[2,24,16,128], index: 1, kind: input, shape index: {}]   ;;  %s6834_s2 = inlined_call_operand.hbm [shape: bf16[2,24,16,128], index: 2, kind: input, shape index: {}]   ;;  %s6835_s3 = inlined_call_operand.vmem [shape: bf16[128,32], index: 3, kind: input, shape index: {}]   ;;  %s6836_s4 = inlined_call_operand.vmem [shape: bf16[3,96,32], index: 4, kind: input, shape index: {}]   ;;  %s6837_s5 = inlined_call_operand.vmem [shape: bf16[32,128], index: 5, kind: input, shape index: {}]   ;;  %s6838_s6 = inlined_call_operand.vmem [shape: f32[2,32], index: 6, kind: input, shape index: {}]   ;;  %s6839_s7 = inlined_call_operand.vmem [shape: f32[1,128], index: 7, kind: input, shape index: {}]   ;;  %s6840_s8 = inlined_call_operand.hbm [shape: bf16[2,24,16,128], index: 8, kind: output, shape index: {}]  }
   0x1   :  { %6876 = sst [smem:[#allocation22_spill]] %s6833_s1 }
   0x2   :  { %6877 = sst [smem:[#allocation23_spill]] %s6840_s8 }
   0x3   :  { %13 = vsyncpa [#allocation4], 0 }
   0x4   :  { %15 = vsyncpa [#allocation4 + $0x1], 0 }
   0x5   :  { %16 = vsyncpa [#allocation7], 0 }
   0x6   :  { %18 = vsyncpa [#allocation7 + $0x1], 0 }
   0x7   :  { %19 = vsyncpa [#allocation5], 0 }
   0x8   :  { %21 = vsyncpa [#allocation5 + $0x1], 0  ;;  %s5567_s27 = smov 0   ;;  %s5569_s28 = smov 0  }
   0x9   :  { %s5571_s29 = smov 0   ;;  %s5573_s30 = smov 0  }
   0xa   :  { %s5575_s9 = smov 0   ;;  %s5577_s10 = smov 0  }
   0xb LB: > { %6878 = sst [smem:[#allocation13_spill]] %s5494_s27  ;;  %s5598_s11 = sadd.s32 4294967295, %s5514_s10   ;;  %s5514_s10 = sphi %s5577_s10, %s27_s10   ;;  %s5510_s9 = sphi %s5575_s9, %s6933_s9   ;;  %s5506_s30 = sphi %s5573_s30, %s6932_s30   ;;  %s5502_s29 = sphi %s5571_s29, %s6931_s29   ;;  %s5498_s28 = sphi %s5569_s28, %s6935_s28   ;;  %s5494_s27 = sphi %s5567_s27, %s6934_s27  }
   0xc   : > { %6879 = sst [smem:[#allocation14_spill]] %s5502_s29  ;;  %s4201_s12 = sadd.s32 4294967294, %s5514_s10  }
   0xd   : > { %6880 = sst [smem:[#allocation15_spill]] %s5506_s30  ;;  %s39_s13 = sadd.s32 1, %s5510_s9 }
   0xe   : > { %6881 = sst [smem:[#allocation16_spill]] %s5510_s9  ;;  %s48_s14 = sadd.s32 1, %s5502_s29 }
   0xf   : > { %6882 = sst [smem:[#allocation17_spill]] %s5514_s10  ;;  %p41_p0 = scmp.ge.s32.totalorder %s39_s13, 2 }
  0x10   : > { %p55_p1 = scmp.ne.s32.totalorder %s5502_s29, %s5498_s28  ;;  %p56_p2 = scmp.eq.s32.totalorder %s5514_s10, 0 }
  0x11   : > { %p61_p3 = scmp.ne.s32.totalorder %s5498_s28, %s5494_s27  ;;  %s6937_s13 = smov (%p41_p0, %s39_s13), 0 }
  0x12   : > { %6883 = sst [smem:[#allocation18_spill]] %s6937_s13  ;;  %p5610_p4 = por %p56_p2, %p55_p1 }
  0x13   : > { %p62_p5 = scmp.eq.s32.totalorder %s5598_s11, 0  ;;  %s43_s16 = ssub.s32 %s5510_s9, %s6937_s13 }
  0x14   : > { %p264_p6 = scmp.eq.s32.totalorder %s5598_s11, 1  ;;  %p46_p7 = scmp.eq.s32.totalorder %s43_s16, 0 }
  0x15   : > { %p5618_p8 = por %p62_p5, %p61_p3  ;;  %p270_p10 = scmp.eq.s32.totalorder %s4201_s12, 1 }
  0x16   : > { %p5622_p9 = por %p264_p6, %p55_p1  ;;  %p4203_p12 = scmp.ge.s32.totalorder %s5514_s10, 2 }
  0x17   : > { %s5627_s19 = scalar_select %p46_p7, %s5502_s29, %s48_s14  }
  0x18   : > { %s6886_s18 = scalar_select %p5622_p9, 1, 0 }
  0x19   : > { %6888 = sst [smem:[#allocation20_spill]] %s5627_s19  ;;  %p5629_p11 = por %p270_p10, %p61_p3 }
  0x1a   : > { %6887 = sst [smem:[#allocation19_spill]] %s6886_s18  ;;  %p5275_p13 = scmp.lt.s32.totalorder %s5514_s10, 2 }
  0x1b   : > { %s6889_s20 = scalar_select %p5629_p11, 1, 0 }
  0x1c   : > { %s5636_s21 = sand.u32 1, %s5502_s29   ;;  %s5248_s22 = smul.u32 192, %s5510_s9 }
  0x1d   : > { %6890 = sst [smem:[#allocation21_spill]] %s6889_s20  ;;  %p5641_p0 = pnand %p5275_p13, %p5610_p4 }
  0x1e   : > { %s330_s24 = sand.u32 1, %s5514_s10   ;;  %s4205_s25 = sshll.u32 %s5636_s21, 3 }
  0x1f   : > { %s6892_s1 = sld [smem:[#allocation22_spill]]  ;;  %s334_s13 = scalar_lea.vmem [#allocation6], %s4205_s25 }
  0x20   : > { %s348_s19 = sshll.u32 %s334_s13, 4  ;;  %s331_s15 = scalar_lea.sflag [#allocation7], %s330_s24  ;;  %s349_s19 = int_to_ptr.vmem [resolvable:$true] %s348_s19 }
  0x21   : > { %s5516_s9 = smov 64   ;;  %s5517_s29 = smov 4  }
  0x22   : > { %s362_s20 = scalar_lea.vmem [#allocation8], %s4205_s25  ;;  %p4209_p1 = scmp.ge.s32.totalorder %s5514_s10, 1 }
  0x23   : > { %s376_s27 = sshll.u32 %s362_s20, 4  ;;  %p384_p2 = scmp.lt.s32.totalorder %s5514_s10, 3  ;;  %s377_s27 = int_to_ptr.vmem [resolvable:$true] %s376_s27 }
  0x24   : > { %s5247_s13 = smul.u32 192, %s5636_s21  ;;  %s317_s24 = scalar_lea.hbm %s6832_s0, %s5248_s22 }
  0x25   : > { %s345_s14 = scalar_lea.hbm %s6892_s1, %s5248_s22  ;;  %p5654_p3 = pnand %p4209_p1, %p384_p2 }
  0x26   : > { %s346_s16 = sshll.u32 %s345_s14, 4  ;;  %s318_s1 = sshll.u32 %s317_s24, 4  ;;  %s347_s16 = int_to_ptr.hbm [resolvable:$true] %s346_s16  ;;  %s319_s1 = int_to_ptr.hbm [resolvable:$true] %s318_s1 }
  0x27   : > { %5267 = dma.hbm_to_vmem [thread:$0]  (!%p5641_p0), %s347_s16, 128, %s349_s19, %s331_s15, %s5516_s9, %s5516_s9, %s5517_s29  }
  0x28   : > { %s4840_s18 = sadd.s32 184, %s5248_s22  ;;  %s309_s19 = scalar_lea.vmem [#allocation3], %s5247_s13 }
  0x29   : > { %s320_s25 = sshll.u32 %s309_s19, 4  ;;  %s373_s8 = scalar_lea.hbm %s6834_s2, %s4840_s18  ;;  %s321_s25 = int_to_ptr.vmem [resolvable:$true] %s320_s25 }
  0x2a   : > { %s374_s10 = sshll.u32 %s373_s8, 4  ;;  %s306_s30 = scalar_lea.sflag [#allocation4], %s5636_s21  ;;  %s375_s10 = int_to_ptr.hbm [resolvable:$true] %s374_s10 }
  0x2b   : > { %5264 = dma.hbm_to_vmem [thread:$0]  (!%p5641_p0), %s319_s1, 3072, %s321_s25, %s306_s30, %s5516_s9, %s5516_s9, %s5517_s29  }
  0x2c   : > { %5270 = dma.hbm_to_vmem [thread:$0]  (!%p5641_p0), %s375_s10, 128, %s377_s27, %s331_s15, %s5516_s9, %s5516_s9, %s5517_s29  }
  0x2d   : > { %388 = sbr.rel (%p5654_p3) target bundleno = 1433 (0x599), region = 52  ;;  %s5673_s22 = sand.u32 (!%p5654_p3), 1, %s5498_s28  }
  0x2e   : > { %s5251_s13 = smul.u32 (!%p5654_p3), 192, %s5673_s22  ;;  %s391_s18 = scalar_lea.sflag (!%p5654_p3), [#allocation4], %s5673_s22 }
  0x30   : > { %s5679_s8 = scalar_lea.vmem (!%p5654_p3), [#allocation3], %s5251_s13 }
  0x32   : > { %5481 = dma.done.wait (%p5618_p8), %s391_s18, 3072  }
  0x33   : > { %5483 = vsyncadd (%p5618_p8), %s391_s18, 4294964224  ;;  %s400_s1 = sand.u32 1, %s5598_s11   ;;  %s4210_s27 = sshll.u32 %s5673_s22, 3 }
  0x34   : > { %s401_s29 = scalar_lea.sflag [#allocation7], %s400_s1  ;;  %s404_s30 = scalar_lea.vmem [#allocation6], %s4210_s27 }
  0x35   : > { %5485 = dma.done.wait (%p5618_p8), %s401_s29, 256  }
  0x36   : > { %5487 = vsyncadd (%p5618_p8), %s401_s29, 4294967040  ;;  %v4874_v0 = vld [vmem:[%s6835_s3 + $0x38] sm:$0xff]  ;;  %v4873_v1 = vld [vmem:[%s6835_s3 + $0x30] sm:$0xff]  ;;  %s5518_s23 = smov 32   ;;  %vm1431_vm0 = vcmask 1047552   ;;  %s5519_s11 = smov 64  }
  0x37   : > { %743 = vmatpush.bf16.msra.mxu0 %v4874_v0  ;;  %v4872_v2 = vld [vmem:[%s6835_s3 + $0x28] sm:$0xff]  ;;  %v4871_v3 = vld [vmem:[%s6835_s3 + $0x20] sm:$0xff]  ;;  %v4870_v4 = vld [vmem:[%s6835_s3 + $0x18] sm:$0xff]  ;;  %vm1432_vm1 = vsmask.f32 7424  ;;  %vm1324_vm3 = vcmask 1040384  }
  0x38   : > { %v4869_v5 = vld [vmem:[%s6835_s3 + $0x10] sm:$0xff]  ;;  %v4868_v6 = vld [vmem:[%s6835_s3 + $0x8] sm:$0xff]  ;;  %v4867_v7 = vld [vmem:[%s6835_s3] sm:$0xff]  ;;  %vm1325_vm4 = vsmask.f32 256  ;;  %vm1590_vm5 = vcmask 261120  }
  0x39   : > { %v4841_v8 = vld [vmem:[%s404_s30] sm:$0xff]  ;;  %v4844_v11 = vld [vmem:[%s5679_s8 + $0x10] sm:$0xff]  ;;  %v4845_v12 = vld [vmem:[%s5679_s8 + $0x18] sm:$0xff]  ;;  %vm1669_vm7 = vcmask 523264   ;;  %vm1904_vm8 = vcmask 781312   ;;  %vm2244_vm9 = vcmask 785408  }
  0x3a   : > { %v4842_v9 = vld [vmem:[%s5679_s8] sm:$0xff]  ;;  %v4843_v10 = vld [vmem:[%s5679_s8 + $0x8] sm:$0xff]  ;;  %v4848_v15 = vld [vmem:[%s5679_s8 + $0x30] sm:$0xff]  ;;  %s414_s18 = scalar_lea.vmem [#allocation8], %s4210_s27  ;;  %s6607_s19 = scalar_lea.vmem [#allocation9], %s5251_s13 }
  0x3b   : > { %744 = vmatpush.bf16.msra.mxu0 %v4873_v1  ;;  %v4846_v13 = vld [vmem:[%s5679_s8 + $0x20] sm:$0xff]  ;;  %v4847_v14 = vld [vmem:[%s5679_s8 + $0x28] sm:$0xff]  ;;  %v5727_v16 = vld [vmem:[%s6838_s6] ss:$0 sm:$0xff]  ;;  %s6924_s30 = sld [smem:[#allocation23_spill]]  ;;  %s4061_s21 = sshll.u32 %s6607_s19, 4  ;;  %s4062_s21 = int_to_ptr.vmem [resolvable:$true] %s4061_s21 }
  0x3c   : > { %v4849_v17 = vld [vmem:[%s5679_s8 + $0x38] sm:$0xff]  ;;  %v4850_v28 = vld [vmem:[%s5679_s8 + $0x40] sm:$0xff]  ;;  %v4851_v44 = vld [vmem:[%s5679_s8 + $0x48] sm:$0xff] }
  0x3d   : > { %v4852_v60 = vld [vmem:[%s5679_s8 + $0x50] sm:$0xff]  ;;  %vm5886_vm2 = vmand %vm1431_vm0, %vm1432_vm1 }
  0x3e   : > { %vm5980_vm6 = vmand %vm1324_vm3, %vm1325_vm4 }
  0x3f   : > { %745 = vmatpush.bf16.msra.mxu0 %v4872_v2 }
  0x43   : > { %746 = vmatpush.bf16.msra.mxu0 %v4871_v3 }
  0x47   : > { %747 = vmatpush.bf16.msra.mxu0 %v4870_v4 }
  0x4b   : > { %748 = vmatpush.bf16.msra.mxu0 %v4869_v5 }
  0x4f   : > { %749 = vmatpush.bf16.msra.mxu0 %v4868_v6 }
  0x53   : > { %750 = vmatpush.bf16.msra.mxu0 %v4867_v7 }
  0x56   : > { %751 = vmatmul.bf16.vlgmr.msra.gmra.mxu0 %v4841_v8 }
  0x66   : > { %756 = vmatmul.bf16.gmra.mxu0 %v4842_v9 }
  0x76   : > { %761 = vmatmul.bf16.gmra.mxu0 %v4843_v10 }
  0x86   : > { %766 = vmatmul.bf16.gmra.mxu0 %v4844_v11 }
  0x96   : > { %771 = vmatmul.bf16.gmra.mxu0 %v4845_v12  ;;  %v4853_v12 = vld [vmem:[%s5679_s8 + $0x58] sm:$0xff] }
  0xa6   : > { %776 = vmatmul.bf16.gmra.mxu0 %v4846_v13 }
  0xb6   : > { %781 = vmatmul.bf16.gmra.mxu0 %v4847_v14 }
  0xc6   : > { %786 = vmatmul.bf16.gmra.mxu0 %v4848_v15 }
  0xd3   : > { %v752_v18 = vpop.f32.mrf.mxu0 }
  0xd4   : > { %v753_v19 = vadd.f32 %v5727_v16, %v752_v18 }
  0xd6   : > { %791 = vmatmul.bf16.gmra.mxu0 %v4849_v17  ;;  %v882_v20 = vmax.f32 %v753_v19, 0.0 }
  0xd8   : > { %v934_v23 = vpack.c.bf16 %v882_v20, %v882_v20 }
  0xda   : > { %v1038_v26 = vunpack.c.l.b16 %v934_v23 }
  0xdb   : > { %v754_v21 = vpop.f32.mrf.mxu0 }
  0xdc   : > { %v755_v22 = vadd.f32 %v5727_v16, %v754_v21 }
  0xde   : > { %v883_v24 = vmax.f32 %v755_v22, 0.0 }
  0xe0   : > { %v935_v25 = vpack.c.bf16 %v883_v24, %v883_v24 }
  0xe2   : > { %v1039_v27 = vunpack.c.l.b16 %v935_v25 }
  0xe3   : > { %v757_v29 = vpop.f32.mrf.mxu0 }
  0xe4   : > { %v5733_v30 = vpack.c.b16 %v1039_v27, %v1038_v26  ;;  %v758_v31 = vadd.f32 %v5727_v16, %v757_v29  ;;  %v4854_v29 = vld [vmem:[%s5679_s8 + $0x60] sm:$0xff] }
  0xe6   : > { %796 = vmatmul.bf16.gmra.mxu0 %v4850_v28  ;;  %v6869_v32 = vshrl.u32 %v5733_v30, 16  ;;  %v6871_v33 = vshll.u32 %v5733_v30, 16  ;;  %v884_v35 = vmax.f32 %v758_v31, 0.0 }
  0xe8   : > { %v1119_v34 = vrot.slane %v6869_v32, 7  ;;  %v936_v39 = vpack.c.bf16 %v884_v35, %v884_v35 }
  0xea   : > { %v5742_v36 = vor.u32 %v6871_v33, %v1119_v34  ;;  %v1040_v42 = vunpack.c.l.b16 %v936_v39 }
  0xeb   : > { %v759_v37 = vpop.f32.mrf.mxu0 }
  0xec   : > { %v760_v38 = vadd.f32 %v5727_v16, %v759_v37 }
  0xee   : > { %v885_v40 = vmax.f32 %v760_v38, 0.0 }
  0xf0   : > { %v937_v41 = vpack.c.bf16 %v885_v40, %v885_v40 }
  0xf2   : > { %v1041_v43 = vunpack.c.l.b16 %v937_v41 }
  0xf3   : > { %v762_v45 = vpop.f32.mrf.mxu0 }
  0xf4   : > { %v5746_v46 = vpack.c.b16 %v1041_v43, %v1040_v42  ;;  %v763_v47 = vadd.f32 %v5727_v16, %v762_v45 }
  0xf6   : > { %801 = vmatmul.bf16.gmra.mxu0 %v4851_v44  ;;  %v6865_v48 = vshrl.u32 %v5746_v46, 16  ;;  %v6868_v49 = vshll.u32 %v5746_v46, 16  ;;  %v886_v51 = vmax.f32 %v763_v47, 0.0 }
  0xf8   : > { %v1126_v50 = vrot.slane %v6865_v48, 7  ;;  %v938_v55 = vpack.c.bf16 %v886_v51, %v886_v51 }
  0xfa   : > { %v5755_v52 = vor.u32 %v6868_v49, %v1126_v50  ;;  %v1042_v58 = vunpack.c.l.b16 %v938_v55 }
  0xfb   : > { %v764_v53 = vpop.f32.mrf.mxu0 }
  0xfc   : > { %v765_v54 = vadd.f32 %v5727_v16, %v764_v53  ;;  %v4855_v53 = vld [vmem:[%s5679_s8 + $0x68] sm:$0xff] }
  0xfe   : > { %v887_v56 = vmax.f32 %v765_v54, 0.0 }
 0x100   : > { %v939_v57 = vpack.c.bf16 %v887_v56, %v887_v56 }
 0x102   : > { %v1043_v59 = vunpack.c.l.b16 %v939_v57 }
 0x103   : > { %v767_v61 = vpop.f32.mrf.mxu0 }
 0x104   : > { %v5759_v62 = vpack.c.b16 %v1043_v59, %v1042_v58  ;;  %v768_v63 = vadd.f32 %v5727_v16, %v767_v61 }
 0x106   : > { %806 = vmatmul.bf16.gmra.mxu0 %v4852_v60  ;;  %v6870_v0 = vshrl.u32 %v5759_v62, 16  ;;  %v6872_v2 = vshll.u32 %v5759_v62, 16  ;;  %v888_v3 = vmax.f32 %v768_v63, 0.0 }
 0x108   : > { %v1133_v1 = vrot.slane %v6870_v0, 7  ;;  %v940_v7 = vpack.c.bf16 %v888_v3, %v888_v3 }
 0x10a   : > { %v5768_v4 = vor.u32 %v6872_v2, %v1133_v1  ;;  %v1044_v10 = vunpack.c.l.b16 %v940_v7 }
 0x10b   : > { %v769_v5 = vpop.f32.mrf.mxu0 }
 0x10c   : > { %v770_v6 = vadd.f32 %v5727_v16, %v769_v5 }
 0x10e   : > { %v889_v8 = vmax.f32 %v770_v6, 0.0 }
 0x110   : > { %v941_v9 = vpack.c.bf16 %v889_v8, %v889_v8 }
 0x112   : > { %v1045_v11 = vunpack.c.l.b16 %v941_v9  ;;  %v4856_v9 = vld [vmem:[%s5679_s8 + $0x70] sm:$0xff] }
 0x113   : > { %v772_v13 = vpop.f32.mrf.mxu0 }
 0x114   : > { %v5772_v14 = vpack.c.b16 %v1045_v11, %v1044_v10  ;;  %v773_v15 = vadd.f32 %v5727_v16, %v772_v13 }
 0x116   : > { %811 = vmatmul.bf16.gmra.mxu0 %v4853_v12  ;;  %v6863_v17 = vshrl.u32 %v5772_v14, 16  ;;  %v6866_v19 = vshll.u32 %v5772_v14, 16  ;;  %v890_v20 = vmax.f32 %v773_v15, 0.0 }
 0x118   : > { %v1140_v18 = vrot.slane %v6863_v17, 7  ;;  %v942_v24 = vpack.c.bf16 %v890_v20, %v890_v20 }
 0x11a   : > { %v5781_v21 = vor.u32 %v6866_v19, %v1140_v18  ;;  %v1046_v27 = vunpack.c.l.b16 %v942_v24 }
 0x11b   : > { %v774_v22 = vpop.f32.mrf.mxu0 }
 0x11c   : > { %v775_v23 = vadd.f32 %v5727_v16, %v774_v22  ;;  %v4934_v22 = vld [vmem:[%s6836_s4 + $0x58] sm:$0xff] }
 0x11d   : > { %2319 = vmatpush.bf16.msrb.mxu0 %v4934_v22  ;;  %5230 = vmatpush.bf16.msra.mxu2 %v4934_v22 }
 0x11e   : > { %v891_v25 = vmax.f32 %v775_v23, 0.0  ;;  %5231 = vmatpush.bf16.msra.mxu3 %v4934_v22  ;;  %5229 = vmatpush.bf16.msra.mxu1 %v4934_v22 }
 0x120   : > { %v943_v26 = vpack.c.bf16 %v891_v25, %v891_v25 }
 0x122   : > { %v1047_v28 = vunpack.c.l.b16 %v943_v26 }
 0x123   : > { %v777_v31 = vpop.f32.mrf.mxu0 }
 0x124   : > { %v5785_v34 = vpack.c.b16 %v1047_v28, %v1046_v27  ;;  %v778_v35 = vadd.f32 %v5727_v16, %v777_v31 }
 0x126   : > { %816 = vmatmul.bf16.gmra.mxu0 %v4854_v29  ;;  %v6864_v37 = vshrl.u32 %v5785_v34, 16  ;;  %v6867_v39 = vshll.u32 %v5785_v34, 16  ;;  %v892_v40 = vmax.f32 %v778_v35, 0.0  ;;  %v4857_v35 = vld [vmem:[%s5679_s8 + $0x78] sm:$0xff] }
 0x128   : > { %v1147_v38 = vrot.slane %v6864_v37, 7  ;;  %v944_v44 = vpack.c.bf16 %v892_v40, %v892_v40 }
 0x12a   : > { %v5794_v41 = vor.u32 %v6867_v39, %v1147_v38  ;;  %v1048_v50 = vunpack.c.l.b16 %v944_v44 }
 0x12b   : > { %v779_v42 = vpop.f32.mrf.mxu0 }
 0x12c   : > { %v780_v43 = vadd.f32 %v5727_v16, %v779_v42 }
 0x12e   : > { %v893_v45 = vmax.f32 %v780_v43, 0.0 }
 0x130   : > { %v945_v47 = vpack.c.bf16 %v893_v45, %v893_v45 }
 0x132   : > { %v1049_v51 = vunpack.c.l.b16 %v945_v47 }
 0x133   : > { %v782_v54 = vpop.f32.mrf.mxu0 }
 0x134   : > { %v5798_v55 = vpack.c.b16 %v1049_v51, %v1048_v50  ;;  %v783_v56 = vadd.f32 %v5727_v16, %v782_v54 }
 0x136   : > { %821 = vmatmul.bf16.gmra.mxu0 %v4855_v53  ;;  %v6859_v57 = vshrl.u32 %v5798_v55, 16  ;;  %v6862_v59 = vshll.u32 %v5798_v55, 16  ;;  %v894_v60 = vmax.f32 %v783_v56, 0.0 }
 0x138   : > { %v1154_v58 = vrot.slane %v6859_v57, 7  ;;  %v946_v3 = vpack.c.bf16 %v894_v60, %v894_v60 }
 0x13a   : > { %v5807_v61 = vor.u32 %v6862_v59, %v1154_v58  ;;  %v1050_v7 = vunpack.c.l.b16 %v946_v3  ;;  %v4931_v59 = vld [vmem:[%s6836_s4 + $0x40] sm:$0xff] }
 0x13b   : > { %v784_v63 = vpop.f32.mrf.mxu0 }
 0x13c   : > { %v785_v1 = vadd.f32 %v5727_v16, %v784_v63 }
 0x13e   : > { %v895_v5 = vmax.f32 %v785_v1, 0.0  ;;  %v4858_v1 = vld [vmem:[%s5679_s8 + $0x80] sm:$0xff] }
 0x140   : > { %v947_v6 = vpack.c.bf16 %v895_v5, %v895_v5 }
 0x142   : > { %v1051_v8 = vunpack.c.l.b16 %v947_v6 }
 0x143   : > { %v787_v10 = vpop.f32.mrf.mxu0 }
 0x144   : > { %v5811_v11 = vpack.c.b16 %v1051_v8, %v1050_v7  ;;  %v788_v12 = vadd.f32 %v5727_v16, %v787_v10 }
 0x146   : > { %826 = vmatmul.bf16.gmra.mxu0 %v4856_v9  ;;  %v6857_v13 = vshrl.u32 %v5811_v11, 16  ;;  %v6860_v18 = vshll.u32 %v5811_v11, 16  ;;  %v896_v20 = vmax.f32 %v788_v12, 0.0 }
 0x148   : > { %v1161_v15 = vrot.slane %v6857_v13, 7  ;;  %v948_v26 = vpack.c.bf16 %v896_v20, %v896_v20 }
 0x14a   : > { %v5823_v23 = vor.u32 %v6860_v18, %v1161_v15  ;;  %v1052_v29 = vunpack.c.l.b16 %v948_v26 }
 0x14b   : > { %v789_v24 = vpop.f32.mrf.mxu0 }
 0x14c   : > { %v790_v25 = vadd.f32 %v5727_v16, %v789_v24 }
 0x14e   : > { %v897_v27 = vmax.f32 %v790_v25, 0.0 }
 0x150   : > { %v949_v28 = vpack.c.bf16 %v897_v27, %v897_v27 }
 0x152   : > { %v1053_v31 = vunpack.c.l.b16 %v949_v28  ;;  %v4859_v28 = vld [vmem:[%s5679_s8 + $0x88] sm:$0xff] }
 0x153   : > { %v792_v38 = vpop.f32.mrf.mxu0 }
 0x154   : > { %v5827_v40 = vpack.c.b16 %v1053_v31, %v1052_v29  ;;  %v793_v42 = vadd.f32 %v5727_v16, %v792_v38 }
 0x156   : > { %831 = vmatmul.bf16.gmra.mxu0 %v4857_v35  ;;  %v6858_v43 = vshrl.u32 %v5827_v40, 16  ;;  %v6861_v45 = vshll.u32 %v5827_v40, 16  ;;  %v898_v47 = vmax.f32 %v793_v42, 0.0 }
 0x158   : > { %v1168_v44 = vrot.slane %v6858_v43, 7  ;;  %v950_v54 = vpack.c.bf16 %v898_v47, %v898_v47 }
 0x15a   : > { %v5836_v50 = vor.u32 %v6861_v45, %v1168_v44  ;;  %v1054_v60 = vunpack.c.l.b16 %v950_v54 }
 0x15b   : > { %v794_v51 = vpop.f32.mrf.mxu0 }
 0x15c   : > { %v795_v53 = vadd.f32 %v5727_v16, %v794_v51 }
 0x15e   : > { %v899_v56 = vmax.f32 %v795_v53, 0.0 }
 0x160   : > { %v951_v58 = vpack.c.bf16 %v899_v56, %v899_v56 }
 0x162   : > { %v1055_v63 = vunpack.c.l.b16 %v951_v58 }
 0x163   : > { %v797_v3 = vpop.f32.mrf.mxu0 }
 0x164   : > { %v5840_v5 = vpack.c.b16 %v1055_v63, %v1054_v60  ;;  %v798_v6 = vadd.f32 %v5727_v16, %v797_v3  ;;  %v4860_v3 = vld [vmem:[%s5679_s8 + $0x90] sm:$0xff] }
 0x166   : > { %836 = vmatmul.bf16.gmra.mxu0 %v4858_v1  ;;  %v6853_v7 = vshrl.u32 %v5840_v5, 16  ;;  %v6856_v9 = vshll.u32 %v5840_v5, 16  ;;  %v900_v10 = vmax.f32 %v798_v6, 0.0 }
 0x168   : > { %v1175_v8 = vrot.slane %v6853_v7, 7  ;;  %v952_v22 = vpack.c.bf16 %v900_v10, %v900_v10  ;;  %v4865_v7 = vld [vmem:[%s5679_s8 + $0xb8] sm:$0xff] }
 0x16a   : > { %v5849_v12 = vor.u32 %v6856_v9, %v1175_v8  ;;  %v1056_v26 = vunpack.c.l.b16 %v952_v22 }
 0x16b   : > { %v799_v15 = vpop.f32.mrf.mxu0 }
 0x16c   : > { %v800_v20 = vadd.f32 %v5727_v16, %v799_v15 }
 0x16e   : > { %v901_v24 = vmax.f32 %v800_v20, 0.0 }
 0x170   : > { %v953_v25 = vpack.c.bf16 %v901_v24, %v901_v24 }
 0x172   : > { %v1057_v27 = vunpack.c.l.b16 %v953_v25  ;;  %v4933_v25 = vld [vmem:[%s6836_s4 + $0x50] sm:$0xff] }
 0x173   : > { %v802_v29 = vpop.f32.mrf.mxu0  ;;  %2320 = vmatpush.bf16.msrb.mxu0 %v4933_v25  ;;  %5233 = vmatpush.bf16.msra.mxu2 %v4933_v25 }
 0x174   : > { %v5853_v31 = vpack.c.b16 %v1057_v27, %v1056_v26  ;;  %v803_v35 = vadd.f32 %v5727_v16, %v802_v29  ;;  %5234 = vmatpush.bf16.msra.mxu3 %v4933_v25  ;;  %5232 = vmatpush.bf16.msra.mxu1 %v4933_v25 }
 0x176   : > { %841 = vmatmul.bf16.gmra.mxu0 %v4859_v28  ;;  %v6851_v38 = vshrl.u32 %v5853_v31, 16  ;;  %v6854_v44 = vshll.u32 %v5853_v31, 16  ;;  %v902_v47 = vmax.f32 %v803_v35, 0.0 }
 0x178   : > { %v1182_v42 = vrot.slane %v6851_v38, 7  ;;  %v954_v56 = vpack.c.bf16 %v902_v47, %v902_v47 }
 0x17a   : > { %v5862_v51 = vor.u32 %v6854_v44, %v1182_v42  ;;  %v1058_v63 = vunpack.c.l.b16 %v954_v56  ;;  %v4932_v44 = vld [vmem:[%s6836_s4 + $0x48] sm:$0xff] }
 0x17b   : > { %v804_v53 = vpop.f32.mrf.mxu0  ;;  %2321 = vmatpush.bf16.msrb.mxu0 %v4932_v44  ;;  %5236 = vmatpush.bf16.msra.mxu2 %v4932_v44 }
 0x17c   : > { %v805_v54 = vadd.f32 %v5727_v16, %v804_v53  ;;  %5237 = vmatpush.bf16.msra.mxu3 %v4932_v44  ;;  %5235 = vmatpush.bf16.msra.mxu1 %v4932_v44 }
 0x17e   : > { %v903_v58 = vmax.f32 %v805_v54, 0.0  ;;  %v4861_v54 = vld [vmem:[%s5679_s8 + $0x98] sm:$0xff] }
 0x17f   : > { %5239 = vmatpush.bf16.msra.mxu2 %v4931_v59  ;;  %2322 = vmatpush.bf16.msrb.mxu0 %v4931_v59 }
 0x180   : > { %v955_v60 = vpack.c.bf16 %v903_v58, %v903_v58  ;;  %5240 = vmatpush.bf16.msra.mxu3 %v4931_v59  ;;  %5238 = vmatpush.bf16.msra.mxu1 %v4931_v59  ;;  %v4929_v59 = vld [vmem:[%s6836_s4 + $0x30] sm:$0xff] }
 0x182   : > { %v1059_v1 = vunpack.c.l.b16 %v955_v60 }
 0x183   : > { %v807_v6 = vpop.f32.mrf.mxu0 }
 0x184   : > { %v5866_v8 = vpack.c.b16 %v1059_v1, %v1058_v63  ;;  %v808_v10 = vadd.f32 %v5727_v16, %v807_v6 }
 0x186   : > { %846 = vmatmul.bf16.gmra.mxu0 %v4860_v3  ;;  %v6852_v15 = vshrl.u32 %v5866_v8, 16  ;;  %v6855_v22 = vshll.u32 %v5866_v8, 16  ;;  %v904_v24 = vmax.f32 %v808_v10, 0.0 }
 0x188   : > { %v1189_v20 = vrot.slane %v6852_v15, 7  ;;  %v956_v29 = vpack.c.bf16 %v904_v24, %v904_v24 }
 0x18a   : > { %v5878_v26 = vor.u32 %v6855_v22, %v1189_v20  ;;  %v1060_v47 = vunpack.c.l.b16 %v956_v29 }
 0x18b   : > { %v809_v27 = vpop.f32.mrf.mxu0 }
 0x18c   : > { %v810_v28 = vadd.f32 %v5727_v16, %v809_v27  ;;  %v1331_v27 = vsel %vm5980_vm6, 0, %v5794_v41 }
 0x18e   : > { %v905_v35 = vmax.f32 %v810_v28, 0.0 }
 0x190   : > { %v957_v42 = vpack.c.bf16 %v905_v35, %v905_v35 }
 0x192   : > { %v1061_v53 = vunpack.c.l.b16 %v957_v42 }
 0x193   : > { %v812_v56 = vpop.f32.mrf.mxu0 }
 0x194   : > { %v1101_v58 = vpack.c.b16 %v1061_v53, %v1060_v47  ;;  %v813_v60 = vadd.f32 %v5727_v16, %v812_v56  ;;  %v4862_v56 = vld [vmem:[%s5679_s8 + $0xa0] sm:$0xff] }
 0x196   : > { %851 = vmatmul.bf16.gmra.mxu0 %v4861_v54  ;;  %1482 = vrot.lane.b32.xlu0 %v1101_v58, %s5518_s23  ;;  %v1194_v63 = vshrl.u32 %v1101_v58, 16  ;;  %v1197_v1 = vshll.u32 %v1101_v58, 16  ;;  %v906_v10 = vmax.f32 %v813_v60, 0.0 }
 0x198   : > { %v1375_v3 = vrot.slane %v1197_v1, 1  ;;  %v1196_v6 = vrot.slane %v1194_v63, 7  ;;  %v958_v35 = vpack.c.bf16 %v906_v10, %v906_v10 }
 0x19a   : > { %v1376_v20 = vor.u32 %v1375_v3, %v1194_v63  ;;  %v5884_v24 = vor.u32 %v1197_v1, %v1196_v6  ;;  %v1062_v53 = vunpack.c.l.b16 %v958_v35 }
 0x19b   : > { %v814_v25 = vpop.f32.mrf.mxu0 }
 0x19c   : > { %v815_v28 = vadd.f32 %v5727_v16, %v814_v25  ;;  %v1445_v29 = vsel %vm5886_vm2, %v1376_v20, 0 }
 0x19e   : > { %v907_v42 = vmax.f32 %v815_v28, 0.0  ;;  %1560 = vrot.lane.b32.xlu0 %v1445_v29, %s5519_s11 }
 0x1a0   : > { %v959_v47 = vpack.c.bf16 %v907_v42, %v907_v42 }
 0x1a2   : > { %v1063_v54 = vunpack.c.l.b16 %v959_v47 }
 0x1a3   : > { %v817_v58 = vpop.f32.mrf.mxu0 }
 0x1a4   : > { %v1102_v60 = vpack.c.b16 %v1063_v54, %v1062_v53  ;;  %v818_v63 = vadd.f32 %v5727_v16, %v817_v58 }
 0x1a6   : > { %856 = vmatmul.bf16.gmra.mxu0 %v4862_v56  ;;  %1484 = vrot.lane.b32.xlu2 %v1102_v60, %s5518_s23  ;;  %v1201_v1 = vshrl.u32 %v1102_v60, 16  ;;  %v1204_v3 = vshll.u32 %v1102_v60, 16  ;;  %v908_v20 = vmax.f32 %v818_v63, 0.0  ;;  %v4863_v60 = vld [vmem:[%s5679_s8 + $0xa8] sm:$0xff] }
 0x1a8   : > { %v1377_v6 = vrot.slane %v1204_v3, 1  ;;  %v1203_v10 = vrot.slane %v1201_v1, 7  ;;  %v960_v47 = vpack.c.bf16 %v908_v20, %v908_v20 }
 0x1aa   : > { %v1378_v25 = vor.u32 %v1377_v6, %v1201_v1  ;;  %v5897_v28 = vor.u32 %v1204_v3, %v1203_v10  ;;  %v1064_v56 = vunpack.c.l.b16 %v960_v47 }
 0x1ab   : > { %v819_v29 = vpop.f32.mrf.mxu0 }
 0x1ac   : > { %v820_v35 = vadd.f32 %v5727_v16, %v819_v29  ;;  %v1446_v42 = vsel %vm5886_vm2, %v1378_v25, 0 }
 0x1ae   : > { %v909_v53 = vmax.f32 %v820_v35, 0.0  ;;  %1562 = vrot.lane.b32.xlu2 %v1446_v42, %s5519_s11 }
 0x1b0   : > { %v961_v54 = vpack.c.bf16 %v909_v53, %v909_v53 }
 0x1b2   : > { %v1065_v58 = vunpack.c.l.b16 %v961_v54  ;;  %v4864_v54 = vld [vmem:[%s5679_s8 + $0xb0] sm:$0xff] }
 0x1b3   : > { %v822_v38 = vpop.f32.mrf.mxu0 }
 0x1b4   : > { %v5904_v15 = vpack.c.b16 %v1065_v58, %v1064_v56  ;;  %v823_v63 = vadd.f32 %v5727_v16, %v822_v38 }
 0x1b6   : > { %861 = vmatmul.bf16.gmra.mxu0 %v4863_v60  ;;  %v1208_v1 = vshrl.u32 %v5904_v15, 16  ;;  %1486 = vrot.lane.b32.xlu2 %v5904_v15, %s5518_s23  ;;  %v1211_v6 = vshll.u32 %v5904_v15, 16  ;;  %v910_v10 = vmax.f32 %v823_v63, 0.0 }
 0x1b8   : > { %v1210_v3 = vrot.slane %v1208_v1, 7  ;;  %v962_v38 = vpack.c.bf16 %v910_v10, %v910_v10 }
 0x1ba   : > { %v5915_v20 = vor.u32 %v1211_v6, %v1210_v3  ;;  %v1066_v47 = vunpack.c.l.b16 %v962_v38 }
 0x1bb   : > { %v824_v25 = vpop.f32.mrf.mxu0 }
 0x1bc   : > { %v825_v29 = vadd.f32 %v5727_v16, %v824_v25 }
 0x1be   : > { %v911_v35 = vmax.f32 %v825_v29, 0.0 }
 0x1c0   : > { %v963_v42 = vpack.c.bf16 %v911_v35, %v911_v35 }
 0x1c2   : > { %v1067_v53 = vunpack.c.l.b16 %v963_v42 }
 0x1c3   : > { %v827_v56 = vpop.f32.mrf.mxu0 }
 0x1c4   : > { %v5919_v58 = vpack.c.b16 %v1067_v53, %v1066_v47  ;;  %v828_v60 = vadd.f32 %v5727_v16, %v827_v56 }
 0x1c6   : > { %866 = vmatmul.bf16.gmra.mxu0 %v4864_v54  ;;  %v1215_v63 = vshrl.u32 %v5919_v58, 16  ;;  %v1218_v3 = vshll.u32 %v5919_v58, 16  ;;  %v912_v10 = vmax.f32 %v828_v60, 0.0 }
 0x1c8   : > { %v1217_v25 = vrot.slane %v1215_v63, 7  ;;  %v964_v42 = vpack.c.bf16 %v912_v10, %v912_v10 }
 0x1ca   : > { %v5928_v29 = vor.u32 %v1218_v3, %v1217_v25  ;;  %v1068_v56 = vunpack.c.l.b16 %v964_v42 }
 0x1cb   : > { %v829_v38 = vpop.f32.mrf.mxu0 }
 0x1cc   : > { %v830_v35 = vadd.f32 %v5727_v16, %v829_v38 }
 0x1ce   : > { %v913_v47 = vmax.f32 %v830_v35, 0.0 }
 0x1d0   : > { %v965_v53 = vpack.c.bf16 %v913_v47, %v913_v47 }
 0x1d2   : > { %v1069_v54 = vunpack.c.l.b16 %v965_v53 }
 0x1d3   : > { %v832_v22 = vpop.f32.mrf.mxu0 }
 0x1d4   : > { %v5935_v60 = vpack.c.b16 %v1069_v54, %v1068_v56  ;;  %v833_v25 = vadd.f32 %v5727_v16, %v832_v22 }
 0x1d6   : > { %871 = vmatmul.bf16.gmra.mxu0 %v4865_v7  ;;  %v1222_v10 = vshrl.u32 %v5935_v60, 16  ;;  %v1225_v35 = vshll.u32 %v5935_v60, 16  ;;  %v914_v42 = vmax.f32 %v833_v25, 0.0 }
 0x1d8   : > { %v1224_v38 = vrot.slane %v1222_v10, 7  ;;  %v966_v54 = vpack.c.bf16 %v914_v42, %v914_v42 }
 0x1da   : > { %v5944_v47 = vor.u32 %v1225_v35, %v1224_v38  ;;  %v1070_v22 = vunpack.c.l.b16 %v966_v54 }
 0x1db   : > { %v834_v53 = vpop.f32.mrf.mxu0 }
 0x1dc   : > { %v835_v56 = vadd.f32 %v5727_v16, %v834_v53 }
 0x1de   : > { %v915_v44 = vmax.f32 %v835_v56, 0.0 }
 0x1e0   : > { %v967_v9 = vpack.c.bf16 %v915_v44, %v915_v44 }
 0x1e2   : > { %v1071_v7 = vunpack.c.l.b16 %v967_v9 }
 0x1e3   : > { %v837_v13 = vpop.f32.mrf.mxu0 }
 0x1e4   : > { %v5947_v43 = vpack.c.b16 %v1071_v7, %v1070_v22  ;;  %v838_v57 = vadd.f32 %v5727_v16, %v837_v13 }
 0x1e6   : > { %v6875_v18 = vshrl.u32 %v5947_v43, 16  ;;  %v1232_v38 = vshll.u32 %v5947_v43, 16  ;;  %v916_v45 = vmax.f32 %v838_v57, 0.0 }
 0x1e8   : > { %v1231_v25 = vrot.slane %v6875_v18, 7  ;;  %v968_v56 = vpack.c.bf16 %v916_v45, %v916_v45  ;;  %v4930_v45 = vld [vmem:[%s6836_s4 + $0x38] sm:$0xff] }
 0x1e9   : > { %5242 = vmatpush.bf16.msra.mxu2 %v4930_v45  ;;  %2323 = vmatpush.bf16.msrb.mxu0 %v4930_v45 }
 0x1ea   : > { %v5956_v42 = vor.u32 %v1232_v38, %v1231_v25  ;;  %v1072_v22 = vunpack.c.l.b16 %v968_v56  ;;  %5243 = vmatpush.bf16.msra.mxu3 %v4930_v45  ;;  %5241 = vmatpush.bf16.msra.mxu1 %v4930_v45 }
 0x1eb   : > { %v839_v53 = vpop.f32.mrf.mxu0 }
 0x1ec   : > { %v840_v9 = vadd.f32 %v5727_v16, %v839_v53 }
 0x1ed   : > { %5245 = vmatpush.bf16.msra.mxu2 %v4929_v59  ;;  %2324 = vmatpush.bf16.msrb.mxu0 %v4929_v59 }
 0x1ee   : > { %v917_v54 = vmax.f32 %v840_v9, 0.0  ;;  %5246 = vmatpush.bf16.msra.mxu3 %v4929_v59  ;;  %5244 = vmatpush.bf16.msra.mxu1 %v4929_v59 }
 0x1f0   : > { %v969_v44 = vpack.c.bf16 %v917_v54, %v917_v54 }
 0x1f2   : > { %v1073_v13 = vunpack.c.l.b16 %v969_v44 }
 0x1f3   : > { %v842_v7 = vpop.f32.mrf.mxu0 }
 0x1f4   : > { %v5962_v17 = vpack.c.b16 %v1073_v13, %v1072_v22  ;;  %v843_v57 = vadd.f32 %v5727_v16, %v842_v7 }
 0x1f6   : > { %v6873_v25 = vshrl.u32 %v5962_v17, 16  ;;  %v6874_v9 = vshll.u32 %v5962_v17, 16  ;;  %v918_v56 = vmax.f32 %v843_v57, 0.0 }
 0x1f8   : > { %v1238_v53 = vrot.slane %v6873_v25, 7  ;;  %v970_v13 = vpack.c.bf16 %v918_v56, %v918_v56 }
 0x1fa   : > { %v5974_v54 = vor.u32 %v6874_v9, %v1238_v53  ;;  %v1074_v48 = vunpack.c.l.b16 %v970_v13 }
 0x1fb   : > { %v844_v44 = vpop.f32.mrf.mxu0 }
 0x1fc   : > { %v845_v22 = vadd.f32 %v5727_v16, %v844_v44 }
 0x1fe   : > { %v919_v7 = vmax.f32 %v845_v22, 0.0  ;;  %v1339_v22 = vsel %vm5980_vm6, 0, %v5897_v28 }
 0x200   : > { %v971_v57 = vpack.c.bf16 %v919_v7, %v919_v7  ;;  %v1485_v37 = vpop.permute.xlu2 %1484 }
 0x201   : > { %v1629_v13 = vsel %vm1590_vm5, %v1339_v22, %v1485_v37 }
 0x202   : > { %v1075_v19 = vunpack.c.l.b16 %v971_v57 }
 0x203   : > { %v847_v45 = vpop.f32.mrf.mxu0 }
 0x204   : > { %v1108_v53 = vpack.c.b16 %v1075_v19, %v1074_v48  ;;  %v848_v44 = vadd.f32 %v5727_v16, %v847_v45 }
 0x206   : > { %1496 = vrot.lane.b32.xlu1 %v1108_v53, %s5518_s23  ;;  %v1243_v56 = vshrl.u32 %v1108_v53, 16  ;;  %v1246_v59 = vshll.u32 %v1108_v53, 16  ;;  %v920_v32 = vmax.f32 %v848_v44, 0.0 }
 0x208   : > { %v1563_v7 = vpop.permute.xlu2 %1562  ;;  %v1483_v48 = vpop.permute.xlu0 %1482  ;;  %v1389_v19 = vrot.slane %v1246_v59, 1  ;;  %v1245_v57 = vrot.slane %v1243_v56, 7  ;;  %v972_v22 = vpack.c.bf16 %v920_v32, %v920_v32 }
 0x209   : > { %v1695_v49 = vsel %vm1669_vm7, %v1629_v13, %v1563_v7 }
 0x20a   : > { %v1772_v0 = vunpack.c.l.b16 %v1695_v49  ;;  %v1773_v45 = vunpack.c.h.b16 %v1695_v49  ;;  %v1390_v33 = vor.u32 %v1389_v19, %v1243_v56  ;;  %v5991_v25 = vor.u32 %v1246_v59, %v1245_v57 }
 0x20b   : > { %v849_v2 = vpop.f32.mrf.mxu0  ;;  %v1338_v49 = vsel %vm5980_vm6, 0, %v5884_v24  ;;  %v1076_v59 = vunpack.c.l.b16 %v972_v22 }
 0x20c   : > { %v1824_v53 = vpack.c.b16 %v1772_v0, %v1772_v0  ;;  %v1825_v9 = vpack.c.b16 %v1773_v45, %v1773_v45  ;;  %v850_v28 = vadd.f32 %v5727_v16, %v849_v2  ;;  %v1452_v37 = vsel %vm5886_vm2, %v1390_v33, 0 }
 0x20d   : > { %v1626_v0 = vsel %vm1590_vm5, %v1338_v49, %v1483_v48 }
 0x20e   : > { %1929 = vst.msk [vmem:[#allocation2 + $0x60] sm:$0xf] %vm1904_vm8, %v1824_v53  ;;  %v921_v18 = vmax.f32 %v850_v28, 0.0  ;;  %1574 = vrot.lane.b32.xlu1 %v1452_v37, %s5519_s11 }
 0x20f   : > { %1930 = vst.msk [vmem:[#allocation2 + $0x64] sm:$0xf] %vm1904_vm8, %v1825_v9  ;;  %v1379_v9 = vrot.slane %v1211_v6, 1 }
 0x210   : > { %v973_v44 = vpack.c.bf16 %v921_v18, %v921_v18  ;;  %v1561_v56 = vpop.permute.xlu0 %1560 }
 0x211   : > { %v1693_v2 = vsel %vm1669_vm7, %v1626_v0, %v1561_v56  ;;  %v1380_v37 = vor.u32 %v1379_v9, %v1208_v1 }
 0x212   : > { %v1077_v33 = vunpack.c.l.b16 %v973_v44  ;;  %v1770_v32 = vunpack.c.l.b16 %v1693_v2  ;;  %v1771_v13 = vunpack.c.h.b16 %v1693_v2 }
 0x213   : > { %v852_v7 = vpop.f32.mrf.mxu0  ;;  %v1447_v2 = vsel %vm5886_vm2, %v1380_v37, 0 }
 0x214   : > { %v1822_v19 = vpack.c.b16 %v1770_v32, %v1770_v32  ;;  %v1823_v57 = vpack.c.b16 %v1771_v13, %v1771_v13  ;;  %v1109_v45 = vpack.c.b16 %v1077_v33, %v1076_v59  ;;  %v853_v24 = vadd.f32 %v5727_v16, %v852_v7 }
 0x216   : > { %1927 = vst.msk [vmem:[#allocation2 + $0x58] sm:$0xf] %vm1904_vm8, %v1822_v19  ;;  %1498 = vrot.lane.b32.xlu0 %v1109_v45, %s5518_s23  ;;  %v1250_v18 = vshrl.u32 %v1109_v45, 16  ;;  %v1253_v48 = vshll.u32 %v1109_v45, 16  ;;  %v922_v22 = vmax.f32 %v853_v24, 0.0 }
 0x217   : > { %1928 = vst.msk [vmem:[#allocation2 + $0x5c] sm:$0xf] %vm1904_vm8, %v1823_v57  ;;  %v1381_v57 = vrot.slane %v1218_v3, 1 }
 0x218   : > { %v1252_v53 = vrot.slane %v1250_v18, 7  ;;  %v1391_v28 = vrot.slane %v1253_v48, 1  ;;  %v974_v59 = vpack.c.bf16 %v922_v22, %v922_v22 }
 0x21a   : > { %v1392_v49 = vor.u32 %v1391_v28, %v1250_v18  ;;  %v6012_v0 = vor.u32 %v1253_v48, %v1252_v53  ;;  %v1078_v32 = vunpack.c.l.b16 %v974_v59  ;;  %v1382_v53 = vor.u32 %v1381_v57, %v1215_v63 }
 0x21b   : > { %v854_v6 = vpop.f32.mrf.mxu0 }
 0x21c   : > { %v855_v44 = vadd.f32 %v5727_v16, %v854_v6  ;;  %v1453_v56 = vsel %vm5886_vm2, %v1392_v49, 0 }
 0x21d   : > { %1576 = vrot.lane.b32.xlu1 %v1453_v56, %s5519_s11 }
 0x21e   : > { %v923_v33 = vmax.f32 %v855_v44, 0.0  ;;  %1564 = vrot.lane.b32.xlu0 %v1447_v2, %s5519_s11  ;;  %v4915_v15 = vld [vmem:[#allocation2 + $0x58] sm:$0xff]  ;;  %v1448_v44 = vsel %vm5886_vm2, %v1382_v53, 0 }
 0x21f   : > { %4490 = vmatmul.msk.bf16.vlgmr.msra.gmra.mxu2 %vm2244_vm9, %v4915_v15 }
 0x220   : > { %v975_v1 = vpack.c.bf16 %v923_v33, %v923_v33 }
 0x222   : > { %v1079_v13 = vunpack.c.l.b16 %v975_v1 }
 0x223   : > { %v857_v7 = vpop.f32.mrf.mxu0 }
 0x224   : > { %v1110_v19 = vpack.c.b16 %v1079_v13, %v1078_v32  ;;  %v858_v45 = vadd.f32 %v5727_v16, %v857_v7  ;;  %v1383_v32 = vrot.slane %v1225_v35, 1 }
 0x226   : > { %1500 = vrot.lane.b32.xlu1 %v1110_v19, %s5518_s23  ;;  %1488 = vrot.lane.b32.xlu0 %v5919_v58, %s5518_s23  ;;  %v1257_v9 = vshrl.u32 %v1110_v19, 16  ;;  %v1260_v24 = vshll.u32 %v1110_v19, 16  ;;  %v924_v28 = vmax.f32 %v858_v45, 0.0  ;;  %v4916_v58 = vld [vmem:[#allocation2 + $0x60] sm:$0xff] }
 0x228   : > { %v1259_v18 = vrot.slane %v1257_v9, 7  ;;  %v1393_v48 = vrot.slane %v1260_v24, 1  ;;  %v976_v56 = vpack.c.bf16 %v924_v28, %v924_v28 }
 0x22a   : > { %v1394_v37 = vor.u32 %v1393_v48, %v1257_v9  ;;  %v6030_v22 = vor.u32 %v1260_v24, %v1259_v18  ;;  %v1080_v59 = vunpack.c.l.b16 %v976_v56  ;;  %v1384_v9 = vor.u32 %v1383_v32, %v1222_v10 }
 0x22b   : > { %v859_v49 = vpop.f32.mrf.mxu0 }
 0x22c   : > { %v860_v3 = vadd.f32 %v5727_v16, %v859_v49  ;;  %v1454_v6 = vsel %vm5886_vm2, %v1394_v37, 0  ;;  %v1449_v37 = vsel %vm5886_vm2, %v1384_v9, 0 }
 0x22d   : > { %1578 = vrot.lane.b32.xlu2 %v1454_v6, %s5519_s11 }
 0x22e   : > { %v925_v2 = vmax.f32 %v860_v3, 0.0  ;;  %1566 = vrot.lane.b32.xlu1 %v1448_v44, %s5519_s11 }
 0x22f   : > { %4491 = vmatmul.msk.bf16.gmra.mxu2 %vm2244_vm9, %v4916_v58 }
 0x230   : > { %v977_v63 = vpack.c.bf16 %v925_v2, %v925_v2  ;;  %v1385_v2 = vrot.slane %v1232_v38, 1 }
 0x232   : > { %v1081_v33 = vunpack.c.l.b16 %v977_v63 }
 0x233   : > { %v862_v15 = vpop.f32.mrf.mxu0 }
 0x234   : > { %v1111_v1 = vpack.c.b16 %v1081_v33, %v1080_v59  ;;  %v863_v13 = vadd.f32 %v5727_v16, %v862_v15 }
 0x236   : > { %1490 = vrot.lane.b32.xlu1 %v5935_v60, %s5518_s23  ;;  %1502 = vrot.lane.b32.xlu2 %v1111_v1, %s5518_s23  ;;  %v1264_v7 = vshrl.u32 %v1111_v1, 16  ;;  %v1267_v19 = vshll.u32 %v1111_v1, 16  ;;  %v926_v24 = vmax.f32 %v863_v13, 0.0  ;;  %v6898_v1 = vshrl.u32 %v5947_v43, 16 }
 0x238   : > { %v1266_v57 = vrot.slane %v1264_v7, 7  ;;  %v1395_v45 = vrot.slane %v1267_v19, 1  ;;  %v978_v49 = vpack.c.bf16 %v926_v24, %v926_v24  ;;  %v1386_v32 = vor.u32 %v1385_v2, %v6898_v1 }
 0x23a   : > { %v1396_v18 = vor.u32 %v1395_v45, %v1264_v7  ;;  %v6048_v48 = vor.u32 %v1267_v19, %v1266_v57  ;;  %v1082_v10 = vunpack.c.l.b16 %v978_v49  ;;  %v1450_v9 = vsel %vm5886_vm2, %v1386_v32, 0 }
 0x23b   : > { %v864_v53 = vpop.f32.mrf.mxu0 }
 0x23c   : > { %v865_v35 = vadd.f32 %v5727_v16, %v864_v53  ;;  %v1455_v28 = vsel %vm5886_vm2, %v1396_v18, 0 }
 0x23d   : > { %1580 = vrot.lane.b32.xlu0 %v1455_v28, %s5519_s11 }
 0x23e   : > { %v927_v3 = vmax.f32 %v865_v35, 0.0  ;;  %1568 = vrot.lane.b32.xlu2 %v1449_v37, %s5519_s11 }
 0x240   : > { %v979_v60 = vpack.c.bf16 %v927_v3, %v927_v3  ;;  %v6079_v3 = vld [vmem:[%s6838_s6] ss:$0 sm:$0xff] }
 0x242   : > { %v1083_v6 = vunpack.c.l.b16 %v979_v60 }
 0x243   : > { %v867_v44 = vpop.f32.mrf.mxu0 }
 0x244   : > { %v1112_v56 = vpack.c.b16 %v1083_v6, %v1082_v10  ;;  %v868_v58 = vadd.f32 %v5727_v16, %v867_v44  ;;  %v4866_v44 = vld [vmem:[%s414_s18] sm:$0xff]  ;;  %s6923_s18 = sld [smem:[#allocation15_spill]] }
 0x245   : > { %876 = vmatmul.bf16.gmra.mxu0 %v4866_v44 }
 0x246   : > { %1492 = vrot.lane.b32.xlu2 %v5947_v43, %s5518_s23  ;;  %1504 = vrot.lane.b32.xlu0 %v1112_v56, %s5518_s23  ;;  %v1271_v63 = vshrl.u32 %v1112_v56, 16  ;;  %v1274_v59 = vshll.u32 %v1112_v56, 16  ;;  %v928_v13 = vmax.f32 %v868_v58, 0.0  ;;  %v6900_v58 = vshrl.u32 %v5962_v17, 16 }
 0x248   : > { %v1273_v33 = vrot.slane %v1271_v63, 7  ;;  %v1397_v15 = vrot.slane %v1274_v59, 1  ;;  %v980_v24 = vpack.c.bf16 %v928_v13, %v928_v13 }
 0x24a   : > { %v1398_v7 = vor.u32 %v1397_v15, %v1271_v63  ;;  %v6065_v19 = vor.u32 %v1274_v59, %v1273_v33  ;;  %v1084_v53 = vunpack.c.l.b16 %v980_v24  ;;  %s5252_s27 = smul.u32 192, %s6923_s18 }
 0x24b   : > { %v869_v57 = vpop.f32.mrf.mxu0 }
 0x24c   : > { %v870_v38 = vadd.f32 %v5727_v16, %v869_v57  ;;  %v1456_v45 = vsel %vm5886_vm2, %v1398_v7, 0  ;;  %v6899_v16 = vshll.u32 %v5962_v17, 16  ;;  %s4060_s10 = scalar_lea.hbm %s6924_s30, %s5252_s27 }
 0x24d   : > { %1582 = vrot.lane.b32.xlu1 %v1456_v45, %s5519_s11  ;;  %s4063_s15 = sshll.u32 %s4060_s10, 4  ;;  %s4064_s15 = int_to_ptr.hbm [resolvable:$true] %s4063_s15 }
 0x24e   : > { %v929_v18 = vmax.f32 %v870_v38, 0.0  ;;  %1570 = vrot.lane.b32.xlu0 %v1450_v9, %s5519_s11  ;;  %v1387_v49 = vrot.slane %v6899_v16, 1  ;;  %s5442_s26 = sshra.s32 %s4064_s15, 4  ;;  %s5443_s26 = int_to_ptr.hbm [resolvable:$true] %s5442_s26 }
 0x24f   : > { %s5444_s17 = scalar_lea.hbm %s5443_s26, 192 }
 0x250   : > { %v981_v43 = vpack.c.bf16 %v929_v18, %v929_v18  ;;  %v1388_v63 = vor.u32 %v1387_v49, %v6900_v58  ;;  %v6901_v18 = vshll.u32 %v5759_v62, 16  ;;  %p5445_p4 = scmp.ne.s32.totalorder %s5443_s26, %s5444_s17 }
 0x252   : > { %v1085_v35 = vunpack.c.l.b16 %v981_v43  ;;  %v1451_v7 = vsel %vm5886_vm2, %v1388_v63, 0  ;;  %v1357_v43 = vrot.slane %v6901_v18, 1  ;;  %v6910_v18 = vshrl.u32 %v5772_v14, 16  ;;  %p5446_p5 = pnand %p5445_p4, %p5622_p9 }
 0x253   : > { %v872_v28 = vpop.f32.mrf.mxu0 }
 0x254   : > { %v1113_v37 = vpack.c.b16 %v1085_v35, %v1084_v53  ;;  %v873_v60 = vadd.f32 %v6079_v3, %v872_v28  ;;  %v6902_v53 = vshll.u32 %v5733_v30, 16  ;;  %p5447_p6 = pneg %p5446_p5 }
 0x256   : > { %1506 = vrot.lane.b32.xlu1 %v1113_v37, %s5518_s23  ;;  %1494 = vrot.lane.b32.xlu0 %v5962_v17, %s5518_s23  ;;  %v1278_v10 = vshrl.u32 %v1113_v37, 16  ;;  %v1281_v6 = vshll.u32 %v1113_v37, 16  ;;  %v930_v59 = vmax.f32 %v873_v60, 0.0  ;;  %v1353_v35 = vrot.slane %v6902_v53, 1 }
 0x257   : > { %v6903_v60 = vshrl.u32 %v5759_v62, 16 }
 0x258   : > { %v1280_v56 = vrot.slane %v1278_v10, 7  ;;  %v1399_v2 = vrot.slane %v1281_v6, 1  ;;  %v982_v57 = vpack.c.bf16 %v930_v59, %v930_v59 }
 0x25a   : > { %v1400_v33 = vor.u32 %v1399_v2, %v1278_v10  ;;  %v6089_v15 = vor.u32 %v1281_v6, %v1280_v56  ;;  %v1086_v45 = vunpack.c.l.b16 %v982_v57  ;;  %v1358_v10 = vor.u32 %v1357_v43, %v6903_v60 }
 0x25b   : > { %v874_v1 = vpop.f32.mrf.mxu0  ;;  %v6904_v6 = vshrl.u32 %v5733_v30, 16 }
 0x25c   : > { %v875_v32 = vadd.f32 %v6079_v3, %v874_v1  ;;  %v1457_v13 = vsel %vm5886_vm2, %v1400_v33, 0  ;;  %v1436_v63 = vsel %vm5886_vm2, %v1358_v10, 0  ;;  %v4904_v33 = vld [vmem:[%s6836_s4 + $0x28] sm:$0xff] }
 0x25d   : > { %1584 = vrot.lane.b32.xlu2 %v1457_v13, %s5519_s11  ;;  %v1354_v44 = vor.u32 %v1353_v35, %v6904_v6  ;;  %2676 = vmatpush.bf16.msrb.mxu2 %v4904_v33  ;;  %v4963_v33 = vld [vmem:[%s6836_s4 + $0x80] sm:$0xff] }
 0x25e   : > { %v931_v38 = vmax.f32 %v875_v32, 0.0  ;;  %1572 = vrot.lane.b32.xlu1 %v1451_v7, %s5519_s11  ;;  %v6906_v32 = vshll.u32 %v5785_v34, 16  ;;  %v6907_v7 = vshll.u32 %v5772_v14, 16 }
 0x25f   : > { %v1434_v59 = vsel %vm5886_vm2, %v1354_v44, 0  ;;  %v6911_v44 = vshll.u32 %v5798_v55, 16 }
 0x260   : > { %v983_v17 = vpack.c.bf16 %v931_v38, %v931_v38  ;;  %v1361_v13 = vrot.slane %v6906_v32, 1  ;;  %v1359_v57 = vrot.slane %v6907_v7, 1  ;;  %v4964_v38 = vld [vmem:[%s6836_s4 + $0x88] sm:$0xff] }
 0x261   : > { %3095 = vmatpush.bf16.msrb.mxu3 %v4964_v38 }
 0x262   : > { %v1087_v9 = vunpack.c.l.b16 %v983_v17  ;;  %v1360_v43 = vor.u32 %v1359_v57, %v6910_v18  ;;  %v6916_v57 = vshrl.u32 %v5811_v11, 16 }
 0x264   : > { %v1114_v24 = vpack.c.b16 %v1087_v9, %v1086_v45  ;;  %v6908_v45 = vshrl.u32 %v5746_v46, 16  ;;  %v6909_v9 = vshrl.u32 %v5785_v34, 16 }
 0x265   : > { %3096 = vmatpush.bf16.msrb.mxu3 %v4963_v33  ;;  %v1347_v33 = vsel %vm5980_vm6, 0, %v6030_v22 }
 0x266   : > { %1508 = vrot.lane.b32.xlu2 %v1114_v24, %s5518_s23  ;;  %1460 = vrot.lane.b32.xlu1 %v5733_v30, %s5518_s23  ;;  %v1285_v28 = vshrl.u32 %v1114_v24, 16  ;;  %v1288_v37 = vshll.u32 %v1114_v24, 16  ;;  %v6905_v30 = vshll.u32 %v5746_v46, 16  ;;  %v1362_v24 = vor.u32 %v1361_v13, %v6909_v9 }
 0x267   : > { %v6915_v13 = vshrl.u32 %v5827_v40, 16  ;;  %v1346_v9 = vsel %vm5980_vm6, 0, %v6012_v0 }
 0x268   : > { %v1287_v16 = vrot.slane %v1285_v28, 7  ;;  %v1401_v49 = vrot.slane %v1288_v37, 1  ;;  %v1355_v1 = vrot.slane %v6905_v30, 1  ;;  %v1438_v35 = vsel %vm5886_vm2, %v1362_v24, 0 }
 0x269   : > { %v1340_v24 = vsel %vm5980_vm6, 0, %v5915_v20 }
 0x26a   : > { %v1402_v56 = vor.u32 %v1401_v49, %v1285_v28  ;;  %v6109_v2 = vor.u32 %v1288_v37, %v1287_v16  ;;  %v1437_v28 = vsel %vm5886_vm2, %v1360_v43, 0 }
 0x26c   : > { %v1458_v58 = vsel %vm5886_vm2, %v1402_v56, 0  ;;  %v1363_v56 = vrot.slane %v6911_v44, 1  ;;  %v6917_v44 = vshll.u32 %v5840_v5, 16 }
 0x26d   : > { %1586 = vrot.lane.b32.xlu0 %v1458_v58, %s5519_s11  ;;  %v6912_v58 = vshll.u32 %v5827_v40, 16 }
 0x26e   : > { %1542 = vrot.lane.b32.xlu1 %v1436_v63, %s5519_s11  ;;  %1538 = vrot.lane.b32.xlu2 %v1434_v59, %s5519_s11 }
 0x26f   : > { %v1367_v63 = vrot.slane %v6912_v58, 1  ;;  %v6918_v58 = vshll.u32 %v5866_v8, 16 }
 0x271   : > { %v1368_v7 = vor.u32 %v1367_v63, %v6915_v13  ;;  %v1373_v63 = vrot.slane %v6918_v58, 1 }
 0x275   : > { %1464 = vrot.lane.b32.xlu0 %v5759_v62, %s5518_s23  ;;  %v1356_v62 = vor.u32 %v1355_v1, %v6908_v45  ;;  %v6914_v1 = vshrl.u32 %v5798_v55, 16 }
 0x276   : > { %1466 = vrot.lane.b32.xlu1 %v5772_v14, %s5518_s23  ;;  %1462 = vrot.lane.b32.xlu2 %v5746_v46, %s5518_s23  ;;  %v1345_v46 = vsel %vm5980_vm6, 0, %v5991_v25  ;;  %v6913_v25 = vshll.u32 %v5811_v11, 16 }
 0x277   : > { %v1435_v53 = vsel %vm5886_vm2, %v1356_v62, 0  ;;  %v1364_v32 = vor.u32 %v1363_v56, %v6914_v1  ;;  %v1441_v62 = vsel %vm5886_vm2, %v1368_v7, 0  ;;  %v1369_v56 = vrot.slane %v6917_v44, 1 }
 0x278   : > { %v1497_v17 = vpop.permute.xlu1 %1496  ;;  %v1365_v59 = vrot.slane %v6913_v25, 1  ;;  %v6919_v25 = vshll.u32 %v5853_v31, 16  ;;  %v6920_v1 = vshrl.u32 %v5840_v5, 16  ;;  %v6921_v7 = vshrl.u32 %v5866_v8, 16 }
 0x279   : > { %v1647_v14 = vsel %vm1590_vm5, %v1345_v46, %v1497_v17  ;;  %v1487_v17 = vpop.permute.xlu2 %1486  ;;  %v1439_v45 = vsel %vm5886_vm2, %v1364_v32, 0 }
 0x27a   : > { %v1366_v38 = vor.u32 %v1365_v59, %v6916_v57  ;;  %v1371_v59 = vrot.slane %v6919_v25, 1  ;;  %v1370_v32 = vor.u32 %v1369_v56, %v6920_v1  ;;  %v1374_v57 = vor.u32 %v1373_v63, %v6921_v7 }
 0x27c   : > { %v1442_v22 = vsel %vm5886_vm2, %v1370_v32, 0 }
 0x27d   : > { %1540 = vrot.lane.b32.xlu0 %v1435_v53, %s5519_s11  ;;  %v1632_v53 = vsel %vm1590_vm5, %v1340_v24, %v1487_v17 }
 0x27e   : > { %1546 = vrot.lane.b32.xlu1 %v1438_v35, %s5519_s11  ;;  %1544 = vrot.lane.b32.xlu2 %v1437_v28, %s5519_s11 }
 0x280   : > { %v1575_v37 = vpop.permute.xlu1 %1574 }
 0x281   : > { %v1707_v16 = vsel %vm1669_vm7, %v1647_v14, %v1575_v37 }
 0x282   : > { %v1784_v49 = vunpack.c.l.b16 %v1707_v16  ;;  %v1785_v60 = vunpack.c.h.b16 %v1707_v16 }
 0x284   : > { %v1836_v10 = vpack.c.b16 %v1784_v49, %v1784_v49  ;;  %v1837_v6 = vpack.c.b16 %v1785_v60, %v1785_v60 }
 0x285   : > { %1468 = vrot.lane.b32.xlu0 %v5785_v34, %s5518_s23  ;;  %v4903_v34 = vld [vmem:[%s6836_s4 + $0x20] sm:$0xff] }
 0x286   : > { %1941 = vst.msk [vmem:[#allocation2 + $0x90] sm:$0xf] %vm1904_vm8, %v1836_v10  ;;  %1472 = vrot.lane.b32.xlu1 %v5811_v11, %s5518_s23  ;;  %1470 = vrot.lane.b32.xlu2 %v5798_v55, %s5518_s23  ;;  %v1440_v55 = vsel %vm5886_vm2, %v1366_v38, 0  ;;  %v6922_v38 = vshrl.u32 %v5853_v31, 16 }
 0x287   : > { %1942 = vst.msk [vmem:[#allocation2 + $0x94] sm:$0xf] %vm1904_vm8, %v1837_v6  ;;  %2677 = vmatpush.bf16.msrb.mxu2 %v4903_v34  ;;  %v1579_v49 = vpop.permute.xlu2 %1578  ;;  %v4902_v34 = vld [vmem:[%s6836_s4 + $0x18] sm:$0xff] }
 0x288   : > { %v1499_v30 = vpop.permute.xlu0 %1498  ;;  %v1372_v17 = vor.u32 %v1371_v59, %v6922_v38 }
 0x289   : > { %v1650_v18 = vsel %vm1590_vm5, %v1346_v9, %v1499_v30 }
 0x28b   : > { %2678 = vmatpush.bf16.msrb.mxu2 %v4902_v34 }
 0x28d   : > { %1548 = vrot.lane.b32.xlu0 %v1439_v45, %s5519_s11 }
 0x28e   : > { %1552 = vrot.lane.b32.xlu1 %v1441_v62, %s5519_s11  ;;  %1550 = vrot.lane.b32.xlu2 %v1440_v55, %s5519_s11  ;;  %v4922_v11 = vld [vmem:[#allocation2 + $0x90] sm:$0xff] }
 0x28f   : > { %v1577_v43 = vpop.permute.xlu1 %1576  ;;  %4497 = vmatmul.msk.bf16.vlgmr.msra.gmra.mxu3 %vm2244_vm9, %v4922_v11 }
 0x290   : > { %v1709_v35 = vsel %vm1669_vm7, %v1650_v18, %v1577_v43  ;;  %v1565_v28 = vpop.permute.xlu0 %1564  ;;  %v1503_v9 = vpop.permute.xlu2 %1502  ;;  %v1444_v18 = vsel %vm5886_vm2, %v1374_v57, 0 }
 0x291   : > { %v1786_v0 = vunpack.c.l.b16 %v1709_v35  ;;  %v1787_v46 = vunpack.c.h.b16 %v1709_v35  ;;  %v1697_v14 = vsel %vm1669_vm7, %v1632_v53, %v1565_v28  ;;  %v1341_v53 = vsel %vm5980_vm6, 0, %v5928_v29 }
 0x292   : > { %v1774_v37 = vunpack.c.l.b16 %v1697_v14  ;;  %v1775_v16 = vunpack.c.h.b16 %v1697_v14 }
 0x293   : > { %v1838_v60 = vpack.c.b16 %v1786_v0, %v1786_v0  ;;  %v1839_v10 = vpack.c.b16 %v1787_v46, %v1787_v46 }
 0x294   : > { %v1826_v20 = vpack.c.b16 %v1774_v37, %v1774_v37  ;;  %v1827_v6 = vpack.c.b16 %v1775_v16, %v1775_v16 }
 0x295   : > { %1943 = vst.msk [vmem:[#allocation2 + $0x98] sm:$0xf] %vm1904_vm8, %v1838_v60  ;;  %1474 = vrot.lane.b32.xlu0 %v5827_v40, %s5518_s23  ;;  %v4962_v40 = vld [vmem:[%s6836_s4 + $0x78] sm:$0xff]  ;;  %v1342_v60 = vsel %vm5980_vm6, 0, %v5944_v47  ;;  %v1348_v47 = vsel %vm5980_vm6, 0, %v6048_v48 }
 0x296   : > { %1944 = vst.msk [vmem:[#allocation2 + $0x9c] sm:$0xf] %vm1904_vm8, %v1839_v10  ;;  %1478 = vrot.lane.b32.xlu1 %v5853_v31, %s5518_s23  ;;  %1476 = vrot.lane.b32.xlu2 %v5840_v5, %s5518_s23  ;;  %v1443_v31 = vsel %vm5886_vm2, %v1372_v17, 0 }
 0x297   : > { %1931 = vst.msk [vmem:[#allocation2 + $0x68] sm:$0xf] %vm1904_vm8, %v1826_v20  ;;  %3097 = vmatpush.bf16.msrb.mxu3 %v4962_v40  ;;  %v4901_v20 = vld [vmem:[%s6836_s4 + $0x10] sm:$0xff]  ;;  %v1656_v40 = vsel %vm1590_vm5, %v1348_v47, %v1503_v9 }
 0x298   : > { %1932 = vst.msk [vmem:[#allocation2 + $0x6c] sm:$0xf] %vm1904_vm8, %v1827_v6  ;;  %v1501_v30 = vpop.permute.xlu1 %1500  ;;  %v1489_v24 = vpop.permute.xlu0 %1488  ;;  %v4961_v6 = vld [vmem:[%s6836_s4 + $0x70] sm:$0xff]  ;;  %2679 = vmatpush.bf16.msrb.mxu2 %v4901_v20 }
 0x299   : > { %v1653_v13 = vsel %vm1590_vm5, %v1347_v33, %v1501_v30  ;;  %v1635_v28 = vsel %vm1590_vm5, %v1341_v53, %v1489_v24  ;;  %v1569_v29 = vpop.permute.xlu2 %1568 }
 0x29a   : > { %v1711_v45 = vsel %vm1669_vm7, %v1653_v13, %v1579_v49 }
 0x29b   : > { %v1788_v62 = vunpack.c.l.b16 %v1711_v45  ;;  %v1789_v55 = vunpack.c.h.b16 %v1711_v45  ;;  %3098 = vmatpush.bf16.msrb.mxu3 %v4961_v6  ;;  %v1349_v45 = vsel %vm5980_vm6, 0, %v6065_v19  ;;  %v4899_v6 = vld [vmem:[%s6836_s4] sm:$0xff] }
 0x29d   : > { %v1840_v5 = vpack.c.b16 %v1788_v62, %v1788_v62  ;;  %v1841_v11 = vpack.c.b16 %v1789_v55, %v1789_v55  ;;  %1554 = vrot.lane.b32.xlu0 %v1442_v22, %s5519_s11  ;;  %v4923_v43 = vld [vmem:[#allocation2 + $0x98] sm:$0xff]  ;;  %v1343_v62 = vsel %vm5980_vm6, 0, %v5956_v42  ;;  %v4900_v42 = vld [vmem:[%s6836_s4 + $0x8] sm:$0xff] }
 0x29e   : > { %1558 = vrot.lane.b32.xlu1 %v1444_v18, %s5519_s11  ;;  %1556 = vrot.lane.b32.xlu2 %v1443_v31, %s5519_s11 }
 0x29f   : > { %1945 = vst.msk [vmem:[#allocation2 + $0xa0] sm:$0xf] %vm1904_vm8, %v1840_v5  ;;  %v4917_v35 = vld [vmem:[#allocation2 + $0x68] sm:$0xff]  ;;  %4498 = vmatmul.msk.bf16.gmra.mxu3 %vm2244_vm9, %v4923_v43  ;;  %2680 = vmatpush.bf16.msrb.mxu2 %v4900_v42 }
 0x2a0   : > { %1946 = vst.msk [vmem:[#allocation2 + $0xa4] sm:$0xf] %vm1904_vm8, %v1841_v11  ;;  %v1567_v0 = vpop.permute.xlu1 %1566  ;;  %4492 = vmatmul.msk.bf16.gmra.mxu2 %vm2244_vm9, %v4917_v35  ;;  %v4960_v35 = vld [vmem:[%s6836_s4 + $0x68] sm:$0xff] }
 0x2a1   : > { %v1699_v46 = vsel %vm1669_vm7, %v1635_v28, %v1567_v0  ;;  %v1493_v1 = vpop.permute.xlu2 %1492  ;;  %3099 = vmatpush.bf16.msrb.mxu3 %v4960_v35  ;;  %v5520_v35 = vmov 0  }
 0x2a2   : > { %v1776_v14 = vunpack.c.l.b16 %v1699_v46  ;;  %v1777_v37 = vunpack.c.h.b16 %v1699_v46  ;;  %v1641_v5 = vsel %vm1590_vm5, %v1343_v62, %v1493_v1 }
 0x2a3   : > { %2681 = vmatpush.bf16.msrb.mxu2 %v4899_v6  ;;  %v1330_v6 = vsel %vm5980_vm6, 0, %v5781_v21 }
 0x2a4   : > { %v1828_v16 = vpack.c.b16 %v1776_v14, %v1776_v14  ;;  %v1829_v49 = vpack.c.b16 %v1777_v37, %v1777_v37 }
 0x2a5   : > { %1480 = vrot.lane.b32.xlu0 %v5866_v8, %s5518_s23 }
 0x2a6   : > { %1933 = vst.msk [vmem:[#allocation2 + $0x70] sm:$0xf] %vm1904_vm8, %v1828_v16  ;;  %v1350_v16 = vsel %vm5980_vm6, 0, %v6089_v15  ;;  %v1344_v15 = vsel %vm5980_vm6, 0, %v5974_v54 }
 0x2a7   : > { %1934 = vst.msk [vmem:[#allocation2 + $0x74] sm:$0xf] %vm1904_vm8, %v1829_v49  ;;  %v4924_v34 = vld [vmem:[#allocation2 + $0xa0] sm:$0xff] }
 0x2a8   : > { %v1491_v10 = vpop.permute.xlu1 %1490 }
 0x2a9   : > { %v1638_v8 = vsel %vm1590_vm5, %v1342_v60, %v1491_v10 }
 0x2aa   : > { %v1701_v44 = vsel %vm1669_vm7, %v1638_v8, %v1569_v29 }
 0x2ab   : > { %v1778_v56 = vunpack.c.l.b16 %v1701_v44  ;;  %v1779_v58 = vunpack.c.h.b16 %v1701_v44 }
 0x2ad   : > { %v1830_v63 = vpack.c.b16 %v1778_v56, %v1778_v56  ;;  %v1831_v25 = vpack.c.b16 %v1779_v58, %v1779_v58 }
 0x2ae   : > { %v4918_v59 = vld [vmem:[#allocation2 + $0x70] sm:$0xff] }
 0x2af   : > { %1935 = vst.msk [vmem:[#allocation2 + $0x78] sm:$0xf] %vm1904_vm8, %v1830_v63  ;;  %v1581_v33 = vpop.permute.xlu0 %1580  ;;  %4499 = vmatmul.msk.bf16.gmra.mxu3 %vm2244_vm9, %v4924_v34 }
 0x2b0   : > { %1936 = vst.msk [vmem:[#allocation2 + $0x7c] sm:$0xf] %vm1904_vm8, %v1831_v25  ;;  %v1713_v30 = vsel %vm1669_vm7, %v1656_v40, %v1581_v33  ;;  %4493 = vmatmul.msk.bf16.gmra.mxu2 %vm2244_vm9, %v4918_v59  ;;  %v4959_v40 = vld [vmem:[%s6836_s4 + $0x60] sm:$0xff] }
 0x2b1   : > { %v1790_v32 = vunpack.c.l.b16 %v1713_v30  ;;  %v1791_v13 = vunpack.c.h.b16 %v1713_v30  ;;  %3100 = vmatpush.bf16.msrb.mxu3 %v4959_v40 }
 0x2b3   : > { %v1842_v7 = vpack.c.b16 %v1790_v32, %v1790_v32  ;;  %v1843_v48 = vpack.c.b16 %v1791_v13, %v1791_v13 }
 0x2b5   : > { %1947 = vst.msk [vmem:[#allocation2 + $0xa8] sm:$0xf] %vm1904_vm8, %v1842_v7 }
 0x2b6   : > { %1948 = vst.msk [vmem:[#allocation2 + $0xac] sm:$0xf] %vm1904_vm8, %v1843_v48 }
 0x2b7   : > { %v1585_v38 = vpop.permute.xlu2 %1584  ;;  %v4919_v9 = vld [vmem:[#allocation2 + $0x78] sm:$0xff] }
 0x2b8   : > { %v1505_v57 = vpop.permute.xlu0 %1504 }
 0x2b9   : > { %v1659_v55 = vsel %vm1590_vm5, %v1349_v45, %v1505_v57  ;;  %v1327_v57 = vsel %vm5980_vm6, 0, %v5742_v36 }
 0x2bd   : > { %v4925_v17 = vld [vmem:[#allocation2 + $0xa8] sm:$0xff] }
 0x2bf   : > { %v1583_v22 = vpop.permute.xlu1 %1582  ;;  %4500 = vmatmul.msk.bf16.gmra.mxu3 %vm2244_vm9, %v4925_v17 }
 0x2c0   : > { %v1715_v11 = vsel %vm1669_vm7, %v1659_v55, %v1583_v22  ;;  %v1571_v24 = vpop.permute.xlu0 %1570  ;;  %4494 = vmatmul.msk.bf16.gmra.mxu2 %vm2244_vm9, %v4919_v9  ;;  %v1509_v46 = vpop.permute.xlu2 %1508 }
 0x2c1   : > { %v1792_v18 = vunpack.c.l.b16 %v1715_v11  ;;  %v1793_v31 = vunpack.c.h.b16 %v1715_v11  ;;  %v1703_v43 = vsel %vm1669_vm7, %v1641_v5, %v1571_v24  ;;  %v1351_v5 = vsel %vm5980_vm6, 0, %v6109_v2 }
 0x2c2   : > { %v1780_v19 = vunpack.c.l.b16 %v1703_v43  ;;  %v1781_v53 = vunpack.c.h.b16 %v1703_v43  ;;  %v877_v32 = vpop.f32.mrf.mxu0 }
 0x2c3   : > { %v1844_v28 = vpack.c.b16 %v1792_v18, %v1792_v18  ;;  %v1845_v0 = vpack.c.b16 %v1793_v31, %v1793_v31  ;;  %v878_v7 = vadd.f32 %v6079_v3, %v877_v32  ;;  %v1665_v31 = vsel %vm1590_vm5, %v1351_v5, %v1509_v46 }
 0x2c4   : > { %v1832_v14 = vpack.c.b16 %v1780_v19, %v1780_v19  ;;  %v1833_v37 = vpack.c.b16 %v1781_v53, %v1781_v53 }
 0x2c5   : > { %1949 = vst.msk [vmem:[#allocation2 + $0xb0] sm:$0xf] %vm1904_vm8, %v1844_v28  ;;  %v932_v55 = vmax.f32 %v878_v7, 0.0 }
 0x2c6   : > { %1950 = vst.msk [vmem:[#allocation2 + $0xb4] sm:$0xf] %vm1904_vm8, %v1845_v0 }
 0x2c7   : > { %1937 = vst.msk [vmem:[#allocation2 + $0x80] sm:$0xf] %vm1904_vm8, %v1832_v14  ;;  %v984_v43 = vpack.c.bf16 %v932_v55, %v932_v55 }
 0x2c8   : > { %1938 = vst.msk [vmem:[#allocation2 + $0x84] sm:$0xf] %vm1904_vm8, %v1833_v37  ;;  %v1507_v49 = vpop.permute.xlu1 %1506  ;;  %v1495_v56 = vpop.permute.xlu0 %1494 }
 0x2c9   : > { %v1662_v29 = vsel %vm1590_vm5, %v1350_v16, %v1507_v49  ;;  %v1539_v58 = vpop.permute.xlu2 %1538  ;;  %v1644_v47 = vsel %vm1590_vm5, %v1344_v15, %v1495_v56  ;;  %v1088_v37 = vunpack.c.l.b16 %v984_v43 }
 0x2ca   : > { %v1717_v60 = vsel %vm1669_vm7, %v1662_v29, %v1585_v38  ;;  %v879_v18 = vpop.f32.mrf.mxu0 }
 0x2cb   : > { %v1794_v10 = vunpack.c.l.b16 %v1717_v60  ;;  %v1795_v20 = vunpack.c.h.b16 %v1717_v60  ;;  %v880_v19 = vadd.f32 %v6079_v3, %v879_v18  ;;  %v1329_v60 = vsel %vm5980_vm6, 0, %v5768_v4 }
 0x2cd   : > { %v1846_v8 = vpack.c.b16 %v1794_v10, %v1794_v10  ;;  %v1847_v44 = vpack.c.b16 %v1795_v20, %v1795_v20  ;;  %v4926_v63 = vld [vmem:[#allocation2 + $0xb0] sm:$0xff]  ;;  %v933_v46 = vmax.f32 %v880_v19, 0.0 }
 0x2cf   : > { %1951 = vst.msk [vmem:[#allocation2 + $0xb8] sm:$0xf] %vm1904_vm8, %v1846_v8  ;;  %v4920_v25 = vld [vmem:[#allocation2 + $0x80] sm:$0xff]  ;;  %4501 = vmatmul.msk.bf16.gmra.mxu3 %vm2244_vm9, %v4926_v63  ;;  %v985_v16 = vpack.c.bf16 %v933_v46, %v933_v46 }
 0x2d0   : > { %1952 = vst.msk [vmem:[#allocation2 + $0xbc] sm:$0xf] %vm1904_vm8, %v1847_v44  ;;  %v1573_v59 = vpop.permute.xlu1 %1572  ;;  %4495 = vmatmul.msk.bf16.gmra.mxu2 %vm2244_vm9, %v4920_v25 }
 0x2d1   : > { %v1705_v34 = vsel %vm1669_vm7, %v1644_v47, %v1573_v59  ;;  %v6325_v13 = vpop.permute.xlu2 %1462  ;;  %v1089_v49 = vunpack.c.l.b16 %v985_v16 }
 0x2d2   : > { %v1782_v33 = vunpack.c.l.b16 %v1705_v34  ;;  %v1783_v30 = vunpack.c.h.b16 %v1705_v34 }
 0x2d3   : > { %v6352_v10 = vpack.c.b16 %v1089_v49, %v1088_v37  ;;  %v6396_v37 = vpop.f32.mrf.mxu2 }
 0x2d4   : > { %v1834_v54 = vpack.c.b16 %v1782_v33, %v1782_v33  ;;  %v1835_v1 = vpack.c.b16 %v1783_v30, %v1783_v30 }
 0x2d5   : > { %1510 = vrot.lane.b32.xlu2 %v6352_v10, %s5518_s23  ;;  %v1292_v34 = vshrl.u32 %v6352_v10, 16  ;;  %s6925_s23 = smov %s6924_s30 }
 0x2d6   : > { %1939 = vst.msk [vmem:[#allocation2 + $0x88] sm:$0xf] %vm1904_vm8, %v1834_v54  ;;  %s5448_s24 = scalar_lea.hbm %s6925_s23, 384  ;;  %p5449_p7 = scmp.lt.s32.totalorder %s5443_s26, %s6925_s23 }
 0x2d7   : > { %1940 = vst.msk [vmem:[#allocation2 + $0x8c] sm:$0xf] %vm1904_vm8, %v1835_v1  ;;  %v4927_v24 = vld [vmem:[#allocation2 + $0xb8] sm:$0xff]  ;;  %p5450_p8 = scmp.lt.s32.totalorder %s5448_s24, %s5444_s17 }
 0x2d8   : > { %v1461_v48 = vpop.permute.xlu1 %1460 }
 0x2d9   : > { %v1593_v38 = vsel %vm1590_vm5, %v1327_v57, %v1461_v48  ;;  %v1545_v2 = vpop.permute.xlu2 %1544  ;;  %v1328_v48 = vsel %vm5980_vm6, 0, %v5755_v52  ;;  %p5451_p10 = por %p5450_p8, %p5449_p7 }
 0x2da   : > { %v1671_v17 = vsel %vm1669_vm7, %v1593_v38, %v1539_v58  ;;  %v1295_v58 = vshll.u32 %v6352_v10, 16  ;;  %v1596_v57 = vsel %vm1590_vm5, %v1328_v48, %v6325_v13 }
 0x2db   : > { %v1748_v45 = vunpack.c.l.b16 %v1671_v17  ;;  %v1749_v62 = vunpack.c.h.b16 %v1671_v17  ;;  %p5452_p13 = pnand %p5451_p10, %p5447_p6 }
 0x2dc   : > { %v1403_v21 = vrot.slane %v1295_v58, 1 }
 0x2dd   : > { %v1800_v22 = vpack.c.b16 %v1748_v45, %v1748_v45  ;;  %v1801_v9 = vpack.c.b16 %v1749_v62, %v1749_v62 }
 0x2de   : > { %v4921_v11 = vld [vmem:[#allocation2 + $0x88] sm:$0xff]  ;;  %v1404_v7 = vor.u32 %v1403_v21, %v1292_v34 }
 0x2df   : > { %1905 = vst.msk [vmem:[#allocation2] sm:$0xf] %vm1904_vm8, %v1800_v22  ;;  %v1587_v36 = vpop.permute.xlu0 %1586  ;;  %4502 = vmatmul.msk.bf16.gmra.mxu3 %vm2244_vm9, %v4927_v24  ;;  %v1333_v24 = vsel %vm5980_vm6, 0, %v5823_v23  ;;  %v1332_v23 = vsel %vm5980_vm6, 0, %v5807_v61 }
 0x2e0   : > { %1906 = vst.msk [vmem:[#allocation2 + $0x4] sm:$0xf] %vm1904_vm8, %v1801_v9  ;;  %v1719_v53 = vsel %vm1669_vm7, %v1665_v31, %v1587_v36  ;;  %v1543_v42 = vpop.permute.xlu1 %1542  ;;  %4496 = vmatmul.msk.bf16.gmra.mxu2 %vm2244_vm9, %v4921_v11  ;;  %v1459_v17 = vsel %vm5886_vm2, %v1404_v7, 0 }
 0x2e1   : > { %1961 = vst.msk [vmem:[#allocation2] sm:$0xf] %vm1904_vm8, %v5520_v35  ;;  %v1796_v28 = vunpack.c.l.b16 %v1719_v53  ;;  %v1797_v0 = vunpack.c.h.b16 %v1719_v53  ;;  %v1471_v25 = vpop.permute.xlu2 %1470  ;;  %1588 = vrot.lane.b32.xlu0 %v1459_v17, %s5519_s11 }
 0x2e2   : > { %1962 = vst.msk [vmem:[#allocation2 + $0x4] sm:$0xf] %vm1904_vm8, %v5520_v35  ;;  %v1608_v49 = vsel %vm1590_vm5, %v1332_v23, %v1471_v25  ;;  %v6415_v25 = vpop.f32.mrf.mxu2 }
 0x2e3   : > { %v1848_v3 = vpack.c.b16 %v1796_v28, %v1796_v28  ;;  %v1849_v14 = vpack.c.b16 %v1797_v0, %v1797_v0 }
 0x2e5   : > { %1953 = vst.msk [vmem:[#allocation2 + $0xc0] sm:$0xf] %vm1904_vm8, %v1848_v3 }
 0x2e6   : > { %1954 = vst.msk [vmem:[#allocation2 + $0xc4] sm:$0xf] %vm1904_vm8, %v1849_v14 }
 0x2e7   : > { %v1465_v29 = vpop.permute.xlu0 %1464 }
 0x2e8   : > { %v1599_v20 = vsel %vm1590_vm5, %v1329_v60, %v1465_v29  ;;  %v1467_v8 = vpop.permute.xlu1 %1466 }
 0x2e9   : > { %v1675_v44 = vsel %vm1669_vm7, %v1599_v20, %v1543_v42  ;;  %v1602_v56 = vsel %vm1590_vm5, %v1330_v6, %v1467_v8  ;;  %v4875_v32 = vld [vmem:[#allocation2] sm:$0xff]  ;;  %v1551_v9 = vpop.permute.xlu2 %1550 }
 0x2ea   : > { %v1752_v63 = vunpack.c.l.b16 %v1675_v44  ;;  %v1753_v4 = vunpack.c.h.b16 %v1675_v44  ;;  %v1677_v15 = vsel %vm1669_vm7, %v1602_v56, %v1545_v2 }
 0x2eb   : > { %v1754_v47 = vunpack.c.l.b16 %v1677_v15  ;;  %v1755_v59 = vunpack.c.h.b16 %v1677_v15 }
 0x2ec   : > { %v1804_v40 = vpack.c.b16 %v1752_v63, %v1752_v63  ;;  %v1805_v33 = vpack.c.b16 %v1753_v4, %v1753_v4  ;;  %v1334_v4 = vsel %vm5980_vm6, 0, %v5836_v50 }
 0x2ed   : > { %v1806_v30 = vpack.c.b16 %v1754_v47, %v1754_v47  ;;  %v1807_v54 = vpack.c.b16 %v1755_v59, %v1755_v59  ;;  %v4928_v1 = vld [vmem:[#allocation2 + $0xc0] sm:$0xff]  ;;  %v1336_v59 = vsel %vm5980_vm6, 0, %v5862_v51 }
 0x2ee   : > { %1909 = vst.msk [vmem:[#allocation2 + $0x10] sm:$0xf] %vm1904_vm8, %v1804_v40  ;;  %v4966_v40 = vld [vmem:[%s6837_s5 + $0x8] sm:$0xff] }
 0x2ef   : > { %1910 = vst.msk [vmem:[#allocation2 + $0x14] sm:$0xf] %vm1904_vm8, %v1805_v33  ;;  %v1541_v38 = vpop.permute.xlu0 %1540  ;;  %4503 = vmatmul.msk.bf16.gmra.mxu3 %vm2244_vm9, %v4928_v1  ;;  %3730 = vmatpush.bf16.msrb.mxu1 %v4966_v40 }
 0x2f0   : > { %1911 = vst.msk [vmem:[#allocation2 + $0x18] sm:$0xf] %vm1904_vm8, %v1806_v30  ;;  %v1673_v45 = vsel %vm1669_vm7, %v1596_v57, %v1541_v38  ;;  %v1547_v62 = vpop.permute.xlu1 %1546  ;;  %4624 = vmatmul.msk.bf16.vlgmr.msrb.gmra.mxu2 %vm2244_vm9, %v4875_v32 }
 0x2f1   : > { %1912 = vst.msk [vmem:[#allocation2 + $0x1c] sm:$0xf] %vm1904_vm8, %v1807_v54  ;;  %v1750_v52 = vunpack.c.l.b16 %v1673_v45  ;;  %v1751_v55 = vunpack.c.h.b16 %v1673_v45  ;;  %v1477_v29 = vpop.permute.xlu2 %1476 }
 0x2f3   : > { %v1802_v13 = vpack.c.b16 %v1750_v52, %v1750_v52  ;;  %v1803_v22 = vpack.c.b16 %v1751_v55, %v1751_v55 }
 0x2f5   : > { %1907 = vst.msk [vmem:[#allocation2 + $0x8] sm:$0xf] %vm1904_vm8, %v1802_v13 }
 0x2f6   : > { %1908 = vst.msk [vmem:[#allocation2 + $0xc] sm:$0xf] %vm1904_vm8, %v1803_v22  ;;  %v4935_v16 = vld [vmem:[#allocation2 + $0x10] sm:$0xff] }
 0x2f7   : > { %v1469_v5 = vpop.permute.xlu0 %1468  ;;  %v4906_v45 = vld [vmem:[#allocation2 + $0x10] sm:$0xff] }
 0x2f8   : > { %v1605_v11 = vsel %vm1590_vm5, %v1331_v27, %v1469_v5  ;;  %v1473_v18 = vpop.permute.xlu1 %1472  ;;  %v4936_v52 = vld [vmem:[#allocation2 + $0x18] sm:$0xff]  ;;  %v4877_v22 = vld [vmem:[#allocation2 + $0x10] sm:$0xff]  ;;  %v6440_v5 = vpop.f32.mrf.mxu2 }
 0x2f9   : > { %v1679_v31 = vsel %vm1669_vm7, %v1605_v11, %v1547_v62  ;;  %v1611_v36 = vsel %vm1590_vm5, %v1333_v24, %v1473_v18  ;;  %v1557_v33 = vpop.permute.xlu2 %1556  ;;  %v1335_v62 = vsel %vm5980_vm6, 0, %v5849_v12  ;;  %v4878_v23 = vld [vmem:[#allocation2 + $0x18] sm:$0xff] }
 0x2fa   : > { %v1756_v43 = vunpack.c.l.b16 %v1679_v31  ;;  %v1757_v19 = vunpack.c.h.b16 %v1679_v31  ;;  %v1683_v53 = vsel %vm1669_vm7, %v1611_v36, %v1551_v9  ;;  %v1617_v55 = vsel %vm1590_vm5, %v1335_v62, %v1477_v29 }
 0x2fb   : > { %v1760_v42 = vunpack.c.l.b16 %v1683_v53  ;;  %v1761_v2 = vunpack.c.h.b16 %v1683_v53  ;;  %v1337_v36 = vsel %vm5980_vm6, 0, %v5878_v26 }
 0x2fc   : > { %v1808_v28 = vpack.c.b16 %v1756_v43, %v1756_v43  ;;  %v1809_v41 = vpack.c.b16 %v1757_v19, %v1757_v19 }
 0x2fd   : > { %v1812_v0 = vpack.c.b16 %v1760_v42, %v1760_v42  ;;  %v1813_v46 = vpack.c.b16 %v1761_v2, %v1761_v2  ;;  %v4905_v3 = vld [vmem:[#allocation2 + $0x8] sm:$0xff] }
 0x2fe   : > { %v4876_v14 = vld [vmem:[#allocation2 + $0x8] sm:$0xff]  ;;  %1913 = vst.msk [vmem:[#allocation2 + $0x20] sm:$0xf] %vm1904_vm8, %v1808_v28  ;;  %4480 = vmatmul.msk.bf16.vlgmr.msrb.gmra.mxu0 %vm2244_vm9, %v4905_v3 }
 0x2ff   : > { %1914 = vst.msk [vmem:[#allocation2 + $0x24] sm:$0xf] %vm1904_vm8, %v1809_v41  ;;  %v1549_v60 = vpop.permute.xlu0 %1548  ;;  %4780 = vmatmul.msk.bf16.vlgmr.msrb.gmra.mxu3 %vm2244_vm9, %v4935_v16 }
 0x300   : > { %1917 = vst.msk [vmem:[#allocation2 + $0x30] sm:$0xf] %vm1904_vm8, %v1812_v0  ;;  %v1681_v20 = vsel %vm1669_vm7, %v1608_v49, %v1549_v60  ;;  %v1553_v6 = vpop.permute.xlu1 %1552  ;;  %4625 = vmatmul.msk.bf16.gmra.mxu2 %vm2244_vm9, %v4876_v14  ;;  %v6454_v0 = vpop.f32.mrf.mxu2  ;;  %v4907_v14 = vld [vmem:[#allocation2 + $0x18] sm:$0xff] }
 0x301   : > { %1918 = vst.msk [vmem:[#allocation2 + $0x34] sm:$0xf] %vm1904_vm8, %v1813_v46  ;;  %v1758_v61 = vunpack.c.l.b16 %v1681_v20  ;;  %v1759_v8 = vunpack.c.h.b16 %v1681_v20 }
 0x303   : > { %v1810_v44 = vpack.c.b16 %v1758_v61, %v1758_v61  ;;  %v1811_v56 = vpack.c.b16 %v1759_v8, %v1759_v8 }
 0x305   : > { %1915 = vst.msk [vmem:[#allocation2 + $0x28] sm:$0xf] %vm1904_vm8, %v1810_v44 }
 0x306   : > { %1916 = vst.msk [vmem:[#allocation2 + $0x2c] sm:$0xf] %vm1904_vm8, %v1811_v56  ;;  %v4908_v63 = vld [vmem:[#allocation2 + $0x20] sm:$0xff] }
 0x307   : > { %v1475_v15 = vpop.permute.xlu0 %1474  ;;  %4483 = vmatmul.msk.bf16.vlgmr.msra.gmra.mxu1 %vm2244_vm9, %v4908_v63  ;;  %v4937_v26 = vld [vmem:[#allocation2 + $0x20] sm:$0xff] }
 0x308   : > { %v1614_v47 = vsel %vm1590_vm5, %v1334_v4, %v1475_v15  ;;  %v1479_v21 = vpop.permute.xlu1 %1478  ;;  %v4910_v29 = vld [vmem:[#allocation2 + $0x30] sm:$0xff]  ;;  %v4879_v61 = vld [vmem:[#allocation2 + $0x20] sm:$0xff] }
 0x309   : > { %v1685_v30 = vsel %vm1669_vm7, %v1614_v47, %v1553_v6  ;;  %v1620_v50 = vsel %vm1590_vm5, %v1336_v59, %v1479_v21  ;;  %v4939_v15 = vld [vmem:[#allocation2 + $0x30] sm:$0xff]  ;;  %v4965_v59 = vld [vmem:[%s6837_s5] sm:$0xff] }
 0x30a   : > { %v1762_v54 = vunpack.c.l.b16 %v1685_v30  ;;  %v1763_v1 = vunpack.c.h.b16 %v1685_v30  ;;  %v1689_v32 = vsel %vm1669_vm7, %v1620_v50, %v1557_v33  ;;  %3731 = vmatpush.bf16.msrb.mxu1 %v4965_v59 }
 0x30b   : > { %v1766_v7 = vunpack.c.l.b16 %v1689_v32  ;;  %v1767_v48 = vunpack.c.h.b16 %v1689_v32 }
 0x30c   : > { %v1814_v57 = vpack.c.b16 %v1762_v54, %v1762_v54  ;;  %v1815_v38 = vpack.c.b16 %v1763_v1, %v1763_v1  ;;  %v4881_v1 = vld [vmem:[#allocation2 + $0x30] sm:$0xff] }
 0x30d   : > { %v1818_v51 = vpack.c.b16 %v1766_v7, %v1766_v7  ;;  %v1819_v17 = vpack.c.b16 %v1767_v48, %v1767_v48  ;;  %v4909_v31 = vld [vmem:[#allocation2 + $0x28] sm:$0xff] }
 0x30e   : > { %1919 = vst.msk [vmem:[#allocation2 + $0x38] sm:$0xf] %vm1904_vm8, %v1814_v57  ;;  %4481 = vmatmul.msk.bf16.gmra.mxu0 %vm2244_vm9, %v4906_v45  ;;  %v4938_v6 = vld [vmem:[#allocation2 + $0x28] sm:$0xff] }
 0x30f   : > { %1920 = vst.msk [vmem:[#allocation2 + $0x3c] sm:$0xf] %vm1904_vm8, %v1815_v38  ;;  %v1555_v13 = vpop.permute.xlu0 %1554  ;;  %4781 = vmatmul.msk.bf16.gmra.mxu3 %vm2244_vm9, %v4936_v52  ;;  %v4880_v47 = vld [vmem:[#allocation2 + $0x28] sm:$0xff]  ;;  %v1294_v38 = vrot.slane %v1292_v34, 7 }
 0x310   : > { %1923 = vst.msk [vmem:[#allocation2 + $0x48] sm:$0xf] %vm1904_vm8, %v1818_v51  ;;  %v1687_v9 = vsel %vm1669_vm7, %v1617_v55, %v1555_v13  ;;  %4626 = vmatmul.msk.bf16.gmra.mxu2 %vm2244_vm9, %v4877_v22  ;;  %v1559_v19 = vpop.permute.xlu1 %1558 }
 0x311   : > { %1924 = vst.msk [vmem:[#allocation2 + $0x4c] sm:$0xf] %vm1904_vm8, %v1819_v17  ;;  %v1764_v12 = vunpack.c.l.b16 %v1687_v9  ;;  %v1765_v27 = vunpack.c.h.b16 %v1687_v9  ;;  %v1297_v62 = vor.u32 %v1295_v58, %v1294_v38  ;;  %v4944_v38 = vld [vmem:[#allocation2 + $0x58] sm:$0xff] }
 0x312   : > { %v6442_v18 = vpop.f32.mrf.mxu3 }
 0x313   : > { %v1816_v11 = vpack.c.b16 %v1764_v12, %v1764_v12  ;;  %v1817_v24 = vpack.c.b16 %v1765_v27, %v1765_v27  ;;  %v1352_v55 = vsel %vm5980_vm6, 0, %v1297_v62 }
 0x315   : > { %1921 = vst.msk [vmem:[#allocation2 + $0x40] sm:$0xf] %vm1904_vm8, %v1816_v11 }
 0x316   : > { %1922 = vst.msk [vmem:[#allocation2 + $0x44] sm:$0xf] %vm1904_vm8, %v1817_v24  ;;  %v4911_v56 = vld [vmem:[#allocation2 + $0x38] sm:$0xff] }
 0x317   : > { %v1481_v43 = vpop.permute.xlu0 %1480  ;;  %4484 = vmatmul.msk.bf16.gmra.mxu1 %vm2244_vm9, %v4909_v31  ;;  %v4940_v54 = vld [vmem:[#allocation2 + $0x38] sm:$0xff] }
 0x318   : > { %v1623_v53 = vsel %vm1590_vm5, %v1337_v36, %v1481_v43  ;;  %v4913_v48 = vld [vmem:[#allocation2 + $0x48] sm:$0xff]  ;;  %v4882_v45 = vld [vmem:[#allocation2 + $0x38] sm:$0xff] }
 0x319   : > { %v1691_v42 = vsel %vm1669_vm7, %v1623_v53, %v1559_v19  ;;  %v4942_v36 = vld [vmem:[#allocation2 + $0x48] sm:$0xff] }
 0x31a   : > { %v1768_v2 = vunpack.c.l.b16 %v1691_v42  ;;  %v1769_v28 = vunpack.c.h.b16 %v1691_v42  ;;  %v6452_v41 = vpop.f32.mrf.mxu3 }
 0x31c   : > { %v1820_v46 = vpack.c.b16 %v1768_v2, %v1768_v2  ;;  %v1821_v3 = vpack.c.b16 %v1769_v28, %v1769_v28 }
 0x31d   : > { %v4912_v33 = vld [vmem:[#allocation2 + $0x40] sm:$0xff] }
 0x31e   : > { %1925 = vst.msk [vmem:[#allocation2 + $0x50] sm:$0xf] %vm1904_vm8, %v1820_v46  ;;  %4482 = vmatmul.msk.bf16.gmra.mxu0 %vm2244_vm9, %v4907_v14  ;;  %v4941_v17 = vld [vmem:[#allocation2 + $0x40] sm:$0xff] }
 0x31f   : > { %1926 = vst.msk [vmem:[#allocation2 + $0x54] sm:$0xf] %vm1904_vm8, %v1821_v3  ;;  %4782 = vmatmul.msk.bf16.gmra.mxu3 %vm2244_vm9, %v4937_v26  ;;  %v4883_v43 = vld [vmem:[#allocation2 + $0x40] sm:$0xff]  ;;  %v4884_v3 = vld [vmem:[#allocation2 + $0x48] sm:$0xff] }
 0x320   : > { %4627 = vmatmul.msk.bf16.gmra.mxu2 %vm2244_vm9, %v4878_v23 }
 0x322   : > { %v6461_v16 = vpop.f32.mrf.mxu3 }
 0x323   : > { %v6463_v49 = vpop.f32.mrf.mxu2 }
 0x326   : > { %v4914_v24 = vld [vmem:[#allocation2 + $0x50] sm:$0xff] }
 0x327   : > { %4485 = vmatmul.msk.bf16.gmra.mxu1 %vm2244_vm9, %v4910_v29  ;;  %v4943_v46 = vld [vmem:[#allocation2 + $0x50] sm:$0xff]  ;;  %v6542_v29 = vld [vmem:[%s6838_s6 + $0x1] ss:$0 sm:$0xff] }
 0x32a   : > { %v6466_v60 = vpop.f32.mrf.mxu3 }
 0x32b   : > { %v6468_v20 = vpop.f32.mrf.mxu2 }
 0x32f   : > { %4783 = vmatmul.msk.bf16.gmra.mxu3 %vm2244_vm9, %v4938_v6  ;;  %v1511_v52 = vpop.permute.xlu2 %1510 }
 0x330   : > { %4628 = vmatmul.msk.bf16.gmra.mxu2 %vm2244_vm9, %v4879_v61  ;;  %v1668_v34 = vsel %vm1590_vm5, %v1352_v55, %v1511_v52 }
 0x332   : > { %v6472_v8 = vpop.f32.mrf.mxu3 }
 0x333   : > { %v6474_v44 = vpop.f32.mrf.mxu2 }
 0x337   : > { %4486 = vmatmul.msk.bf16.gmra.mxu1 %vm2244_vm9, %v4911_v56 }
 0x33a   : > { %v6477_v63 = vpop.f32.mrf.mxu3 }
 0x33b   : > { %v6479_v4 = vpop.f32.mrf.mxu2 }
 0x33f   : > { %4784 = vmatmul.msk.bf16.gmra.mxu3 %vm2244_vm9, %v4939_v15 }
 0x340   : > { %4629 = vmatmul.msk.bf16.gmra.mxu2 %vm2244_vm9, %v4880_v47 }
 0x342   : > { %v6486_v21 = vpop.f32.mrf.mxu3 }
 0x343   : > { %v6488_v40 = vpop.f32.mrf.mxu2 }
 0x347   : > { %4487 = vmatmul.msk.bf16.gmra.mxu1 %vm2244_vm9, %v4912_v33 }
 0x34a   : > { %v6491_v30 = vpop.f32.mrf.mxu3 }
 0x34b   : > { %v6493_v50 = vpop.f32.mrf.mxu2 }
 0x34f   : > { %4785 = vmatmul.msk.bf16.gmra.mxu3 %vm2244_vm9, %v4940_v54 }
 0x350   : > { %4630 = vmatmul.msk.bf16.gmra.mxu2 %vm2244_vm9, %v4881_v1 }
 0x352   : > { %v6497_v32 = vpop.f32.mrf.mxu3 }
 0x353   : > { %v6499_v7 = vpop.f32.mrf.mxu2  ;;  %v1589_v13 = vpop.permute.xlu0 %1588 }
 0x354   : > { %v1721_v12 = vsel %vm1669_vm7, %v1668_v34, %v1589_v13 }
 0x355   : > { %v1798_v27 = vunpack.c.l.b16 %v1721_v12  ;;  %v1799_v11 = vunpack.c.h.b16 %v1721_v12 }
 0x357   : > { %4488 = vmatmul.msk.bf16.gmra.mxu1 %vm2244_vm9, %v4913_v48  ;;  %v1850_v10 = vpack.c.b16 %v1798_v27, %v1798_v27  ;;  %v1851_v58 = vpack.c.b16 %v1799_v11, %v1799_v11 }
 0x359   : > { %1955 = vst.msk [vmem:[#allocation2 + $0xc8] sm:$0xf] %vm1904_vm8, %v1850_v10 }
 0x35a   : > { %v6502_v57 = vpop.f32.mrf.mxu3  ;;  %1956 = vst.msk [vmem:[#allocation2 + $0xcc] sm:$0xf] %vm1904_vm8, %v1851_v58 }
 0x35b   : > { %v6506_v51 = vpop.f32.mrf.mxu2  ;;  %1964 = vst.msk [vmem:[#allocation2 + $0xc8] sm:$0xf] %vm1904_vm8, %v5520_v35 }
 0x35c   : > { %1965 = vst.msk [vmem:[#allocation2 + $0xcc] sm:$0xf] %vm1904_vm8, %v5520_v35 }
 0x35f   : > { %4786 = vmatmul.msk.bf16.gmra.mxu3 %vm2244_vm9, %v4941_v17  ;;  %v4885_v17 = vld [vmem:[#allocation2 + $0x50] sm:$0xff] }
 0x360   : > { %4631 = vmatmul.msk.bf16.gmra.mxu2 %vm2244_vm9, %v4882_v45 }
 0x362   : > { %v6514_v22 = vpop.f32.mrf.mxu3 }
 0x363   : > { %v6517_v9 = vpop.f32.mrf.mxu2 }
 0x367   : > { %4489 = vmatmul.msk.bf16.gmra.mxu1 %vm2244_vm9, %v4914_v24 }
 0x36a   : > { %v6523_v39 = vpop.f32.mrf.mxu3 }
 0x36b   : > { %v6527_v31 = vpop.f32.mrf.mxu2 }
 0x36f   : > { %4787 = vmatmul.msk.bf16.gmra.mxu3 %vm2244_vm9, %v4942_v36 }
 0x370   : > { %4632 = vmatmul.msk.bf16.gmra.mxu2 %vm2244_vm9, %v4883_v43 }
 0x372   : > { %v6533_v19 = vpop.f32.mrf.mxu3 }
 0x373   : > { %v2683_v53 = vpop.f32.mrf.mxu2 }
 0x37a   : > { %v6535_v42 = vpop.f32.mrf.mxu3 }
 0x37b   : > { %v2685_v2 = vpop.f32.mrf.mxu2  ;;  %v2326_v28 = vpop.f32.mrf.mxu0 }
 0x37c   : > { %v2684_v35 = vadd.f32 %v2683_v53, %v2326_v28 }
 0x37f   : > { %4788 = vmatmul.msk.bf16.gmra.mxu3 %vm2244_vm9, %v4943_v46 }
 0x380   : > { %4633 = vmatmul.msk.bf16.gmra.mxu2 %vm2244_vm9, %v4884_v3 }
 0x382   : > { %v3102_v14 = vpop.f32.mrf.mxu3 }
 0x383   : > { %v2688_v26 = vpop.f32.mrf.mxu2  ;;  %v3222_v23 = vadd.f32 %v3102_v14, %v2684_v35  ;;  %v2328_v6 = vpop.f32.mrf.mxu0  ;;  %v4945_v14 = vld [vmem:[#allocation2 + $0x60] sm:$0xff] }
 0x384   : > { %v2686_v56 = vadd.f32 %v2685_v2, %v2328_v6  ;;  %v6545_v15 = vpop.f32.mrf.mxu1 }
 0x385   : > { %v3272_v61 = vadd.f32 %v6542_v29, %v3222_v23  ;;  %v4886_v23 = vld [vmem:[#allocation2 + $0x58] sm:$0xff] }
 0x387   : > { %v3320_v59 = vmax.f32 %v3272_v61, 0.0 }
 0x389   : > { %v3368_v45 = vpack.c.bf16 %v3320_v59, %v3320_v59 }
 0x38a   : > { %v3104_v47 = vpop.f32.mrf.mxu3 }
 0x38b   : > { %v2690_v33 = vpop.f32.mrf.mxu2  ;;  %v3223_v54 = vadd.f32 %v3104_v47, %v2686_v56  ;;  %v2331_v1 = vpop.f32.mrf.mxu0  ;;  %v3568_v34 = vunpack.c.l.b16 %v3368_v45 }
 0x38c   : > { %v2689_v55 = vadd.f32 %v2688_v26, %v2331_v1  ;;  %v2343_v10 = vpop.f32.mrf.mxu1 }
 0x38d   : > { %v3273_v48 = vadd.f32 %v6542_v29, %v3223_v54 }
 0x38f   : > { %v3321_v62 = vmax.f32 %v3273_v48, 0.0  ;;  %4789 = vmatmul.msk.bf16.gmra.mxu3 %vm2244_vm9, %v4944_v38 }
 0x390   : > { %4634 = vmatmul.msk.bf16.gmra.mxu2 %vm2244_vm9, %v4885_v17 }
 0x391   : > { %v3369_v52 = vpack.c.bf16 %v3321_v62, %v3321_v62 }
 0x392   : > { %v3107_v13 = vpop.f32.mrf.mxu3 }
 0x393   : > { %v3569_v12 = vunpack.c.l.b16 %v3369_v52  ;;  %v2693_v27 = vpop.f32.mrf.mxu2  ;;  %v3224_v11 = vadd.f32 %v3107_v13, %v2689_v55  ;;  %v2333_v24 = vpop.f32.mrf.mxu0 }
 0x394   : > { %v2691_v43 = vadd.f32 %v2690_v33, %v2333_v24  ;;  %v2346_v26 = vpop.f32.mrf.mxu1  ;;  %v4887_v24 = vld [vmem:[#allocation2 + $0x60] sm:$0xff] }
 0x395   : > { %v3616_v58 = vpack.c.b16 %v3569_v12, %v3568_v34  ;;  %v3274_v36 = vadd.f32 %v6542_v29, %v3224_v11 }
 0x397   : > { %4812 = vmatmul.msk.bf16.vlgmr.msrb.gmra.mxu1 %vm1590_vm5, %v3616_v58  ;;  %v3322_v2 = vmax.f32 %v3274_v36, 0.0 }
 0x399   : > { %v3370_v6 = vpack.c.bf16 %v3322_v2, %v3322_v2 }
 0x39a   : > { %v3109_v53 = vpop.f32.mrf.mxu3 }
 0x39b   : > { %v2695_v28 = vpop.f32.mrf.mxu2  ;;  %v3225_v46 = vadd.f32 %v3109_v53, %v2691_v43  ;;  %v2336_v3 = vpop.f32.mrf.mxu0  ;;  %v3570_v33 = vunpack.c.l.b16 %v3370_v6 }
 0x39c   : > { %v2694_v47 = vadd.f32 %v2693_v27, %v2336_v3  ;;  %v2348_v62 = vpop.f32.mrf.mxu1  ;;  %v4946_v27 = vld [vmem:[#allocation2 + $0x68] sm:$0xff] }
 0x39d   : > { %v3275_v35 = vadd.f32 %v6542_v29, %v3225_v46 }
 0x39f   : > { %v3323_v61 = vmax.f32 %v3275_v35, 0.0  ;;  %4790 = vmatmul.msk.bf16.gmra.mxu3 %vm2244_vm9, %v4945_v14 }
 0x3a0   : > { %4635 = vmatmul.msk.bf16.gmra.mxu2 %vm2244_vm9, %v4886_v23 }
 0x3a1   : > { %v3371_v56 = vpack.c.bf16 %v3323_v61, %v3323_v61 }
 0x3a2   : > { %v3112_v59 = vpop.f32.mrf.mxu3 }
 0x3a3   : > { %v3571_v54 = vunpack.c.l.b16 %v3371_v56  ;;  %v2698_v1 = vpop.f32.mrf.mxu2  ;;  %v3226_v48 = vadd.f32 %v3112_v59, %v2694_v47  ;;  %v2338_v17 = vpop.f32.mrf.mxu0 }
 0x3a4   : > { %v2696_v52 = vadd.f32 %v2695_v28, %v2338_v17  ;;  %v2699_v43 = vadd.f32 %v2698_v1, %v6545_v15  ;;  %v2351_v2 = vpop.f32.mrf.mxu1  ;;  %v4947_v1 = vld [vmem:[#allocation2 + $0x70] sm:$0xff] }
 0x3a5   : > { %v3617_v38 = vpack.c.b16 %v3571_v54, %v3570_v33  ;;  %v3276_v45 = vadd.f32 %v6542_v29, %v3226_v48  ;;  %v4888_v48 = vld [vmem:[#allocation2 + $0x68] sm:$0xff] }
 0x3a7   : > { %4813 = vmatmul.msk.bf16.gmra.mxu1 %vm1590_vm5, %v3617_v38  ;;  %v3324_v13 = vmax.f32 %v3276_v45, 0.0 }
 0x3a9   : > { %v3372_v58 = vpack.c.bf16 %v3324_v13, %v3324_v13 }
 0x3aa   : > { %v3114_v55 = vpop.f32.mrf.mxu3 }
 0x3ab   : > { %v2700_v34 = vpop.f32.mrf.mxu2  ;;  %v3227_v12 = vadd.f32 %v3114_v55, %v2696_v52  ;;  %v3572_v28 = vunpack.c.l.b16 %v3372_v58 }
 0x3ac   : > { %v2701_v61 = vadd.f32 %v2700_v34, %v2343_v10  ;;  %v2353_v54 = vpop.f32.mrf.mxu1 }
 0x3ad   : > { %v3277_v11 = vadd.f32 %v6542_v29, %v3227_v12 }
 0x3af   : > { %v3325_v36 = vmax.f32 %v3277_v11, 0.0  ;;  %4791 = vmatmul.msk.bf16.gmra.mxu3 %vm2244_vm9, %v4946_v27 }
 0x3b0   : > { %4636 = vmatmul.msk.bf16.gmra.mxu2 %vm2244_vm9, %v4887_v24 }
 0x3b1   : > { %v3373_v53 = vpack.c.bf16 %v3325_v36, %v3325_v36 }
 0x3b2   : > { %v3117_v46 = vpop.f32.mrf.mxu3 }
 0x3b3   : > { %v3573_v3 = vunpack.c.l.b16 %v3373_v53  ;;  %v2703_v35 = vpop.f32.mrf.mxu2  ;;  %v3228_v14 = vadd.f32 %v3117_v46, %v2699_v43 }
 0x3b4   : > { %v2704_v45 = vadd.f32 %v2703_v35, %v2346_v26  ;;  %v2356_v27 = vpop.f32.mrf.mxu1  ;;  %v4948_v26 = vld [vmem:[#allocation2 + $0x78] sm:$0xff] }
 0x3b5   : > { %v3618_v23 = vpack.c.b16 %v3573_v3, %v3572_v28  ;;  %v3278_v6 = vadd.f32 %v6542_v29, %v3228_v14  ;;  %v4889_v3 = vld [vmem:[#allocation2 + $0x70] sm:$0xff] }
 0x3b7   : > { %4814 = vmatmul.msk.bf16.gmra.mxu1 %vm1590_vm5, %v3618_v23  ;;  %v3326_v47 = vmax.f32 %v3278_v6, 0.0 }
 0x3b9   : > { %v3374_v38 = vpack.c.bf16 %v3326_v47, %v3326_v47 }
 0x3ba   : > { %v3119_v56 = vpop.f32.mrf.mxu3 }
 0x3bb   : > { %v2705_v59 = vpop.f32.mrf.mxu2  ;;  %v3229_v33 = vadd.f32 %v3119_v56, %v2701_v61  ;;  %v3574_v13 = vunpack.c.l.b16 %v3374_v38 }
 0x3bc   : > { %v2706_v58 = vadd.f32 %v2705_v59, %v2348_v62  ;;  %v2358_v23 = vpop.f32.mrf.mxu1 }
 0x3bd   : > { %v3279_v15 = vadd.f32 %v6542_v29, %v3229_v33 }
 0x3bf   : > { %v3327_v17 = vmax.f32 %v3279_v15, 0.0  ;;  %4792 = vmatmul.msk.bf16.gmra.mxu3 %vm2244_vm9, %v4947_v1 }
 0x3c0   : > { %4637 = vmatmul.msk.bf16.gmra.mxu2 %vm2244_vm9, %v4888_v48 }
 0x3c1   : > { %v3375_v52 = vpack.c.bf16 %v3327_v17, %v3327_v17 }
 0x3c2   : > { %v3122_v55 = vpop.f32.mrf.mxu3 }
 0x3c3   : > { %v3575_v10 = vunpack.c.l.b16 %v3375_v52  ;;  %v2708_v34 = vpop.f32.mrf.mxu2  ;;  %v3230_v12 = vadd.f32 %v3122_v55, %v2704_v45 }
 0x3c4   : > { %v2709_v6 = vadd.f32 %v2708_v34, %v2351_v2  ;;  %v2361_v38 = vpop.f32.mrf.mxu1  ;;  %v4949_v2 = vld [vmem:[#allocation2 + $0x80] sm:$0xff] }
 0x3c5   : > { %v3619_v11 = vpack.c.b16 %v3575_v10, %v3574_v13  ;;  %v3280_v24 = vadd.f32 %v6542_v29, %v3230_v12  ;;  %v4890_v10 = vld [vmem:[#allocation2 + $0x78] sm:$0xff] }
 0x3c7   : > { %4815 = vmatmul.msk.bf16.gmra.mxu1 %vm1590_vm5, %v3619_v11  ;;  %v3328_v43 = vmax.f32 %v3280_v24, 0.0 }
 0x3c9   : > { %v3376_v35 = vpack.c.bf16 %v3328_v43, %v3328_v43 }
 0x3ca   : > { %v3124_v36 = vpop.f32.mrf.mxu3 }
 0x3cb   : > { %v2710_v53 = vpop.f32.mrf.mxu2  ;;  %v3231_v46 = vadd.f32 %v3124_v36, %v2706_v58  ;;  %v3576_v47 = vunpack.c.l.b16 %v3376_v35 }
 0x3cc   : > { %v2711_v48 = vadd.f32 %v2710_v53, %v2353_v54 }
 0x3cd   : > { %v3281_v28 = vadd.f32 %v6542_v29, %v3231_v46  ;;  %v2363_v46 = vpop.f32.mrf.mxu1 }
 0x3cf   : > { %v3329_v14 = vmax.f32 %v3281_v28, 0.0  ;;  %4793 = vmatmul.msk.bf16.gmra.mxu3 %vm2244_vm9, %v4948_v26 }
 0x3d0   : > { %4638 = vmatmul.msk.bf16.gmra.mxu2 %vm2244_vm9, %v4889_v3 }
 0x3d1   : > { %v3377_v61 = vpack.c.bf16 %v3329_v14, %v3329_v14 }
 0x3d2   : > { %v3127_v56 = vpop.f32.mrf.mxu3 }
 0x3d3   : > { %v3577_v62 = vunpack.c.l.b16 %v3377_v61  ;;  %v2713_v59 = vpop.f32.mrf.mxu2  ;;  %v3232_v33 = vadd.f32 %v3127_v56, %v2709_v6 }
 0x3d4   : > { %v2714_v11 = vadd.f32 %v2713_v59, %v2356_v27  ;;  %v4950_v27 = vld [vmem:[#allocation2 + $0x88] sm:$0xff] }
 0x3d5   : > { %v3620_v15 = vpack.c.b16 %v3577_v62, %v3576_v47  ;;  %v3282_v1 = vadd.f32 %v6542_v29, %v3232_v33  ;;  %v2366_v47 = vpop.f32.mrf.mxu1  ;;  %v4891_v62 = vld [vmem:[#allocation2 + $0x80] sm:$0xff] }
 0x3d7   : > { %4816 = vmatmul.msk.bf16.gmra.mxu1 %vm1590_vm5, %v3620_v15  ;;  %v3330_v45 = vmax.f32 %v3282_v1, 0.0 }
 0x3d9   : > { %v3378_v34 = vpack.c.bf16 %v3330_v45, %v3330_v45 }
 0x3da   : > { %v3129_v17 = vpop.f32.mrf.mxu3 }
 0x3db   : > { %v2715_v52 = vpop.f32.mrf.mxu2  ;;  %v3233_v55 = vadd.f32 %v3129_v17, %v2711_v48  ;;  %v3578_v36 = vunpack.c.l.b16 %v3378_v34 }
 0x3dc   : > { %v2716_v3 = vadd.f32 %v2715_v52, %v2358_v23 }
 0x3dd   : > { %v3283_v13 = vadd.f32 %v6542_v29, %v3233_v55 }
 0x3df   : > { %v3331_v12 = vmax.f32 %v3283_v13, 0.0  ;;  %4794 = vmatmul.msk.bf16.gmra.mxu3 %vm2244_vm9, %v4949_v2  ;;  %v2368_v2 = vpop.f32.mrf.mxu1 }
 0x3e0   : > { %4639 = vmatmul.msk.bf16.gmra.mxu2 %vm2244_vm9, %v4890_v10 }
 0x3e1   : > { %v3379_v24 = vpack.c.bf16 %v3331_v12, %v3331_v12 }
 0x3e2   : > { %v3132_v58 = vpop.f32.mrf.mxu3 }
 0x3e3   : > { %v3579_v54 = vunpack.c.l.b16 %v3379_v24  ;;  %v2718_v43 = vpop.f32.mrf.mxu2  ;;  %v3234_v53 = vadd.f32 %v3132_v58, %v2714_v11 }
 0x3e4   : > { %v2719_v15 = vadd.f32 %v2718_v43, %v2361_v38  ;;  %v4951_v38 = vld [vmem:[#allocation2 + $0x90] sm:$0xff] }
 0x3e5   : > { %v3621_v28 = vpack.c.b16 %v3579_v54, %v3578_v36  ;;  %v3284_v26 = vadd.f32 %v6542_v29, %v3234_v53  ;;  %v4892_v36 = vld [vmem:[#allocation2 + $0x88] sm:$0xff] }
 0x3e7   : > { %4817 = vmatmul.msk.bf16.gmra.mxu1 %vm1590_vm5, %v3621_v28  ;;  %v3332_v14 = vmax.f32 %v3284_v26, 0.0  ;;  %v2371_v26 = vpop.f32.mrf.mxu1 }
 0x3e9   : > { %v3380_v59 = vpack.c.bf16 %v3332_v14, %v3332_v14 }
 0x3ea   : > { %v3134_v35 = vpop.f32.mrf.mxu3 }
 0x3eb   : > { %v2720_v6 = vpop.f32.mrf.mxu2  ;;  %v3235_v61 = vadd.f32 %v3134_v35, %v2716_v3  ;;  %v3580_v17 = vunpack.c.l.b16 %v3380_v59 }
 0x3ec   : > { %v2721_v10 = vadd.f32 %v2720_v6, %v2363_v46 }
 0x3ed   : > { %v3285_v56 = vadd.f32 %v6542_v29, %v3235_v61 }
 0x3ef   : > { %v3333_v33 = vmax.f32 %v3285_v56, 0.0  ;;  %4795 = vmatmul.msk.bf16.gmra.mxu3 %vm2244_vm9, %v4950_v27 }
 0x3f0   : > { %4640 = vmatmul.msk.bf16.gmra.mxu2 %vm2244_vm9, %v4891_v62 }
 0x3f1   : > { %v3381_v1 = vpack.c.bf16 %v3333_v33, %v3333_v33 }
 0x3f2   : > { %v3137_v48 = vpop.f32.mrf.mxu3 }
 0x3f3   : > { %v3581_v23 = vunpack.c.l.b16 %v3381_v1  ;;  %v2723_v45 = vpop.f32.mrf.mxu2  ;;  %v3236_v52 = vadd.f32 %v3137_v48, %v2719_v15  ;;  %v2373_v1 = vpop.f32.mrf.mxu1  ;;  %v4952_v48 = vld [vmem:[#allocation2 + $0x98] sm:$0xff] }
 0x3f4   : > { %v2724_v53 = vadd.f32 %v2723_v45, %v2366_v47 }
 0x3f5   : > { %v3622_v55 = vpack.c.b16 %v3581_v23, %v3580_v17  ;;  %v3286_v13 = vadd.f32 %v6542_v29, %v3236_v52  ;;  %v4893_v17 = vld [vmem:[#allocation2 + $0x90] sm:$0xff] }
 0x3f7   : > { %4818 = vmatmul.msk.bf16.gmra.mxu1 %vm1590_vm5, %v3622_v55  ;;  %v3334_v12 = vmax.f32 %v3286_v13, 0.0 }
 0x3f9   : > { %v3382_v54 = vpack.c.bf16 %v3334_v12, %v3334_v12 }
 0x3fa   : > { %v3139_v34 = vpop.f32.mrf.mxu3 }
 0x3fb   : > { %v2725_v11 = vpop.f32.mrf.mxu2  ;;  %v3237_v24 = vadd.f32 %v3139_v34, %v2721_v10  ;;  %v3582_v35 = vunpack.c.l.b16 %v3382_v54 }
 0x3fc   : > { %v2726_v27 = vadd.f32 %v2725_v11, %v2368_v2 }
 0x3fd   : > { %v3287_v58 = vadd.f32 %v6542_v29, %v3237_v24 }
 0x3ff   : > { %v3335_v43 = vmax.f32 %v3287_v58, 0.0  ;;  %4796 = vmatmul.msk.bf16.gmra.mxu3 %vm2244_vm9, %v4951_v38  ;;  %v6594_v58 = vld [vmem:[%s6839_s7] ss:$0 sm:$0xff]  ;;  %v4968_v38 = vld [vmem:[%s5679_s8] sm:$0xff]  }
 0x400   : > { %4641 = vmatmul.msk.bf16.gmra.mxu2 %vm2244_vm9, %v4892_v36 }
 0x401   : > { %v3383_v28 = vpack.c.bf16 %v3335_v43, %v3335_v43  ;;  %v4969_v43 = vunpack.c.l.bf16 %v4968_v38 }
 0x402   : > { %v3142_v3 = vpop.f32.mrf.mxu3 }
 0x403   : > { %v3583_v46 = vunpack.c.l.b16 %v3383_v28  ;;  %v2728_v14 = vpop.f32.mrf.mxu2  ;;  %v3238_v6 = vadd.f32 %v3142_v3, %v2724_v53 }
 0x404   : > { %v2729_v52 = vadd.f32 %v2728_v14, %v2371_v26 }
 0x405   : > { %v3623_v61 = vpack.c.b16 %v3583_v46, %v3582_v35  ;;  %v3288_v56 = vadd.f32 %v6542_v29, %v3238_v6  ;;  %v4970_v46 = vunpack.c.h.bf16 %v4968_v38 }
 0x407   : > { %4819 = vmatmul.msk.bf16.gmra.mxu1 %vm1590_vm5, %v3623_v61  ;;  %v3336_v59 = vmax.f32 %v3288_v56, 0.0 }
 0x409   : > { %v3384_v23 = vpack.c.bf16 %v3336_v59, %v3336_v59 }
 0x40a   : > { %v3144_v62 = vpop.f32.mrf.mxu3 }
 0x40b   : > { %v2730_v33 = vpop.f32.mrf.mxu2  ;;  %v3239_v15 = vadd.f32 %v3144_v62, %v2726_v27  ;;  %v3584_v2 = vunpack.c.l.b16 %v3384_v23  ;;  %v4953_v27 = vld [vmem:[#allocation2 + $0xa0] sm:$0xff]  ;;  %v4894_v62 = vld [vmem:[#allocation2 + $0x98] sm:$0xff] }
 0x40c   : > { %v2731_v54 = vadd.f32 %v2730_v33, %v2373_v1 }
 0x40d   : > { %v3289_v47 = vadd.f32 %v6542_v29, %v3239_v15 }
 0x40f   : > { %v3337_v45 = vmax.f32 %v3289_v47, 0.0  ;;  %4797 = vmatmul.msk.bf16.gmra.mxu3 %vm2244_vm9, %v4952_v48 }
 0x410   : > { %4642 = vmatmul.msk.bf16.gmra.mxu2 %vm2244_vm9, %v4893_v17 }
 0x411   : > { %v3385_v55 = vpack.c.bf16 %v3337_v45, %v3337_v45 }
 0x412   : > { %v3147_v13 = vpop.f32.mrf.mxu3 }
 0x413   : > { %v3585_v10 = vunpack.c.l.b16 %v3385_v55  ;;  %v2733_v34 = vpop.f32.mrf.mxu2  ;;  %v3240_v12 = vadd.f32 %v3147_v13, %v2729_v52 }
 0x414   : > { %v3733_v11 = vpop.f32.mrf.mxu1  ;;  %v2734_v1 = vadd.f32 %v2733_v34, %v6396_v37 }
 0x415   : > { %v3624_v24 = vpack.c.b16 %v3585_v10, %v3584_v2  ;;  %v3290_v36 = vadd.f32 %v6542_v29, %v3240_v12  ;;  %v3734_v53 = vadd.f32 %v6594_v58, %v3733_v11  ;;  %v5183_v11 = vld [vmem:[%s5679_s8 + $0x8] sm:$0xff]  }
 0x416   : > { %v4973_v34 = vunpack.c.l.bf16 %v5183_v11 }
 0x417   : > { %4820 = vmatmul.msk.bf16.gmra.mxu1 %vm1590_vm5, %v3624_v24  ;;  %v3338_v26 = vmax.f32 %v3290_v36, 0.0  ;;  %v3853_v6 = vadd.f32 %v4969_v43, %v3734_v53 }
 0x419   : > { %v3386_v59 = vpack.c.bf16 %v3338_v26, %v3338_v26  ;;  %v3901_v47 = vmax.f32 %v3853_v6, 0.0  ;;  %v4954_v6 = vld [vmem:[#allocation2 + $0xa8] sm:$0xff] }
 0x41a   : > { %v3149_v28 = vpop.f32.mrf.mxu3 }
 0x41b   : > { %v2735_v3 = vpop.f32.mrf.mxu2  ;;  %v3241_v35 = vadd.f32 %v3149_v28, %v2731_v54  ;;  %v3586_v45 = vunpack.c.l.b16 %v3386_v59  ;;  %v4974_v28 = vunpack.c.h.bf16 %v5183_v11 }
 0x41c   : > { %v3735_v14 = vpop.f32.mrf.mxu1  ;;  %v2736_v37 = vadd.f32 %v2735_v3, %v6415_v25 }
 0x41d   : > { %v3291_v61 = vadd.f32 %v6542_v29, %v3241_v35  ;;  %v3736_v56 = vadd.f32 %v6594_v58, %v3735_v14 }
 0x41f   : > { %v3339_v15 = vmax.f32 %v3291_v61, 0.0  ;;  %v3854_v33 = vadd.f32 %v4970_v46, %v3736_v56  ;;  %4798 = vmatmul.msk.bf16.gmra.mxu3 %vm2244_vm9, %v4953_v27  ;;  %v4895_v61 = vld [vmem:[#allocation2 + $0xa0] sm:$0xff] }
 0x420   : > { %4643 = vmatmul.msk.bf16.gmra.mxu2 %vm2244_vm9, %v4894_v62 }
 0x421   : > { %v3387_v48 = vpack.c.bf16 %v3339_v15, %v3339_v15  ;;  %v3902_v17 = vmax.f32 %v3854_v33, 0.0 }
 0x422   : > { %v3152_v23 = vpop.f32.mrf.mxu3 }
 0x423   : > { %v3587_v52 = vunpack.c.l.b16 %v3387_v48  ;;  %v5066_v55 = vpack.c.bf16 %v3902_v17, %v3901_v47  ;;  %v2738_v13 = vpop.f32.mrf.mxu2  ;;  %v3242_v2 = vadd.f32 %v3152_v23, %v2734_v1 }
 0x424   : > { %v3738_v10 = vpop.f32.mrf.mxu1  ;;  %v2739_v3 = vadd.f32 %v2738_v13, %v6440_v5 }
 0x425   : > { %v3625_v12 = vpack.c.b16 %v3587_v52, %v3586_v45  ;;  %5067 = vst [vmem:[%s6607_s19] sm:$0xff] %v5066_v55   ;;  %v3292_v24 = vadd.f32 %v6542_v29, %v3242_v2  ;;  %v3739_v38 = vadd.f32 %v6594_v58, %v3738_v10  ;;  %v5184_v55 = vld [vmem:[%s5679_s8 + $0x10] sm:$0xff]  }
 0x426   : > { %v4977_v5 = vunpack.c.l.bf16 %v5184_v55 }
 0x427   : > { %4821 = vmatmul.msk.bf16.gmra.mxu1 %vm1590_vm5, %v3625_v12  ;;  %v3340_v54 = vmax.f32 %v3292_v24, 0.0  ;;  %v3855_v35 = vadd.f32 %v4973_v34, %v3739_v38  ;;  %v4978_v34 = vunpack.c.h.bf16 %v5184_v55 }
 0x429   : > { %v3388_v56 = vpack.c.bf16 %v3340_v54, %v3340_v54  ;;  %v3903_v62 = vmax.f32 %v3855_v35, 0.0 }
 0x42a   : > { %v3154_v36 = vpop.f32.mrf.mxu3 }
 0x42b   : > { %v2740_v43 = vpop.f32.mrf.mxu2  ;;  %v3243_v53 = vadd.f32 %v3154_v36, %v2736_v37  ;;  %v3588_v1 = vunpack.c.l.b16 %v3388_v56 }
 0x42c   : > { %v3740_v26 = vpop.f32.mrf.mxu1  ;;  %v2741_v10 = vadd.f32 %v2740_v43, %v6454_v0 }
 0x42d   : > { %v3293_v46 = vadd.f32 %v6542_v29, %v3243_v53  ;;  %v3741_v14 = vadd.f32 %v6594_v58, %v3740_v26  ;;  %v4896_v26 = vld [vmem:[#allocation2 + $0xa8] sm:$0xff] }
 0x42f   : > { %v3341_v27 = vmax.f32 %v3293_v46, 0.0  ;;  %v3856_v25 = vadd.f32 %v4974_v28, %v3741_v14  ;;  %4799 = vmatmul.msk.bf16.gmra.mxu3 %vm2244_vm9, %v4954_v6  ;;  %v4955_v28 = vld [vmem:[#allocation2 + $0xb0] sm:$0xff] }
 0x430   : > { %4644 = vmatmul.msk.bf16.gmra.mxu2 %vm2244_vm9, %v4895_v61 }
 0x431   : > { %v3389_v59 = vpack.c.bf16 %v3341_v27, %v3341_v27  ;;  %v3904_v15 = vmax.f32 %v3856_v25, 0.0 }
 0x432   : > { %v3157_v33 = vpop.f32.mrf.mxu3 }
 0x433   : > { %v3589_v47 = vunpack.c.l.b16 %v3389_v59  ;;  %v5071_v48 = vpack.c.bf16 %v3904_v15, %v3903_v62  ;;  %v2743_v17 = vpop.f32.mrf.mxu2  ;;  %v3244_v23 = vadd.f32 %v3157_v33, %v2739_v3 }
 0x434   : > { %v3743_v45 = vpop.f32.mrf.mxu1  ;;  %v2744_v43 = vadd.f32 %v2743_v17, %v6463_v49 }
 0x435   : > { %v3626_v52 = vpack.c.b16 %v3589_v47, %v3588_v1  ;;  %5206 = vst [vmem:[%s6607_s19 + $0x8] sm:$0xff] %v5071_v48   ;;  %v3294_v2 = vadd.f32 %v6542_v29, %v3244_v23  ;;  %v3744_v13 = vadd.f32 %v6594_v58, %v3743_v45  ;;  %v5185_v1 = vld [vmem:[%s5679_s8 + $0x18] sm:$0xff]  }
 0x436   : > { %v4981_v49 = vunpack.c.l.bf16 %v5185_v1 }
 0x437   : > { %4822 = vmatmul.msk.bf16.gmra.mxu1 %vm1590_vm5, %v3626_v52  ;;  %v3342_v11 = vmax.f32 %v3294_v2, 0.0  ;;  %v3857_v36 = vadd.f32 %v4977_v5, %v3744_v13  ;;  %v4982_v2 = vunpack.c.h.bf16 %v5185_v1 }
 0x439   : > { %v3390_v35 = vpack.c.bf16 %v3342_v11, %v3342_v11  ;;  %v3905_v14 = vmax.f32 %v3857_v36, 0.0  ;;  %v4956_v11 = vld [vmem:[#allocation2 + $0xb8] sm:$0xff] }
 0x43a   : > { %v3159_v12 = vpop.f32.mrf.mxu3 }
 0x43b   : > { %v2745_v24 = vpop.f32.mrf.mxu2  ;;  %v3245_v37 = vadd.f32 %v3159_v12, %v2741_v10  ;;  %v3590_v27 = vunpack.c.l.b16 %v3390_v35 }
 0x43c   : > { %v3745_v38 = vpop.f32.mrf.mxu1  ;;  %v2746_v48 = vadd.f32 %v2745_v24, %v6468_v20 }
 0x43d   : > { %v3295_v54 = vadd.f32 %v6542_v29, %v3245_v37  ;;  %v3746_v53 = vadd.f32 %v6594_v58, %v3745_v38  ;;  %v4897_v37 = vld [vmem:[#allocation2 + $0xb0] sm:$0xff] }
 0x43f   : > { %v3343_v46 = vmax.f32 %v3295_v54, 0.0  ;;  %v3858_v0 = vadd.f32 %v4978_v34, %v3746_v53  ;;  %4800 = vmatmul.msk.bf16.gmra.mxu3 %vm2244_vm9, %v4955_v28 }
 0x440   : > { %4645 = vmatmul.msk.bf16.gmra.mxu2 %vm2244_vm9, %v4896_v26 }
 0x441   : > { %v3391_v6 = vpack.c.bf16 %v3343_v46, %v3343_v46  ;;  %v3906_v61 = vmax.f32 %v3858_v0, 0.0 }
 0x442   : > { %v3162_v56 = vpop.f32.mrf.mxu3 }
 0x443   : > { %v3591_v25 = vunpack.c.l.b16 %v3391_v6  ;;  %v5076_v3 = vpack.c.bf16 %v3906_v61, %v3905_v14  ;;  %v2748_v62 = vpop.f32.mrf.mxu2  ;;  %v3246_v59 = vadd.f32 %v3162_v56, %v2744_v43  ;;  %v5186_v61 = vld [vmem:[%s5679_s8 + $0x20] sm:$0xff]  }
 0x444   : > { %v3748_v15 = vpop.f32.mrf.mxu1  ;;  %v2749_v24 = vadd.f32 %v2748_v62, %v6474_v44  ;;  %v4985_v44 = vunpack.c.l.bf16 %v5186_v61 }
 0x445   : > { %v3627_v33 = vpack.c.b16 %v3591_v25, %v3590_v27  ;;  %5207 = vst [vmem:[%s6607_s19 + $0x10] sm:$0xff] %v5076_v3   ;;  %v3296_v47 = vadd.f32 %v6542_v29, %v3246_v59  ;;  %v3749_v17 = vadd.f32 %v6594_v58, %v3748_v15 }
 0x447   : > { %4823 = vmatmul.msk.bf16.gmra.mxu1 %vm1590_vm5, %v3627_v33  ;;  %v3344_v45 = vmax.f32 %v3296_v47, 0.0  ;;  %v3859_v5 = vadd.f32 %v4981_v49, %v3749_v17  ;;  %v4986_v33 = vunpack.c.h.bf16 %v5186_v61  ;;  %v4957_v17 = vld [vmem:[#allocation2 + $0xc0] sm:$0xff] }
 0x449   : > { %v3392_v34 = vpack.c.bf16 %v3344_v45, %v3344_v45  ;;  %v3907_v36 = vmax.f32 %v3859_v5, 0.0 }
 0x44a   : > { %v3164_v23 = vpop.f32.mrf.mxu3 }
 0x44b   : > { %v2750_v52 = vpop.f32.mrf.mxu2  ;;  %v3247_v55 = vadd.f32 %v3164_v23, %v2746_v48  ;;  %v3592_v26 = vunpack.c.l.b16 %v3392_v34  ;;  %v4898_v23 = vld [vmem:[#allocation2 + $0xb8] sm:$0xff] }
 0x44c   : > { %v3750_v10 = vpop.f32.mrf.mxu1  ;;  %v2751_v27 = vadd.f32 %v2750_v52, %v6479_v4 }
 0x44d   : > { %v3297_v13 = vadd.f32 %v6542_v29, %v3247_v55  ;;  %v3751_v12 = vadd.f32 %v6594_v58, %v3750_v10 }
 0x44f   : > { %v3345_v38 = vmax.f32 %v3297_v13, 0.0  ;;  %v3860_v20 = vadd.f32 %v4982_v2, %v3751_v12  ;;  %4801 = vmatmul.msk.bf16.gmra.mxu3 %vm2244_vm9, %v4956_v11 }
 0x450   : > { %4646 = vmatmul.msk.bf16.gmra.mxu2 %vm2244_vm9, %v4897_v37 }
 0x451   : > { %v3393_v54 = vpack.c.bf16 %v3345_v38, %v3345_v38  ;;  %v3908_v53 = vmax.f32 %v3860_v20, 0.0 }
 0x452   : > { %v3167_v28 = vpop.f32.mrf.mxu3 }
 0x453   : > { %v3593_v35 = vunpack.c.l.b16 %v3393_v54  ;;  %v5081_v46 = vpack.c.bf16 %v3908_v53, %v3907_v36  ;;  %v2753_v0 = vpop.f32.mrf.mxu2  ;;  %v3248_v43 = vadd.f32 %v3167_v28, %v2749_v24  ;;  %v5187_v36 = vld [vmem:[%s5679_s8 + $0x28] sm:$0xff]  }
 0x454   : > { %v3753_v14 = vpop.f32.mrf.mxu1  ;;  %v2754_v52 = vadd.f32 %v2753_v0, %v6488_v40  ;;  %v4989_v40 = vunpack.c.l.bf16 %v5187_v36 }
 0x455   : > { %v3628_v6 = vpack.c.b16 %v3593_v35, %v3592_v26  ;;  %5208 = vst [vmem:[%s6607_s19 + $0x18] sm:$0xff] %v5081_v46   ;;  %v3298_v56 = vadd.f32 %v6542_v29, %v3248_v43  ;;  %v3754_v25 = vadd.f32 %v6594_v58, %v3753_v14  ;;  %v4990_v43 = vunpack.c.h.bf16 %v5187_v36  ;;  %v4958_v14 = vld [vmem:[#allocation2 + $0xc8] sm:$0xff] }
 0x457   : > { %4824 = vmatmul.msk.bf16.gmra.mxu1 %vm1590_vm5, %v3628_v6  ;;  %v3346_v62 = vmax.f32 %v3298_v56, 0.0  ;;  %v3861_v47 = vadd.f32 %v4985_v44, %v3754_v25 }
 0x459   : > { %v3394_v45 = vpack.c.bf16 %v3346_v62, %v3346_v62  ;;  %v3909_v2 = vmax.f32 %v3861_v47, 0.0 }
 0x45a   : > { %v3169_v3 = vpop.f32.mrf.mxu3 }
 0x45b   : > { %v2755_v59 = vpop.f32.mrf.mxu2  ;;  %v3249_v15 = vadd.f32 %v3169_v3, %v2751_v27  ;;  %v3594_v12 = vunpack.c.l.b16 %v3394_v45 }
 0x45c   : > { %v3755_v1 = vpop.f32.mrf.mxu1  ;;  %v2756_v53 = vadd.f32 %v2755_v59, %v6493_v50 }
 0x45d   : > { %v3299_v48 = vadd.f32 %v6542_v29, %v3249_v15  ;;  %v3756_v49 = vadd.f32 %v6594_v58, %v3755_v1 }
 0x45f   : > { %v3347_v55 = vmax.f32 %v3299_v48, 0.0  ;;  %v3862_v4 = vadd.f32 %v4986_v33, %v3756_v49  ;;  %4802 = vmatmul.msk.bf16.gmra.mxu3 %vm2244_vm9, %v4957_v17 }
 0x460   : > { %4647 = vmatmul.msk.bf16.gmra.mxu2 %vm2244_vm9, %v4898_v23 }
 0x461   : > { %v3395_v10 = vpack.c.bf16 %v3347_v55, %v3347_v55  ;;  %v3910_v5 = vmax.f32 %v3862_v4, 0.0  ;;  %v5188_v55 = vld [vmem:[%s5679_s8 + $0x30] sm:$0xff]  }
 0x462   : > { %v3172_v13 = vpop.f32.mrf.mxu3 }
 0x463   : > { %v3595_v11 = vunpack.c.l.b16 %v3395_v10  ;;  %v5086_v37 = vpack.c.bf16 %v3910_v5, %v3909_v2  ;;  %v2758_v34 = vpop.f32.mrf.mxu2  ;;  %v3250_v38 = vadd.f32 %v3172_v13, %v2754_v52 }
 0x464   : > { %v3758_v20 = vpop.f32.mrf.mxu1  ;;  %v2759_v3 = vadd.f32 %v2758_v34, %v6499_v7  ;;  %v4993_v7 = vunpack.c.l.bf16 %v5188_v55 }
 0x465   : > { %v3629_v24 = vpack.c.b16 %v3595_v11, %v3594_v12  ;;  %5209 = vst [vmem:[%s6607_s19 + $0x20] sm:$0xff] %v5086_v37   ;;  %v3300_v54 = vadd.f32 %v6542_v29, %v3250_v38  ;;  %v3759_v28 = vadd.f32 %v6594_v58, %v3758_v20  ;;  %v4994_v11 = vunpack.c.h.bf16 %v5188_v55 }
 0x467   : > { %4825 = vmatmul.msk.bf16.gmra.mxu1 %vm1590_vm5, %v3629_v24  ;;  %v3348_v35 = vmax.f32 %v3300_v54, 0.0  ;;  %v3863_v61 = vadd.f32 %v4989_v40, %v3759_v28 }
 0x469   : > { %v3396_v44 = vpack.c.bf16 %v3348_v35, %v3348_v35  ;;  %v3911_v62 = vmax.f32 %v3863_v61, 0.0 }
 0x46a   : > { %v3174_v26 = vpop.f32.mrf.mxu3 }
 0x46b   : > { %v2760_v46 = vpop.f32.mrf.mxu2  ;;  %v3251_v0 = vadd.f32 %v3174_v26, %v2756_v53  ;;  %v3596_v1 = vunpack.c.l.b16 %v3396_v44 }
 0x46c   : > { %v3760_v6 = vpop.f32.mrf.mxu1  ;;  %v2761_v52 = vadd.f32 %v2760_v46, %v6506_v51 }
 0x46d   : > { %v3301_v56 = vadd.f32 %v6542_v29, %v3251_v0  ;;  %v3761_v27 = vadd.f32 %v6594_v58, %v3760_v6 }
 0x46f   : > { %v3349_v25 = vmax.f32 %v3301_v56, 0.0  ;;  %v3864_v50 = vadd.f32 %v4990_v43, %v3761_v27  ;;  %4803 = vmatmul.msk.bf16.gmra.mxu3 %vm2244_vm9, %v4958_v14  ;;  %v5189_v56 = vld [vmem:[%s5679_s8 + $0x38] sm:$0xff]  }
 0x471   : > { %v3397_v59 = vpack.c.bf16 %v3349_v25, %v3349_v25  ;;  %v3912_v15 = vmax.f32 %v3864_v50, 0.0 }
 0x472   : > { %v3177_v33 = vpop.f32.mrf.mxu3 }
 0x473   : > { %v3597_v47 = vunpack.c.l.b16 %v3397_v59  ;;  %v5091_v48 = vpack.c.bf16 %v3912_v15, %v3911_v62  ;;  %v2763_v49 = vpop.f32.mrf.mxu2  ;;  %v3252_v17 = vadd.f32 %v3177_v33, %v2759_v3  ;;  %v4998_v15 = vunpack.c.h.bf16 %v5189_v56 }
 0x474   : > { %v3763_v23 = vpop.f32.mrf.mxu1  ;;  %v2764_v51 = vadd.f32 %v2763_v49, %v6517_v9  ;;  %v4997_v9 = vunpack.c.l.bf16 %v5189_v56 }
 0x475   : > { %v3630_v45 = vpack.c.b16 %v3597_v47, %v3596_v1  ;;  %5210 = vst [vmem:[%s6607_s19 + $0x28] sm:$0xff] %v5091_v48   ;;  %v3302_v4 = vadd.f32 %v6542_v29, %v3252_v17  ;;  %v3764_v2 = vadd.f32 %v6594_v58, %v3763_v23 }
 0x477   : > { %4826 = vmatmul.msk.bf16.gmra.mxu1 %vm1590_vm5, %v3630_v45  ;;  %v3350_v5 = vmax.f32 %v3302_v4, 0.0  ;;  %v3865_v34 = vadd.f32 %v4993_v7, %v3764_v2 }
 0x479   : > { %v3398_v24 = vpack.c.bf16 %v3350_v5, %v3350_v5  ;;  %v3913_v53 = vmax.f32 %v3865_v34, 0.0 }
 0x47a   : > { %v3179_v10 = vpop.f32.mrf.mxu3 }
 0x47b   : > { %v2765_v13 = vpop.f32.mrf.mxu2  ;;  %v3253_v12 = vadd.f32 %v3179_v10, %v2761_v52  ;;  %v3598_v35 = vunpack.c.l.b16 %v3398_v24 }
 0x47c   : > { %v3765_v37 = vpop.f32.mrf.mxu1  ;;  %v2766_v44 = vadd.f32 %v2765_v13, %v6527_v31 }
 0x47d   : > { %v3303_v38 = vadd.f32 %v6542_v29, %v3253_v12  ;;  %v3766_v20 = vadd.f32 %v6594_v58, %v3765_v37  ;;  %v5190_v37 = vld [vmem:[%s5679_s8 + $0x40] sm:$0xff]  }
 0x47f   : > { %v3351_v36 = vmax.f32 %v3303_v38, 0.0  ;;  %v3866_v54 = vadd.f32 %v4994_v11, %v3766_v20 }
 0x481   : > { %v3399_v40 = vpack.c.bf16 %v3351_v36, %v3351_v36  ;;  %v3914_v28 = vmax.f32 %v3866_v54, 0.0 }
 0x482   : > { %v3182_v26 = vpop.f32.mrf.mxu3 }
 0x483   : > { %v3599_v46 = vunpack.c.l.b16 %v3399_v40  ;;  %v5096_v0 = vpack.c.bf16 %v3914_v28, %v3913_v53  ;;  %v2768_v43 = vpop.f32.mrf.mxu2  ;;  %v3254_v14 = vadd.f32 %v3182_v26, %v2764_v51  ;;  %v5002_v53 = vunpack.c.h.bf16 %v5190_v37 }
 0x484   : > { %v3768_v6 = vpop.f32.mrf.mxu1  ;;  %v2769_v31 = vadd.f32 %v2768_v43, %v6442_v18  ;;  %v5001_v18 = vunpack.c.l.bf16 %v5190_v37 }
 0x485   : > { %v3631_v61 = vpack.c.b16 %v3599_v46, %v3598_v35  ;;  %5211 = vst [vmem:[%s6607_s19 + $0x30] sm:$0xff] %v5096_v0   ;;  %v3304_v27 = vadd.f32 %v6542_v29, %v3254_v14  ;;  %v3769_v25 = vadd.f32 %v6594_v58, %v3768_v6 }
 0x487   : > { %4827 = vmatmul.msk.bf16.gmra.mxu1 %vm1590_vm5, %v3631_v61  ;;  %v3352_v3 = vmax.f32 %v3304_v27, 0.0  ;;  %v3867_v1 = vadd.f32 %v4997_v9, %v3769_v25 }
 0x489   : > { %v3400_v49 = vpack.c.bf16 %v3352_v3, %v3352_v3  ;;  %v3915_v45 = vmax.f32 %v3867_v1, 0.0 }
 0x48a   : > { %v3184_v50 = vpop.f32.mrf.mxu3 }
 0x48b   : > { %v2770_v62 = vpop.f32.mrf.mxu2  ;;  %v3255_v59 = vadd.f32 %v3184_v50, %v2766_v44  ;;  %v3600_v7 = vunpack.c.l.b16 %v3400_v49 }
 0x48c   : > { %v3770_v33 = vpop.f32.mrf.mxu1  ;;  %v2771_v38 = vadd.f32 %v2770_v62, %v6452_v41  ;;  %v5191_v62 = vld [vmem:[%s5679_s8 + $0x48] sm:$0xff]  }
 0x48d   : > { %v3305_v47 = vadd.f32 %v6542_v29, %v3255_v59  ;;  %v3771_v48 = vadd.f32 %v6594_v58, %v3770_v33  ;;  %v6695_v59 = vld [vmem:[%s6838_s6 + $0x1] ss:$0 sm:$0xff]  ;;  %v5005_v33 = vunpack.c.l.bf16 %v5191_v62 }
 0x48f   : > { %v3353_v17 = vmax.f32 %v3305_v47, 0.0  ;;  %v3868_v23 = vadd.f32 %v4998_v15, %v3771_v48 }
 0x491   : > { %v3401_v55 = vpack.c.bf16 %v3353_v17, %v3353_v17  ;;  %v3916_v4 = vmax.f32 %v3868_v23, 0.0  ;;  %v5006_v23 = vunpack.c.h.bf16 %v5191_v62 }
 0x492   : > { %v3187_v52 = vpop.f32.mrf.mxu3 }
 0x493   : > { %v3601_v2 = vunpack.c.l.b16 %v3401_v55  ;;  %v5101_v10 = vpack.c.bf16 %v3916_v4, %v3915_v45  ;;  %v2773_v5 = vpop.f32.mrf.mxu2  ;;  %v3256_v13 = vadd.f32 %v3187_v52, %v2769_v31 }
 0x494   : > { %v3773_v12 = vpop.f32.mrf.mxu1  ;;  %v2774_v41 = vadd.f32 %v2773_v5, %v6461_v16 }
 0x495   : > { %v3632_v11 = vpack.c.b16 %v3601_v2, %v3600_v7  ;;  %5212 = vst [vmem:[%s6607_s19 + $0x38] sm:$0xff] %v5101_v10   ;;  %v3306_v34 = vadd.f32 %v6542_v29, %v3256_v13  ;;  %v3774_v20 = vadd.f32 %v6594_v58, %v3773_v12 }
 0x497   : > { %4828 = vmatmul.msk.bf16.gmra.mxu1 %vm1590_vm5, %v3632_v11  ;;  %v3354_v36 = vmax.f32 %v3306_v34, 0.0  ;;  %v3869_v28 = vadd.f32 %v5001_v18, %v3774_v20 }
 0x499   : > { %v3402_v46 = vpack.c.bf16 %v3354_v36, %v3354_v36  ;;  %v3917_v14 = vmax.f32 %v3869_v28, 0.0  ;;  %v5192_v36 = vld [vmem:[%s5679_s8 + $0x50] sm:$0xff]  }
 0x49a   : > { %v3189_v24 = vpop.f32.mrf.mxu3 }
 0x49b   : > { %v2775_v54 = vpop.f32.mrf.mxu2  ;;  %v3257_v51 = vadd.f32 %v3189_v24, %v2771_v38  ;;  %v3602_v27 = vunpack.c.l.b16 %v3402_v46  ;;  %v5010_v46 = vunpack.c.h.bf16 %v5192_v36 }
 0x49c   : > { %v3775_v40 = vpop.f32.mrf.mxu1  ;;  %v2776_v15 = vadd.f32 %v2775_v54, %v6466_v60 }
 0x49d   : > { %v3307_v26 = vadd.f32 %v6542_v29, %v3257_v51  ;;  %v3776_v35 = vadd.f32 %v6594_v58, %v3775_v40 }
 0x49f   : > { %v3355_v0 = vmax.f32 %v3307_v26, 0.0  ;;  %v3870_v43 = vadd.f32 %v5002_v53, %v3776_v35 }
 0x4a1   : > { %v3403_v6 = vpack.c.bf16 %v3355_v0, %v3355_v0  ;;  %v3918_v61 = vmax.f32 %v3870_v43, 0.0 }
 0x4a2   : > { %v3192_v56 = vpop.f32.mrf.mxu3 }
 0x4a3   : > { %v3603_v44 = vunpack.c.l.b16 %v3403_v6  ;;  %v5106_v9 = vpack.c.bf16 %v3918_v61, %v3917_v14  ;;  %v2778_v25 = vpop.f32.mrf.mxu2  ;;  %v3258_v50 = vadd.f32 %v3192_v56, %v2774_v41 }
 0x4a4   : > { %v3778_v3 = vpop.f32.mrf.mxu1  ;;  %v2779_v60 = vadd.f32 %v2778_v25, %v6472_v8  ;;  %v5009_v8 = vunpack.c.l.bf16 %v5192_v36 }
 0x4a5   : > { %v3633_v29 = vpack.c.b16 %v3603_v44, %v3602_v27  ;;  %5213 = vst [vmem:[%s6607_s19 + $0x40] sm:$0xff] %v5106_v9   ;;  %v3308_v16 = vadd.f32 %v6695_v59, %v3258_v50  ;;  %v3779_v1 = vadd.f32 %v6594_v58, %v3778_v3 }
 0x4a7   : > { %4829 = vmatmul.msk.bf16.gmra.mxu1 %vm1590_vm5, %v3633_v29  ;;  %v3356_v48 = vmax.f32 %v3308_v16, 0.0  ;;  %v3871_v45 = vadd.f32 %v5005_v33, %v3779_v1  ;;  %v5193_v1 = vld [vmem:[%s5679_s8 + $0x58] sm:$0xff]  }
 0x4a9   : > { %v3404_v52 = vpack.c.bf16 %v3356_v48, %v3356_v48  ;;  %v3919_v10 = vmax.f32 %v3871_v45, 0.0  ;;  %v5014_v45 = vunpack.c.h.bf16 %v5193_v1 }
 0x4aa   : > { %v3194_v47 = vpop.f32.mrf.mxu3 }
 0x4ab   : > { %v2780_v49 = vpop.f32.mrf.mxu2  ;;  %v3259_v17 = vadd.f32 %v3194_v47, %v2776_v15  ;;  %v3604_v11 = vunpack.c.l.b16 %v3404_v52 }
 0x4ac   : > { %v3780_v31 = vpop.f32.mrf.mxu1  ;;  %v2781_v51 = vadd.f32 %v2780_v49, %v6477_v63 }
 0x4ad   : > { %v3309_v55 = vadd.f32 %v6695_v59, %v3259_v17  ;;  %v3781_v4 = vadd.f32 %v6594_v58, %v3780_v31 }
 0x4af   : > { %v3357_v7 = vmax.f32 %v3309_v55, 0.0  ;;  %v3872_v2 = vadd.f32 %v5006_v23, %v3781_v4 }
 0x4b1   : > { %v3405_v5 = vpack.c.bf16 %v3357_v7, %v3357_v7  ;;  %v3920_v13 = vmax.f32 %v3872_v2, 0.0 }
 0x4b2   : > { %v3197_v12 = vpop.f32.mrf.mxu3 }
 0x4b3   : > { %v3605_v37 = vunpack.c.l.b16 %v3405_v5  ;;  %v5111_v34 = vpack.c.bf16 %v3920_v13, %v3919_v10  ;;  %v2783_v38 = vpop.f32.mrf.mxu2  ;;  %v3260_v18 = vadd.f32 %v3197_v12, %v2779_v60 }
 0x4b4   : > { %v3783_v20 = vpop.f32.mrf.mxu1  ;;  %v2784_v63 = vadd.f32 %v2783_v38, %v6486_v21  ;;  %v5013_v21 = vunpack.c.l.bf16 %v5193_v1 }
 0x4b5   : > { %v3634_v24 = vpack.c.b16 %v3605_v37, %v3604_v11  ;;  %5214 = vst [vmem:[%s6607_s19 + $0x48] sm:$0xff] %v5111_v34   ;;  %v3310_v54 = vadd.f32 %v6695_v59, %v3260_v18  ;;  %v3784_v53 = vadd.f32 %v6594_v58, %v3783_v20 }
 0x4b7   : > { %4830 = vmatmul.msk.bf16.gmra.mxu1 %vm1590_vm5, %v3634_v24  ;;  %v3358_v28 = vmax.f32 %v3310_v54, 0.0  ;;  %v3873_v43 = vadd.f32 %v5009_v8, %v3784_v53  ;;  %v5194_v54 = vld [vmem:[%s5679_s8 + $0x60] sm:$0xff]  }
 0x4b9   : > { %v3406_v6 = vpack.c.bf16 %v3358_v28, %v3358_v28  ;;  %v3921_v27 = vmax.f32 %v3873_v43, 0.0 }
 0x4ba   : > { %v3199_v40 = vpop.f32.mrf.mxu3 }
 0x4bb   : > { %v2785_v26 = vpop.f32.mrf.mxu2  ;;  %v3261_v35 = vadd.f32 %v3199_v40, %v2781_v51  ;;  %v3606_v50 = vunpack.c.l.b16 %v3406_v6 }
 0x4bc   : > { %v3785_v0 = vpop.f32.mrf.mxu1  ;;  %v2786_v48 = vadd.f32 %v2785_v26, %v6491_v30 }
 0x4bd   : > { %v3311_v41 = vadd.f32 %v6695_v59, %v3261_v35  ;;  %v3786_v14 = vadd.f32 %v6594_v58, %v3785_v0 }
 0x4bf   : > { %v3359_v61 = vmax.f32 %v3311_v41, 0.0  ;;  %v3874_v56 = vadd.f32 %v5010_v46, %v3786_v14  ;;  %v5018_v46 = vunpack.c.h.bf16 %v5194_v54 }
 0x4c1   : > { %v3407_v44 = vpack.c.bf16 %v3359_v61, %v3359_v61  ;;  %v3922_v9 = vmax.f32 %v3874_v56, 0.0 }
 0x4c2   : > { %v3202_v25 = vpop.f32.mrf.mxu3 }
 0x4c3   : > { %v3607_v3 = vunpack.c.l.b16 %v3407_v44  ;;  %v5116_v29 = vpack.c.bf16 %v3922_v9, %v3921_v27  ;;  %v3262_v62 = vadd.f32 %v3202_v25, %v2784_v63  ;;  %v2788_v16 = vpop.f32.mrf.mxu2 }
 0x4c4   : > { %v3788_v15 = vpop.f32.mrf.mxu1  ;;  %v2789_v30 = vadd.f32 %v2788_v16, %v6497_v32  ;;  %v5017_v32 = vunpack.c.l.bf16 %v5194_v54 }
 0x4c5   : > { %v3635_v33 = vpack.c.b16 %v3607_v3, %v3606_v50  ;;  %5215 = vst [vmem:[%s6607_s19 + $0x50] sm:$0xff] %v5116_v29   ;;  %v3312_v47 = vadd.f32 %v6695_v59, %v3262_v62  ;;  %v3789_v49 = vadd.f32 %v6594_v58, %v3788_v15 }
 0x4c7   : > { %4831 = vmatmul.msk.bf16.gmra.mxu1 %vm1590_vm5, %v3635_v33  ;;  %v3360_v23 = vmax.f32 %v3312_v47, 0.0  ;;  %v3875_v4 = vadd.f32 %v5013_v21, %v3789_v49  ;;  %v5195_v33 = vld [vmem:[%s5679_s8 + $0x68] sm:$0xff]  }
 0x4c9   : > { %v3408_v60 = vpack.c.bf16 %v3360_v23, %v3360_v23  ;;  %v3923_v13 = vmax.f32 %v3875_v4, 0.0  ;;  %v5022_v23 = vunpack.c.h.bf16 %v5195_v33 }
 0x4ca   : > { %v3204_v17 = vpop.f32.mrf.mxu3 }
 0x4cb   : > { %v3263_v31 = vadd.f32 %v3204_v17, %v2786_v48  ;;  %v2790_v2 = vpop.f32.mrf.mxu2  ;;  %v3608_v34 = vunpack.c.l.b16 %v3408_v60 }
 0x4cc   : > { %v3790_v55 = vpop.f32.mrf.mxu1  ;;  %v2791_v53 = vadd.f32 %v2790_v2, %v6502_v57 }
 0x4cd   : > { %v3313_v52 = vadd.f32 %v6695_v59, %v3263_v31  ;;  %v3791_v7 = vadd.f32 %v6594_v58, %v3790_v55 }
 0x4cf   : > { %v3361_v10 = vmax.f32 %v3313_v52, 0.0  ;;  %v3876_v5 = vadd.f32 %v5014_v45, %v3791_v7 }
 0x4d1   : > { %v3409_v12 = vpack.c.bf16 %v3361_v10, %v3361_v10  ;;  %v3924_v11 = vmax.f32 %v3876_v5, 0.0 }
 0x4d2   : > { %v3207_v37 = vpop.f32.mrf.mxu3 }
 0x4d3   : > { %v3609_v38 = vunpack.c.l.b16 %v3409_v12  ;;  %v5121_v18 = vpack.c.bf16 %v3924_v11, %v3923_v13  ;;  %v3264_v20 = vadd.f32 %v3207_v37, %v2789_v30  ;;  %v2793_v8 = vpop.f32.mrf.mxu2 }
 0x4d4   : > { %v3793_v24 = vpop.f32.mrf.mxu1  ;;  %v2794_v57 = vadd.f32 %v2793_v8, %v6514_v22  ;;  %v5021_v22 = vunpack.c.l.bf16 %v5195_v33 }
 0x4d5   : > { %v3636_v36 = vpack.c.b16 %v3609_v38, %v3608_v34  ;;  %5216 = vst [vmem:[%s6607_s19 + $0x58] sm:$0xff] %v5121_v18   ;;  %v3314_v51 = vadd.f32 %v6695_v59, %v3264_v20  ;;  %v3794_v40 = vadd.f32 %v6594_v58, %v3793_v24  ;;  %v5196_v24 = vld [vmem:[%s5679_s8 + $0x70] sm:$0xff]  }
 0x4d7   : > { %4832 = vmatmul.msk.bf16.gmra.mxu1 %vm1590_vm5, %v3636_v36  ;;  %v3362_v26 = vmax.f32 %v3314_v51, 0.0  ;;  %v3877_v43 = vadd.f32 %v5017_v32, %v3794_v40  ;;  %v5026_v40 = vunpack.c.h.bf16 %v5196_v24 }
 0x4d9   : > { %v3410_v6 = vpack.c.bf16 %v3362_v26, %v3362_v26  ;;  %v3925_v63 = vmax.f32 %v3877_v43, 0.0 }
 0x4da   : > { %v3209_v28 = vpop.f32.mrf.mxu3 }
 0x4db   : > { %v3265_v35 = vadd.f32 %v3209_v28, %v2791_v53  ;;  %v2795_v9 = vpop.f32.mrf.mxu2  ;;  %v3610_v50 = vunpack.c.l.b16 %v3410_v6 }
 0x4dc   : > { %v3795_v0 = vpop.f32.mrf.mxu1  ;;  %v2796_v47 = vadd.f32 %v2795_v9, %v6523_v39 }
 0x4dd   : > { %v3315_v41 = vadd.f32 %v6695_v59, %v3265_v35  ;;  %v3796_v14 = vadd.f32 %v6594_v58, %v3795_v0 }
 0x4df   : > { %v3363_v61 = vmax.f32 %v3315_v41, 0.0  ;;  %v3878_v56 = vadd.f32 %v5018_v46, %v3796_v14 }
 0x4e1   : > { %v3411_v27 = vpack.c.bf16 %v3363_v61, %v3363_v61  ;;  %v3926_v44 = vmax.f32 %v3878_v56, 0.0 }
 0x4e2   : > { %v3212_v25 = vpop.f32.mrf.mxu3 }
 0x4e3   : > { %v3611_v3 = vunpack.c.l.b16 %v3411_v27  ;;  %v5126_v29 = vpack.c.bf16 %v3926_v44, %v3925_v63  ;;  %v3266_v62 = vadd.f32 %v3212_v25, %v2794_v57  ;;  %v2798_v31 = vpop.f32.mrf.mxu2  ;;  %v5197_v44 = vld [vmem:[%s5679_s8 + $0x78] sm:$0xff]  }
 0x4e4   : > { %v3798_v16 = vpop.f32.mrf.mxu1  ;;  %v2799_v39 = vadd.f32 %v2798_v31, %v6533_v19  ;;  %v5025_v19 = vunpack.c.l.bf16 %v5196_v24  ;;  %v5030_v25 = vunpack.c.h.bf16 %v5197_v44 }
 0x4e5   : > { %v3637_v15 = vpack.c.b16 %v3611_v3, %v3610_v50  ;;  %5217 = vst [vmem:[%s6607_s19 + $0x60] sm:$0xff] %v5126_v29   ;;  %v3316_v1 = vadd.f32 %v6695_v59, %v3266_v62  ;;  %v3799_v48 = vadd.f32 %v6594_v58, %v3798_v16 }
 0x4e7   : > { %4833 = vmatmul.msk.bf16.gmra.mxu1 %vm1590_vm5, %v3637_v15  ;;  %v3364_v49 = vmax.f32 %v3316_v1, 0.0  ;;  %v3879_v55 = vadd.f32 %v5021_v22, %v3799_v48 }
 0x4e9   : > { %v3412_v7 = vpack.c.bf16 %v3364_v49, %v3364_v49  ;;  %v3927_v10 = vmax.f32 %v3879_v55, 0.0 }
 0x4ea   : > { %v3214_v21 = vpop.f32.mrf.mxu3 }
 0x4eb   : > { %v3267_v17 = vadd.f32 %v3214_v21, %v2796_v47  ;;  %v3612_v12 = vunpack.c.l.b16 %v3412_v7  ;;  %v2800_v20 = vpop.f32.mrf.mxu2  ;;  %v5198_v47 = vld [vmem:[%s5679_s8 + $0x80] sm:$0xff]   ;;  %v5199_v7 = vld [vmem:[%s5679_s8 + $0x88] sm:$0xff]  }
 0x4ec   : > { %v3800_v45 = vpop.f32.mrf.mxu1  ;;  %v2801_v54 = vadd.f32 %v2800_v20, %v6535_v42  ;;  %v5033_v22 = vunpack.c.l.bf16 %v5198_v47  ;;  %v5034_v21 = vunpack.c.h.bf16 %v5198_v47 }
 0x4ed   : > { %v3317_v4 = vadd.f32 %v6695_v59, %v3267_v17  ;;  %v3801_v52 = vadd.f32 %v6594_v58, %v3800_v45 }
 0x4ef   : > { %v3365_v2 = vmax.f32 %v3317_v4, 0.0  ;;  %v3880_v60 = vadd.f32 %v5022_v23, %v3801_v52 }
 0x4f1   : > { %v3413_v5 = vpack.c.bf16 %v3365_v2, %v3365_v2  ;;  %v3928_v30 = vmax.f32 %v3880_v60, 0.0  ;;  %v5037_v2 = vunpack.c.l.bf16 %v5199_v7  ;;  %v6762_v60 = vld [vmem:[%s6839_s7] ss:$0 sm:$0xff] }
 0x4f2   : > { %v3217_v13 = vpop.f32.mrf.mxu3 }
 0x4f3   : > { %v3613_v11 = vunpack.c.l.b16 %v3413_v5  ;;  %v5131_v37 = vpack.c.bf16 %v3928_v30, %v3927_v10  ;;  %v3268_v34 = vadd.f32 %v3217_v13, %v2799_v39  ;;  %v5038_v10 = vunpack.c.h.bf16 %v5199_v7 }
 0x4f4   : > { %v3803_v38 = vpop.f32.mrf.mxu1 }
 0x4f5   : > { %v3638_v18 = vpack.c.b16 %v3613_v11, %v3612_v12  ;;  %5218 = vst [vmem:[%s6607_s19 + $0x68] sm:$0xff] %v5131_v37   ;;  %v3318_v36 = vadd.f32 %v6695_v59, %v3268_v34  ;;  %v3804_v51 = vadd.f32 %v6594_v58, %v3803_v38  ;;  %v5200_v38 = vld [vmem:[%s5679_s8 + $0x90] sm:$0xff]  }
 0x4f6   : > { %v5042_v24 = vunpack.c.h.bf16 %v5200_v38 }
 0x4f7   : > { %4834 = vmatmul.msk.bf16.gmra.mxu1 %vm1590_vm5, %v3638_v18  ;;  %v3366_v53 = vmax.f32 %v3318_v36, 0.0  ;;  %v3881_v26 = vadd.f32 %v5025_v19, %v3804_v51  ;;  %v5041_v18 = vunpack.c.l.bf16 %v5200_v38 }
 0x4f9   : > { %v3414_v0 = vpack.c.bf16 %v3366_v53, %v3366_v53  ;;  %v3929_v14 = vmax.f32 %v3881_v26, 0.0 }
 0x4fa   : > { %v3219_v8 = vpop.f32.mrf.mxu3 }
 0x4fb   : > { %v3269_v32 = vadd.f32 %v3219_v8, %v2801_v54  ;;  %v3614_v61 = vunpack.c.l.b16 %v3414_v0 }
 0x4fc   : > { %v3805_v28 = vpop.f32.mrf.mxu1 }
 0x4fd   : > { %v3319_v35 = vadd.f32 %v6695_v59, %v3269_v32  ;;  %v3806_v46 = vadd.f32 %v6594_v58, %v3805_v28  ;;  %v5029_v59 = vunpack.c.l.bf16 %v5197_v44  ;;  %v5201_v28 = vld [vmem:[%s5679_s8 + $0x98] sm:$0xff]  }
 0x4fe   : > { %v5045_v26 = vunpack.c.l.bf16 %v5201_v28 }
 0x4ff   : > { %v3367_v43 = vmax.f32 %v3319_v35, 0.0  ;;  %v3882_v41 = vadd.f32 %v5026_v40, %v3806_v46  ;;  %v5046_v46 = vunpack.c.h.bf16 %v5201_v28 }
 0x501   : > { %v3415_v42 = vpack.c.bf16 %v3367_v43, %v3367_v43  ;;  %v3930_v6 = vmax.f32 %v3882_v41, 0.0 }
 0x503   : > { %v3615_v56 = vunpack.c.l.b16 %v3415_v42  ;;  %v5136_v57 = vpack.c.bf16 %v3930_v6, %v3929_v14 }
 0x504   : > { %v3808_v63 = vpop.f32.mrf.mxu1 }
 0x505   : > { %v3639_v27 = vpack.c.b16 %v3615_v56, %v3614_v61  ;;  %5219 = vst [vmem:[%s6607_s19 + $0x70] sm:$0xff] %v5136_v57   ;;  %v3809_v9 = vadd.f32 %v6594_v58, %v3808_v63  ;;  %v5202_v57 = vld [vmem:[%s5679_s8 + $0xa0] sm:$0xff]  }
 0x506   : > { %v5049_v63 = vunpack.c.l.bf16 %v5202_v57  ;;  %v5050_v44 = vunpack.c.h.bf16 %v5202_v57 }
 0x507   : > { %4835 = vmatmul.msk.bf16.gmra.mxu1 %vm1590_vm5, %v3639_v27  ;;  %v3883_v3 = vadd.f32 %v5029_v59, %v3809_v9 }
 0x509   : > { %v3931_v16 = vmax.f32 %v3883_v3, 0.0 }
 0x50c   : > { %v3810_v50 = vpop.f32.mrf.mxu1 }
 0x50d   : > { %v3811_v29 = vadd.f32 %v6594_v58, %v3810_v50 }
 0x50f   : > { %v3884_v62 = vadd.f32 %v5030_v25, %v3811_v29 }
 0x511   : > { %v3932_v15 = vmax.f32 %v3884_v62, 0.0 }
 0x513   : > { %v5141_v33 = vpack.c.bf16 %v3932_v15, %v3931_v16  ;;  %v5203_v15 = vld [vmem:[%s5679_s8 + $0xa8] sm:$0xff]  }
 0x514   : > { %v3813_v1 = vpop.f32.mrf.mxu1  ;;  %v5054_v47 = vunpack.c.h.bf16 %v5203_v15 }
 0x515   : > { %5220 = vst [vmem:[%s6607_s19 + $0x78] sm:$0xff] %v5141_v33   ;;  %v3814_v48 = vadd.f32 %v6594_v58, %v3813_v1  ;;  %v5053_v33 = vunpack.c.l.bf16 %v5203_v15 }
 0x517   : > { %v3885_v17 = vadd.f32 %v5033_v22, %v3814_v48 }
 0x519   : > { %v3933_v45 = vmax.f32 %v3885_v17, 0.0 }
 0x51c   : > { %v3815_v49 = vpop.f32.mrf.mxu1 }
 0x51d   : > { %v3816_v23 = vadd.f32 %v6594_v58, %v3815_v49 }
 0x51f   : > { %v3886_v31 = vadd.f32 %v5034_v21, %v3816_v23 }
 0x521   : > { %v3934_v55 = vmax.f32 %v3886_v31, 0.0 }
 0x523   : > { %v5146_v4 = vpack.c.bf16 %v3934_v55, %v3933_v45  ;;  %v5204_v55 = vld [vmem:[%s5679_s8 + $0xb0] sm:$0xff]  }
 0x524   : > { %v3818_v52 = vpop.f32.mrf.mxu1  ;;  %v5058_v7 = vunpack.c.h.bf16 %v5204_v55 }
 0x525   : > { %5221 = vst [vmem:[%s6607_s19 + $0x80] sm:$0xff] %v5146_v4   ;;  %v3819_v39 = vadd.f32 %v6762_v60, %v3818_v52  ;;  %v5057_v4 = vunpack.c.l.bf16 %v5204_v55 }
 0x527   : > { %v3887_v58 = vadd.f32 %v5037_v2, %v3819_v39 }
 0x529   : > { %v3935_v12 = vmax.f32 %v3887_v58, 0.0 }
 0x52c   : > { %v3820_v5 = vpop.f32.mrf.mxu1 }
 0x52d   : > { %v3821_v30 = vadd.f32 %v6762_v60, %v3820_v5 }
 0x52f   : > { %v3888_v13 = vadd.f32 %v5038_v10, %v3821_v30 }
 0x531   : > { %v3936_v11 = vmax.f32 %v3888_v13, 0.0 }
 0x533   : > { %v5151_v37 = vpack.c.bf16 %v3936_v11, %v3935_v12  ;;  %v5205_v11 = vld [vmem:[%s5679_s8 + $0xb8] sm:$0xff]   ;;  %s4046_s8 = scalar_lea.sflag [#allocation5], %s5673_s22 }
 0x534   : > { %v3823_v34 = vpop.f32.mrf.mxu1  ;;  %v5062_v38 = vunpack.c.h.bf16 %v5205_v11 }
 0x535   : > { %5222 = vst [vmem:[%s6607_s19 + $0x88] sm:$0xff] %v5151_v37   ;;  %v3824_v20 = vadd.f32 %v6762_v60, %v3823_v34  ;;  %v5061_v37 = vunpack.c.l.bf16 %v5205_v11 }
 0x537   : > { %v3889_v54 = vadd.f32 %v5041_v18, %v3824_v20 }
 0x539   : > { %v3937_v8 = vmax.f32 %v3889_v54, 0.0 }
 0x53c   : > { %v3825_v36 = vpop.f32.mrf.mxu1 }
 0x53d   : > { %v3826_v19 = vadd.f32 %v6762_v60, %v3825_v36 }
 0x53f   : > { %v3890_v51 = vadd.f32 %v5042_v24, %v3826_v19 }
 0x541   : > { %v3938_v53 = vmax.f32 %v3890_v51, 0.0 }
 0x543   : > { %v5156_v32 = vpack.c.bf16 %v3938_v53, %v3937_v8 }
 0x544   : > { %v3828_v40 = vpop.f32.mrf.mxu1 }
 0x545   : > { %5223 = vst [vmem:[%s6607_s19 + $0x90] sm:$0xff] %v5156_v32   ;;  %v3829_v35 = vadd.f32 %v6762_v60, %v3828_v40 }
 0x547   : > { %v3891_v43 = vadd.f32 %v5045_v26, %v3829_v35 }
 0x549   : > { %v3939_v42 = vmax.f32 %v3891_v43, 0.0 }
 0x54c   : > { %v3830_v0 = vpop.f32.mrf.mxu1 }
 0x54d   : > { %v3831_v41 = vadd.f32 %v6762_v60, %v3830_v0 }
 0x54f   : > { %v3892_v14 = vadd.f32 %v5046_v46, %v3831_v41 }
 0x551   : > { %v3940_v6 = vmax.f32 %v3892_v14, 0.0 }
 0x553   : > { %v5161_v61 = vpack.c.bf16 %v3940_v6, %v3939_v42 }
 0x554   : > { %v3833_v56 = vpop.f32.mrf.mxu1 }
 0x555   : > { %5224 = vst [vmem:[%s6607_s19 + $0x98] sm:$0xff] %v5161_v61   ;;  %v3834_v27 = vadd.f32 %v6762_v60, %v3833_v56 }
 0x557   : > { %v3893_v9 = vadd.f32 %v5049_v63, %v3834_v27 }
 0x559   : > { %v3941_v3 = vmax.f32 %v3893_v9, 0.0 }
 0x55c   : > { %v3835_v59 = vpop.f32.mrf.mxu1 }
 0x55d   : > { %v3836_v25 = vadd.f32 %v6762_v60, %v3835_v59 }
 0x55f   : > { %v3894_v50 = vadd.f32 %v5050_v44, %v3836_v25 }
 0x561   : > { %v3942_v29 = vmax.f32 %v3894_v50, 0.0 }
 0x563   : > { %v5166_v62 = vpack.c.bf16 %v3942_v29, %v3941_v3 }
 0x564   : > { %v3838_v16 = vpop.f32.mrf.mxu1 }
 0x565   : > { %5225 = vst [vmem:[%s6607_s19 + $0xa0] sm:$0xff] %v5166_v62   ;;  %v3839_v1 = vadd.f32 %v6762_v60, %v3838_v16 }
 0x567   : > { %v3895_v48 = vadd.f32 %v5053_v33, %v3839_v1 }
 0x569   : > { %v3943_v17 = vmax.f32 %v3895_v48, 0.0 }
 0x56c   : > { %v3840_v22 = vpop.f32.mrf.mxu1 }
 0x56d   : > { %v3841_v21 = vadd.f32 %v6762_v60, %v3840_v22 }
 0x56f   : > { %v3896_v49 = vadd.f32 %v5054_v47, %v3841_v21 }
 0x571   : > { %v3944_v23 = vmax.f32 %v3896_v49, 0.0 }
 0x573   : > { %v5171_v31 = vpack.c.bf16 %v3944_v23, %v3943_v17 }
 0x574   : > { %v3843_v45 = vpop.f32.mrf.mxu1 }
 0x575   : > { %5226 = vst [vmem:[%s6607_s19 + $0xa8] sm:$0xff] %v5171_v31   ;;  %v3844_v52 = vadd.f32 %v6762_v60, %v3843_v45 }
 0x577   : > { %v3897_v39 = vadd.f32 %v5057_v4, %v3844_v52 }
 0x579   : > { %v3945_v58 = vmax.f32 %v3897_v39, 0.0 }
 0x57c   : > { %v3845_v2 = vpop.f32.mrf.mxu1 }
 0x57d   : > { %v3846_v10 = vadd.f32 %v6762_v60, %v3845_v2 }
 0x57f   : > { %v3898_v5 = vadd.f32 %v5058_v7, %v3846_v10 }
 0x581   : > { %v3946_v30 = vmax.f32 %v3898_v5, 0.0 }
 0x583   : > { %v5176_v13 = vpack.c.bf16 %v3946_v30, %v3945_v58 }
 0x584   : > { %v3848_v12 = vpop.f32.mrf.mxu1 }
 0x585   : > { %5227 = vst [vmem:[%s6607_s19 + $0xb0] sm:$0xff] %v5176_v13   ;;  %v3849_v34 = vadd.f32 %v6762_v60, %v3848_v12 }
 0x587   : > { %v3899_v20 = vadd.f32 %v5061_v37, %v3849_v34 }
 0x589   : > { %v3947_v54 = vmax.f32 %v3899_v20, 0.0 }
 0x58c   : > { %v3850_v18 = vpop.f32.mrf.mxu1 }
 0x58d   : > { %v3851_v24 = vadd.f32 %v6762_v60, %v3850_v18 }
 0x58f   : > { %v3900_v36 = vadd.f32 %v5062_v38, %v3851_v24 }
 0x591   : > { %v3948_v19 = vmax.f32 %v3900_v36, 0.0 }
 0x593   : > { %v5181_v51 = vpack.c.bf16 %v3948_v19, %v3947_v54 }
 0x595   : > { %5228 = vst [vmem:[%s6607_s19 + $0xb8] sm:$0xff] %v5181_v51  }
 0x596   : > { %5455 = shalt.err (!%p5452_p13)
}
 0x597   : > { %s5521_s22 = smov 4  }
 0x598   : > { %5259 = dma.vmem_to_hbm [thread:$0]  (%p5622_p9), %s4062_s21, 3072, %s4064_s15, %s4046_s8, %s5519_s11, %s5519_s11, %s5521_s22  }
 0x599 PF: > { %s6927_s19 = sld [smem:[#allocation13_spill]]  ;;  %p5272_p0 = pnand %p4203_p12, %p5629_p11 }
 0x59a   : > { %s6929_s16 = sld [smem:[#allocation17_spill]] }
 0x59b   : > { %p5273_p1 = pneg %p5272_p0 }
 0x59f   : > { %s4078_s18 = sand.u32 1, %s6927_s19  }
 0x5a0   : > { %s4079_s27 = scalar_lea.sflag [#allocation5], %s4078_s18 }
 0x5a1   : > { %5489 = dma.done.wait (%p5273_p1), %s4079_s27, 3072  }
 0x5a2   : > { %5491 = vsyncadd (%p5273_p1), %s4079_s27, 4294964224  ;;  %s27_s10 = sadd.s32 1, %s6929_s16   ;;  %s6930_s1 = sld [smem:[#allocation14_spill]] }
 0x5a3   : > { %p24_p2 = scmp.ge.s32.totalorder %s27_s10, 4   ;;  %s6931_s29 = sld [smem:[#allocation20_spill]] }
 0x5a4   : > { %s6932_s30 = sld [smem:[#allocation16_spill]]  ;;  %s6934_s27 = smov %s5498_s28 }
 0x5a5   : > { %s6933_s9 = sld [smem:[#allocation18_spill]]  ;;  %26 = sbr.rel (!%p24_p2) target bundleno = 11 (0xb), region = 130 }
 0x5a8   : > { %s6935_s28 = smov %s6930_s1 }
 0x5aa   :  { %4085 = vsyncpa [#allocation4], 1 }
 0x5ab   :  { %4087 = vsyncpa [#allocation4 + $0x1], 1 }
 0x5ac   :  { %4088 = vsyncpa [#allocation7], 1 }
 0x5ad   :  { %4090 = vsyncpa [#allocation7 + $0x1], 1 }
 0x5ae   :  { %4091 = vsyncpa [#allocation5], 1 }
 0x5af   :  { %4093 = vsyncpa [#allocation5 + $0x1], 1 }

// kernel: tpu_custom_call.1
= control target key start
LH: loop header
LB: loop body
LE: loop exit
PB: predicated region body
PF: predicated region fallthrough
CT: control target
= control target key end

     0   :  { %s6832_s0 = inlined_call_operand.hbm [shape: bf16[2,24,16,128], index: 0, kind: input, shape index: {}]   ;;  %s6833_s1 = inlined_call_operand.hbm [shape: bf16[2,24,16,128], index: 1, kind: input, shape index: {}]   ;;  %s6834_s2 = inlined_call_operand.hbm [shape: bf16[2,24,16,128], index: 2, kind: input, shape index: {}]   ;;  %s6835_s3 = inlined_call_operand.vmem [shape: bf16[128,32], index: 3, kind: input, shape index: {}]   ;;  %s6836_s4 = inlined_call_operand.vmem [shape: bf16[3,96,32], index: 4, kind: input, shape index: {}]   ;;  %s6837_s5 = inlined_call_operand.vmem [shape: bf16[32,128], index: 5, kind: input, shape index: {}]   ;;  %s6838_s6 = inlined_call_operand.vmem [shape: f32[2,32], index: 6, kind: input, shape index: {}]   ;;  %s6839_s7 = inlined_call_operand.vmem [shape: f32[1,128], index: 7, kind: input, shape index: {}]   ;;  %s6840_s8 = inlined_call_operand.hbm [shape: bf16[2,24,16,128], index: 8, kind: output, shape index: {}]  }
   0x1   :  { %6876 = sst [smem:[#allocation22_spill]] %s6833_s1 }
   0x2   :  { %6877 = sst [smem:[#allocation23_spill]] %s6840_s8 }
   0x3   :  { %13 = vsyncpa [#allocation4], 0 }
   0x4   :  { %15 = vsyncpa [#allocation4 + $0x1], 0 }
   0x5   :  { %16 = vsyncpa [#allocation7], 0 }
   0x6   :  { %18 = vsyncpa [#allocation7 + $0x1], 0 }
   0x7   :  { %19 = vsyncpa [#allocation5], 0 }
   0x8   :  { %21 = vsyncpa [#allocation5 + $0x1], 0  ;;  %s5567_s27 = smov 0   ;;  %s5569_s28 = smov 0  }
   0x9   :  { %s5571_s29 = smov 0   ;;  %s5573_s30 = smov 0  }
   0xa   :  { %s5575_s9 = smov 0   ;;  %s5577_s10 = smov 0  }
   0xb LB: > { %6878 = sst [smem:[#allocation13_spill]] %s5494_s27  ;;  %s5598_s11 = sadd.s32 4294967295, %s5514_s10   ;;  %s5514_s10 = sphi %s5577_s10, %s27_s10   ;;  %s5510_s9 = sphi %s5575_s9, %s6933_s9   ;;  %s5506_s30 = sphi %s5573_s30, %s6932_s30   ;;  %s5502_s29 = sphi %s5571_s29, %s6931_s29   ;;  %s5498_s28 = sphi %s5569_s28, %s6935_s28   ;;  %s5494_s27 = sphi %s5567_s27, %s6934_s27  }
   0xc   : > { %6879 = sst [smem:[#allocation14_spill]] %s5502_s29  ;;  %s4201_s12 = sadd.s32 4294967294, %s5514_s10  }
   0xd   : > { %6880 = sst [smem:[#allocation15_spill]] %s5506_s30  ;;  %s39_s13 = sadd.s32 1, %s5510_s9 }
   0xe   : > { %6881 = sst [smem:[#allocation16_spill]] %s5510_s9  ;;  %s48_s14 = sadd.s32 1, %s5502_s29 }
   0xf   : > { %6882 = sst [smem:[#allocation17_spill]] %s5514_s10  ;;  %p41_p0 = scmp.ge.s32.totalorder %s39_s13, 2 }
  0x10   : > { %p55_p1 = scmp.ne.s32.totalorder %s5502_s29, %s5498_s28  ;;  %p56_p2 = scmp.eq.s32.totalorder %s5514_s10, 0 }
  0x11   : > { %p61_p3 = scmp.ne.s32.totalorder %s5498_s28, %s5494_s27  ;;  %s6937_s13 = smov (%p41_p0, %s39_s13), 0 }
  0x12   : > { %6883 = sst [smem:[#allocation18_spill]] %s6937_s13  ;;  %p5610_p4 = por %p56_p2, %p55_p1 }
  0x13   : > { %p62_p5 = scmp.eq.s32.totalorder %s5598_s11, 0  ;;  %s43_s16 = ssub.s32 %s5510_s9, %s6937_s13 }
  0x14   : > { %p264_p6 = scmp.eq.s32.totalorder %s5598_s11, 1  ;;  %p46_p7 = scmp.eq.s32.totalorder %s43_s16, 0 }
  0x15   : > { %p5618_p8 = por %p62_p5, %p61_p3  ;;  %p270_p10 = scmp.eq.s32.totalorder %s4201_s12, 1 }
  0x16   : > { %p5622_p9 = por %p264_p6, %p55_p1  ;;  %p4203_p12 = scmp.ge.s32.totalorder %s5514_s10, 2 }
  0x17   : > { %s5627_s19 = scalar_select %p46_p7, %s5502_s29, %s48_s14  }
  0x18   : > { %s6886_s18 = scalar_select %p5622_p9, 1, 0 }
  0x19   : > { %6888 = sst [smem:[#allocation20_spill]] %s5627_s19  ;;  %p5629_p11 = por %p270_p10, %p61_p3 }
  0x1a   : > { %6887 = sst [smem:[#allocation19_spill]] %s6886_s18  ;;  %p5275_p13 = scmp.lt.s32.totalorder %s5514_s10, 2 }
  0x1b   : > { %s6889_s20 = scalar_select %p5629_p11, 1, 0 }
  0x1c   : > { %s5636_s21 = sand.u32 1, %s5502_s29   ;;  %s5248_s22 = smul.u32 192, %s5510_s9 }
  0x1d   : > { %6890 = sst [smem:[#allocation21_spill]] %s6889_s20  ;;  %p5641_p0 = pnand %p5275_p13, %p5610_p4 }
  0x1e   : > { %s330_s24 = sand.u32 1, %s5514_s10   ;;  %s4205_s25 = sshll.u32 %s5636_s21, 3 }
  0x1f   : > { %s6892_s1 = sld [smem:[#allocation22_spill]]  ;;  %s334_s13 = scalar_lea.vmem [#allocation6], %s4205_s25 }
  0x20   : > { %s348_s19 = sshll.u32 %s334_s13, 4  ;;  %s331_s15 = scalar_lea.sflag [#allocation7], %s330_s24  ;;  %s349_s19 = int_to_ptr.vmem [resolvable:$true] %s348_s19 }
  0x21   : > { %s5516_s9 = smov 64   ;;  %s5517_s29 = smov 4  }
  0x22   : > { %s362_s20 = scalar_lea.vmem [#allocation8], %s4205_s25  ;;  %p4209_p1 = scmp.ge.s32.totalorder %s5514_s10, 1 }
  0x23   : > { %s376_s27 = sshll.u32 %s362_s20, 4  ;;  %p384_p2 = scmp.lt.s32.totalorder %s5514_s10, 3  ;;  %s377_s27 = int_to_ptr.vmem [resolvable:$true] %s376_s27 }
  0x24   : > { %s5247_s13 = smul.u32 192, %s5636_s21  ;;  %s317_s24 = scalar_lea.hbm %s6832_s0, %s5248_s22 }
  0x25   : > { %s345_s14 = scalar_lea.hbm %s6892_s1, %s5248_s22  ;;  %p5654_p3 = pnand %p4209_p1, %p384_p2 }
  0x26   : > { %s346_s16 = sshll.u32 %s345_s14, 4  ;;  %s318_s1 = sshll.u32 %s317_s24, 4  ;;  %s347_s16 = int_to_ptr.hbm [resolvable:$true] %s346_s16  ;;  %s319_s1 = int_to_ptr.hbm [resolvable:$true] %s318_s1 }
  0x27   : > { %5267 = dma.hbm_to_vmem [thread:$0]  (!%p5641_p0), %s347_s16, 128, %s349_s19, %s331_s15, %s5516_s9, %s5516_s9, %s5517_s29  }
  0x28   : > { %s4840_s18 = sadd.s32 184, %s5248_s22  ;;  %s309_s19 = scalar_lea.vmem [#allocation3], %s5247_s13 }
  0x29   : > { %s320_s25 = sshll.u32 %s309_s19, 4  ;;  %s373_s8 = scalar_lea.hbm %s6834_s2, %s4840_s18  ;;  %s321_s25 = int_to_ptr.vmem [resolvable:$true] %s320_s25 }
  0x2a   : > { %s374_s10 = sshll.u32 %s373_s8, 4  ;;  %s306_s30 = scalar_lea.sflag [#allocation4], %s5636_s21  ;;  %s375_s10 = int_to_ptr.hbm [resolvable:$true] %s374_s10 }
  0x2b   : > { %5264 = dma.hbm_to_vmem [thread:$0]  (!%p5641_p0), %s319_s1, 3072, %s321_s25, %s306_s30, %s5516_s9, %s5516_s9, %s5517_s29  }
  0x2c   : > { %5270 = dma.hbm_to_vmem [thread:$0]  (!%p5641_p0), %s375_s10, 128, %s377_s27, %s331_s15, %s5516_s9, %s5516_s9, %s5517_s29  }
  0x2d   : > { %388 = sbr.rel (%p5654_p3) target bundleno = 1433 (0x599), region = 52  ;;  %s5673_s22 = sand.u32 (!%p5654_p3), 1, %s5498_s28  }
  0x2e   : > { %s5251_s13 = smul.u32 (!%p5654_p3), 192, %s5673_s22  ;;  %s391_s18 = scalar_lea.sflag (!%p5654_p3), [#allocation4], %s5673_s22 }
  0x30   : > { %s5679_s8 = scalar_lea.vmem (!%p5654_p3), [#allocation3], %s5251_s13 }
  0x32   : > { %5481 = dma.done.wait (%p5618_p8), %s391_s18, 3072  }
  0x33   : > { %5483 = vsyncadd (%p5618_p8), %s391_s18, 4294964224  ;;  %s400_s1 = sand.u32 1, %s5598_s11   ;;  %s4210_s27 = sshll.u32 %s5673_s22, 3 }
  0x34   : > { %s401_s29 = scalar_lea.sflag [#allocation7], %s400_s1  ;;  %s404_s30 = scalar_lea.vmem [#allocation6], %s4210_s27 }
  0x35   : > { %5485 = dma.done.wait (%p5618_p8), %s401_s29, 256  }
  0x36   : > { %5487 = vsyncadd (%p5618_p8), %s401_s29, 4294967040  ;;  %v4874_v0 = vld [vmem:[%s6835_s3 + $0x38] sm:$0xff]  ;;  %v4873_v1 = vld [vmem:[%s6835_s3 + $0x30] sm:$0xff]  ;;  %s5518_s23 = smov 32   ;;  %vm1431_vm0 = vcmask 1047552   ;;  %s5519_s11 = smov 64  }
  0x37   : > { %743 = vmatpush.bf16.msra.mxu0 %v4874_v0  ;;  %v4872_v2 = vld [vmem:[%s6835_s3 + $0x28] sm:$0xff]  ;;  %v4871_v3 = vld [vmem:[%s6835_s3 + $0x20] sm:$0xff]  ;;  %v4870_v4 = vld [vmem:[%s6835_s3 + $0x18] sm:$0xff]  ;;  %vm1432_vm1 = vsmask.f32 7424  ;;  %vm1324_vm3 = vcmask 1040384  }
  0x38   : > { %v4869_v5 = vld [vmem:[%s6835_s3 + $0x10] sm:$0xff]  ;;  %v4868_v6 = vld [vmem:[%s6835_s3 + $0x8] sm:$0xff]  ;;  %v4867_v7 = vld [vmem:[%s6835_s3] sm:$0xff]  ;;  %vm1325_vm4 = vsmask.f32 256  ;;  %vm1590_vm5 = vcmask 261120  }
  0x39   : > { %v4841_v8 = vld [vmem:[%s404_s30] sm:$0xff]  ;;  %v4844_v11 = vld [vmem:[%s5679_s8 + $0x10] sm:$0xff]  ;;  %v4845_v12 = vld [vmem:[%s5679_s8 + $0x18] sm:$0xff]  ;;  %vm1669_vm7 = vcmask 523264   ;;  %vm1904_vm8 = vcmask 781312   ;;  %vm2244_vm9 = vcmask 785408  }
  0x3a   : > { %v4842_v9 = vld [vmem:[%s5679_s8] sm:$0xff]  ;;  %v4843_v10 = vld [vmem:[%s5679_s8 + $0x8] sm:$0xff]  ;;  %v4848_v15 = vld [vmem:[%s5679_s8 + $0x30] sm:$0xff]  ;;  %s414_s18 = scalar_lea.vmem [#allocation8], %s4210_s27  ;;  %s6607_s19 = scalar_lea.vmem [#allocation9], %s5251_s13 }
  0x3b   : > { %744 = vmatpush.bf16.msra.mxu0 %v4873_v1  ;;  %v4846_v13 = vld [vmem:[%s5679_s8 + $0x20] sm:$0xff]  ;;  %v4847_v14 = vld [vmem:[%s5679_s8 + $0x28] sm:$0xff]  ;;  %v5727_v16 = vld [vmem:[%s6838_s6] ss:$0 sm:$0xff]  ;;  %s6924_s30 = sld [smem:[#allocation23_spill]]  ;;  %s4061_s21 = sshll.u32 %s6607_s19, 4  ;;  %s4062_s21 = int_to_ptr.vmem [resolvable:$true] %s4061_s21 }
  0x3c   : > { %v4849_v17 = vld [vmem:[%s5679_s8 + $0x38] sm:$0xff]  ;;  %v4850_v28 = vld [vmem:[%s5679_s8 + $0x40] sm:$0xff]  ;;  %v4851_v44 = vld [vmem:[%s5679_s8 + $0x48] sm:$0xff] }
  0x3d   : > { %v4852_v60 = vld [vmem:[%s5679_s8 + $0x50] sm:$0xff]  ;;  %vm5886_vm2 = vmand %vm1431_vm0, %vm1432_vm1 }
  0x3e   : > { %vm5980_vm6 = vmand %vm1324_vm3, %vm1325_vm4 }
  0x3f   : > { %745 = vmatpush.bf16.msra.mxu0 %v4872_v2 }
  0x43   : > { %746 = vmatpush.bf16.msra.mxu0 %v4871_v3 }
  0x47   : > { %747 = vmatpush.bf16.msra.mxu0 %v4870_v4 }
  0x4b   : > { %748 = vmatpush.bf16.msra.mxu0 %v4869_v5 }
  0x4f   : > { %749 = vmatpush.bf16.msra.mxu0 %v4868_v6 }
  0x53   : > { %750 = vmatpush.bf16.msra.mxu0 %v4867_v7 }
  0x56   : > { %751 = vmatmul.bf16.vlgmr.msra.gmra.mxu0 %v4841_v8 }
  0x66   : > { %756 = vmatmul.bf16.gmra.mxu0 %v4842_v9 }
  0x76   : > { %761 = vmatmul.bf16.gmra.mxu0 %v4843_v10 }
  0x86   : > { %766 = vmatmul.bf16.gmra.mxu0 %v4844_v11 }
  0x96   : > { %771 = vmatmul.bf16.gmra.mxu0 %v4845_v12  ;;  %v4853_v12 = vld [vmem:[%s5679_s8 + $0x58] sm:$0xff] }
  0xa6   : > { %776 = vmatmul.bf16.gmra.mxu0 %v4846_v13 }
  0xb6   : > { %781 = vmatmul.bf16.gmra.mxu0 %v4847_v14 }
  0xc6   : > { %786 = vmatmul.bf16.gmra.mxu0 %v4848_v15 }
  0xd3   : > { %v752_v18 = vpop.f32.mrf.mxu0 }
  0xd4   : > { %v753_v19 = vadd.f32 %v5727_v16, %v752_v18 }
  0xd6   : > { %791 = vmatmul.bf16.gmra.mxu0 %v4849_v17  ;;  %v882_v20 = vmax.f32 %v753_v19, 0.0 }
  0xd8   : > { %v934_v23 = vpack.c.bf16 %v882_v20, %v882_v20 }
  0xda   : > { %v1038_v26 = vunpack.c.l.b16 %v934_v23 }
  0xdb   : > { %v754_v21 = vpop.f32.mrf.mxu0 }
  0xdc   : > { %v755_v22 = vadd.f32 %v5727_v16, %v754_v21 }
  0xde   : > { %v883_v24 = vmax.f32 %v755_v22, 0.0 }
  0xe0   : > { %v935_v25 = vpack.c.bf16 %v883_v24, %v883_v24 }
  0xe2   : > { %v1039_v27 = vunpack.c.l.b16 %v935_v25 }
  0xe3   : > { %v757_v29 = vpop.f32.mrf.mxu0 }
  0xe4   : > { %v5733_v30 = vpack.c.b16 %v1039_v27, %v1038_v26  ;;  %v758_v31 = vadd.f32 %v5727_v16, %v757_v29  ;;  %v4854_v29 = vld [vmem:[%s5679_s8 + $0x60] sm:$0xff] }
  0xe6   : > { %796 = vmatmul.bf16.gmra.mxu0 %v4850_v28  ;;  %v6869_v32 = vshrl.u32 %v5733_v30, 16  ;;  %v6871_v33 = vshll.u32 %v5733_v30, 16  ;;  %v884_v35 = vmax.f32 %v758_v31, 0.0 }
  0xe8   : > { %v1119_v34 = vrot.slane %v6869_v32, 7  ;;  %v936_v39 = vpack.c.bf16 %v884_v35, %v884_v35 }
  0xea   : > { %v5742_v36 = vor.u32 %v6871_v33, %v1119_v34  ;;  %v1040_v42 = vunpack.c.l.b16 %v936_v39 }
  0xeb   : > { %v759_v37 = vpop.f32.mrf.mxu0 }
  0xec   : > { %v760_v38 = vadd.f32 %v5727_v16, %v759_v37 }
  0xee   : > { %v885_v40 = vmax.f32 %v760_v38, 0.0 }
  0xf0   : > { %v937_v41 = vpack.c.bf16 %v885_v40, %v885_v40 }
  0xf2   : > { %v1041_v43 = vunpack.c.l.b16 %v937_v41 }
  0xf3   : > { %v762_v45 = vpop.f32.mrf.mxu0 }
  0xf4   : > { %v5746_v46 = vpack.c.b16 %v1041_v43, %v1040_v42  ;;  %v763_v47 = vadd.f32 %v5727_v16, %v762_v45 }
  0xf6   : > { %801 = vmatmul.bf16.gmra.mxu0 %v4851_v44  ;;  %v6865_v48 = vshrl.u32 %v5746_v46, 16  ;;  %v6868_v49 = vshll.u32 %v5746_v46, 16  ;;  %v886_v51 = vmax.f32 %v763_v47, 0.0 }
  0xf8   : > { %v1126_v50 = vrot.slane %v6865_v48, 7  ;;  %v938_v55 = vpack.c.bf16 %v886_v51, %v886_v51 }
  0xfa   : > { %v5755_v52 = vor.u32 %v6868_v49, %v1126_v50  ;;  %v1042_v58 = vunpack.c.l.b16 %v938_v55 }
  0xfb   : > { %v764_v53 = vpop.f32.mrf.mxu0 }
  0xfc   : > { %v765_v54 = vadd.f32 %v5727_v16, %v764_v53  ;;  %v4855_v53 = vld [vmem:[%s5679_s8 + $0x68] sm:$0xff] }
  0xfe   : > { %v887_v56 = vmax.f32 %v765_v54, 0.0 }
 0x100   : > { %v939_v57 = vpack.c.bf16 %v887_v56, %v887_v56 }
 0x102   : > { %v1043_v59 = vunpack.c.l.b16 %v939_v57 }
 0x103   : > { %v767_v61 = vpop.f32.mrf.mxu0 }
 0x104   : > { %v5759_v62 = vpack.c.b16 %v1043_v59, %v1042_v58  ;;  %v768_v63 = vadd.f32 %v5727_v16, %v767_v61 }
 0x106   : > { %806 = vmatmul.bf16.gmra.mxu0 %v4852_v60  ;;  %v6870_v0 = vshrl.u32 %v5759_v62, 16  ;;  %v6872_v2 = vshll.u32 %v5759_v62, 16  ;;  %v888_v3 = vmax.f32 %v768_v63, 0.0 }
 0x108   : > { %v1133_v1 = vrot.slane %v6870_v0, 7  ;;  %v940_v7 = vpack.c.bf16 %v888_v3, %v888_v3 }
 0x10a   : > { %v5768_v4 = vor.u32 %v6872_v2, %v1133_v1  ;;  %v1044_v10 = vunpack.c.l.b16 %v940_v7 }
 0x10b   : > { %v769_v5 = vpop.f32.mrf.mxu0 }
 0x10c   : > { %v770_v6 = vadd.f32 %v5727_v16, %v769_v5 }
 0x10e   : > { %v889_v8 = vmax.f32 %v770_v6, 0.0 }
 0x110   : > { %v941_v9 = vpack.c.bf16 %v889_v8, %v889_v8 }
 0x112   : > { %v1045_v11 = vunpack.c.l.b16 %v941_v9  ;;  %v4856_v9 = vld [vmem:[%s5679_s8 + $0x70] sm:$0xff] }
 0x113   : > { %v772_v13 = vpop.f32.mrf.mxu0 }
 0x114   : > { %v5772_v14 = vpack.c.b16 %v1045_v11, %v1044_v10  ;;  %v773_v15 = vadd.f32 %v5727_v16, %v772_v13 }
 0x116   : > { %811 = vmatmul.bf16.gmra.mxu0 %v4853_v12  ;;  %v6863_v17 = vshrl.u32 %v5772_v14, 16  ;;  %v6866_v19 = vshll.u32 %v5772_v14, 16  ;;  %v890_v20 = vmax.f32 %v773_v15, 0.0 }
 0x118   : > { %v1140_v18 = vrot.slane %v6863_v17, 7  ;;  %v942_v24 = vpack.c.bf16 %v890_v20, %v890_v20 }
 0x11a   : > { %v5781_v21 = vor.u32 %v6866_v19, %v1140_v18  ;;  %v1046_v27 = vunpack.c.l.b16 %v942_v24 }
 0x11b   : > { %v774_v22 = vpop.f32.mrf.mxu0 }
 0x11c   : > { %v775_v23 = vadd.f32 %v5727_v16, %v774_v22  ;;  %v4934_v22 = vld [vmem:[%s6836_s4 + $0x58] sm:$0xff] }
 0x11d   : > { %2319 = vmatpush.bf16.msrb.mxu0 %v4934_v22  ;;  %5230 = vmatpush.bf16.msra.mxu2 %v4934_v22 }
 0x11e   : > { %v891_v25 = vmax.f32 %v775_v23, 0.0  ;;  %5231 = vmatpush.bf16.msra.mxu3 %v4934_v22  ;;  %5229 = vmatpush.bf16.msra.mxu1 %v4934_v22 }
 0x120   : > { %v943_v26 = vpack.c.bf16 %v891_v25, %v891_v25 }
 0x122   : > { %v1047_v28 = vunpack.c.l.b16 %v943_v26 }
 0x123   : > { %v777_v31 = vpop.f32.mrf.mxu0 }
 0x124   : > { %v5785_v34 = vpack.c.b16 %v1047_v28, %v1046_v27  ;;  %v778_v35 = vadd.f32 %v5727_v16, %v777_v31 }
 0x126   : > { %816 = vmatmul.bf16.gmra.mxu0 %v4854_v29  ;;  %v6864_v37 = vshrl.u32 %v5785_v34, 16  ;;  %v6867_v39 = vshll.u32 %v5785_v34, 16  ;;  %v892_v40 = vmax.f32 %v778_v35, 0.0  ;;  %v4857_v35 = vld [vmem:[%s5679_s8 + $0x78] sm:$0xff] }
 0x128   : > { %v1147_v38 = vrot.slane %v6864_v37, 7  ;;  %v944_v44 = vpack.c.bf16 %v892_v40, %v892_v40 }
 0x12a   : > { %v5794_v41 = vor.u32 %v6867_v39, %v1147_v38  ;;  %v1048_v50 = vunpack.c.l.b16 %v944_v44 }
 0x12b   : > { %v779_v42 = vpop.f32.mrf.mxu0 }
 0x12c   : > { %v780_v43 = vadd.f32 %v5727_v16, %v779_v42 }
 0x12e   : > { %v893_v45 = vmax.f32 %v780_v43, 0.0 }
 0x130   : > { %v945_v47 = vpack.c.bf16 %v893_v45, %v893_v45 }
 0x132   : > { %v1049_v51 = vunpack.c.l.b16 %v945_v47 }
 0x133   : > { %v782_v54 = vpop.f32.mrf.mxu0 }
 0x134   : > { %v5798_v55 = vpack.c.b16 %v1049_v51, %v1048_v50  ;;  %v783_v56 = vadd.f32 %v5727_v16, %v782_v54 }
 0x136   : > { %821 = vmatmul.bf16.gmra.mxu0 %v4855_v53  ;;  %v6859_v57 = vshrl.u32 %v5798_v55, 16  ;;  %v6862_v59 = vshll.u32 %v5798_v55, 16  ;;  %v894_v60 = vmax.f32 %v783_v56, 0.0 }
 0x138   : > { %v1154_v58 = vrot.slane %v6859_v57, 7  ;;  %v946_v3 = vpack.c.bf16 %v894_v60, %v894_v60 }
 0x13a   : > { %v5807_v61 = vor.u32 %v6862_v59, %v1154_v58  ;;  %v1050_v7 = vunpack.c.l.b16 %v946_v3  ;;  %v4931_v59 = vld [vmem:[%s6836_s4 + $0x40] sm:$0xff] }
 0x13b   : > { %v784_v63 = vpop.f32.mrf.mxu0 }
 0x13c   : > { %v785_v1 = vadd.f32 %v5727_v16, %v784_v63 }
 0x13e   : > { %v895_v5 = vmax.f32 %v785_v1, 0.0  ;;  %v4858_v1 = vld [vmem:[%s5679_s8 + $0x80] sm:$0xff] }
 0x140   : > { %v947_v6 = vpack.c.bf16 %v895_v5, %v895_v5 }
 0x142   : > { %v1051_v8 = vunpack.c.l.b16 %v947_v6 }
 0x143   : > { %v787_v10 = vpop.f32.mrf.mxu0 }
 0x144   : > { %v5811_v11 = vpack.c.b16 %v1051_v8, %v1050_v7  ;;  %v788_v12 = vadd.f32 %v5727_v16, %v787_v10 }
 0x146   : > { %826 = vmatmul.bf16.gmra.mxu0 %v4856_v9  ;;  %v6857_v13 = vshrl.u32 %v5811_v11, 16  ;;  %v6860_v18 = vshll.u32 %v5811_v11, 16  ;;  %v896_v20 = vmax.f32 %v788_v12, 0.0 }
 0x148   : > { %v1161_v15 = vrot.slane %v6857_v13, 7  ;;  %v948_v26 = vpack.c.bf16 %v896_v20, %v896_v20 }
 0x14a   : > { %v5823_v23 = vor.u32 %v6860_v18, %v1161_v15  ;;  %v1052_v29 = vunpack.c.l.b16 %v948_v26 }
 0x14b   : > { %v789_v24 = vpop.f32.mrf.mxu0 }
 0x14c   : > { %v790_v25 = vadd.f32 %v5727_v16, %v789_v24 }
 0x14e   : > { %v897_v27 = vmax.f32 %v790_v25, 0.0 }
 0x150   : > { %v949_v28 = vpack.c.bf16 %v897_v27, %v897_v27 }
 0x152   : > { %v1053_v31 = vunpack.c.l.b16 %v949_v28  ;;  %v4859_v28 = vld [vmem:[%s5679_s8 + $0x88] sm:$0xff] }
 0x153   : > { %v792_v38 = vpop.f32.mrf.mxu0 }
 0x154   : > { %v5827_v40 = vpack.c.b16 %v1053_v31, %v1052_v29  ;;  %v793_v42 = vadd.f32 %v5727_v16, %v792_v38 }
 0x156   : > { %831 = vmatmul.bf16.gmra.mxu0 %v4857_v35  ;;  %v6858_v43 = vshrl.u32 %v5827_v40, 16  ;;  %v6861_v45 = vshll.u32 %v5827_v40, 16  ;;  %v898_v47 = vmax.f32 %v793_v42, 0.0 }
 0x158   : > { %v1168_v44 = vrot.slane %v6858_v43, 7  ;;  %v950_v54 = vpack.c.bf16 %v898_v47, %v898_v47 }
 0x15a   : > { %v5836_v50 = vor.u32 %v6861_v45, %v1168_v44  ;;  %v1054_v60 = vunpack.c.l.b16 %v950_v54 }
 0x15b   : > { %v794_v51 = vpop.f32.mrf.mxu0 }
 0x15c   : > { %v795_v53 = vadd.f32 %v5727_v16, %v794_v51 }
 0x15e   : > { %v899_v56 = vmax.f32 %v795_v53, 0.0 }
 0x160   : > { %v951_v58 = vpack.c.bf16 %v899_v56, %v899_v56 }
 0x162   : > { %v1055_v63 = vunpack.c.l.b16 %v951_v58 }
 0x163   : > { %v797_v3 = vpop.f32.mrf.mxu0 }
 0x164   : > { %v5840_v5 = vpack.c.b16 %v1055_v63, %v1054_v60  ;;  %v798_v6 = vadd.f32 %v5727_v16, %v797_v3  ;;  %v4860_v3 = vld [vmem:[%s5679_s8 + $0x90] sm:$0xff] }
 0x166   : > { %836 = vmatmul.bf16.gmra.mxu0 %v4858_v1  ;;  %v6853_v7 = vshrl.u32 %v5840_v5, 16  ;;  %v6856_v9 = vshll.u32 %v5840_v5, 16  ;;  %v900_v10 = vmax.f32 %v798_v6, 0.0 }
 0x168   : > { %v1175_v8 = vrot.slane %v6853_v7, 7  ;;  %v952_v22 = vpack.c.bf16 %v900_v10, %v900_v10  ;;  %v4865_v7 = vld [vmem:[%s5679_s8 + $0xb8] sm:$0xff] }
 0x16a   : > { %v5849_v12 = vor.u32 %v6856_v9, %v1175_v8  ;;  %v1056_v26 = vunpack.c.l.b16 %v952_v22 }
 0x16b   : > { %v799_v15 = vpop.f32.mrf.mxu0 }
 0x16c   : > { %v800_v20 = vadd.f32 %v5727_v16, %v799_v15 }
 0x16e   : > { %v901_v24 = vmax.f32 %v800_v20, 0.0 }
 0x170   : > { %v953_v25 = vpack.c.bf16 %v901_v24, %v901_v24 }
 0x172   : > { %v1057_v27 = vunpack.c.l.b16 %v953_v25  ;;  %v4933_v25 = vld [vmem:[%s6836_s4 + $0x50] sm:$0xff] }
 0x173   : > { %v802_v29 = vpop.f32.mrf.mxu0  ;;  %2320 = vmatpush.bf16.msrb.mxu0 %v4933_v25  ;;  %5233 = vmatpush.bf16.msra.mxu2 %v4933_v25 }
 0x174   : > { %v5853_v31 = vpack.c.b16 %v1057_v27, %v1056_v26  ;;  %v803_v35 = vadd.f32 %v5727_v16, %v802_v29  ;;  %5234 = vmatpush.bf16.msra.mxu3 %v4933_v25  ;;  %5232 = vmatpush.bf16.msra.mxu1 %v4933_v25 }
 0x176   : > { %841 = vmatmul.bf16.gmra.mxu0 %v4859_v28  ;;  %v6851_v38 = vshrl.u32 %v5853_v31, 16  ;;  %v6854_v44 = vshll.u32 %v5853_v31, 16  ;;  %v902_v47 = vmax.f32 %v803_v35, 0.0 }
 0x178   : > { %v1182_v42 = vrot.slane %v6851_v38, 7  ;;  %v954_v56 = vpack.c.bf16 %v902_v47, %v902_v47 }
 0x17a   : > { %v5862_v51 = vor.u32 %v6854_v44, %v1182_v42  ;;  %v1058_v63 = vunpack.c.l.b16 %v954_v56  ;;  %v4932_v44 = vld [vmem:[%s6836_s4 + $0x48] sm:$0xff] }
 0x17b   : > { %v804_v53 = vpop.f32.mrf.mxu0  ;;  %2321 = vmatpush.bf16.msrb.mxu0 %v4932_v44  ;;  %5236 = vmatpush.bf16.msra.mxu2 %v4932_v44 }
 0x17c   : > { %v805_v54 = vadd.f32 %v5727_v16, %v804_v53  ;;  %5237 = vmatpush.bf16.msra.mxu3 %v4932_v44  ;;  %5235 = vmatpush.bf16.msra.mxu1 %v4932_v44 }
 0x17e   : > { %v903_v58 = vmax.f32 %v805_v54, 0.0  ;;  %v4861_v54 = vld [vmem:[%s5679_s8 + $0x98] sm:$0xff] }
 0x17f   : > { %5239 = vmatpush.bf16.msra.mxu2 %v4931_v59  ;;  %2322 = vmatpush.bf16.msrb.mxu0 %v4931_v59 }
 0x180   : > { %v955_v60 = vpack.c.bf16 %v903_v58, %v903_v58  ;;  %5240 = vmatpush.bf16.msra.mxu3 %v4931_v59  ;;  %5238 = vmatpush.bf16.msra.mxu1 %v4931_v59  ;;  %v4929_v59 = vld [vmem:[%s6836_s4 + $0x30] sm:$0xff] }
 0x182   : > { %v1059_v1 = vunpack.c.l.b16 %v955_v60 }
 0x183   : > { %v807_v6 = vpop.f32.mrf.mxu0 }
 0x184   : > { %v5866_v8 = vpack.c.b16 %v1059_v1, %v1058_v63  ;;  %v808_v10 = vadd.f32 %v5727_v16, %v807_v6 }
 0x186   : > { %846 = vmatmul.bf16.gmra.mxu0 %v4860_v3  ;;  %v6852_v15 = vshrl.u32 %v5866_v8, 16  ;;  %v6855_v22 = vshll.u32 %v5866_v8, 16  ;;  %v904_v24 = vmax.f32 %v808_v10, 0.0 }
 0x188   : > { %v1189_v20 = vrot.slane %v6852_v15, 7  ;;  %v956_v29 = vpack.c.bf16 %v904_v24, %v904_v24 }
 0x18a   : > { %v5878_v26 = vor.u32 %v6855_v22, %v1189_v20  ;;  %v1060_v47 = vunpack.c.l.b16 %v956_v29 }
 0x18b   : > { %v809_v27 = vpop.f32.mrf.mxu0 }
 0x18c   : > { %v810_v28 = vadd.f32 %v5727_v16, %v809_v27  ;;  %v1331_v27 = vsel %vm5980_vm6, 0, %v5794_v41 }
 0x18e   : > { %v905_v35 = vmax.f32 %v810_v28, 0.0 }
 0x190   : > { %v957_v42 = vpack.c.bf16 %v905_v35, %v905_v35 }
 0x192   : > { %v1061_v53 = vunpack.c.l.b16 %v957_v42 }
 0x193   : > { %v812_v56 = vpop.f32.mrf.mxu0 }
 0x194   : > { %v1101_v58 = vpack.c.b16 %v1061_v53, %v1060_v47  ;;  %v813_v60 = vadd.f32 %v5727_v16, %v812_v56  ;;  %v4862_v56 = vld [vmem:[%s5679_s8 + $0xa0] sm:$0xff] }
 0x196   : > { %851 = vmatmul.bf16.gmra.mxu0 %v4861_v54  ;;  %1482 = vrot.lane.b32.xlu0 %v1101_v58, %s5518_s23  ;;  %v1194_v63 = vshrl.u32 %v1101_v58, 16  ;;  %v1197_v1 = vshll.u32 %v1101_v58, 16  ;;  %v906_v10 = vmax.f32 %v813_v60, 0.0 }
 0x198   : > { %v1375_v3 = vrot.slane %v1197_v1, 1  ;;  %v1196_v6 = vrot.slane %v1194_v63, 7  ;;  %v958_v35 = vpack.c.bf16 %v906_v10, %v906_v10 }
 0x19a   : > { %v1376_v20 = vor.u32 %v1375_v3, %v1194_v63  ;;  %v5884_v24 = vor.u32 %v1197_v1, %v1196_v6  ;;  %v1062_v53 = vunpack.c.l.b16 %v958_v35 }
 0x19b   : > { %v814_v25 = vpop.f32.mrf.mxu0 }
 0x19c   : > { %v815_v28 = vadd.f32 %v5727_v16, %v814_v25  ;;  %v1445_v29 = vsel %vm5886_vm2, %v1376_v20, 0 }
 0x19e   : > { %v907_v42 = vmax.f32 %v815_v28, 0.0  ;;  %1560 = vrot.lane.b32.xlu0 %v1445_v29, %s5519_s11 }
 0x1a0   : > { %v959_v47 = vpack.c.bf16 %v907_v42, %v907_v42 }
 0x1a2   : > { %v1063_v54 = vunpack.c.l.b16 %v959_v47 }
 0x1a3   : > { %v817_v58 = vpop.f32.mrf.mxu0 }
 0x1a4   : > { %v1102_v60 = vpack.c.b16 %v1063_v54, %v1062_v53  ;;  %v818_v63 = vadd.f32 %v5727_v16, %v817_v58 }
 0x1a6   : > { %856 = vmatmul.bf16.gmra.mxu0 %v4862_v56  ;;  %1484 = vrot.lane.b32.xlu2 %v1102_v60, %s5518_s23  ;;  %v1201_v1 = vshrl.u32 %v1102_v60, 16  ;;  %v1204_v3 = vshll.u32 %v1102_v60, 16  ;;  %v908_v20 = vmax.f32 %v818_v63, 0.0  ;;  %v4863_v60 = vld [vmem:[%s5679_s8 + $0xa8] sm:$0xff] }
 0x1a8   : > { %v1377_v6 = vrot.slane %v1204_v3, 1  ;;  %v1203_v10 = vrot.slane %v1201_v1, 7  ;;  %v960_v47 = vpack.c.bf16 %v908_v20, %v908_v20 }
 0x1aa   : > { %v1378_v25 = vor.u32 %v1377_v6, %v1201_v1  ;;  %v5897_v28 = vor.u32 %v1204_v3, %v1203_v10  ;;  %v1064_v56 = vunpack.c.l.b16 %v960_v47 }
 0x1ab   : > { %v819_v29 = vpop.f32.mrf.mxu0 }
 0x1ac   : > { %v820_v35 = vadd.f32 %v5727_v16, %v819_v29  ;;  %v1446_v42 = vsel %vm5886_vm2, %v1378_v25, 0 }
 0x1ae   : > { %v909_v53 = vmax.f32 %v820_v35, 0.0  ;;  %1562 = vrot.lane.b32.xlu2 %v1446_v42, %s5519_s11 }
 0x1b0   : > { %v961_v54 = vpack.c.bf16 %v909_v53, %v909_v53 }
 0x1b2   : > { %v1065_v58 = vunpack.c.l.b16 %v961_v54  ;;  %v4864_v54 = vld [vmem:[%s5679_s8 + $0xb0] sm:$0xff] }
 0x1b3   : > { %v822_v38 = vpop.f32.mrf.mxu0 }
 0x1b4   : > { %v5904_v15 = vpack.c.b16 %v1065_v58, %v1064_v56  ;;  %v823_v63 = vadd.f32 %v5727_v16, %v822_v38 }
 0x1b6   : > { %861 = vmatmul.bf16.gmra.mxu0 %v4863_v60  ;;  %v1208_v1 = vshrl.u32 %v5904_v15, 16  ;;  %1486 = vrot.lane.b32.xlu2 %v5904_v15, %s5518_s23  ;;  %v1211_v6 = vshll.u32 %v5904_v15, 16  ;;  %v910_v10 = vmax.f32 %v823_v63, 0.0 }
 0x1b8   : > { %v1210_v3 = vrot.slane %v1208_v1, 7  ;;  %v962_v38 = vpack.c.bf16 %v910_v10, %v910_v10 }
 0x1ba   : > { %v5915_v20 = vor.u32 %v1211_v6, %v1210_v3  ;;  %v1066_v47 = vunpack.c.l.b16 %v962_v38 }
 0x1bb   : > { %v824_v25 = vpop.f32.mrf.mxu0 }
 0x1bc   : > { %v825_v29 = vadd.f32 %v5727_v16, %v824_v25 }
 0x1be   : > { %v911_v35 = vmax.f32 %v825_v29, 0.0 }
 0x1c0   : > { %v963_v42 = vpack.c.bf16 %v911_v35, %v911_v35 }
 0x1c2   : > { %v1067_v53 = vunpack.c.l.b16 %v963_v42 }
 0x1c3   : > { %v827_v56 = vpop.f32.mrf.mxu0 }
 0x1c4   : > { %v5919_v58 = vpack.c.b16 %v1067_v53, %v1066_v47  ;;  %v828_v60 = vadd.f32 %v5727_v16, %v827_v56 }
 0x1c6   : > { %866 = vmatmul.bf16.gmra.mxu0 %v4864_v54  ;;  %v1215_v63 = vshrl.u32 %v5919_v58, 16  ;;  %v1218_v3 = vshll.u32 %v5919_v58, 16  ;;  %v912_v10 = vmax.f32 %v828_v60, 0.0 }
 0x1c8   : > { %v1217_v25 = vrot.slane %v1215_v63, 7  ;;  %v964_v42 = vpack.c.bf16 %v912_v10, %v912_v10 }
 0x1ca   : > { %v5928_v29 = vor.u32 %v1218_v3, %v1217_v25  ;;  %v1068_v56 = vunpack.c.l.b16 %v964_v42 }
 0x1cb   : > { %v829_v38 = vpop.f32.mrf.mxu0 }
 0x1cc   : > { %v830_v35 = vadd.f32 %v5727_v16, %v829_v38 }
 0x1ce   : > { %v913_v47 = vmax.f32 %v830_v35, 0.0 }
 0x1d0   : > { %v965_v53 = vpack.c.bf16 %v913_v47, %v913_v47 }
 0x1d2   : > { %v1069_v54 = vunpack.c.l.b16 %v965_v53 }
 0x1d3   : > { %v832_v22 = vpop.f32.mrf.mxu0 }
 0x1d4   : > { %v5935_v60 = vpack.c.b16 %v1069_v54, %v1068_v56  ;;  %v833_v25 = vadd.f32 %v5727_v16, %v832_v22 }
 0x1d6   : > { %871 = vmatmul.bf16.gmra.mxu0 %v4865_v7  ;;  %v1222_v10 = vshrl.u32 %v5935_v60, 16  ;;  %v1225_v35 = vshll.u32 %v5935_v60, 16  ;;  %v914_v42 = vmax.f32 %v833_v25, 0.0 }
 0x1d8   : > { %v1224_v38 = vrot.slane %v1222_v10, 7  ;;  %v966_v54 = vpack.c.bf16 %v914_v42, %v914_v42 }
 0x1da   : > { %v5944_v47 = vor.u32 %v1225_v35, %v1224_v38  ;;  %v1070_v22 = vunpack.c.l.b16 %v966_v54 }
 0x1db   : > { %v834_v53 = vpop.f32.mrf.mxu0 }
 0x1dc   : > { %v835_v56 = vadd.f32 %v5727_v16, %v834_v53 }
 0x1de   : > { %v915_v44 = vmax.f32 %v835_v56, 0.0 }
 0x1e0   : > { %v967_v9 = vpack.c.bf16 %v915_v44, %v915_v44 }
 0x1e2   : > { %v1071_v7 = vunpack.c.l.b16 %v967_v9 }
 0x1e3   : > { %v837_v13 = vpop.f32.mrf.mxu0 }
 0x1e4   : > { %v5947_v43 = vpack.c.b16 %v1071_v7, %v1070_v22  ;;  %v838_v57 = vadd.f32 %v5727_v16, %v837_v13 }
 0x1e6   : > { %v6875_v18 = vshrl.u32 %v5947_v43, 16  ;;  %v1232_v38 = vshll.u32 %v5947_v43, 16  ;;  %v916_v45 = vmax.f32 %v838_v57, 0.0 }
 0x1e8   : > { %v1231_v25 = vrot.slane %v6875_v18, 7  ;;  %v968_v56 = vpack.c.bf16 %v916_v45, %v916_v45  ;;  %v4930_v45 = vld [vmem:[%s6836_s4 + $0x38] sm:$0xff] }
 0x1e9   : > { %5242 = vmatpush.bf16.msra.mxu2 %v4930_v45  ;;  %2323 = vmatpush.bf16.msrb.mxu0 %v4930_v45 }
 0x1ea   : > { %v5956_v42 = vor.u32 %v1232_v38, %v1231_v25  ;;  %v1072_v22 = vunpack.c.l.b16 %v968_v56  ;;  %5243 = vmatpush.bf16.msra.mxu3 %v4930_v45  ;;  %5241 = vmatpush.bf16.msra.mxu1 %v4930_v45 }
 0x1eb   : > { %v839_v53 = vpop.f32.mrf.mxu0 }
 0x1ec   : > { %v840_v9 = vadd.f32 %v5727_v16, %v839_v53 }
 0x1ed   : > { %5245 = vmatpush.bf16.msra.mxu2 %v4929_v59  ;;  %2324 = vmatpush.bf16.msrb.mxu0 %v4929_v59 }
 0x1ee   : > { %v917_v54 = vmax.f32 %v840_v9, 0.0  ;;  %5246 = vmatpush.bf16.msra.mxu3 %v4929_v59  ;;  %5244 = vmatpush.bf16.msra.mxu1 %v4929_v59 }
 0x1f0   : > { %v969_v44 = vpack.c.bf16 %v917_v54, %v917_v54 }
 0x1f2   : > { %v1073_v13 = vunpack.c.l.b16 %v969_v44 }
 0x1f3   : > { %v842_v7 = vpop.f32.mrf.mxu0 }
 0x1f4   : > { %v5962_v17 = vpack.c.b16 %v1073_v13, %v1072_v22  ;;  %v843_v57 = vadd.f32 %v5727_v16, %v842_v7 }
 0x1f6   : > { %v6873_v25 = vshrl.u32 %v5962_v17, 16  ;;  %v6874_v9 = vshll.u32 %v5962_v17, 16  ;;  %v918_v56 = vmax.f32 %v843_v57, 0.0 }
 0x1f8   : > { %v1238_v53 = vrot.slane %v6873_v25, 7  ;;  %v970_v13 = vpack.c.bf16 %v918_v56, %v918_v56 }
 0x1fa   : > { %v5974_v54 = vor.u32 %v6874_v9, %v1238_v53  ;;  %v1074_v48 = vunpack.c.l.b16 %v970_v13 }
 0x1fb   : > { %v844_v44 = vpop.f32.mrf.mxu0 }
 0x1fc   : > { %v845_v22 = vadd.f32 %v5727_v16, %v844_v44 }
 0x1fe   : > { %v919_v7 = vmax.f32 %v845_v22, 0.0  ;;  %v1339_v22 = vsel %vm5980_vm6, 0, %v5897_v28 }
 0x200   : > { %v971_v57 = vpack.c.bf16 %v919_v7, %v919_v7  ;;  %v1485_v37 = vpop.permute.xlu2 %1484 }
 0x201   : > { %v1629_v13 = vsel %vm1590_vm5, %v1339_v22, %v1485_v37 }
 0x202   : > { %v1075_v19 = vunpack.c.l.b16 %v971_v57 }
 0x203   : > { %v847_v45 = vpop.f32.mrf.mxu0 }
 0x204   : > { %v1108_v53 = vpack.c.b16 %v1075_v19, %v1074_v48  ;;  %v848_v44 = vadd.f32 %v5727_v16, %v847_v45 }
 0x206   : > { %1496 = vrot.lane.b32.xlu1 %v1108_v53, %s5518_s23  ;;  %v1243_v56 = vshrl.u32 %v1108_v53, 16  ;;  %v1246_v59 = vshll.u32 %v1108_v53, 16  ;;  %v920_v32 = vmax.f32 %v848_v44, 0.0 }
 0x208   : > { %v1563_v7 = vpop.permute.xlu2 %1562  ;;  %v1483_v48 = vpop.permute.xlu0 %1482  ;;  %v1389_v19 = vrot.slane %v1246_v59, 1  ;;  %v1245_v57 = vrot.slane %v1243_v56, 7  ;;  %v972_v22 = vpack.c.bf16 %v920_v32, %v920_v32 }
 0x209   : > { %v1695_v49 = vsel %vm1669_vm7, %v1629_v13, %v1563_v7 }
 0x20a   : > { %v1772_v0 = vunpack.c.l.b16 %v1695_v49  ;;  %v1773_v45 = vunpack.c.h.b16 %v1695_v49  ;;  %v1390_v33 = vor.u32 %v1389_v19, %v1243_v56  ;;  %v5991_v25 = vor.u32 %v1246_v59, %v1245_v57 }
 0x20b   : > { %v849_v2 = vpop.f32.mrf.mxu0  ;;  %v1338_v49 = vsel %vm5980_vm6, 0, %v5884_v24  ;;  %v1076_v59 = vunpack.c.l.b16 %v972_v22 }
 0x20c   : > { %v1824_v53 = vpack.c.b16 %v1772_v0, %v1772_v0  ;;  %v1825_v9 = vpack.c.b16 %v1773_v45, %v1773_v45  ;;  %v850_v28 = vadd.f32 %v5727_v16, %v849_v2  ;;  %v1452_v37 = vsel %vm5886_vm2, %v1390_v33, 0 }
 0x20d   : > { %v1626_v0 = vsel %vm1590_vm5, %v1338_v49, %v1483_v48 }
 0x20e   : > { %1929 = vst.msk [vmem:[#allocation2 + $0x60] sm:$0xf] %vm1904_vm8, %v1824_v53  ;;  %v921_v18 = vmax.f32 %v850_v28, 0.0  ;;  %1574 = vrot.lane.b32.xlu1 %v1452_v37, %s5519_s11 }
 0x20f   : > { %1930 = vst.msk [vmem:[#allocation2 + $0x64] sm:$0xf] %vm1904_vm8, %v1825_v9  ;;  %v1379_v9 = vrot.slane %v1211_v6, 1 }
 0x210   : > { %v973_v44 = vpack.c.bf16 %v921_v18, %v921_v18  ;;  %v1561_v56 = vpop.permute.xlu0 %1560 }
 0x211   : > { %v1693_v2 = vsel %vm1669_vm7, %v1626_v0, %v1561_v56  ;;  %v1380_v37 = vor.u32 %v1379_v9, %v1208_v1 }
 0x212   : > { %v1077_v33 = vunpack.c.l.b16 %v973_v44  ;;  %v1770_v32 = vunpack.c.l.b16 %v1693_v2  ;;  %v1771_v13 = vunpack.c.h.b16 %v1693_v2 }
 0x213   : > { %v852_v7 = vpop.f32.mrf.mxu0  ;;  %v1447_v2 = vsel %vm5886_vm2, %v1380_v37, 0 }
 0x214   : > { %v1822_v19 = vpack.c.b16 %v1770_v32, %v1770_v32  ;;  %v1823_v57 = vpack.c.b16 %v1771_v13, %v1771_v13  ;;  %v1109_v45 = vpack.c.b16 %v1077_v33, %v1076_v59  ;;  %v853_v24 = vadd.f32 %v5727_v16, %v852_v7 }
 0x216   : > { %1927 = vst.msk [vmem:[#allocation2 + $0x58] sm:$0xf] %vm1904_vm8, %v1822_v19  ;;  %1498 = vrot.lane.b32.xlu0 %v1109_v45, %s5518_s23  ;;  %v1250_v18 = vshrl.u32 %v1109_v45, 16  ;;  %v1253_v48 = vshll.u32 %v1109_v45, 16  ;;  %v922_v22 = vmax.f32 %v853_v24, 0.0 }
 0x217   : > { %1928 = vst.msk [vmem:[#allocation2 + $0x5c] sm:$0xf] %vm1904_vm8, %v1823_v57  ;;  %v1381_v57 = vrot.slane %v1218_v3, 1 }
 0x218   : > { %v1252_v53 = vrot.slane %v1250_v18, 7  ;;  %v1391_v28 = vrot.slane %v1253_v48, 1  ;;  %v974_v59 = vpack.c.bf16 %v922_v22, %v922_v22 }
 0x21a   : > { %v1392_v49 = vor.u32 %v1391_v28, %v1250_v18  ;;  %v6012_v0 = vor.u32 %v1253_v48, %v1252_v53  ;;  %v1078_v32 = vunpack.c.l.b16 %v974_v59  ;;  %v1382_v53 = vor.u32 %v1381_v57, %v1215_v63 }
 0x21b   : > { %v854_v6 = vpop.f32.mrf.mxu0 }
 0x21c   : > { %v855_v44 = vadd.f32 %v5727_v16, %v854_v6  ;;  %v1453_v56 = vsel %vm5886_vm2, %v1392_v49, 0 }
 0x21d   : > { %1576 = vrot.lane.b32.xlu1 %v1453_v56, %s5519_s11 }
 0x21e   : > { %v923_v33 = vmax.f32 %v855_v44, 0.0  ;;  %1564 = vrot.lane.b32.xlu0 %v1447_v2, %s5519_s11  ;;  %v4915_v15 = vld [vmem:[#allocation2 + $0x58] sm:$0xff]  ;;  %v1448_v44 = vsel %vm5886_vm2, %v1382_v53, 0 }
 0x21f   : > { %4490 = vmatmul.msk.bf16.vlgmr.msra.gmra.mxu2 %vm2244_vm9, %v4915_v15 }
 0x220   : > { %v975_v1 = vpack.c.bf16 %v923_v33, %v923_v33 }
 0x222   : > { %v1079_v13 = vunpack.c.l.b16 %v975_v1 }
 0x223   : > { %v857_v7 = vpop.f32.mrf.mxu0 }
 0x224   : > { %v1110_v19 = vpack.c.b16 %v1079_v13, %v1078_v32  ;;  %v858_v45 = vadd.f32 %v5727_v16, %v857_v7  ;;  %v1383_v32 = vrot.slane %v1225_v35, 1 }
 0x226   : > { %1500 = vrot.lane.b32.xlu1 %v1110_v19, %s5518_s23  ;;  %1488 = vrot.lane.b32.xlu0 %v5919_v58, %s5518_s23  ;;  %v1257_v9 = vshrl.u32 %v1110_v19, 16  ;;  %v1260_v24 = vshll.u32 %v1110_v19, 16  ;;  %v924_v28 = vmax.f32 %v858_v45, 0.0  ;;  %v4916_v58 = vld [vmem:[#allocation2 + $0x60] sm:$0xff] }
 0x228   : > { %v1259_v18 = vrot.slane %v1257_v9, 7  ;;  %v1393_v48 = vrot.slane %v1260_v24, 1  ;;  %v976_v56 = vpack.c.bf16 %v924_v28, %v924_v28 }
 0x22a   : > { %v1394_v37 = vor.u32 %v1393_v48, %v1257_v9  ;;  %v6030_v22 = vor.u32 %v1260_v24, %v1259_v18  ;;  %v1080_v59 = vunpack.c.l.b16 %v976_v56  ;;  %v1384_v9 = vor.u32 %v1383_v32, %v1222_v10 }
 0x22b   : > { %v859_v49 = vpop.f32.mrf.mxu0 }
 0x22c   : > { %v860_v3 = vadd.f32 %v5727_v16, %v859_v49  ;;  %v1454_v6 = vsel %vm5886_vm2, %v1394_v37, 0  ;;  %v1449_v37 = vsel %vm5886_vm2, %v1384_v9, 0 }
 0x22d   : > { %1578 = vrot.lane.b32.xlu2 %v1454_v6, %s5519_s11 }
 0x22e   : > { %v925_v2 = vmax.f32 %v860_v3, 0.0  ;;  %1566 = vrot.lane.b32.xlu1 %v1448_v44, %s5519_s11 }
 0x22f   : > { %4491 = vmatmul.msk.bf16.gmra.mxu2 %vm2244_vm9, %v4916_v58 }
 0x230   : > { %v977_v63 = vpack.c.bf16 %v925_v2, %v925_v2  ;;  %v1385_v2 = vrot.slane %v1232_v38, 1 }
 0x232   : > { %v1081_v33 = vunpack.c.l.b16 %v977_v63 }
 0x233   : > { %v862_v15 = vpop.f32.mrf.mxu0 }
 0x234   : > { %v1111_v1 = vpack.c.b16 %v1081_v33, %v1080_v59  ;;  %v863_v13 = vadd.f32 %v5727_v16, %v862_v15 }
 0x236   : > { %1490 = vrot.lane.b32.xlu1 %v5935_v60, %s5518_s23  ;;  %1502 = vrot.lane.b32.xlu2 %v1111_v1, %s5518_s23  ;;  %v1264_v7 = vshrl.u32 %v1111_v1, 16  ;;  %v1267_v19 = vshll.u32 %v1111_v1, 16  ;;  %v926_v24 = vmax.f32 %v863_v13, 0.0  ;;  %v6898_v1 = vshrl.u32 %v5947_v43, 16 }
 0x238   : > { %v1266_v57 = vrot.slane %v1264_v7, 7  ;;  %v1395_v45 = vrot.slane %v1267_v19, 1  ;;  %v978_v49 = vpack.c.bf16 %v926_v24, %v926_v24  ;;  %v1386_v32 = vor.u32 %v1385_v2, %v6898_v1 }
 0x23a   : > { %v1396_v18 = vor.u32 %v1395_v45, %v1264_v7  ;;  %v6048_v48 = vor.u32 %v1267_v19, %v1266_v57  ;;  %v1082_v10 = vunpack.c.l.b16 %v978_v49  ;;  %v1450_v9 = vsel %vm5886_vm2, %v1386_v32, 0 }
 0x23b   : > { %v864_v53 = vpop.f32.mrf.mxu0 }
 0x23c   : > { %v865_v35 = vadd.f32 %v5727_v16, %v864_v53  ;;  %v1455_v28 = vsel %vm5886_vm2, %v1396_v18, 0 }
 0x23d   : > { %1580 = vrot.lane.b32.xlu0 %v1455_v28, %s5519_s11 }
 0x23e   : > { %v927_v3 = vmax.f32 %v865_v35, 0.0  ;;  %1568 = vrot.lane.b32.xlu2 %v1449_v37, %s5519_s11 }
 0x240   : > { %v979_v60 = vpack.c.bf16 %v927_v3, %v927_v3  ;;  %v6079_v3 = vld [vmem:[%s6838_s6] ss:$0 sm:$0xff] }
 0x242   : > { %v1083_v6 = vunpack.c.l.b16 %v979_v60 }
 0x243   : > { %v867_v44 = vpop.f32.mrf.mxu0 }
 0x244   : > { %v1112_v56 = vpack.c.b16 %v1083_v6, %v1082_v10  ;;  %v868_v58 = vadd.f32 %v5727_v16, %v867_v44  ;;  %v4866_v44 = vld [vmem:[%s414_s18] sm:$0xff]  ;;  %s6923_s18 = sld [smem:[#allocation15_spill]] }
 0x245   : > { %876 = vmatmul.bf16.gmra.mxu0 %v4866_v44 }
 0x246   : > { %1492 = vrot.lane.b32.xlu2 %v5947_v43, %s5518_s23  ;;  %1504 = vrot.lane.b32.xlu0 %v1112_v56, %s5518_s23  ;;  %v1271_v63 = vshrl.u32 %v1112_v56, 16  ;;  %v1274_v59 = vshll.u32 %v1112_v56, 16  ;;  %v928_v13 = vmax.f32 %v868_v58, 0.0  ;;  %v6900_v58 = vshrl.u32 %v5962_v17, 16 }
 0x248   : > { %v1273_v33 = vrot.slane %v1271_v63, 7  ;;  %v1397_v15 = vrot.slane %v1274_v59, 1  ;;  %v980_v24 = vpack.c.bf16 %v928_v13, %v928_v13 }
 0x24a   : > { %v1398_v7 = vor.u32 %v1397_v15, %v1271_v63  ;;  %v6065_v19 = vor.u32 %v1274_v59, %v1273_v33  ;;  %v1084_v53 = vunpack.c.l.b16 %v980_v24  ;;  %s5252_s27 = smul.u32 192, %s6923_s18 }
 0x24b   : > { %v869_v57 = vpop.f32.mrf.mxu0 }
 0x24c   : > { %v870_v38 = vadd.f32 %v5727_v16, %v869_v57  ;;  %v1456_v45 = vsel %vm5886_vm2, %v1398_v7, 0  ;;  %v6899_v16 = vshll.u32 %v5962_v17, 16  ;;  %s4060_s10 = scalar_lea.hbm %s6924_s30, %s5252_s27 }
 0x24d   : > { %1582 = vrot.lane.b32.xlu1 %v1456_v45, %s5519_s11  ;;  %s4063_s15 = sshll.u32 %s4060_s10, 4  ;;  %s4064_s15 = int_to_ptr.hbm [resolvable:$true] %s4063_s15 }
 0x24e   : > { %v929_v18 = vmax.f32 %v870_v38, 0.0  ;;  %1570 = vrot.lane.b32.xlu0 %v1450_v9, %s5519_s11  ;;  %v1387_v49 = vrot.slane %v6899_v16, 1  ;;  %s5442_s26 = sshra.s32 %s4064_s15, 4  ;;  %s5443_s26 = int_to_ptr.hbm [resolvable:$true] %s5442_s26 }
 0x24f   : > { %s5444_s17 = scalar_lea.hbm %s5443_s26, 192 }
 0x250   : > { %v981_v43 = vpack.c.bf16 %v929_v18, %v929_v18  ;;  %v1388_v63 = vor.u32 %v1387_v49, %v6900_v58  ;;  %v6901_v18 = vshll.u32 %v5759_v62, 16  ;;  %p5445_p4 = scmp.ne.s32.totalorder %s5443_s26, %s5444_s17 }
 0x252   : > { %v1085_v35 = vunpack.c.l.b16 %v981_v43  ;;  %v1451_v7 = vsel %vm5886_vm2, %v1388_v63, 0  ;;  %v1357_v43 = vrot.slane %v6901_v18, 1  ;;  %v6910_v18 = vshrl.u32 %v5772_v14, 16  ;;  %p5446_p5 = pnand %p5445_p4, %p5622_p9 }
 0x253   : > { %v872_v28 = vpop.f32.mrf.mxu0 }
 0x254   : > { %v1113_v37 = vpack.c.b16 %v1085_v35, %v1084_v53  ;;  %v873_v60 = vadd.f32 %v6079_v3, %v872_v28  ;;  %v6902_v53 = vshll.u32 %v5733_v30, 16  ;;  %p5447_p6 = pneg %p5446_p5 }
 0x256   : > { %1506 = vrot.lane.b32.xlu1 %v1113_v37, %s5518_s23  ;;  %1494 = vrot.lane.b32.xlu0 %v5962_v17, %s5518_s23  ;;  %v1278_v10 = vshrl.u32 %v1113_v37, 16  ;;  %v1281_v6 = vshll.u32 %v1113_v37, 16  ;;  %v930_v59 = vmax.f32 %v873_v60, 0.0  ;;  %v1353_v35 = vrot.slane %v6902_v53, 1 }
 0x257   : > { %v6903_v60 = vshrl.u32 %v5759_v62, 16 }
 0x258   : > { %v1280_v56 = vrot.slane %v1278_v10, 7  ;;  %v1399_v2 = vrot.slane %v1281_v6, 1  ;;  %v982_v57 = vpack.c.bf16 %v930_v59, %v930_v59 }
 0x25a   : > { %v1400_v33 = vor.u32 %v1399_v2, %v1278_v10  ;;  %v6089_v15 = vor.u32 %v1281_v6, %v1280_v56  ;;  %v1086_v45 = vunpack.c.l.b16 %v982_v57  ;;  %v1358_v10 = vor.u32 %v1357_v43, %v6903_v60 }
 0x25b   : > { %v874_v1 = vpop.f32.mrf.mxu0  ;;  %v6904_v6 = vshrl.u32 %v5733_v30, 16 }
 0x25c   : > { %v875_v32 = vadd.f32 %v6079_v3, %v874_v1  ;;  %v1457_v13 = vsel %vm5886_vm2, %v1400_v33, 0  ;;  %v1436_v63 = vsel %vm5886_vm2, %v1358_v10, 0  ;;  %v4904_v33 = vld [vmem:[%s6836_s4 + $0x28] sm:$0xff] }
 0x25d   : > { %1584 = vrot.lane.b32.xlu2 %v1457_v13, %s5519_s11  ;;  %v1354_v44 = vor.u32 %v1353_v35, %v6904_v6  ;;  %2676 = vmatpush.bf16.msrb.mxu2 %v4904_v33  ;;  %v4963_v33 = vld [vmem:[%s6836_s4 + $0x80] sm:$0xff] }
 0x25e   : > { %v931_v38 = vmax.f32 %v875_v32, 0.0  ;;  %1572 = vrot.lane.b32.xlu1 %v1451_v7, %s5519_s11  ;;  %v6906_v32 = vshll.u32 %v5785_v34, 16  ;;  %v6907_v7 = vshll.u32 %v5772_v14, 16 }
 0x25f   : > { %v1434_v59 = vsel %vm5886_vm2, %v1354_v44, 0  ;;  %v6911_v44 = vshll.u32 %v5798_v55, 16 }
 0x260   : > { %v983_v17 = vpack.c.bf16 %v931_v38, %v931_v38  ;;  %v1361_v13 = vrot.slane %v6906_v32, 1  ;;  %v1359_v57 = vrot.slane %v6907_v7, 1  ;;  %v4964_v38 = vld [vmem:[%s6836_s4 + $0x88] sm:$0xff] }
 0x261   : > { %3095 = vmatpush.bf16.msrb.mxu3 %v4964_v38 }
 0x262   : > { %v1087_v9 = vunpack.c.l.b16 %v983_v17  ;;  %v1360_v43 = vor.u32 %v1359_v57, %v6910_v18  ;;  %v6916_v57 = vshrl.u32 %v5811_v11, 16 }
 0x264   : > { %v1114_v24 = vpack.c.b16 %v1087_v9, %v1086_v45  ;;  %v6908_v45 = vshrl.u32 %v5746_v46, 16  ;;  %v6909_v9 = vshrl.u32 %v5785_v34, 16 }
 0x265   : > { %3096 = vmatpush.bf16.msrb.mxu3 %v4963_v33  ;;  %v1347_v33 = vsel %vm5980_vm6, 0, %v6030_v22 }
 0x266   : > { %1508 = vrot.lane.b32.xlu2 %v1114_v24, %s5518_s23  ;;  %1460 = vrot.lane.b32.xlu1 %v5733_v30, %s5518_s23  ;;  %v1285_v28 = vshrl.u32 %v1114_v24, 16  ;;  %v1288_v37 = vshll.u32 %v1114_v24, 16  ;;  %v6905_v30 = vshll.u32 %v5746_v46, 16  ;;  %v1362_v24 = vor.u32 %v1361_v13, %v6909_v9 }
 0x267   : > { %v6915_v13 = vshrl.u32 %v5827_v40, 16  ;;  %v1346_v9 = vsel %vm5980_vm6, 0, %v6012_v0 }
 0x268   : > { %v1287_v16 = vrot.slane %v1285_v28, 7  ;;  %v1401_v49 = vrot.slane %v1288_v37, 1  ;;  %v1355_v1 = vrot.slane %v6905_v30, 1  ;;  %v1438_v35 = vsel %vm5886_vm2, %v1362_v24, 0 }
 0x269   : > { %v1340_v24 = vsel %vm5980_vm6, 0, %v5915_v20 }
 0x26a   : > { %v1402_v56 = vor.u32 %v1401_v49, %v1285_v28  ;;  %v6109_v2 = vor.u32 %v1288_v37, %v1287_v16  ;;  %v1437_v28 = vsel %vm5886_vm2, %v1360_v43, 0 }
 0x26c   : > { %v1458_v58 = vsel %vm5886_vm2, %v1402_v56, 0  ;;  %v1363_v56 = vrot.slane %v6911_v44, 1  ;;  %v6917_v44 = vshll.u32 %v5840_v5, 16 }
 0x26d   : > { %1586 = vrot.lane.b32.xlu0 %v1458_v58, %s5519_s11  ;;  %v6912_v58 = vshll.u32 %v5827_v40, 16 }
 0x26e   : > { %1542 = vrot.lane.b32.xlu1 %v1436_v63, %s5519_s11  ;;  %1538 = vrot.lane.b32.xlu2 %v1434_v59, %s5519_s11 }
 0x26f   : > { %v1367_v63 = vrot.slane %v6912_v58, 1  ;;  %v6918_v58 = vshll.u32 %v5866_v8, 16 }
 0x271   : > { %v1368_v7 = vor.u32 %v1367_v63, %v6915_v13  ;;  %v1373_v63 = vrot.slane %v6918_v58, 1 }
 0x275   : > { %1464 = vrot.lane.b32.xlu0 %v5759_v62, %s5518_s23  ;;  %v1356_v62 = vor.u32 %v1355_v1, %v6908_v45  ;;  %v6914_v1 = vshrl.u32 %v5798_v55, 16 }
 0x276   : > { %1466 = vrot.lane.b32.xlu1 %v5772_v14, %s5518_s23  ;;  %1462 = vrot.lane.b32.xlu2 %v5746_v46, %s5518_s23  ;;  %v1345_v46 = vsel %vm5980_vm6, 0, %v5991_v25  ;;  %v6913_v25 = vshll.u32 %v5811_v11, 16 }
 0x277   : > { %v1435_v53 = vsel %vm5886_vm2, %v1356_v62, 0  ;;  %v1364_v32 = vor.u32 %v1363_v56, %v6914_v1  ;;  %v1441_v62 = vsel %vm5886_vm2, %v1368_v7, 0  ;;  %v1369_v56 = vrot.slane %v6917_v44, 1 }
 0x278   : > { %v1497_v17 = vpop.permute.xlu1 %1496  ;;  %v1365_v59 = vrot.slane %v6913_v25, 1  ;;  %v6919_v25 = vshll.u32 %v5853_v31, 16  ;;  %v6920_v1 = vshrl.u32 %v5840_v5, 16  ;;  %v6921_v7 = vshrl.u32 %v5866_v8, 16 }
 0x279   : > { %v1647_v14 = vsel %vm1590_vm5, %v1345_v46, %v1497_v17  ;;  %v1487_v17 = vpop.permute.xlu2 %1486  ;;  %v1439_v45 = vsel %vm5886_vm2, %v1364_v32, 0 }
 0x27a   : > { %v1366_v38 = vor.u32 %v1365_v59, %v6916_v57  ;;  %v1371_v59 = vrot.slane %v6919_v25, 1  ;;  %v1370_v32 = vor.u32 %v1369_v56, %v6920_v1  ;;  %v1374_v57 = vor.u32 %v1373_v63, %v6921_v7 }
 0x27c   : > { %v1442_v22 = vsel %vm5886_vm2, %v1370_v32, 0 }
 0x27d   : > { %1540 = vrot.lane.b32.xlu0 %v1435_v53, %s5519_s11  ;;  %v1632_v53 = vsel %vm1590_vm5, %v1340_v24, %v1487_v17 }
 0x27e   : > { %1546 = vrot.lane.b32.xlu1 %v1438_v35, %s5519_s11  ;;  %1544 = vrot.lane.b32.xlu2 %v1437_v28, %s5519_s11 }
 0x280   : > { %v1575_v37 = vpop.permute.xlu1 %1574 }
 0x281   : > { %v1707_v16 = vsel %vm1669_vm7, %v1647_v14, %v1575_v37 }
 0x282   : > { %v1784_v49 = vunpack.c.l.b16 %v1707_v16  ;;  %v1785_v60 = vunpack.c.h.b16 %v1707_v16 }
 0x284   : > { %v1836_v10 = vpack.c.b16 %v1784_v49, %v1784_v49  ;;  %v1837_v6 = vpack.c.b16 %v1785_v60, %v1785_v60 }
 0x285   : > { %1468 = vrot.lane.b32.xlu0 %v5785_v34, %s5518_s23  ;;  %v4903_v34 = vld [vmem:[%s6836_s4 + $0x20] sm:$0xff] }
 0x286   : > { %1941 = vst.msk [vmem:[#allocation2 + $0x90] sm:$0xf] %vm1904_vm8, %v1836_v10  ;;  %1472 = vrot.lane.b32.xlu1 %v5811_v11, %s5518_s23  ;;  %1470 = vrot.lane.b32.xlu2 %v5798_v55, %s5518_s23  ;;  %v1440_v55 = vsel %vm5886_vm2, %v1366_v38, 0  ;;  %v6922_v38 = vshrl.u32 %v5853_v31, 16 }
 0x287   : > { %1942 = vst.msk [vmem:[#allocation2 + $0x94] sm:$0xf] %vm1904_vm8, %v1837_v6  ;;  %2677 = vmatpush.bf16.msrb.mxu2 %v4903_v34  ;;  %v1579_v49 = vpop.permute.xlu2 %1578  ;;  %v4902_v34 = vld [vmem:[%s6836_s4 + $0x18] sm:$0xff] }
 0x288   : > { %v1499_v30 = vpop.permute.xlu0 %1498  ;;  %v1372_v17 = vor.u32 %v1371_v59, %v6922_v38 }
 0x289   : > { %v1650_v18 = vsel %vm1590_vm5, %v1346_v9, %v1499_v30 }
 0x28b   : > { %2678 = vmatpush.bf16.msrb.mxu2 %v4902_v34 }
 0x28d   : > { %1548 = vrot.lane.b32.xlu0 %v1439_v45, %s5519_s11 }
 0x28e   : > { %1552 = vrot.lane.b32.xlu1 %v1441_v62, %s5519_s11  ;;  %1550 = vrot.lane.b32.xlu2 %v1440_v55, %s5519_s11  ;;  %v4922_v11 = vld [vmem:[#allocation2 + $0x90] sm:$0xff] }
 0x28f   : > { %v1577_v43 = vpop.permute.xlu1 %1576  ;;  %4497 = vmatmul.msk.bf16.vlgmr.msra.gmra.mxu3 %vm2244_vm9, %v4922_v11 }
 0x290   : > { %v1709_v35 = vsel %vm1669_vm7, %v1650_v18, %v1577_v43  ;;  %v1565_v28 = vpop.permute.xlu0 %1564  ;;  %v1503_v9 = vpop.permute.xlu2 %1502  ;;  %v1444_v18 = vsel %vm5886_vm2, %v1374_v57, 0 }
 0x291   : > { %v1786_v0 = vunpack.c.l.b16 %v1709_v35  ;;  %v1787_v46 = vunpack.c.h.b16 %v1709_v35  ;;  %v1697_v14 = vsel %vm1669_vm7, %v1632_v53, %v1565_v28  ;;  %v1341_v53 = vsel %vm5980_vm6, 0, %v5928_v29 }
 0x292   : > { %v1774_v37 = vunpack.c.l.b16 %v1697_v14  ;;  %v1775_v16 = vunpack.c.h.b16 %v1697_v14 }
 0x293   : > { %v1838_v60 = vpack.c.b16 %v1786_v0, %v1786_v0  ;;  %v1839_v10 = vpack.c.b16 %v1787_v46, %v1787_v46 }
 0x294   : > { %v1826_v20 = vpack.c.b16 %v1774_v37, %v1774_v37  ;;  %v1827_v6 = vpack.c.b16 %v1775_v16, %v1775_v16 }
 0x295   : > { %1943 = vst.msk [vmem:[#allocation2 + $0x98] sm:$0xf] %vm1904_vm8, %v1838_v60  ;;  %1474 = vrot.lane.b32.xlu0 %v5827_v40, %s5518_s23  ;;  %v4962_v40 = vld [vmem:[%s6836_s4 + $0x78] sm:$0xff]  ;;  %v1342_v60 = vsel %vm5980_vm6, 0, %v5944_v47  ;;  %v1348_v47 = vsel %vm5980_vm6, 0, %v6048_v48 }
 0x296   : > { %1944 = vst.msk [vmem:[#allocation2 + $0x9c] sm:$0xf] %vm1904_vm8, %v1839_v10  ;;  %1478 = vrot.lane.b32.xlu1 %v5853_v31, %s5518_s23  ;;  %1476 = vrot.lane.b32.xlu2 %v5840_v5, %s5518_s23  ;;  %v1443_v31 = vsel %vm5886_vm2, %v1372_v17, 0 }
 0x297   : > { %1931 = vst.msk [vmem:[#allocation2 + $0x68] sm:$0xf] %vm1904_vm8, %v1826_v20  ;;  %3097 = vmatpush.bf16.msrb.mxu3 %v4962_v40  ;;  %v4901_v20 = vld [vmem:[%s6836_s4 + $0x10] sm:$0xff]  ;;  %v1656_v40 = vsel %vm1590_vm5, %v1348_v47, %v1503_v9 }
 0x298   : > { %1932 = vst.msk [vmem:[#allocation2 + $0x6c] sm:$0xf] %vm1904_vm8, %v1827_v6  ;;  %v1501_v30 = vpop.permute.xlu1 %1500  ;;  %v1489_v24 = vpop.permute.xlu0 %1488  ;;  %v4961_v6 = vld [vmem:[%s6836_s4 + $0x70] sm:$0xff]  ;;  %2679 = vmatpush.bf16.msrb.mxu2 %v4901_v20 }
 0x299   : > { %v1653_v13 = vsel %vm1590_vm5, %v1347_v33, %v1501_v30  ;;  %v1635_v28 = vsel %vm1590_vm5, %v1341_v53, %v1489_v24  ;;  %v1569_v29 = vpop.permute.xlu2 %1568 }
 0x29a   : > { %v1711_v45 = vsel %vm1669_vm7, %v1653_v13, %v1579_v49 }
 0x29b   : > { %v1788_v62 = vunpack.c.l.b16 %v1711_v45  ;;  %v1789_v55 = vunpack.c.h.b16 %v1711_v45  ;;  %3098 = vmatpush.bf16.msrb.mxu3 %v4961_v6  ;;  %v1349_v45 = vsel %vm5980_vm6, 0, %v6065_v19  ;;  %v4899_v6 = vld [vmem:[%s6836_s4] sm:$0xff] }
 0x29d   : > { %v1840_v5 = vpack.c.b16 %v1788_v62, %v1788_v62  ;;  %v1841_v11 = vpack.c.b16 %v1789_v55, %v1789_v55  ;;  %1554 = vrot.lane.b32.xlu0 %v1442_v22, %s5519_s11  ;;  %v4923_v43 = vld [vmem:[#allocation2 + $0x98] sm:$0xff]  ;;  %v1343_v62 = vsel %vm5980_vm6, 0, %v5956_v42  ;;  %v4900_v42 = vld [vmem:[%s6836_s4 + $0x8] sm:$0xff] }
 0x29e   : > { %1558 = vrot.lane.b32.xlu1 %v1444_v18, %s5519_s11  ;;  %1556 = vrot.lane.b32.xlu2 %v1443_v31, %s5519_s11 }
 0x29f   : > { %1945 = vst.msk [vmem:[#allocation2 + $0xa0] sm:$0xf] %vm1904_vm8, %v1840_v5  ;;  %v4917_v35 = vld [vmem:[#allocation2 + $0x68] sm:$0xff]  ;;  %4498 = vmatmul.msk.bf16.gmra.mxu3 %vm2244_vm9, %v4923_v43  ;;  %2680 = vmatpush.bf16.msrb.mxu2 %v4900_v42 }
 0x2a0   : > { %1946 = vst.msk [vmem:[#allocation2 + $0xa4] sm:$0xf] %vm1904_vm8, %v1841_v11  ;;  %v1567_v0 = vpop.permute.xlu1 %1566  ;;  %4492 = vmatmul.msk.bf16.gmra.mxu2 %vm2244_vm9, %v4917_v35  ;;  %v4960_v35 = vld [vmem:[%s6836_s4 + $0x68] sm:$0xff] }
 0x2a1   : > { %v1699_v46 = vsel %vm1669_vm7, %v1635_v28, %v1567_v0  ;;  %v1493_v1 = vpop.permute.xlu2 %1492  ;;  %3099 = vmatpush.bf16.msrb.mxu3 %v4960_v35  ;;  %v5520_v35 = vmov 0  }
 0x2a2   : > { %v1776_v14 = vunpack.c.l.b16 %v1699_v46  ;;  %v1777_v37 = vunpack.c.h.b16 %v1699_v46  ;;  %v1641_v5 = vsel %vm1590_vm5, %v1343_v62, %v1493_v1 }
 0x2a3   : > { %2681 = vmatpush.bf16.msrb.mxu2 %v4899_v6  ;;  %v1330_v6 = vsel %vm5980_vm6, 0, %v5781_v21 }
 0x2a4   : > { %v1828_v16 = vpack.c.b16 %v1776_v14, %v1776_v14  ;;  %v1829_v49 = vpack.c.b16 %v1777_v37, %v1777_v37 }
 0x2a5   : > { %1480 = vrot.lane.b32.xlu0 %v5866_v8, %s5518_s23 }
 0x2a6   : > { %1933 = vst.msk [vmem:[#allocation2 + $0x70] sm:$0xf] %vm1904_vm8, %v1828_v16  ;;  %v1350_v16 = vsel %vm5980_vm6, 0, %v6089_v15  ;;  %v1344_v15 = vsel %vm5980_vm6, 0, %v5974_v54 }
 0x2a7   : > { %1934 = vst.msk [vmem:[#allocation2 + $0x74] sm:$0xf] %vm1904_vm8, %v1829_v49  ;;  %v4924_v34 = vld [vmem:[#allocation2 + $0xa0] sm:$0xff] }
 0x2a8   : > { %v1491_v10 = vpop.permute.xlu1 %1490 }
 0x2a9   : > { %v1638_v8 = vsel %vm1590_vm5, %v1342_v60, %v1491_v10 }
 0x2aa   : > { %v1701_v44 = vsel %vm1669_vm7, %v1638_v8, %v1569_v29 }
 0x2ab   : > { %v1778_v56 = vunpack.c.l.b16 %v1701_v44  ;;  %v1779_v58 = vunpack.c.h.b16 %v1701_v44 }
 0x2ad   : > { %v1830_v63 = vpack.c.b16 %v1778_v56, %v1778_v56  ;;  %v1831_v25 = vpack.c.b16 %v1779_v58, %v1779_v58 }
 0x2ae   : > { %v4918_v59 = vld [vmem:[#allocation2 + $0x70] sm:$0xff] }
 0x2af   : > { %1935 = vst.msk [vmem:[#allocation2 + $0x78] sm:$0xf] %vm1904_vm8, %v1830_v63  ;;  %v1581_v33 = vpop.permute.xlu0 %1580  ;;  %4499 = vmatmul.msk.bf16.gmra.mxu3 %vm2244_vm9, %v4924_v34 }
 0x2b0   : > { %1936 = vst.msk [vmem:[#allocation2 + $0x7c] sm:$0xf] %vm1904_vm8, %v1831_v25  ;;  %v1713_v30 = vsel %vm1669_vm7, %v1656_v40, %v1581_v33  ;;  %4493 = vmatmul.msk.bf16.gmra.mxu2 %vm2244_vm9, %v4918_v59  ;;  %v4959_v40 = vld [vmem:[%s6836_s4 + $0x60] sm:$0xff] }
 0x2b1   : > { %v1790_v32 = vunpack.c.l.b16 %v1713_v30  ;;  %v1791_v13 = vunpack.c.h.b16 %v1713_v30  ;;  %3100 = vmatpush.bf16.msrb.mxu3 %v4959_v40 }
 0x2b3   : > { %v1842_v7 = vpack.c.b16 %v1790_v32, %v1790_v32  ;;  %v1843_v48 = vpack.c.b16 %v1791_v13, %v1791_v13 }
 0x2b5   : > { %1947 = vst.msk [vmem:[#allocation2 + $0xa8] sm:$0xf] %vm1904_vm8, %v1842_v7 }
 0x2b6   : > { %1948 = vst.msk [vmem:[#allocation2 + $0xac] sm:$0xf] %vm1904_vm8, %v1843_v48 }
 0x2b7   : > { %v1585_v38 = vpop.permute.xlu2 %1584  ;;  %v4919_v9 = vld [vmem:[#allocation2 + $0x78] sm:$0xff] }
 0x2b8   : > { %v1505_v57 = vpop.permute.xlu0 %1504 }
 0x2b9   : > { %v1659_v55 = vsel %vm1590_vm5, %v1349_v45, %v1505_v57  ;;  %v1327_v57 = vsel %vm5980_vm6, 0, %v5742_v36 }
 0x2bd   : > { %v4925_v17 = vld [vmem:[#allocation2 + $0xa8] sm:$0xff] }
 0x2bf   : > { %v1583_v22 = vpop.permute.xlu1 %1582  ;;  %4500 = vmatmul.msk.bf16.gmra.mxu3 %vm2244_vm9, %v4925_v17 }
 0x2c0   : > { %v1715_v11 = vsel %vm1669_vm7, %v1659_v55, %v1583_v22  ;;  %v1571_v24 = vpop.permute.xlu0 %1570  ;;  %4494 = vmatmul.msk.bf16.gmra.mxu2 %vm2244_vm9, %v4919_v9  ;;  %v1509_v46 = vpop.permute.xlu2 %1508 }
 0x2c1   : > { %v1792_v18 = vunpack.c.l.b16 %v1715_v11  ;;  %v1793_v31 = vunpack.c.h.b16 %v1715_v11  ;;  %v1703_v43 = vsel %vm1669_vm7, %v1641_v5, %v1571_v24  ;;  %v1351_v5 = vsel %vm5980_vm6, 0, %v6109_v2 }
 0x2c2   : > { %v1780_v19 = vunpack.c.l.b16 %v1703_v43  ;;  %v1781_v53 = vunpack.c.h.b16 %v1703_v43  ;;  %v877_v32 = vpop.f32.mrf.mxu0 }
 0x2c3   : > { %v1844_v28 = vpack.c.b16 %v1792_v18, %v1792_v18  ;;  %v1845_v0 = vpack.c.b16 %v1793_v31, %v1793_v31  ;;  %v878_v7 = vadd.f32 %v6079_v3, %v877_v32  ;;  %v1665_v31 = vsel %vm1590_vm5, %v1351_v5, %v1509_v46 }
 0x2c4   : > { %v1832_v14 = vpack.c.b16 %v1780_v19, %v1780_v19  ;;  %v1833_v37 = vpack.c.b16 %v1781_v53, %v1781_v53 }
 0x2c5   : > { %1949 = vst.msk [vmem:[#allocation2 + $0xb0] sm:$0xf] %vm1904_vm8, %v1844_v28  ;;  %v932_v55 = vmax.f32 %v878_v7, 0.0 }
 0x2c6   : > { %1950 = vst.msk [vmem:[#allocation2 + $0xb4] sm:$0xf] %vm1904_vm8, %v1845_v0 }
 0x2c7   : > { %1937 = vst.msk [vmem:[#allocation2 + $0x80] sm:$0xf] %vm1904_vm8, %v1832_v14  ;;  %v984_v43 = vpack.c.bf16 %v932_v55, %v932_v55 }
 0x2c8   : > { %1938 = vst.msk [vmem:[#allocation2 + $0x84] sm:$0xf] %vm1904_vm8, %v1833_v37  ;;  %v1507_v49 = vpop.permute.xlu1 %1506  ;;  %v1495_v56 = vpop.permute.xlu0 %1494 }
 0x2c9   : > { %v1662_v29 = vsel %vm1590_vm5, %v1350_v16, %v1507_v49  ;;  %v1539_v58 = vpop.permute.xlu2 %1538  ;;  %v1644_v47 = vsel %vm1590_vm5, %v1344_v15, %v1495_v56  ;;  %v1088_v37 = vunpack.c.l.b16 %v984_v43 }
 0x2ca   : > { %v1717_v60 = vsel %vm1669_vm7, %v1662_v29, %v1585_v38  ;;  %v879_v18 = vpop.f32.mrf.mxu0 }
 0x2cb   : > { %v1794_v10 = vunpack.c.l.b16 %v1717_v60  ;;  %v1795_v20 = vunpack.c.h.b16 %v1717_v60  ;;  %v880_v19 = vadd.f32 %v6079_v3, %v879_v18  ;;  %v1329_v60 = vsel %vm5980_vm6, 0, %v5768_v4 }
 0x2cd   : > { %v1846_v8 = vpack.c.b16 %v1794_v10, %v1794_v10  ;;  %v1847_v44 = vpack.c.b16 %v1795_v20, %v1795_v20  ;;  %v4926_v63 = vld [vmem:[#allocation2 + $0xb0] sm:$0xff]  ;;  %v933_v46 = vmax.f32 %v880_v19, 0.0 }
 0x2cf   : > { %1951 = vst.msk [vmem:[#allocation2 + $0xb8] sm:$0xf] %vm1904_vm8, %v1846_v8  ;;  %v4920_v25 = vld [vmem:[#allocation2 + $0x80] sm:$0xff]  ;;  %4501 = vmatmul.msk.bf16.gmra.mxu3 %vm2244_vm9, %v4926_v63  ;;  %v985_v16 = vpack.c.bf16 %v933_v46, %v933_v46 }
 0x2d0   : > { %1952 = vst.msk [vmem:[#allocation2 + $0xbc] sm:$0xf] %vm1904_vm8, %v1847_v44  ;;  %v1573_v59 = vpop.permute.xlu1 %1572  ;;  %4495 = vmatmul.msk.bf16.gmra.mxu2 %vm2244_vm9, %v4920_v25 }
 0x2d1   : > { %v1705_v34 = vsel %vm1669_vm7, %v1644_v47, %v1573_v59  ;;  %v6325_v13 = vpop.permute.xlu2 %1462  ;;  %v1089_v49 = vunpack.c.l.b16 %v985_v16 }
 0x2d2   : > { %v1782_v33 = vunpack.c.l.b16 %v1705_v34  ;;  %v1783_v30 = vunpack.c.h.b16 %v1705_v34 }
 0x2d3   : > { %v6352_v10 = vpack.c.b16 %v1089_v49, %v1088_v37  ;;  %v6396_v37 = vpop.f32.mrf.mxu2 }
 0x2d4   : > { %v1834_v54 = vpack.c.b16 %v1782_v33, %v1782_v33  ;;  %v1835_v1 = vpack.c.b16 %v1783_v30, %v1783_v30 }
 0x2d5   : > { %1510 = vrot.lane.b32.xlu2 %v6352_v10, %s5518_s23  ;;  %v1292_v34 = vshrl.u32 %v6352_v10, 16  ;;  %s6925_s23 = smov %s6924_s30 }
 0x2d6   : > { %1939 = vst.msk [vmem:[#allocation2 + $0x88] sm:$0xf] %vm1904_vm8, %v1834_v54  ;;  %s5448_s24 = scalar_lea.hbm %s6925_s23, 384  ;;  %p5449_p7 = scmp.lt.s32.totalorder %s5443_s26, %s6925_s23 }
 0x2d7   : > { %1940 = vst.msk [vmem:[#allocation2 + $0x8c] sm:$0xf] %vm1904_vm8, %v1835_v1  ;;  %v4927_v24 = vld [vmem:[#allocation2 + $0xb8] sm:$0xff]  ;;  %p5450_p8 = scmp.lt.s32.totalorder %s5448_s24, %s5444_s17 }
 0x2d8   : > { %v1461_v48 = vpop.permute.xlu1 %1460 }
 0x2d9   : > { %v1593_v38 = vsel %vm1590_vm5, %v1327_v57, %v1461_v48  ;;  %v1545_v2 = vpop.permute.xlu2 %1544  ;;  %v1328_v48 = vsel %vm5980_vm6, 0, %v5755_v52  ;;  %p5451_p10 = por %p5450_p8, %p5449_p7 }
 0x2da   : > { %v1671_v17 = vsel %vm1669_vm7, %v1593_v38, %v1539_v58  ;;  %v1295_v58 = vshll.u32 %v6352_v10, 16  ;;  %v1596_v57 = vsel %vm1590_vm5, %v1328_v48, %v6325_v13 }
 0x2db   : > { %v1748_v45 = vunpack.c.l.b16 %v1671_v17  ;;  %v1749_v62 = vunpack.c.h.b16 %v1671_v17  ;;  %p5452_p13 = pnand %p5451_p10, %p5447_p6 }
 0x2dc   : > { %v1403_v21 = vrot.slane %v1295_v58, 1 }
 0x2dd   : > { %v1800_v22 = vpack.c.b16 %v1748_v45, %v1748_v45  ;;  %v1801_v9 = vpack.c.b16 %v1749_v62, %v1749_v62 }
 0x2de   : > { %v4921_v11 = vld [vmem:[#allocation2 + $0x88] sm:$0xff]  ;;  %v1404_v7 = vor.u32 %v1403_v21, %v1292_v34 }
 0x2df   : > { %1905 = vst.msk [vmem:[#allocation2] sm:$0xf] %vm1904_vm8, %v1800_v22  ;;  %v1587_v36 = vpop.permute.xlu0 %1586  ;;  %4502 = vmatmul.msk.bf16.gmra.mxu3 %vm2244_vm9, %v4927_v24  ;;  %v1333_v24 = vsel %vm5980_vm6, 0, %v5823_v23  ;;  %v1332_v23 = vsel %vm5980_vm6, 0, %v5807_v61 }
 0x2e0   : > { %1906 = vst.msk [vmem:[#allocation2 + $0x4] sm:$0xf] %vm1904_vm8, %v1801_v9  ;;  %v1719_v53 = vsel %vm1669_vm7, %v1665_v31, %v1587_v36  ;;  %v1543_v42 = vpop.permute.xlu1 %1542  ;;  %4496 = vmatmul.msk.bf16.gmra.mxu2 %vm2244_vm9, %v4921_v11  ;;  %v1459_v17 = vsel %vm5886_vm2, %v1404_v7, 0 }
 0x2e1   : > { %1961 = vst.msk [vmem:[#allocation2] sm:$0xf] %vm1904_vm8, %v5520_v35  ;;  %v1796_v28 = vunpack.c.l.b16 %v1719_v53  ;;  %v1797_v0 = vunpack.c.h.b16 %v1719_v53  ;;  %v1471_v25 = vpop.permute.xlu2 %1470  ;;  %1588 = vrot.lane.b32.xlu0 %v1459_v17, %s5519_s11 }
 0x2e2   : > { %1962 = vst.msk [vmem:[#allocation2 + $0x4] sm:$0xf] %vm1904_vm8, %v5520_v35  ;;  %v1608_v49 = vsel %vm1590_vm5, %v1332_v23, %v1471_v25  ;;  %v6415_v25 = vpop.f32.mrf.mxu2 }
 0x2e3   : > { %v1848_v3 = vpack.c.b16 %v1796_v28, %v1796_v28  ;;  %v1849_v14 = vpack.c.b16 %v1797_v0, %v1797_v0 }
 0x2e5   : > { %1953 = vst.msk [vmem:[#allocation2 + $0xc0] sm:$0xf] %vm1904_vm8, %v1848_v3 }
 0x2e6   : > { %1954 = vst.msk [vmem:[#allocation2 + $0xc4] sm:$0xf] %vm1904_vm8, %v1849_v14 }
 0x2e7   : > { %v1465_v29 = vpop.permute.xlu0 %1464 }
 0x2e8   : > { %v1599_v20 = vsel %vm1590_vm5, %v1329_v60, %v1465_v29  ;;  %v1467_v8 = vpop.permute.xlu1 %1466 }
 0x2e9   : > { %v1675_v44 = vsel %vm1669_vm7, %v1599_v20, %v1543_v42  ;;  %v1602_v56 = vsel %vm1590_vm5, %v1330_v6, %v1467_v8  ;;  %v4875_v32 = vld [vmem:[#allocation2] sm:$0xff]  ;;  %v1551_v9 = vpop.permute.xlu2 %1550 }
 0x2ea   : > { %v1752_v63 = vunpack.c.l.b16 %v1675_v44  ;;  %v1753_v4 = vunpack.c.h.b16 %v1675_v44  ;;  %v1677_v15 = vsel %vm1669_vm7, %v1602_v56, %v1545_v2 }
 0x2eb   : > { %v1754_v47 = vunpack.c.l.b16 %v1677_v15  ;;  %v1755_v59 = vunpack.c.h.b16 %v1677_v15 }
 0x2ec   : > { %v1804_v40 = vpack.c.b16 %v1752_v63, %v1752_v63  ;;  %v1805_v33 = vpack.c.b16 %v1753_v4, %v1753_v4  ;;  %v1334_v4 = vsel %vm5980_vm6, 0, %v5836_v50 }
 0x2ed   : > { %v1806_v30 = vpack.c.b16 %v1754_v47, %v1754_v47  ;;  %v1807_v54 = vpack.c.b16 %v1755_v59, %v1755_v59  ;;  %v4928_v1 = vld [vmem:[#allocation2 + $0xc0] sm:$0xff]  ;;  %v1336_v59 = vsel %vm5980_vm6, 0, %v5862_v51 }
 0x2ee   : > { %1909 = vst.msk [vmem:[#allocation2 + $0x10] sm:$0xf] %vm1904_vm8, %v1804_v40  ;;  %v4966_v40 = vld [vmem:[%s6837_s5 + $0x8] sm:$0xff] }
 0x2ef   : > { %1910 = vst.msk [vmem:[#allocation2 + $0x14] sm:$0xf] %vm1904_vm8, %v1805_v33  ;;  %v1541_v38 = vpop.permute.xlu0 %1540  ;;  %4503 = vmatmul.msk.bf16.gmra.mxu3 %vm2244_vm9, %v4928_v1  ;;  %3730 = vmatpush.bf16.msrb.mxu1 %v4966_v40 }
 0x2f0   : > { %1911 = vst.msk [vmem:[#allocation2 + $0x18] sm:$0xf] %vm1904_vm8, %v1806_v30  ;;  %v1673_v45 = vsel %vm1669_vm7, %v1596_v57, %v1541_v38  ;;  %v1547_v62 = vpop.permute.xlu1 %1546  ;;  %4624 = vmatmul.msk.bf16.vlgmr.msrb.gmra.mxu2 %vm2244_vm9, %v4875_v32 }
 0x2f1   : > { %1912 = vst.msk [vmem:[#allocation2 + $0x1c] sm:$0xf] %vm1904_vm8, %v1807_v54  ;;  %v1750_v52 = vunpack.c.l.b16 %v1673_v45  ;;  %v1751_v55 = vunpack.c.h.b16 %v1673_v45  ;;  %v1477_v29 = vpop.permute.xlu2 %1476 }
 0x2f3   : > { %v1802_v13 = vpack.c.b16 %v1750_v52, %v1750_v52  ;;  %v1803_v22 = vpack.c.b16 %v1751_v55, %v1751_v55 }
 0x2f5   : > { %1907 = vst.msk [vmem:[#allocation2 + $0x8] sm:$0xf] %vm1904_vm8, %v1802_v13 }
 0x2f6   : > { %1908 = vst.msk [vmem:[#allocation2 + $0xc] sm:$0xf] %vm1904_vm8, %v1803_v22  ;;  %v4935_v16 = vld [vmem:[#allocation2 + $0x10] sm:$0xff] }
 0x2f7   : > { %v1469_v5 = vpop.permute.xlu0 %1468  ;;  %v4906_v45 = vld [vmem:[#allocation2 + $0x10] sm:$0xff] }
 0x2f8   : > { %v1605_v11 = vsel %vm1590_vm5, %v1331_v27, %v1469_v5  ;;  %v1473_v18 = vpop.permute.xlu1 %1472  ;;  %v4936_v52 = vld [vmem:[#allocation2 + $0x18] sm:$0xff]  ;;  %v4877_v22 = vld [vmem:[#allocation2 + $0x10] sm:$0xff]  ;;  %v6440_v5 = vpop.f32.mrf.mxu2 }
 0x2f9   : > { %v1679_v31 = vsel %vm1669_vm7, %v1605_v11, %v1547_v62  ;;  %v1611_v36 = vsel %vm1590_vm5, %v1333_v24, %v1473_v18  ;;  %v1557_v33 = vpop.permute.xlu2 %1556  ;;  %v1335_v62 = vsel %vm5980_vm6, 0, %v5849_v12  ;;  %v4878_v23 = vld [vmem:[#allocation2 + $0x18] sm:$0xff] }
 0x2fa   : > { %v1756_v43 = vunpack.c.l.b16 %v1679_v31  ;;  %v1757_v19 = vunpack.c.h.b16 %v1679_v31  ;;  %v1683_v53 = vsel %vm1669_vm7, %v1611_v36, %v1551_v9  ;;  %v1617_v55 = vsel %vm1590_vm5, %v1335_v62, %v1477_v29 }
 0x2fb   : > { %v1760_v42 = vunpack.c.l.b16 %v1683_v53  ;;  %v1761_v2 = vunpack.c.h.b16 %v1683_v53  ;;  %v1337_v36 = vsel %vm5980_vm6, 0, %v5878_v26 }
 0x2fc   : > { %v1808_v28 = vpack.c.b16 %v1756_v43, %v1756_v43  ;;  %v1809_v41 = vpack.c.b16 %v1757_v19, %v1757_v19 }
 0x2fd   : > { %v1812_v0 = vpack.c.b16 %v1760_v42, %v1760_v42  ;;  %v1813_v46 = vpack.c.b16 %v1761_v2, %v1761_v2  ;;  %v4905_v3 = vld [vmem:[#allocation2 + $0x8] sm:$0xff] }
 0x2fe   : > { %v4876_v14 = vld [vmem:[#allocation2 + $0x8] sm:$0xff]  ;;  %1913 = vst.msk [vmem:[#allocation2 + $0x20] sm:$0xf] %vm1904_vm8, %v1808_v28  ;;  %4480 = vmatmul.msk.bf16.vlgmr.msrb.gmra.mxu0 %vm2244_vm9, %v4905_v3 }
 0x2ff   : > { %1914 = vst.msk [vmem:[#allocation2 + $0x24] sm:$0xf] %vm1904_vm8, %v1809_v41  ;;  %v1549_v60 = vpop.permute.xlu0 %1548  ;;  %4780 = vmatmul.msk.bf16.vlgmr.msrb.gmra.mxu3 %vm2244_vm9, %v4935_v16 }
 0x300   : > { %1917 = vst.msk [vmem:[#allocation2 + $0x30] sm:$0xf] %vm1904_vm8, %v1812_v0  ;;  %v1681_v20 = vsel %vm1669_vm7, %v1608_v49, %v1549_v60  ;;  %v1553_v6 = vpop.permute.xlu1 %1552  ;;  %4625 = vmatmul.msk.bf16.gmra.mxu2 %vm2244_vm9, %v4876_v14  ;;  %v6454_v0 = vpop.f32.mrf.mxu2  ;;  %v4907_v14 = vld [vmem:[#allocation2 + $0x18] sm:$0xff] }
 0x301   : > { %1918 = vst.msk [vmem:[#allocation2 + $0x34] sm:$0xf] %vm1904_vm8, %v1813_v46  ;;  %v1758_v61 = vunpack.c.l.b16 %v1681_v20  ;;  %v1759_v8 = vunpack.c.h.b16 %v1681_v20 }
 0x303   : > { %v1810_v44 = vpack.c.b16 %v1758_v61, %v1758_v61  ;;  %v1811_v56 = vpack.c.b16 %v1759_v8, %v1759_v8 }
 0x305   : > { %1915 = vst.msk [vmem:[#allocation2 + $0x28] sm:$0xf] %vm1904_vm8, %v1810_v44 }
 0x306   : > { %1916 = vst.msk [vmem:[#allocation2 + $0x2c] sm:$0xf] %vm1904_vm8, %v1811_v56  ;;  %v4908_v63 = vld [vmem:[#allocation2 + $0x20] sm:$0xff] }
 0x307   : > { %v1475_v15 = vpop.permute.xlu0 %1474  ;;  %4483 = vmatmul.msk.bf16.vlgmr.msra.gmra.mxu1 %vm2244_vm9, %v4908_v63  ;;  %v4937_v26 = vld [vmem:[#allocation2 + $0x20] sm:$0xff] }
 0x308   : > { %v1614_v47 = vsel %vm1590_vm5, %v1334_v4, %v1475_v15  ;;  %v1479_v21 = vpop.permute.xlu1 %1478  ;;  %v4910_v29 = vld [vmem:[#allocation2 + $0x30] sm:$0xff]  ;;  %v4879_v61 = vld [vmem:[#allocation2 + $0x20] sm:$0xff] }
 0x309   : > { %v1685_v30 = vsel %vm1669_vm7, %v1614_v47, %v1553_v6  ;;  %v1620_v50 = vsel %vm1590_vm5, %v1336_v59, %v1479_v21  ;;  %v4939_v15 = vld [vmem:[#allocation2 + $0x30] sm:$0xff]  ;;  %v4965_v59 = vld [vmem:[%s6837_s5] sm:$0xff] }
 0x30a   : > { %v1762_v54 = vunpack.c.l.b16 %v1685_v30  ;;  %v1763_v1 = vunpack.c.h.b16 %v1685_v30  ;;  %v1689_v32 = vsel %vm1669_vm7, %v1620_v50, %v1557_v33  ;;  %3731 = vmatpush.bf16.msrb.mxu1 %v4965_v59 }
 0x30b   : > { %v1766_v7 = vunpack.c.l.b16 %v1689_v32  ;;  %v1767_v48 = vunpack.c.h.b16 %v1689_v32 }
 0x30c   : > { %v1814_v57 = vpack.c.b16 %v1762_v54, %v1762_v54  ;;  %v1815_v38 = vpack.c.b16 %v1763_v1, %v1763_v1  ;;  %v4881_v1 = vld [vmem:[#allocation2 + $0x30] sm:$0xff] }
 0x30d   : > { %v1818_v51 = vpack.c.b16 %v1766_v7, %v1766_v7  ;;  %v1819_v17 = vpack.c.b16 %v1767_v48, %v1767_v48  ;;  %v4909_v31 = vld [vmem:[#allocation2 + $0x28] sm:$0xff] }
 0x30e   : > { %1919 = vst.msk [vmem:[#allocation2 + $0x38] sm:$0xf] %vm1904_vm8, %v1814_v57  ;;  %4481 = vmatmul.msk.bf16.gmra.mxu0 %vm2244_vm9, %v4906_v45  ;;  %v4938_v6 = vld [vmem:[#allocation2 + $0x28] sm:$0xff] }
 0x30f   : > { %1920 = vst.msk [vmem:[#allocation2 + $0x3c] sm:$0xf] %vm1904_vm8, %v1815_v38  ;;  %v1555_v13 = vpop.permute.xlu0 %1554  ;;  %4781 = vmatmul.msk.bf16.gmra.mxu3 %vm2244_vm9, %v4936_v52  ;;  %v4880_v47 = vld [vmem:[#allocation2 + $0x28] sm:$0xff]  ;;  %v1294_v38 = vrot.slane %v1292_v34, 7 }
 0x310   : > { %1923 = vst.msk [vmem:[#allocation2 + $0x48] sm:$0xf] %vm1904_vm8, %v1818_v51  ;;  %v1687_v9 = vsel %vm1669_vm7, %v1617_v55, %v1555_v13  ;;  %4626 = vmatmul.msk.bf16.gmra.mxu2 %vm2244_vm9, %v4877_v22  ;;  %v1559_v19 = vpop.permute.xlu1 %1558 }
 0x311   : > { %1924 = vst.msk [vmem:[#allocation2 + $0x4c] sm:$0xf] %vm1904_vm8, %v1819_v17  ;;  %v1764_v12 = vunpack.c.l.b16 %v1687_v9  ;;  %v1765_v27 = vunpack.c.h.b16 %v1687_v9  ;;  %v1297_v62 = vor.u32 %v1295_v58, %v1294_v38  ;;  %v4944_v38 = vld [vmem:[#allocation2 + $0x58] sm:$0xff] }
 0x312   : > { %v6442_v18 = vpop.f32.mrf.mxu3 }
 0x313   : > { %v1816_v11 = vpack.c.b16 %v1764_v12, %v1764_v12  ;;  %v1817_v24 = vpack.c.b16 %v1765_v27, %v1765_v27  ;;  %v1352_v55 = vsel %vm5980_vm6, 0, %v1297_v62 }
 0x315   : > { %1921 = vst.msk [vmem:[#allocation2 + $0x40] sm:$0xf] %vm1904_vm8, %v1816_v11 }
 0x316   : > { %1922 = vst.msk [vmem:[#allocation2 + $0x44] sm:$0xf] %vm1904_vm8, %v1817_v24  ;;  %v4911_v56 = vld [vmem:[#allocation2 + $0x38] sm:$0xff] }
 0x317   : > { %v1481_v43 = vpop.permute.xlu0 %1480  ;;  %4484 = vmatmul.msk.bf16.gmra.mxu1 %vm2244_vm9, %v4909_v31  ;;  %v4940_v54 = vld [vmem:[#allocation2 + $0x38] sm:$0xff] }
 0x318   : > { %v1623_v53 = vsel %vm1590_vm5, %v1337_v36, %v1481_v43  ;;  %v4913_v48 = vld [vmem:[#allocation2 + $0x48] sm:$0xff]  ;;  %v4882_v45 = vld [vmem:[#allocation2 + $0x38] sm:$0xff] }
 0x319   : > { %v1691_v42 = vsel %vm1669_vm7, %v1623_v53, %v1559_v19  ;;  %v4942_v36 = vld [vmem:[#allocation2 + $0x48] sm:$0xff] }
 0x31a   : > { %v1768_v2 = vunpack.c.l.b16 %v1691_v42  ;;  %v1769_v28 = vunpack.c.h.b16 %v1691_v42  ;;  %v6452_v41 = vpop.f32.mrf.mxu3 }
 0x31c   : > { %v1820_v46 = vpack.c.b16 %v1768_v2, %v1768_v2  ;;  %v1821_v3 = vpack.c.b16 %v1769_v28, %v1769_v28 }
 0x31d   : > { %v4912_v33 = vld [vmem:[#allocation2 + $0x40] sm:$0xff] }
 0x31e   : > { %1925 = vst.msk [vmem:[#allocation2 + $0x50] sm:$0xf] %vm1904_vm8, %v1820_v46  ;;  %4482 = vmatmul.msk.bf16.gmra.mxu0 %vm2244_vm9, %v4907_v14  ;;  %v4941_v17 = vld [vmem:[#allocation2 + $0x40] sm:$0xff] }
 0x31f   : > { %1926 = vst.msk [vmem:[#allocation2 + $0x54] sm:$0xf] %vm1904_vm8, %v1821_v3  ;;  %4782 = vmatmul.msk.bf16.gmra.mxu3 %vm2244_vm9, %v4937_v26  ;;  %v4883_v43 = vld [vmem:[#allocation2 + $0x40] sm:$0xff]  ;;  %v4884_v3 = vld [vmem:[#allocation2 + $0x48] sm:$0xff] }
 0x320   : > { %4627 = vmatmul.msk.bf16.gmra.mxu2 %vm2244_vm9, %v4878_v23 }
 0x322   : > { %v6461_v16 = vpop.f32.mrf.mxu3 }
 0x323   : > { %v6463_v49 = vpop.f32.mrf.mxu2 }
 0x326   : > { %v4914_v24 = vld [vmem:[#allocation2 + $0x50] sm:$0xff] }
 0x327   : > { %4485 = vmatmul.msk.bf16.gmra.mxu1 %vm2244_vm9, %v4910_v29  ;;  %v4943_v46 = vld [vmem:[#allocation2 + $0x50] sm:$0xff]  ;;  %v6542_v29 = vld [vmem:[%s6838_s6 + $0x1] ss:$0 sm:$0xff] }
 0x32a   : > { %v6466_v60 = vpop.f32.mrf.mxu3 }
 0x32b   : > { %v6468_v20 = vpop.f32.mrf.mxu2 }
 0x32f   : > { %4783 = vmatmul.msk.bf16.gmra.mxu3 %vm2244_vm9, %v4938_v6  ;;  %v1511_v52 = vpop.permute.xlu2 %1510 }
 0x330   : > { %4628 = vmatmul.msk.bf16.gmra.mxu2 %vm2244_vm9, %v4879_v61  ;;  %v1668_v34 = vsel %vm1590_vm5, %v1352_v55, %v1511_v52 }
 0x332   : > { %v6472_v8 = vpop.f32.mrf.mxu3 }
 0x333   : > { %v6474_v44 = vpop.f32.mrf.mxu2 }
 0x337   : > { %4486 = vmatmul.msk.bf16.gmra.mxu1 %vm2244_vm9, %v4911_v56 }
 0x33a   : > { %v6477_v63 = vpop.f32.mrf.mxu3 }
 0x33b   : > { %v6479_v4 = vpop.f32.mrf.mxu2 }
 0x33f   : > { %4784 = vmatmul.msk.bf16.gmra.mxu3 %vm2244_vm9, %v4939_v15 }
 0x340   : > { %4629 = vmatmul.msk.bf16.gmra.mxu2 %vm2244_vm9, %v4880_v47 }
 0x342   : > { %v6486_v21 = vpop.f32.mrf.mxu3 }
 0x343   : > { %v6488_v40 = vpop.f32.mrf.mxu2 }
 0x347   : > { %4487 = vmatmul.msk.bf16.gmra.mxu1 %vm2244_vm9, %v4912_v33 }
 0x34a   : > { %v6491_v30 = vpop.f32.mrf.mxu3 }
 0x34b   : > { %v6493_v50 = vpop.f32.mrf.mxu2 }
 0x34f   : > { %4785 = vmatmul.msk.bf16.gmra.mxu3 %vm2244_vm9, %v4940_v54 }
 0x350   : > { %4630 = vmatmul.msk.bf16.gmra.mxu2 %vm2244_vm9, %v4881_v1 }
 0x352   : > { %v6497_v32 = vpop.f32.mrf.mxu3 }
 0x353   : > { %v6499_v7 = vpop.f32.mrf.mxu2  ;;  %v1589_v13 = vpop.permute.xlu0 %1588 }
 0x354   : > { %v1721_v12 = vsel %vm1669_vm7, %v1668_v34, %v1589_v13 }
 0x355   : > { %v1798_v27 = vunpack.c.l.b16 %v1721_v12  ;;  %v1799_v11 = vunpack.c.h.b16 %v1721_v12 }
 0x357   : > { %4488 = vmatmul.msk.bf16.gmra.mxu1 %vm2244_vm9, %v4913_v48  ;;  %v1850_v10 = vpack.c.b16 %v1798_v27, %v1798_v27  ;;  %v1851_v58 = vpack.c.b16 %v1799_v11, %v1799_v11 }
 0x359   : > { %1955 = vst.msk [vmem:[#allocation2 + $0xc8] sm:$0xf] %vm1904_vm8, %v1850_v10 }
 0x35a   : > { %v6502_v57 = vpop.f32.mrf.mxu3  ;;  %1956 = vst.msk [vmem:[#allocation2 + $0xcc] sm:$0xf] %vm1904_vm8, %v1851_v58 }
 0x35b   : > { %v6506_v51 = vpop.f32.mrf.mxu2  ;;  %1964 = vst.msk [vmem:[#allocation2 + $0xc8] sm:$0xf] %vm1904_vm8, %v5520_v35 }
 0x35c   : > { %1965 = vst.msk [vmem:[#allocation2 + $0xcc] sm:$0xf] %vm1904_vm8, %v5520_v35 }
 0x35f   : > { %4786 = vmatmul.msk.bf16.gmra.mxu3 %vm2244_vm9, %v4941_v17  ;;  %v4885_v17 = vld [vmem:[#allocation2 + $0x50] sm:$0xff] }
 0x360   : > { %4631 = vmatmul.msk.bf16.gmra.mxu2 %vm2244_vm9, %v4882_v45 }
 0x362   : > { %v6514_v22 = vpop.f32.mrf.mxu3 }
 0x363   : > { %v6517_v9 = vpop.f32.mrf.mxu2 }
 0x367   : > { %4489 = vmatmul.msk.bf16.gmra.mxu1 %vm2244_vm9, %v4914_v24 }
 0x36a   : > { %v6523_v39 = vpop.f32.mrf.mxu3 }
 0x36b   : > { %v6527_v31 = vpop.f32.mrf.mxu2 }
 0x36f   : > { %4787 = vmatmul.msk.bf16.gmra.mxu3 %vm2244_vm9, %v4942_v36 }
 0x370   : > { %4632 = vmatmul.msk.bf16.gmra.mxu2 %vm2244_vm9, %v4883_v43 }
 0x372   : > { %v6533_v19 = vpop.f32.mrf.mxu3 }
 0x373   : > { %v2683_v53 = vpop.f32.mrf.mxu2 }
 0x37a   : > { %v6535_v42 = vpop.f32.mrf.mxu3 }
 0x37b   : > { %v2685_v2 = vpop.f32.mrf.mxu2  ;;  %v2326_v28 = vpop.f32.mrf.mxu0 }
 0x37c   : > { %v2684_v35 = vadd.f32 %v2683_v53, %v2326_v28 }
 0x37f   : > { %4788 = vmatmul.msk.bf16.gmra.mxu3 %vm2244_vm9, %v4943_v46 }
 0x380   : > { %4633 = vmatmul.msk.bf16.gmra.mxu2 %vm2244_vm9, %v4884_v3 }
 0x382   : > { %v3102_v14 = vpop.f32.mrf.mxu3 }
 0x383   : > { %v2688_v26 = vpop.f32.mrf.mxu2  ;;  %v3222_v23 = vadd.f32 %v3102_v14, %v2684_v35  ;;  %v2328_v6 = vpop.f32.mrf.mxu0  ;;  %v4945_v14 = vld [vmem:[#allocation2 + $0x60] sm:$0xff] }
 0x384   : > { %v2686_v56 = vadd.f32 %v2685_v2, %v2328_v6  ;;  %v6545_v15 = vpop.f32.mrf.mxu1 }
 0x385   : > { %v3272_v61 = vadd.f32 %v6542_v29, %v3222_v23  ;;  %v4886_v23 = vld [vmem:[#allocation2 + $0x58] sm:$0xff] }
 0x387   : > { %v3320_v59 = vmax.f32 %v3272_v61, 0.0 }
 0x389   : > { %v3368_v45 = vpack.c.bf16 %v3320_v59, %v3320_v59 }
 0x38a   : > { %v3104_v47 = vpop.f32.mrf.mxu3 }
 0x38b   : > { %v2690_v33 = vpop.f32.mrf.mxu2  ;;  %v3223_v54 = vadd.f32 %v3104_v47, %v2686_v56  ;;  %v2331_v1 = vpop.f32.mrf.mxu0  ;;  %v3568_v34 = vunpack.c.l.b16 %v3368_v45 }
 0x38c   : > { %v2689_v55 = vadd.f32 %v2688_v26, %v2331_v1  ;;  %v2343_v10 = vpop.f32.mrf.mxu1 }
 0x38d   : > { %v3273_v48 = vadd.f32 %v6542_v29, %v3223_v54 }
 0x38f   : > { %v3321_v62 = vmax.f32 %v3273_v48, 0.0  ;;  %4789 = vmatmul.msk.bf16.gmra.mxu3 %vm2244_vm9, %v4944_v38 }
 0x390   : > { %4634 = vmatmul.msk.bf16.gmra.mxu2 %vm2244_vm9, %v4885_v17 }
 0x391   : > { %v3369_v52 = vpack.c.bf16 %v3321_v62, %v3321_v62 }
 0x392   : > { %v3107_v13 = vpop.f32.mrf.mxu3 }
 0x393   : > { %v3569_v12 = vunpack.c.l.b16 %v3369_v52  ;;  %v2693_v27 = vpop.f32.mrf.mxu2  ;;  %v3224_v11 = vadd.f32 %v3107_v13, %v2689_v55  ;;  %v2333_v24 = vpop.f32.mrf.mxu0 }
 0x394   : > { %v2691_v43 = vadd.f32 %v2690_v33, %v2333_v24  ;;  %v2346_v26 = vpop.f32.mrf.mxu1  ;;  %v4887_v24 = vld [vmem:[#allocation2 + $0x60] sm:$0xff] }
 0x395   : > { %v3616_v58 = vpack.c.b16 %v3569_v12, %v3568_v34  ;;  %v3274_v36 = vadd.f32 %v6542_v29, %v3224_v11 }
 0x397   : > { %4812 = vmatmul.msk.bf16.vlgmr.msrb.gmra.mxu1 %vm1590_vm5, %v3616_v58  ;;  %v3322_v2 = vmax.f32 %v3274_v36, 0.0 }
 0x399   : > { %v3370_v6 = vpack.c.bf16 %v3322_v2, %v3322_v2 }
 0x39a   : > { %v3109_v53 = vpop.f32.mrf.mxu3 }
 0x39b   : > { %v2695_v28 = vpop.f32.mrf.mxu2  ;;  %v3225_v46 = vadd.f32 %v3109_v53, %v2691_v43  ;;  %v2336_v3 = vpop.f32.mrf.mxu0  ;;  %v3570_v33 = vunpack.c.l.b16 %v3370_v6 }
 0x39c   : > { %v2694_v47 = vadd.f32 %v2693_v27, %v2336_v3  ;;  %v2348_v62 = vpop.f32.mrf.mxu1  ;;  %v4946_v27 = vld [vmem:[#allocation2 + $0x68] sm:$0xff] }
 0x39d   : > { %v3275_v35 = vadd.f32 %v6542_v29, %v3225_v46 }
 0x39f   : > { %v3323_v61 = vmax.f32 %v3275_v35, 0.0  ;;  %4790 = vmatmul.msk.bf16.gmra.mxu3 %vm2244_vm9, %v4945_v14 }
 0x3a0   : > { %4635 = vmatmul.msk.bf16.gmra.mxu2 %vm2244_vm9, %v4886_v23 }
 0x3a1   : > { %v3371_v56 = vpack.c.bf16 %v3323_v61, %v3323_v61 }
 0x3a2   : > { %v3112_v59 = vpop.f32.mrf.mxu3 }
 0x3a3   : > { %v3571_v54 = vunpack.c.l.b16 %v3371_v56  ;;  %v2698_v1 = vpop.f32.mrf.mxu2  ;;  %v3226_v48 = vadd.f32 %v3112_v59, %v2694_v47  ;;  %v2338_v17 = vpop.f32.mrf.mxu0 }
 0x3a4   : > { %v2696_v52 = vadd.f32 %v2695_v28, %v2338_v17  ;;  %v2699_v43 = vadd.f32 %v2698_v1, %v6545_v15  ;;  %v2351_v2 = vpop.f32.mrf.mxu1  ;;  %v4947_v1 = vld [vmem:[#allocation2 + $0x70] sm:$0xff] }
 0x3a5   : > { %v3617_v38 = vpack.c.b16 %v3571_v54, %v3570_v33  ;;  %v3276_v45 = vadd.f32 %v6542_v29, %v3226_v48  ;;  %v4888_v48 = vld [vmem:[#allocation2 + $0x68] sm:$0xff] }
 0x3a7   : > { %4813 = vmatmul.msk.bf16.gmra.mxu1 %vm1590_vm5, %v3617_v38  ;;  %v3324_v13 = vmax.f32 %v3276_v45, 0.0 }
 0x3a9   : > { %v3372_v58 = vpack.c.bf16 %v3324_v13, %v3324_v13 }
 0x3aa   : > { %v3114_v55 = vpop.f32.mrf.mxu3 }
 0x3ab   : > { %v2700_v34 = vpop.f32.mrf.mxu2  ;;  %v3227_v12 = vadd.f32 %v3114_v55, %v2696_v52  ;;  %v3572_v28 = vunpack.c.l.b16 %v3372_v58 }
 0x3ac   : > { %v2701_v61 = vadd.f32 %v2700_v34, %v2343_v10  ;;  %v2353_v54 = vpop.f32.mrf.mxu1 }
 0x3ad   : > { %v3277_v11 = vadd.f32 %v6542_v29, %v3227_v12 }
 0x3af   : > { %v3325_v36 = vmax.f32 %v3277_v11, 0.0  ;;  %4791 = vmatmul.msk.bf16.gmra.mxu3 %vm2244_vm9, %v4946_v27 }
 0x3b0   : > { %4636 = vmatmul.msk.bf16.gmra.mxu2 %vm2244_vm9, %v4887_v24 }
 0x3b1   : > { %v3373_v53 = vpack.c.bf16 %v3325_v36, %v3325_v36 }
 0x3b2   : > { %v3117_v46 = vpop.f32.mrf.mxu3 }
 0x3b3   : > { %v3573_v3 = vunpack.c.l.b16 %v3373_v53  ;;  %v2703_v35 = vpop.f32.mrf.mxu2  ;;  %v3228_v14 = vadd.f32 %v3117_v46, %v2699_v43 }
 0x3b4   : > { %v2704_v45 = vadd.f32 %v2703_v35, %v2346_v26  ;;  %v2356_v27 = vpop.f32.mrf.mxu1  ;;  %v4948_v26 = vld [vmem:[#allocation2 + $0x78] sm:$0xff] }
 0x3b5   : > { %v3618_v23 = vpack.c.b16 %v3573_v3, %v3572_v28  ;;  %v3278_v6 = vadd.f32 %v6542_v29, %v3228_v14  ;;  %v4889_v3 = vld [vmem:[#allocation2 + $0x70] sm:$0xff] }
 0x3b7   : > { %4814 = vmatmul.msk.bf16.gmra.mxu1 %vm1590_vm5, %v3618_v23  ;;  %v3326_v47 = vmax.f32 %v3278_v6, 0.0 }
 0x3b9   : > { %v3374_v38 = vpack.c.bf16 %v3326_v47, %v3326_v47 }
 0x3ba   : > { %v3119_v56 = vpop.f32.mrf.mxu3 }
 0x3bb   : > { %v2705_v59 = vpop.f32.mrf.mxu2  ;;  %v3229_v33 = vadd.f32 %v3119_v56, %v2701_v61  ;;  %v3574_v13 = vunpack.c.l.b16 %v3374_v38 }
 0x3bc   : > { %v2706_v58 = vadd.f32 %v2705_v59, %v2348_v62  ;;  %v2358_v23 = vpop.f32.mrf.mxu1 }
 0x3bd   : > { %v3279_v15 = vadd.f32 %v6542_v29, %v3229_v33 }
 0x3bf   : > { %v3327_v17 = vmax.f32 %v3279_v15, 0.0  ;;  %4792 = vmatmul.msk.bf16.gmra.mxu3 %vm2244_vm9, %v4947_v1 }
 0x3c0   : > { %4637 = vmatmul.msk.bf16.gmra.mxu2 %vm2244_vm9, %v4888_v48 }
 0x3c1   : > { %v3375_v52 = vpack.c.bf16 %v3327_v17, %v3327_v17 }
 0x3c2   : > { %v3122_v55 = vpop.f32.mrf.mxu3 }
 0x3c3   : > { %v3575_v10 = vunpack.c.l.b16 %v3375_v52  ;;  %v2708_v34 = vpop.f32.mrf.mxu2  ;;  %v3230_v12 = vadd.f32 %v3122_v55, %v2704_v45 }
 0x3c4   : > { %v2709_v6 = vadd.f32 %v2708_v34, %v2351_v2  ;;  %v2361_v38 = vpop.f32.mrf.mxu1  ;;  %v4949_v2 = vld [vmem:[#allocation2 + $0x80] sm:$0xff] }
 0x3c5   : > { %v3619_v11 = vpack.c.b16 %v3575_v10, %v3574_v13  ;;  %v3280_v24 = vadd.f32 %v6542_v29, %v3230_v12  ;;  %v4890_v10 = vld [vmem:[#allocation2 + $0x78] sm:$0xff] }
 0x3c7   : > { %4815 = vmatmul.msk.bf16.gmra.mxu1 %vm1590_vm5, %v3619_v11  ;;  %v3328_v43 = vmax.f32 %v3280_v24, 0.0 }
 0x3c9   : > { %v3376_v35 = vpack.c.bf16 %v3328_v43, %v3328_v43 }
 0x3ca   : > { %v3124_v36 = vpop.f32.mrf.mxu3 }
 0x3cb   : > { %v2710_v53 = vpop.f32.mrf.mxu2  ;;  %v3231_v46 = vadd.f32 %v3124_v36, %v2706_v58  ;;  %v3576_v47 = vunpack.c.l.b16 %v3376_v35 }
 0x3cc   : > { %v2711_v48 = vadd.f32 %v2710_v53, %v2353_v54 }
 0x3cd   : > { %v3281_v28 = vadd.f32 %v6542_v29, %v3231_v46  ;;  %v2363_v46 = vpop.f32.mrf.mxu1 }
 0x3cf   : > { %v3329_v14 = vmax.f32 %v3281_v28, 0.0  ;;  %4793 = vmatmul.msk.bf16.gmra.mxu3 %vm2244_vm9, %v4948_v26 }
 0x3d0   : > { %4638 = vmatmul.msk.bf16.gmra.mxu2 %vm2244_vm9, %v4889_v3 }
 0x3d1   : > { %v3377_v61 = vpack.c.bf16 %v3329_v14, %v3329_v14 }
 0x3d2   : > { %v3127_v56 = vpop.f32.mrf.mxu3 }
 0x3d3   : > { %v3577_v62 = vunpack.c.l.b16 %v3377_v61  ;;  %v2713_v59 = vpop.f32.mrf.mxu2  ;;  %v3232_v33 = vadd.f32 %v3127_v56, %v2709_v6 }
 0x3d4   : > { %v2714_v11 = vadd.f32 %v2713_v59, %v2356_v27  ;;  %v4950_v27 = vld [vmem:[#allocation2 + $0x88] sm:$0xff] }
 0x3d5   : > { %v3620_v15 = vpack.c.b16 %v3577_v62, %v3576_v47  ;;  %v3282_v1 = vadd.f32 %v6542_v29, %v3232_v33  ;;  %v2366_v47 = vpop.f32.mrf.mxu1  ;;  %v4891_v62 = vld [vmem:[#allocation2 + $0x80] sm:$0xff] }
 0x3d7   : > { %4816 = vmatmul.msk.bf16.gmra.mxu1 %vm1590_vm5, %v3620_v15  ;;  %v3330_v45 = vmax.f32 %v3282_v1, 0.0 }
 0x3d9   : > { %v3378_v34 = vpack.c.bf16 %v3330_v45, %v3330_v45 }
 0x3da   : > { %v3129_v17 = vpop.f32.mrf.mxu3 }
 0x3db   : > { %v2715_v52 = vpop.f32.mrf.mxu2  ;;  %v3233_v55 = vadd.f32 %v3129_v17, %v2711_v48  ;;  %v3578_v36 = vunpack.c.l.b16 %v3378_v34 }
 0x3dc   : > { %v2716_v3 = vadd.f32 %v2715_v52, %v2358_v23 }
 0x3dd   : > { %v3283_v13 = vadd.f32 %v6542_v29, %v3233_v55 }
 0x3df   : > { %v3331_v12 = vmax.f32 %v3283_v13, 0.0  ;;  %4794 = vmatmul.msk.bf16.gmra.mxu3 %vm2244_vm9, %v4949_v2  ;;  %v2368_v2 = vpop.f32.mrf.mxu1 }
 0x3e0   : > { %4639 = vmatmul.msk.bf16.gmra.mxu2 %vm2244_vm9, %v4890_v10 }
 0x3e1   : > { %v3379_v24 = vpack.c.bf16 %v3331_v12, %v3331_v12 }
 0x3e2   : > { %v3132_v58 = vpop.f32.mrf.mxu3 }
 0x3e3   : > { %v3579_v54 = vunpack.c.l.b16 %v3379_v24  ;;  %v2718_v43 = vpop.f32.mrf.mxu2  ;;  %v3234_v53 = vadd.f32 %v3132_v58, %v2714_v11 }
 0x3e4   : > { %v2719_v15 = vadd.f32 %v2718_v43, %v2361_v38  ;;  %v4951_v38 = vld [vmem:[#allocation2 + $0x90] sm:$0xff] }
 0x3e5   : > { %v3621_v28 = vpack.c.b16 %v3579_v54, %v3578_v36  ;;  %v3284_v26 = vadd.f32 %v6542_v29, %v3234_v53  ;;  %v4892_v36 = vld [vmem:[#allocation2 + $0x88] sm:$0xff] }
 0x3e7   : > { %4817 = vmatmul.msk.bf16.gmra.mxu1 %vm1590_vm5, %v3621_v28  ;;  %v3332_v14 = vmax.f32 %v3284_v26, 0.0  ;;  %v2371_v26 = vpop.f32.mrf.mxu1 }
 0x3e9   : > { %v3380_v59 = vpack.c.bf16 %v3332_v14, %v3332_v14 }
 0x3ea   : > { %v3134_v35 = vpop.f32.mrf.mxu3 }
 0x3eb   : > { %v2720_v6 = vpop.f32.mrf.mxu2  ;;  %v3235_v61 = vadd.f32 %v3134_v35, %v2716_v3  ;;  %v3580_v17 = vunpack.c.l.b16 %v3380_v59 }
 0x3ec   : > { %v2721_v10 = vadd.f32 %v2720_v6, %v2363_v46 }
 0x3ed   : > { %v3285_v56 = vadd.f32 %v6542_v29, %v3235_v61 }
 0x3ef   : > { %v3333_v33 = vmax.f32 %v3285_v56, 0.0  ;;  %4795 = vmatmul.msk.bf16.gmra.mxu3 %vm2244_vm9, %v4950_v27 }
 0x3f0   : > { %4640 = vmatmul.msk.bf16.gmra.mxu2 %vm2244_vm9, %v4891_v62 }
 0x3f1   : > { %v3381_v1 = vpack.c.bf16 %v3333_v33, %v3333_v33 }
 0x3f2   : > { %v3137_v48 = vpop.f32.mrf.mxu3 }
 0x3f3   : > { %v3581_v23 = vunpack.c.l.b16 %v3381_v1  ;;  %v2723_v45 = vpop.f32.mrf.mxu2  ;;  %v3236_v52 = vadd.f32 %v3137_v48, %v2719_v15  ;;  %v2373_v1 = vpop.f32.mrf.mxu1  ;;  %v4952_v48 = vld [vmem:[#allocation2 + $0x98] sm:$0xff] }
 0x3f4   : > { %v2724_v53 = vadd.f32 %v2723_v45, %v2366_v47 }
 0x3f5   : > { %v3622_v55 = vpack.c.b16 %v3581_v23, %v3580_v17  ;;  %v3286_v13 = vadd.f32 %v6542_v29, %v3236_v52  ;;  %v4893_v17 = vld [vmem:[#allocation2 + $0x90] sm:$0xff] }
 0x3f7   : > { %4818 = vmatmul.msk.bf16.gmra.mxu1 %vm1590_vm5, %v3622_v55  ;;  %v3334_v12 = vmax.f32 %v3286_v13, 0.0 }
 0x3f9   : > { %v3382_v54 = vpack.c.bf16 %v3334_v12, %v3334_v12 }
 0x3fa   : > { %v3139_v34 = vpop.f32.mrf.mxu3 }
 0x3fb   : > { %v2725_v11 = vpop.f32.mrf.mxu2  ;;  %v3237_v24 = vadd.f32 %v3139_v34, %v2721_v10  ;;  %v3582_v35 = vunpack.c.l.b16 %v3382_v54 }
 0x3fc   : > { %v2726_v27 = vadd.f32 %v2725_v11, %v2368_v2 }
 0x3fd   : > { %v3287_v58 = vadd.f32 %v6542_v29, %v3237_v24 }
 0x3ff   : > { %v3335_v43 = vmax.f32 %v3287_v58, 0.0  ;;  %4796 = vmatmul.msk.bf16.gmra.mxu3 %vm2244_vm9, %v4951_v38  ;;  %v6594_v58 = vld [vmem:[%s6839_s7] ss:$0 sm:$0xff]  ;;  %v4968_v38 = vld [vmem:[%s5679_s8] sm:$0xff]  }
 0x400   : > { %4641 = vmatmul.msk.bf16.gmra.mxu2 %vm2244_vm9, %v4892_v36 }
 0x401   : > { %v3383_v28 = vpack.c.bf16 %v3335_v43, %v3335_v43  ;;  %v4969_v43 = vunpack.c.l.bf16 %v4968_v38 }
 0x402   : > { %v3142_v3 = vpop.f32.mrf.mxu3 }
 0x403   : > { %v3583_v46 = vunpack.c.l.b16 %v3383_v28  ;;  %v2728_v14 = vpop.f32.mrf.mxu2  ;;  %v3238_v6 = vadd.f32 %v3142_v3, %v2724_v53 }
 0x404   : > { %v2729_v52 = vadd.f32 %v2728_v14, %v2371_v26 }
 0x405   : > { %v3623_v61 = vpack.c.b16 %v3583_v46, %v3582_v35  ;;  %v3288_v56 = vadd.f32 %v6542_v29, %v3238_v6  ;;  %v4970_v46 = vunpack.c.h.bf16 %v4968_v38 }
 0x407   : > { %4819 = vmatmul.msk.bf16.gmra.mxu1 %vm1590_vm5, %v3623_v61  ;;  %v3336_v59 = vmax.f32 %v3288_v56, 0.0 }
 0x409   : > { %v3384_v23 = vpack.c.bf16 %v3336_v59, %v3336_v59 }
 0x40a   : > { %v3144_v62 = vpop.f32.mrf.mxu3 }
 0x40b   : > { %v2730_v33 = vpop.f32.mrf.mxu2  ;;  %v3239_v15 = vadd.f32 %v3144_v62, %v2726_v27  ;;  %v3584_v2 = vunpack.c.l.b16 %v3384_v23  ;;  %v4953_v27 = vld [vmem:[#allocation2 + $0xa0] sm:$0xff]  ;;  %v4894_v62 = vld [vmem:[#allocation2 + $0x98] sm:$0xff] }
 0x40c   : > { %v2731_v54 = vadd.f32 %v2730_v33, %v2373_v1 }
 0x40d   : > { %v3289_v47 = vadd.f32 %v6542_v29, %v3239_v15 }
 0x40f   : > { %v3337_v45 = vmax.f32 %v3289_v47, 0.0  ;;  %4797 = vmatmul.msk.bf16.gmra.mxu3 %vm2244_vm9, %v4952_v48 }
 0x410   : > { %4642 = vmatmul.msk.bf16.gmra.mxu2 %vm2244_vm9, %v4893_v17 }
 0x411   : > { %v3385_v55 = vpack.c.bf16 %v3337_v45, %v3337_v45 }
 0x412   : > { %v3147_v13 = vpop.f32.mrf.mxu3 }
 0x413   : > { %v3585_v10 = vunpack.c.l.b16 %v3385_v55  ;;  %v2733_v34 = vpop.f32.mrf.mxu2  ;;  %v3240_v12 = vadd.f32 %v3147_v13, %v2729_v52 }
 0x414   : > { %v3733_v11 = vpop.f32.mrf.mxu1  ;;  %v2734_v1 = vadd.f32 %v2733_v34, %v6396_v37 }
 0x415   : > { %v3624_v24 = vpack.c.b16 %v3585_v10, %v3584_v2  ;;  %v3290_v36 = vadd.f32 %v6542_v29, %v3240_v12  ;;  %v3734_v53 = vadd.f32 %v6594_v58, %v3733_v11  ;;  %v5183_v11 = vld [vmem:[%s5679_s8 + $0x8] sm:$0xff]  }
 0x416   : > { %v4973_v34 = vunpack.c.l.bf16 %v5183_v11 }
 0x417   : > { %4820 = vmatmul.msk.bf16.gmra.mxu1 %vm1590_vm5, %v3624_v24  ;;  %v3338_v26 = vmax.f32 %v3290_v36, 0.0  ;;  %v3853_v6 = vadd.f32 %v4969_v43, %v3734_v53 }
 0x419   : > { %v3386_v59 = vpack.c.bf16 %v3338_v26, %v3338_v26  ;;  %v3901_v47 = vmax.f32 %v3853_v6, 0.0  ;;  %v4954_v6 = vld [vmem:[#allocation2 + $0xa8] sm:$0xff] }
 0x41a   : > { %v3149_v28 = vpop.f32.mrf.mxu3 }
 0x41b   : > { %v2735_v3 = vpop.f32.mrf.mxu2  ;;  %v3241_v35 = vadd.f32 %v3149_v28, %v2731_v54  ;;  %v3586_v45 = vunpack.c.l.b16 %v3386_v59  ;;  %v4974_v28 = vunpack.c.h.bf16 %v5183_v11 }
 0x41c   : > { %v3735_v14 = vpop.f32.mrf.mxu1  ;;  %v2736_v37 = vadd.f32 %v2735_v3, %v6415_v25 }
 0x41d   : > { %v3291_v61 = vadd.f32 %v6542_v29, %v3241_v35  ;;  %v3736_v56 = vadd.f32 %v6594_v58, %v3735_v14 }
 0x41f   : > { %v3339_v15 = vmax.f32 %v3291_v61, 0.0  ;;  %v3854_v33 = vadd.f32 %v4970_v46, %v3736_v56  ;;  %4798 = vmatmul.msk.bf16.gmra.mxu3 %vm2244_vm9, %v4953_v27  ;;  %v4895_v61 = vld [vmem:[#allocation2 + $0xa0] sm:$0xff] }
 0x420   : > { %4643 = vmatmul.msk.bf16.gmra.mxu2 %vm2244_vm9, %v4894_v62 }
 0x421   : > { %v3387_v48 = vpack.c.bf16 %v3339_v15, %v3339_v15  ;;  %v3902_v17 = vmax.f32 %v3854_v33, 0.0 }
 0x422   : > { %v3152_v23 = vpop.f32.mrf.mxu3 }
 0x423   : > { %v3587_v52 = vunpack.c.l.b16 %v3387_v48  ;;  %v5066_v55 = vpack.c.bf16 %v3902_v17, %v3901_v47  ;;  %v2738_v13 = vpop.f32.mrf.mxu2  ;;  %v3242_v2 = vadd.f32 %v3152_v23, %v2734_v1 }
 0x424   : > { %v3738_v10 = vpop.f32.mrf.mxu1  ;;  %v2739_v3 = vadd.f32 %v2738_v13, %v6440_v5 }
 0x425   : > { %v3625_v12 = vpack.c.b16 %v3587_v52, %v3586_v45  ;;  %5067 = vst [vmem:[%s6607_s19] sm:$0xff] %v5066_v55   ;;  %v3292_v24 = vadd.f32 %v6542_v29, %v3242_v2  ;;  %v3739_v38 = vadd.f32 %v6594_v58, %v3738_v10  ;;  %v5184_v55 = vld [vmem:[%s5679_s8 + $0x10] sm:$0xff]  }
 0x426   : > { %v4977_v5 = vunpack.c.l.bf16 %v5184_v55 }
 0x427   : > { %4821 = vmatmul.msk.bf16.gmra.mxu1 %vm1590_vm5, %v3625_v12  ;;  %v3340_v54 = vmax.f32 %v3292_v24, 0.0  ;;  %v3855_v35 = vadd.f32 %v4973_v34, %v3739_v38  ;;  %v4978_v34 = vunpack.c.h.bf16 %v5184_v55 }
 0x429   : > { %v3388_v56 = vpack.c.bf16 %v3340_v54, %v3340_v54  ;;  %v3903_v62 = vmax.f32 %v3855_v35, 0.0 }
 0x42a   : > { %v3154_v36 = vpop.f32.mrf.mxu3 }
 0x42b   : > { %v2740_v43 = vpop.f32.mrf.mxu2  ;;  %v3243_v53 = vadd.f32 %v3154_v36, %v2736_v37  ;;  %v3588_v1 = vunpack.c.l.b16 %v3388_v56 }
 0x42c   : > { %v3740_v26 = vpop.f32.mrf.mxu1  ;;  %v2741_v10 = vadd.f32 %v2740_v43, %v6454_v0 }
 0x42d   : > { %v3293_v46 = vadd.f32 %v6542_v29, %v3243_v53  ;;  %v3741_v14 = vadd.f32 %v6594_v58, %v3740_v26  ;;  %v4896_v26 = vld [vmem:[#allocation2 + $0xa8] sm:$0xff] }
 0x42f   : > { %v3341_v27 = vmax.f32 %v3293_v46, 0.0  ;;  %v3856_v25 = vadd.f32 %v4974_v28, %v3741_v14  ;;  %4799 = vmatmul.msk.bf16.gmra.mxu3 %vm2244_vm9, %v4954_v6  ;;  %v4955_v28 = vld [vmem:[#allocation2 + $0xb0] sm:$0xff] }
 0x430   : > { %4644 = vmatmul.msk.bf16.gmra.mxu2 %vm2244_vm9, %v4895_v61 }
 0x431   : > { %v3389_v59 = vpack.c.bf16 %v3341_v27, %v3341_v27  ;;  %v3904_v15 = vmax.f32 %v3856_v25, 0.0 }
 0x432   : > { %v3157_v33 = vpop.f32.mrf.mxu3 }
 0x433   : > { %v3589_v47 = vunpack.c.l.b16 %v3389_v59  ;;  %v5071_v48 = vpack.c.bf16 %v3904_v15, %v3903_v62  ;;  %v2743_v17 = vpop.f32.mrf.mxu2  ;;  %v3244_v23 = vadd.f32 %v3157_v33, %v2739_v3 }
 0x434   : > { %v3743_v45 = vpop.f32.mrf.mxu1  ;;  %v2744_v43 = vadd.f32 %v2743_v17, %v6463_v49 }
 0x435   : > { %v3626_v52 = vpack.c.b16 %v3589_v47, %v3588_v1  ;;  %5206 = vst [vmem:[%s6607_s19 + $0x8] sm:$0xff] %v5071_v48   ;;  %v3294_v2 = vadd.f32 %v6542_v29, %v3244_v23  ;;  %v3744_v13 = vadd.f32 %v6594_v58, %v3743_v45  ;;  %v5185_v1 = vld [vmem:[%s5679_s8 + $0x18] sm:$0xff]  }
 0x436   : > { %v4981_v49 = vunpack.c.l.bf16 %v5185_v1 }
 0x437   : > { %4822 = vmatmul.msk.bf16.gmra.mxu1 %vm1590_vm5, %v3626_v52  ;;  %v3342_v11 = vmax.f32 %v3294_v2, 0.0  ;;  %v3857_v36 = vadd.f32 %v4977_v5, %v3744_v13  ;;  %v4982_v2 = vunpack.c.h.bf16 %v5185_v1 }
 0x439   : > { %v3390_v35 = vpack.c.bf16 %v3342_v11, %v3342_v11  ;;  %v3905_v14 = vmax.f32 %v3857_v36, 0.0  ;;  %v4956_v11 = vld [vmem:[#allocation2 + $0xb8] sm:$0xff] }
 0x43a   : > { %v3159_v12 = vpop.f32.mrf.mxu3 }
 0x43b   : > { %v2745_v24 = vpop.f32.mrf.mxu2  ;;  %v3245_v37 = vadd.f32 %v3159_v12, %v2741_v10  ;;  %v3590_v27 = vunpack.c.l.b16 %v3390_v35 }
 0x43c   : > { %v3745_v38 = vpop.f32.mrf.mxu1  ;;  %v2746_v48 = vadd.f32 %v2745_v24, %v6468_v20 }
 0x43d   : > { %v3295_v54 = vadd.f32 %v6542_v29, %v3245_v37  ;;  %v3746_v53 = vadd.f32 %v6594_v58, %v3745_v38  ;;  %v4897_v37 = vld [vmem:[#allocation2 + $0xb0] sm:$0xff] }
 0x43f   : > { %v3343_v46 = vmax.f32 %v3295_v54, 0.0  ;;  %v3858_v0 = vadd.f32 %v4978_v34, %v3746_v53  ;;  %4800 = vmatmul.msk.bf16.gmra.mxu3 %vm2244_vm9, %v4955_v28 }
 0x440   : > { %4645 = vmatmul.msk.bf16.gmra.mxu2 %vm2244_vm9, %v4896_v26 }
 0x441   : > { %v3391_v6 = vpack.c.bf16 %v3343_v46, %v3343_v46  ;;  %v3906_v61 = vmax.f32 %v3858_v0, 0.0 }
 0x442   : > { %v3162_v56 = vpop.f32.mrf.mxu3 }
 0x443   : > { %v3591_v25 = vunpack.c.l.b16 %v3391_v6  ;;  %v5076_v3 = vpack.c.bf16 %v3906_v61, %v3905_v14  ;;  %v2748_v62 = vpop.f32.mrf.mxu2  ;;  %v3246_v59 = vadd.f32 %v3162_v56, %v2744_v43  ;;  %v5186_v61 = vld [vmem:[%s5679_s8 + $0x20] sm:$0xff]  }
 0x444   : > { %v3748_v15 = vpop.f32.mrf.mxu1  ;;  %v2749_v24 = vadd.f32 %v2748_v62, %v6474_v44  ;;  %v4985_v44 = vunpack.c.l.bf16 %v5186_v61 }
 0x445   : > { %v3627_v33 = vpack.c.b16 %v3591_v25, %v3590_v27  ;;  %5207 = vst [vmem:[%s6607_s19 + $0x10] sm:$0xff] %v5076_v3   ;;  %v3296_v47 = vadd.f32 %v6542_v29, %v3246_v59  ;;  %v3749_v17 = vadd.f32 %v6594_v58, %v3748_v15 }
 0x447   : > { %4823 = vmatmul.msk.bf16.gmra.mxu1 %vm1590_vm5, %v3627_v33  ;;  %v3344_v45 = vmax.f32 %v3296_v47, 0.0  ;;  %v3859_v5 = vadd.f32 %v4981_v49, %v3749_v17  ;;  %v4986_v33 = vunpack.c.h.bf16 %v5186_v61  ;;  %v4957_v17 = vld [vmem:[#allocation2 + $0xc0] sm:$0xff] }
 0x449   : > { %v3392_v34 = vpack.c.bf16 %v3344_v45, %v3344_v45  ;;  %v3907_v36 = vmax.f32 %v3859_v5, 0.0 }
 0x44a   : > { %v3164_v23 = vpop.f32.mrf.mxu3 }
 0x44b   : > { %v2750_v52 = vpop.f32.mrf.mxu2  ;;  %v3247_v55 = vadd.f32 %v3164_v23, %v2746_v48  ;;  %v3592_v26 = vunpack.c.l.b16 %v3392_v34  ;;  %v4898_v23 = vld [vmem:[#allocation2 + $0xb8] sm:$0xff] }
 0x44c   : > { %v3750_v10 = vpop.f32.mrf.mxu1  ;;  %v2751_v27 = vadd.f32 %v2750_v52, %v6479_v4 }
 0x44d   : > { %v3297_v13 = vadd.f32 %v6542_v29, %v3247_v55  ;;  %v3751_v12 = vadd.f32 %v6594_v58, %v3750_v10 }
 0x44f   : > { %v3345_v38 = vmax.f32 %v3297_v13, 0.0  ;;  %v3860_v20 = vadd.f32 %v4982_v2, %v3751_v12  ;;  %4801 = vmatmul.msk.bf16.gmra.mxu3 %vm2244_vm9, %v4956_v11 }
 0x450   : > { %4646 = vmatmul.msk.bf16.gmra.mxu2 %vm2244_vm9, %v4897_v37 }
 0x451   : > { %v3393_v54 = vpack.c.bf16 %v3345_v38, %v3345_v38  ;;  %v3908_v53 = vmax.f32 %v3860_v20, 0.0 }
 0x452   : > { %v3167_v28 = vpop.f32.mrf.mxu3 }
 0x453   : > { %v3593_v35 = vunpack.c.l.b16 %v3393_v54  ;;  %v5081_v46 = vpack.c.bf16 %v3908_v53, %v3907_v36  ;;  %v2753_v0 = vpop.f32.mrf.mxu2  ;;  %v3248_v43 = vadd.f32 %v3167_v28, %v2749_v24  ;;  %v5187_v36 = vld [vmem:[%s5679_s8 + $0x28] sm:$0xff]  }
 0x454   : > { %v3753_v14 = vpop.f32.mrf.mxu1  ;;  %v2754_v52 = vadd.f32 %v2753_v0, %v6488_v40  ;;  %v4989_v40 = vunpack.c.l.bf16 %v5187_v36 }
 0x455   : > { %v3628_v6 = vpack.c.b16 %v3593_v35, %v3592_v26  ;;  %5208 = vst [vmem:[%s6607_s19 + $0x18] sm:$0xff] %v5081_v46   ;;  %v3298_v56 = vadd.f32 %v6542_v29, %v3248_v43  ;;  %v3754_v25 = vadd.f32 %v6594_v58, %v3753_v14  ;;  %v4990_v43 = vunpack.c.h.bf16 %v5187_v36  ;;  %v4958_v14 = vld [vmem:[#allocation2 + $0xc8] sm:$0xff] }
 0x457   : > { %4824 = vmatmul.msk.bf16.gmra.mxu1 %vm1590_vm5, %v3628_v6  ;;  %v3346_v62 = vmax.f32 %v3298_v56, 0.0  ;;  %v3861_v47 = vadd.f32 %v4985_v44, %v3754_v25 }
 0x459   : > { %v3394_v45 = vpack.c.bf16 %v3346_v62, %v3346_v62  ;;  %v3909_v2 = vmax.f32 %v3861_v47, 0.0 }
 0x45a   : > { %v3169_v3 = vpop.f32.mrf.mxu3 }
 0x45b   : > { %v2755_v59 = vpop.f32.mrf.mxu2  ;;  %v3249_v15 = vadd.f32 %v3169_v3, %v2751_v27  ;;  %v3594_v12 = vunpack.c.l.b16 %v3394_v45 }
 0x45c   : > { %v3755_v1 = vpop.f32.mrf.mxu1  ;;  %v2756_v53 = vadd.f32 %v2755_v59, %v6493_v50 }
 0x45d   : > { %v3299_v48 = vadd.f32 %v6542_v29, %v3249_v15  ;;  %v3756_v49 = vadd.f32 %v6594_v58, %v3755_v1 }
 0x45f   : > { %v3347_v55 = vmax.f32 %v3299_v48, 0.0  ;;  %v3862_v4 = vadd.f32 %v4986_v33, %v3756_v49  ;;  %4802 = vmatmul.msk.bf16.gmra.mxu3 %vm2244_vm9, %v4957_v17 }
 0x460   : > { %4647 = vmatmul.msk.bf16.gmra.mxu2 %vm2244_vm9, %v4898_v23 }
 0x461   : > { %v3395_v10 = vpack.c.bf16 %v3347_v55, %v3347_v55  ;;  %v3910_v5 = vmax.f32 %v3862_v4, 0.0  ;;  %v5188_v55 = vld [vmem:[%s5679_s8 + $0x30] sm:$0xff]  }
 0x462   : > { %v3172_v13 = vpop.f32.mrf.mxu3 }
 0x463   : > { %v3595_v11 = vunpack.c.l.b16 %v3395_v10  ;;  %v5086_v37 = vpack.c.bf16 %v3910_v5, %v3909_v2  ;;  %v2758_v34 = vpop.f32.mrf.mxu2  ;;  %v3250_v38 = vadd.f32 %v3172_v13, %v2754_v52 }
 0x464   : > { %v3758_v20 = vpop.f32.mrf.mxu1  ;;  %v2759_v3 = vadd.f32 %v2758_v34, %v6499_v7  ;;  %v4993_v7 = vunpack.c.l.bf16 %v5188_v55 }
 0x465   : > { %v3629_v24 = vpack.c.b16 %v3595_v11, %v3594_v12  ;;  %5209 = vst [vmem:[%s6607_s19 + $0x20] sm:$0xff] %v5086_v37   ;;  %v3300_v54 = vadd.f32 %v6542_v29, %v3250_v38  ;;  %v3759_v28 = vadd.f32 %v6594_v58, %v3758_v20  ;;  %v4994_v11 = vunpack.c.h.bf16 %v5188_v55 }
 0x467   : > { %4825 = vmatmul.msk.bf16.gmra.mxu1 %vm1590_vm5, %v3629_v24  ;;  %v3348_v35 = vmax.f32 %v3300_v54, 0.0  ;;  %v3863_v61 = vadd.f32 %v4989_v40, %v3759_v28 }
 0x469   : > { %v3396_v44 = vpack.c.bf16 %v3348_v35, %v3348_v35  ;;  %v3911_v62 = vmax.f32 %v3863_v61, 0.0 }
 0x46a   : > { %v3174_v26 = vpop.f32.mrf.mxu3 }
 0x46b   : > { %v2760_v46 = vpop.f32.mrf.mxu2  ;;  %v3251_v0 = vadd.f32 %v3174_v26, %v2756_v53  ;;  %v3596_v1 = vunpack.c.l.b16 %v3396_v44 }
 0x46c   : > { %v3760_v6 = vpop.f32.mrf.mxu1  ;;  %v2761_v52 = vadd.f32 %v2760_v46, %v6506_v51 }
 0x46d   : > { %v3301_v56 = vadd.f32 %v6542_v29, %v3251_v0  ;;  %v3761_v27 = vadd.f32 %v6594_v58, %v3760_v6 }
 0x46f   : > { %v3349_v25 = vmax.f32 %v3301_v56, 0.0  ;;  %v3864_v50 = vadd.f32 %v4990_v43, %v3761_v27  ;;  %4803 = vmatmul.msk.bf16.gmra.mxu3 %vm2244_vm9, %v4958_v14  ;;  %v5189_v56 = vld [vmem:[%s5679_s8 + $0x38] sm:$0xff]  }
 0x471   : > { %v3397_v59 = vpack.c.bf16 %v3349_v25, %v3349_v25  ;;  %v3912_v15 = vmax.f32 %v3864_v50, 0.0 }
 0x472   : > { %v3177_v33 = vpop.f32.mrf.mxu3 }
 0x473   : > { %v3597_v47 = vunpack.c.l.b16 %v3397_v59  ;;  %v5091_v48 = vpack.c.bf16 %v3912_v15, %v3911_v62  ;;  %v2763_v49 = vpop.f32.mrf.mxu2  ;;  %v3252_v17 = vadd.f32 %v3177_v33, %v2759_v3  ;;  %v4998_v15 = vunpack.c.h.bf16 %v5189_v56 }
 0x474   : > { %v3763_v23 = vpop.f32.mrf.mxu1  ;;  %v2764_v51 = vadd.f32 %v2763_v49, %v6517_v9  ;;  %v4997_v9 = vunpack.c.l.bf16 %v5189_v56 }
 0x475   : > { %v3630_v45 = vpack.c.b16 %v3597_v47, %v3596_v1  ;;  %5210 = vst [vmem:[%s6607_s19 + $0x28] sm:$0xff] %v5091_v48   ;;  %v3302_v4 = vadd.f32 %v6542_v29, %v3252_v17  ;;  %v3764_v2 = vadd.f32 %v6594_v58, %v3763_v23 }
 0x477   : > { %4826 = vmatmul.msk.bf16.gmra.mxu1 %vm1590_vm5, %v3630_v45  ;;  %v3350_v5 = vmax.f32 %v3302_v4, 0.0  ;;  %v3865_v34 = vadd.f32 %v4993_v7, %v3764_v2 }
 0x479   : > { %v3398_v24 = vpack.c.bf16 %v3350_v5, %v3350_v5  ;;  %v3913_v53 = vmax.f32 %v3865_v34, 0.0 }
 0x47a   : > { %v3179_v10 = vpop.f32.mrf.mxu3 }
 0x47b   : > { %v2765_v13 = vpop.f32.mrf.mxu2  ;;  %v3253_v12 = vadd.f32 %v3179_v10, %v2761_v52  ;;  %v3598_v35 = vunpack.c.l.b16 %v3398_v24 }
 0x47c   : > { %v3765_v37 = vpop.f32.mrf.mxu1  ;;  %v2766_v44 = vadd.f32 %v2765_v13, %v6527_v31 }
 0x47d   : > { %v3303_v38 = vadd.f32 %v6542_v29, %v3253_v12  ;;  %v3766_v20 = vadd.f32 %v6594_v58, %v3765_v37  ;;  %v5190_v37 = vld [vmem:[%s5679_s8 + $0x40] sm:$0xff]  }
 0x47f   : > { %v3351_v36 = vmax.f32 %v3303_v38, 0.0  ;;  %v3866_v54 = vadd.f32 %v4994_v11, %v3766_v20 }
 0x481   : > { %v3399_v40 = vpack.c.bf16 %v3351_v36, %v3351_v36  ;;  %v3914_v28 = vmax.f32 %v3866_v54, 0.0 }
 0x482   : > { %v3182_v26 = vpop.f32.mrf.mxu3 }
 0x483   : > { %v3599_v46 = vunpack.c.l.b16 %v3399_v40  ;;  %v5096_v0 = vpack.c.bf16 %v3914_v28, %v3913_v53  ;;  %v2768_v43 = vpop.f32.mrf.mxu2  ;;  %v3254_v14 = vadd.f32 %v3182_v26, %v2764_v51  ;;  %v5002_v53 = vunpack.c.h.bf16 %v5190_v37 }
 0x484   : > { %v3768_v6 = vpop.f32.mrf.mxu1  ;;  %v2769_v31 = vadd.f32 %v2768_v43, %v6442_v18  ;;  %v5001_v18 = vunpack.c.l.bf16 %v5190_v37 }
 0x485   : > { %v3631_v61 = vpack.c.b16 %v3599_v46, %v3598_v35  ;;  %5211 = vst [vmem:[%s6607_s19 + $0x30] sm:$0xff] %v5096_v0   ;;  %v3304_v27 = vadd.f32 %v6542_v29, %v3254_v14  ;;  %v3769_v25 = vadd.f32 %v6594_v58, %v3768_v6 }
 0x487   : > { %4827 = vmatmul.msk.bf16.gmra.mxu1 %vm1590_vm5, %v3631_v61  ;;  %v3352_v3 = vmax.f32 %v3304_v27, 0.0  ;;  %v3867_v1 = vadd.f32 %v4997_v9, %v3769_v25 }
 0x489   : > { %v3400_v49 = vpack.c.bf16 %v3352_v3, %v3352_v3  ;;  %v3915_v45 = vmax.f32 %v3867_v1, 0.0 }
 0x48a   : > { %v3184_v50 = vpop.f32.mrf.mxu3 }
 0x48b   : > { %v2770_v62 = vpop.f32.mrf.mxu2  ;;  %v3255_v59 = vadd.f32 %v3184_v50, %v2766_v44  ;;  %v3600_v7 = vunpack.c.l.b16 %v3400_v49 }
 0x48c   : > { %v3770_v33 = vpop.f32.mrf.mxu1  ;;  %v2771_v38 = vadd.f32 %v2770_v62, %v6452_v41  ;;  %v5191_v62 = vld [vmem:[%s5679_s8 + $0x48] sm:$0xff]  }
 0x48d   : > { %v3305_v47 = vadd.f32 %v6542_v29, %v3255_v59  ;;  %v3771_v48 = vadd.f32 %v6594_v58, %v3770_v33  ;;  %v6695_v59 = vld [vmem:[%s6838_s6 + $0x1] ss:$0 sm:$0xff]  ;;  %v5005_v33 = vunpack.c.l.bf16 %v5191_v62 }
 0x48f   : > { %v3353_v17 = vmax.f32 %v3305_v47, 0.0  ;;  %v3868_v23 = vadd.f32 %v4998_v15, %v3771_v48 }
 0x491   : > { %v3401_v55 = vpack.c.bf16 %v3353_v17, %v3353_v17  ;;  %v3916_v4 = vmax.f32 %v3868_v23, 0.0  ;;  %v5006_v23 = vunpack.c.h.bf16 %v5191_v62 }
 0x492   : > { %v3187_v52 = vpop.f32.mrf.mxu3 }
 0x493   : > { %v3601_v2 = vunpack.c.l.b16 %v3401_v55  ;;  %v5101_v10 = vpack.c.bf16 %v3916_v4, %v3915_v45  ;;  %v2773_v5 = vpop.f32.mrf.mxu2  ;;  %v3256_v13 = vadd.f32 %v3187_v52, %v2769_v31 }
 0x494   : > { %v3773_v12 = vpop.f32.mrf.mxu1  ;;  %v2774_v41 = vadd.f32 %v2773_v5, %v6461_v16 }
 0x495   : > { %v3632_v11 = vpack.c.b16 %v3601_v2, %v3600_v7  ;;  %5212 = vst [vmem:[%s6607_s19 + $0x38] sm:$0xff] %v5101_v10   ;;  %v3306_v34 = vadd.f32 %v6542_v29, %v3256_v13  ;;  %v3774_v20 = vadd.f32 %v6594_v58, %v3773_v12 }
 0x497   : > { %4828 = vmatmul.msk.bf16.gmra.mxu1 %vm1590_vm5, %v3632_v11  ;;  %v3354_v36 = vmax.f32 %v3306_v34, 0.0  ;;  %v3869_v28 = vadd.f32 %v5001_v18, %v3774_v20 }
 0x499   : > { %v3402_v46 = vpack.c.bf16 %v3354_v36, %v3354_v36  ;;  %v3917_v14 = vmax.f32 %v3869_v28, 0.0  ;;  %v5192_v36 = vld [vmem:[%s5679_s8 + $0x50] sm:$0xff]  }
 0x49a   : > { %v3189_v24 = vpop.f32.mrf.mxu3 }
 0x49b   : > { %v2775_v54 = vpop.f32.mrf.mxu2  ;;  %v3257_v51 = vadd.f32 %v3189_v24, %v2771_v38  ;;  %v3602_v27 = vunpack.c.l.b16 %v3402_v46  ;;  %v5010_v46 = vunpack.c.h.bf16 %v5192_v36 }
 0x49c   : > { %v3775_v40 = vpop.f32.mrf.mxu1  ;;  %v2776_v15 = vadd.f32 %v2775_v54, %v6466_v60 }
 0x49d   : > { %v3307_v26 = vadd.f32 %v6542_v29, %v3257_v51  ;;  %v3776_v35 = vadd.f32 %v6594_v58, %v3775_v40 }
 0x49f   : > { %v3355_v0 = vmax.f32 %v3307_v26, 0.0  ;;  %v3870_v43 = vadd.f32 %v5002_v53, %v3776_v35 }
 0x4a1   : > { %v3403_v6 = vpack.c.bf16 %v3355_v0, %v3355_v0  ;;  %v3918_v61 = vmax.f32 %v3870_v43, 0.0 }
 0x4a2   : > { %v3192_v56 = vpop.f32.mrf.mxu3 }
 0x4a3   : > { %v3603_v44 = vunpack.c.l.b16 %v3403_v6  ;;  %v5106_v9 = vpack.c.bf16 %v3918_v61, %v3917_v14  ;;  %v2778_v25 = vpop.f32.mrf.mxu2  ;;  %v3258_v50 = vadd.f32 %v3192_v56, %v2774_v41 }
 0x4a4   : > { %v3778_v3 = vpop.f32.mrf.mxu1  ;;  %v2779_v60 = vadd.f32 %v2778_v25, %v6472_v8  ;;  %v5009_v8 = vunpack.c.l.bf16 %v5192_v36 }
 0x4a5   : > { %v3633_v29 = vpack.c.b16 %v3603_v44, %v3602_v27  ;;  %5213 = vst [vmem:[%s6607_s19 + $0x40] sm:$0xff] %v5106_v9   ;;  %v3308_v16 = vadd.f32 %v6695_v59, %v3258_v50  ;;  %v3779_v1 = vadd.f32 %v6594_v58, %v3778_v3 }
 0x4a7   : > { %4829 = vmatmul.msk.bf16.gmra.mxu1 %vm1590_vm5, %v3633_v29  ;;  %v3356_v48 = vmax.f32 %v3308_v16, 0.0  ;;  %v3871_v45 = vadd.f32 %v5005_v33, %v3779_v1  ;;  %v5193_v1 = vld [vmem:[%s5679_s8 + $0x58] sm:$0xff]  }
 0x4a9   : > { %v3404_v52 = vpack.c.bf16 %v3356_v48, %v3356_v48  ;;  %v3919_v10 = vmax.f32 %v3871_v45, 0.0  ;;  %v5014_v45 = vunpack.c.h.bf16 %v5193_v1 }
 0x4aa   : > { %v3194_v47 = vpop.f32.mrf.mxu3 }
 0x4ab   : > { %v2780_v49 = vpop.f32.mrf.mxu2  ;;  %v3259_v17 = vadd.f32 %v3194_v47, %v2776_v15  ;;  %v3604_v11 = vunpack.c.l.b16 %v3404_v52 }
 0x4ac   : > { %v3780_v31 = vpop.f32.mrf.mxu1  ;;  %v2781_v51 = vadd.f32 %v2780_v49, %v6477_v63 }
 0x4ad   : > { %v3309_v55 = vadd.f32 %v6695_v59, %v3259_v17  ;;  %v3781_v4 = vadd.f32 %v6594_v58, %v3780_v31 }
 0x4af   : > { %v3357_v7 = vmax.f32 %v3309_v55, 0.0  ;;  %v3872_v2 = vadd.f32 %v5006_v23, %v3781_v4 }
 0x4b1   : > { %v3405_v5 = vpack.c.bf16 %v3357_v7, %v3357_v7  ;;  %v3920_v13 = vmax.f32 %v3872_v2, 0.0 }
 0x4b2   : > { %v3197_v12 = vpop.f32.mrf.mxu3 }
 0x4b3   : > { %v3605_v37 = vunpack.c.l.b16 %v3405_v5  ;;  %v5111_v34 = vpack.c.bf16 %v3920_v13, %v3919_v10  ;;  %v2783_v38 = vpop.f32.mrf.mxu2  ;;  %v3260_v18 = vadd.f32 %v3197_v12, %v2779_v60 }
 0x4b4   : > { %v3783_v20 = vpop.f32.mrf.mxu1  ;;  %v2784_v63 = vadd.f32 %v2783_v38, %v6486_v21  ;;  %v5013_v21 = vunpack.c.l.bf16 %v5193_v1 }
 0x4b5   : > { %v3634_v24 = vpack.c.b16 %v3605_v37, %v3604_v11  ;;  %5214 = vst [vmem:[%s6607_s19 + $0x48] sm:$0xff] %v5111_v34   ;;  %v3310_v54 = vadd.f32 %v6695_v59, %v3260_v18  ;;  %v3784_v53 = vadd.f32 %v6594_v58, %v3783_v20 }
 0x4b7   : > { %4830 = vmatmul.msk.bf16.gmra.mxu1 %vm1590_vm5, %v3634_v24  ;;  %v3358_v28 = vmax.f32 %v3310_v54, 0.0  ;;  %v3873_v43 = vadd.f32 %v5009_v8, %v3784_v53  ;;  %v5194_v54 = vld [vmem:[%s5679_s8 + $0x60] sm:$0xff]  }
 0x4b9   : > { %v3406_v6 = vpack.c.bf16 %v3358_v28, %v3358_v28  ;;  %v3921_v27 = vmax.f32 %v3873_v43, 0.0 }
 0x4ba   : > { %v3199_v40 = vpop.f32.mrf.mxu3 }
 0x4bb   : > { %v2785_v26 = vpop.f32.mrf.mxu2  ;;  %v3261_v35 = vadd.f32 %v3199_v40, %v2781_v51  ;;  %v3606_v50 = vunpack.c.l.b16 %v3406_v6 }
 0x4bc   : > { %v3785_v0 = vpop.f32.mrf.mxu1  ;;  %v2786_v48 = vadd.f32 %v2785_v26, %v6491_v30 }
 0x4bd   : > { %v3311_v41 = vadd.f32 %v6695_v59, %v3261_v35  ;;  %v3786_v14 = vadd.f32 %v6594_v58, %v3785_v0 }
 0x4bf   : > { %v3359_v61 = vmax.f32 %v3311_v41, 0.0  ;;  %v3874_v56 = vadd.f32 %v5010_v46, %v3786_v14  ;;  %v5018_v46 = vunpack.c.h.bf16 %v5194_v54 }
 0x4c1   : > { %v3407_v44 = vpack.c.bf16 %v3359_v61, %v3359_v61  ;;  %v3922_v9 = vmax.f32 %v3874_v56, 0.0 }
 0x4c2   : > { %v3202_v25 = vpop.f32.mrf.mxu3 }
 0x4c3   : > { %v3607_v3 = vunpack.c.l.b16 %v3407_v44  ;;  %v5116_v29 = vpack.c.bf16 %v3922_v9, %v3921_v27  ;;  %v3262_v62 = vadd.f32 %v3202_v25, %v2784_v63  ;;  %v2788_v16 = vpop.f32.mrf.mxu2 }
 0x4c4   : > { %v3788_v15 = vpop.f32.mrf.mxu1  ;;  %v2789_v30 = vadd.f32 %v2788_v16, %v6497_v32  ;;  %v5017_v32 = vunpack.c.l.bf16 %v5194_v54 }
 0x4c5   : > { %v3635_v33 = vpack.c.b16 %v3607_v3, %v3606_v50  ;;  %5215 = vst [vmem:[%s6607_s19 + $0x50] sm:$0xff] %v5116_v29   ;;  %v3312_v47 = vadd.f32 %v6695_v59, %v3262_v62  ;;  %v3789_v49 = vadd.f32 %v6594_v58, %v3788_v15 }
 0x4c7   : > { %4831 = vmatmul.msk.bf16.gmra.mxu1 %vm1590_vm5, %v3635_v33  ;;  %v3360_v23 = vmax.f32 %v3312_v47, 0.0  ;;  %v3875_v4 = vadd.f32 %v5013_v21, %v3789_v49  ;;  %v5195_v33 = vld [vmem:[%s5679_s8 + $0x68] sm:$0xff]  }
 0x4c9   : > { %v3408_v60 = vpack.c.bf16 %v3360_v23, %v3360_v23  ;;  %v3923_v13 = vmax.f32 %v3875_v4, 0.0  ;;  %v5022_v23 = vunpack.c.h.bf16 %v5195_v33 }
 0x4ca   : > { %v3204_v17 = vpop.f32.mrf.mxu3 }
 0x4cb   : > { %v3263_v31 = vadd.f32 %v3204_v17, %v2786_v48  ;;  %v2790_v2 = vpop.f32.mrf.mxu2  ;;  %v3608_v34 = vunpack.c.l.b16 %v3408_v60 }
 0x4cc   : > { %v3790_v55 = vpop.f32.mrf.mxu1  ;;  %v2791_v53 = vadd.f32 %v2790_v2, %v6502_v57 }
 0x4cd   : > { %v3313_v52 = vadd.f32 %v6695_v59, %v3263_v31  ;;  %v3791_v7 = vadd.f32 %v6594_v58, %v3790_v55 }
 0x4cf   : > { %v3361_v10 = vmax.f32 %v3313_v52, 0.0  ;;  %v3876_v5 = vadd.f32 %v5014_v45, %v3791_v7 }
 0x4d1   : > { %v3409_v12 = vpack.c.bf16 %v3361_v10, %v3361_v10  ;;  %v3924_v11 = vmax.f32 %v3876_v5, 0.0 }
 0x4d2   : > { %v3207_v37 = vpop.f32.mrf.mxu3 }
 0x4d3   : > { %v3609_v38 = vunpack.c.l.b16 %v3409_v12  ;;  %v5121_v18 = vpack.c.bf16 %v3924_v11, %v3923_v13  ;;  %v3264_v20 = vadd.f32 %v3207_v37, %v2789_v30  ;;  %v2793_v8 = vpop.f32.mrf.mxu2 }
 0x4d4   : > { %v3793_v24 = vpop.f32.mrf.mxu1  ;;  %v2794_v57 = vadd.f32 %v2793_v8, %v6514_v22  ;;  %v5021_v22 = vunpack.c.l.bf16 %v5195_v33 }
 0x4d5   : > { %v3636_v36 = vpack.c.b16 %v3609_v38, %v3608_v34  ;;  %5216 = vst [vmem:[%s6607_s19 + $0x58] sm:$0xff] %v5121_v18   ;;  %v3314_v51 = vadd.f32 %v6695_v59, %v3264_v20  ;;  %v3794_v40 = vadd.f32 %v6594_v58, %v3793_v24  ;;  %v5196_v24 = vld [vmem:[%s5679_s8 + $0x70] sm:$0xff]  }
 0x4d7   : > { %4832 = vmatmul.msk.bf16.gmra.mxu1 %vm1590_vm5, %v3636_v36  ;;  %v3362_v26 = vmax.f32 %v3314_v51, 0.0  ;;  %v3877_v43 = vadd.f32 %v5017_v32, %v3794_v40  ;;  %v5026_v40 = vunpack.c.h.bf16 %v5196_v24 }
 0x4d9   : > { %v3410_v6 = vpack.c.bf16 %v3362_v26, %v3362_v26  ;;  %v3925_v63 = vmax.f32 %v3877_v43, 0.0 }
 0x4da   : > { %v3209_v28 = vpop.f32.mrf.mxu3 }
 0x4db   : > { %v3265_v35 = vadd.f32 %v3209_v28, %v2791_v53  ;;  %v2795_v9 = vpop.f32.mrf.mxu2  ;;  %v3610_v50 = vunpack.c.l.b16 %v3410_v6 }
 0x4dc   : > { %v3795_v0 = vpop.f32.mrf.mxu1  ;;  %v2796_v47 = vadd.f32 %v2795_v9, %v6523_v39 }
 0x4dd   : > { %v3315_v41 = vadd.f32 %v6695_v59, %v3265_v35  ;;  %v3796_v14 = vadd.f32 %v6594_v58, %v3795_v0 }
 0x4df   : > { %v3363_v61 = vmax.f32 %v3315_v41, 0.0  ;;  %v3878_v56 = vadd.f32 %v5018_v46, %v3796_v14 }
 0x4e1   : > { %v3411_v27 = vpack.c.bf16 %v3363_v61, %v3363_v61  ;;  %v3926_v44 = vmax.f32 %v3878_v56, 0.0 }
 0x4e2   : > { %v3212_v25 = vpop.f32.mrf.mxu3 }
 0x4e3   : > { %v3611_v3 = vunpack.c.l.b16 %v3411_v27  ;;  %v5126_v29 = vpack.c.bf16 %v3926_v44, %v3925_v63  ;;  %v3266_v62 = vadd.f32 %v3212_v25, %v2794_v57  ;;  %v2798_v31 = vpop.f32.mrf.mxu2  ;;  %v5197_v44 = vld [vmem:[%s5679_s8 + $0x78] sm:$0xff]  }
 0x4e4   : > { %v3798_v16 = vpop.f32.mrf.mxu1  ;;  %v2799_v39 = vadd.f32 %v2798_v31, %v6533_v19  ;;  %v5025_v19 = vunpack.c.l.bf16 %v5196_v24  ;;  %v5030_v25 = vunpack.c.h.bf16 %v5197_v44 }
 0x4e5   : > { %v3637_v15 = vpack.c.b16 %v3611_v3, %v3610_v50  ;;  %5217 = vst [vmem:[%s6607_s19 + $0x60] sm:$0xff] %v5126_v29   ;;  %v3316_v1 = vadd.f32 %v6695_v59, %v3266_v62  ;;  %v3799_v48 = vadd.f32 %v6594_v58, %v3798_v16 }
 0x4e7   : > { %4833 = vmatmul.msk.bf16.gmra.mxu1 %vm1590_vm5, %v3637_v15  ;;  %v3364_v49 = vmax.f32 %v3316_v1, 0.0  ;;  %v3879_v55 = vadd.f32 %v5021_v22, %v3799_v48 }
 0x4e9   : > { %v3412_v7 = vpack.c.bf16 %v3364_v49, %v3364_v49  ;;  %v3927_v10 = vmax.f32 %v3879_v55, 0.0 }
 0x4ea   : > { %v3214_v21 = vpop.f32.mrf.mxu3 }
 0x4eb   : > { %v3267_v17 = vadd.f32 %v3214_v21, %v2796_v47  ;;  %v3612_v12 = vunpack.c.l.b16 %v3412_v7  ;;  %v2800_v20 = vpop.f32.mrf.mxu2  ;;  %v5198_v47 = vld [vmem:[%s5679_s8 + $0x80] sm:$0xff]   ;;  %v5199_v7 = vld [vmem:[%s5679_s8 + $0x88] sm:$0xff]  }
 0x4ec   : > { %v3800_v45 = vpop.f32.mrf.mxu1  ;;  %v2801_v54 = vadd.f32 %v2800_v20, %v6535_v42  ;;  %v5033_v22 = vunpack.c.l.bf16 %v5198_v47  ;;  %v5034_v21 = vunpack.c.h.bf16 %v5198_v47 }
 0x4ed   : > { %v3317_v4 = vadd.f32 %v6695_v59, %v3267_v17  ;;  %v3801_v52 = vadd.f32 %v6594_v58, %v3800_v45 }
 0x4ef   : > { %v3365_v2 = vmax.f32 %v3317_v4, 0.0  ;;  %v3880_v60 = vadd.f32 %v5022_v23, %v3801_v52 }
 0x4f1   : > { %v3413_v5 = vpack.c.bf16 %v3365_v2, %v3365_v2  ;;  %v3928_v30 = vmax.f32 %v3880_v60, 0.0  ;;  %v5037_v2 = vunpack.c.l.bf16 %v5199_v7  ;;  %v6762_v60 = vld [vmem:[%s6839_s7] ss:$0 sm:$0xff] }
 0x4f2   : > { %v3217_v13 = vpop.f32.mrf.mxu3 }
 0x4f3   : > { %v3613_v11 = vunpack.c.l.b16 %v3413_v5  ;;  %v5131_v37 = vpack.c.bf16 %v3928_v30, %v3927_v10  ;;  %v3268_v34 = vadd.f32 %v3217_v13, %v2799_v39  ;;  %v5038_v10 = vunpack.c.h.bf16 %v5199_v7 }
 0x4f4   : > { %v3803_v38 = vpop.f32.mrf.mxu1 }
 0x4f5   : > { %v3638_v18 = vpack.c.b16 %v3613_v11, %v3612_v12  ;;  %5218 = vst [vmem:[%s6607_s19 + $0x68] sm:$0xff] %v5131_v37   ;;  %v3318_v36 = vadd.f32 %v6695_v59, %v3268_v34  ;;  %v3804_v51 = vadd.f32 %v6594_v58, %v3803_v38  ;;  %v5200_v38 = vld [vmem:[%s5679_s8 + $0x90] sm:$0xff]  }
 0x4f6   : > { %v5042_v24 = vunpack.c.h.bf16 %v5200_v38 }
 0x4f7   : > { %4834 = vmatmul.msk.bf16.gmra.mxu1 %vm1590_vm5, %v3638_v18  ;;  %v3366_v53 = vmax.f32 %v3318_v36, 0.0  ;;  %v3881_v26 = vadd.f32 %v5025_v19, %v3804_v51  ;;  %v5041_v18 = vunpack.c.l.bf16 %v5200_v38 }
 0x4f9   : > { %v3414_v0 = vpack.c.bf16 %v3366_v53, %v3366_v53  ;;  %v3929_v14 = vmax.f32 %v3881_v26, 0.0 }
 0x4fa   : > { %v3219_v8 = vpop.f32.mrf.mxu3 }
 0x4fb   : > { %v3269_v32 = vadd.f32 %v3219_v8, %v2801_v54  ;;  %v3614_v61 = vunpack.c.l.b16 %v3414_v0 }
 0x4fc   : > { %v3805_v28 = vpop.f32.mrf.mxu1 }
 0x4fd   : > { %v3319_v35 = vadd.f32 %v6695_v59, %v3269_v32  ;;  %v3806_v46 = vadd.f32 %v6594_v58, %v3805_v28  ;;  %v5029_v59 = vunpack.c.l.bf16 %v5197_v44  ;;  %v5201_v28 = vld [vmem:[%s5679_s8 + $0x98] sm:$0xff]  }
 0x4fe   : > { %v5045_v26 = vunpack.c.l.bf16 %v5201_v28 }
 0x4ff   : > { %v3367_v43 = vmax.f32 %v3319_v35, 0.0  ;;  %v3882_v41 = vadd.f32 %v5026_v40, %v3806_v46  ;;  %v5046_v46 = vunpack.c.h.bf16 %v5201_v28 }
 0x501   : > { %v3415_v42 = vpack.c.bf16 %v3367_v43, %v3367_v43  ;;  %v3930_v6 = vmax.f32 %v3882_v41, 0.0 }
 0x503   : > { %v3615_v56 = vunpack.c.l.b16 %v3415_v42  ;;  %v5136_v57 = vpack.c.bf16 %v3930_v6, %v3929_v14 }
 0x504   : > { %v3808_v63 = vpop.f32.mrf.mxu1 }
 0x505   : > { %v3639_v27 = vpack.c.b16 %v3615_v56, %v3614_v61  ;;  %5219 = vst [vmem:[%s6607_s19 + $0x70] sm:$0xff] %v5136_v57   ;;  %v3809_v9 = vadd.f32 %v6594_v58, %v3808_v63  ;;  %v5202_v57 = vld [vmem:[%s5679_s8 + $0xa0] sm:$0xff]  }
 0x506   : > { %v5049_v63 = vunpack.c.l.bf16 %v5202_v57  ;;  %v5050_v44 = vunpack.c.h.bf16 %v5202_v57 }
 0x507   : > { %4835 = vmatmul.msk.bf16.gmra.mxu1 %vm1590_vm5, %v3639_v27  ;;  %v3883_v3 = vadd.f32 %v5029_v59, %v3809_v9 }
 0x509   : > { %v3931_v16 = vmax.f32 %v3883_v3, 0.0 }
 0x50c   : > { %v3810_v50 = vpop.f32.mrf.mxu1 }
 0x50d   : > { %v3811_v29 = vadd.f32 %v6594_v58, %v3810_v50 }
 0x50f   : > { %v3884_v62 = vadd.f32 %v5030_v25, %v3811_v29 }
 0x511   : > { %v3932_v15 = vmax.f32 %v3884_v62, 0.0 }
 0x513   : > { %v5141_v33 = vpack.c.bf16 %v3932_v15, %v3931_v16  ;;  %v5203_v15 = vld [vmem:[%s5679_s8 + $0xa8] sm:$0xff]  }
 0x514   : > { %v3813_v1 = vpop.f32.mrf.mxu1  ;;  %v5054_v47 = vunpack.c.h.bf16 %v5203_v15 }
 0x515   : > { %5220 = vst [vmem:[%s6607_s19 + $0x78] sm:$0xff] %v5141_v33   ;;  %v3814_v48 = vadd.f32 %v6594_v58, %v3813_v1  ;;  %v5053_v33 = vunpack.c.l.bf16 %v5203_v15 }
 0x517   : > { %v3885_v17 = vadd.f32 %v5033_v22, %v3814_v48 }
 0x519   : > { %v3933_v45 = vmax.f32 %v3885_v17, 0.0 }
 0x51c   : > { %v3815_v49 = vpop.f32.mrf.mxu1 }
 0x51d   : > { %v3816_v23 = vadd.f32 %v6594_v58, %v3815_v49 }
 0x51f   : > { %v3886_v31 = vadd.f32 %v5034_v21, %v3816_v23 }
 0x521   : > { %v3934_v55 = vmax.f32 %v3886_v31, 0.0 }
 0x523   : > { %v5146_v4 = vpack.c.bf16 %v3934_v55, %v3933_v45  ;;  %v5204_v55 = vld [vmem:[%s5679_s8 + $0xb0] sm:$0xff]  }
 0x524   : > { %v3818_v52 = vpop.f32.mrf.mxu1  ;;  %v5058_v7 = vunpack.c.h.bf16 %v5204_v55 }
 0x525   : > { %5221 = vst [vmem:[%s6607_s19 + $0x80] sm:$0xff] %v5146_v4   ;;  %v3819_v39 = vadd.f32 %v6762_v60, %v3818_v52  ;;  %v5057_v4 = vunpack.c.l.bf16 %v5204_v55 }
 0x527   : > { %v3887_v58 = vadd.f32 %v5037_v2, %v3819_v39 }
 0x529   : > { %v3935_v12 = vmax.f32 %v3887_v58, 0.0 }
 0x52c   : > { %v3820_v5 = vpop.f32.mrf.mxu1 }
 0x52d   : > { %v3821_v30 = vadd.f32 %v6762_v60, %v3820_v5 }
 0x52f   : > { %v3888_v13 = vadd.f32 %v5038_v10, %v3821_v30 }
 0x531   : > { %v3936_v11 = vmax.f32 %v3888_v13, 0.0 }
 0x533   : > { %v5151_v37 = vpack.c.bf16 %v3936_v11, %v3935_v12  ;;  %v5205_v11 = vld [vmem:[%s5679_s8 + $0xb8] sm:$0xff]   ;;  %s4046_s8 = scalar_lea.sflag [#allocation5], %s5673_s22 }
 0x534   : > { %v3823_v34 = vpop.f32.mrf.mxu1  ;;  %v5062_v38 = vunpack.c.h.bf16 %v5205_v11 }
 0x535   : > { %5222 = vst [vmem:[%s6607_s19 + $0x88] sm:$0xff] %v5151_v37   ;;  %v3824_v20 = vadd.f32 %v6762_v60, %v3823_v34  ;;  %v5061_v37 = vunpack.c.l.bf16 %v5205_v11 }
 0x537   : > { %v3889_v54 = vadd.f32 %v5041_v18, %v3824_v20 }
 0x539   : > { %v3937_v8 = vmax.f32 %v3889_v54, 0.0 }
 0x53c   : > { %v3825_v36 = vpop.f32.mrf.mxu1 }
 0x53d   : > { %v3826_v19 = vadd.f32 %v6762_v60, %v3825_v36 }
 0x53f   : > { %v3890_v51 = vadd.f32 %v5042_v24, %v3826_v19 }
 0x541   : > { %v3938_v53 = vmax.f32 %v3890_v51, 0.0 }
 0x543   : > { %v5156_v32 = vpack.c.bf16 %v3938_v53, %v3937_v8 }
 0x544   : > { %v3828_v40 = vpop.f32.mrf.mxu1 }
 0x545   : > { %5223 = vst [vmem:[%s6607_s19 + $0x90] sm:$0xff] %v5156_v32   ;;  %v3829_v35 = vadd.f32 %v6762_v60, %v3828_v40 }
 0x547   : > { %v3891_v43 = vadd.f32 %v5045_v26, %v3829_v35 }
 0x549   : > { %v3939_v42 = vmax.f32 %v3891_v43, 0.0 }
 0x54c   : > { %v3830_v0 = vpop.f32.mrf.mxu1 }
 0x54d   : > { %v3831_v41 = vadd.f32 %v6762_v60, %v3830_v0 }
 0x54f   : > { %v3892_v14 = vadd.f32 %v5046_v46, %v3831_v41 }
 0x551   : > { %v3940_v6 = vmax.f32 %v3892_v14, 0.0 }
 0x553   : > { %v5161_v61 = vpack.c.bf16 %v3940_v6, %v3939_v42 }
 0x554   : > { %v3833_v56 = vpop.f32.mrf.mxu1 }
 0x555   : > { %5224 = vst [vmem:[%s6607_s19 + $0x98] sm:$0xff] %v5161_v61   ;;  %v3834_v27 = vadd.f32 %v6762_v60, %v3833_v56 }
 0x557   : > { %v3893_v9 = vadd.f32 %v5049_v63, %v3834_v27 }
 0x559   : > { %v3941_v3 = vmax.f32 %v3893_v9, 0.0 }
 0x55c   : > { %v3835_v59 = vpop.f32.mrf.mxu1 }
 0x55d   : > { %v3836_v25 = vadd.f32 %v6762_v60, %v3835_v59 }
 0x55f   : > { %v3894_v50 = vadd.f32 %v5050_v44, %v3836_v25 }
 0x561   : > { %v3942_v29 = vmax.f32 %v3894_v50, 0.0 }
 0x563   : > { %v5166_v62 = vpack.c.bf16 %v3942_v29, %v3941_v3 }
 0x564   : > { %v3838_v16 = vpop.f32.mrf.mxu1 }
 0x565   : > { %5225 = vst [vmem:[%s6607_s19 + $0xa0] sm:$0xff] %v5166_v62   ;;  %v3839_v1 = vadd.f32 %v6762_v60, %v3838_v16 }
 0x567   : > { %v3895_v48 = vadd.f32 %v5053_v33, %v3839_v1 }
 0x569   : > { %v3943_v17 = vmax.f32 %v3895_v48, 0.0 }
 0x56c   : > { %v3840_v22 = vpop.f32.mrf.mxu1 }
 0x56d   : > { %v3841_v21 = vadd.f32 %v6762_v60, %v3840_v22 }
 0x56f   : > { %v3896_v49 = vadd.f32 %v5054_v47, %v3841_v21 }
 0x571   : > { %v3944_v23 = vmax.f32 %v3896_v49, 0.0 }
 0x573   : > { %v5171_v31 = vpack.c.bf16 %v3944_v23, %v3943_v17 }
 0x574   : > { %v3843_v45 = vpop.f32.mrf.mxu1 }
 0x575   : > { %5226 = vst [vmem:[%s6607_s19 + $0xa8] sm:$0xff] %v5171_v31   ;;  %v3844_v52 = vadd.f32 %v6762_v60, %v3843_v45 }
 0x577   : > { %v3897_v39 = vadd.f32 %v5057_v4, %v3844_v52 }
 0x579   : > { %v3945_v58 = vmax.f32 %v3897_v39, 0.0 }
 0x57c   : > { %v3845_v2 = vpop.f32.mrf.mxu1 }
 0x57d   : > { %v3846_v10 = vadd.f32 %v6762_v60, %v3845_v2 }
 0x57f   : > { %v3898_v5 = vadd.f32 %v5058_v7, %v3846_v10 }
 0x581   : > { %v3946_v30 = vmax.f32 %v3898_v5, 0.0 }
 0x583   : > { %v5176_v13 = vpack.c.bf16 %v3946_v30, %v3945_v58 }
 0x584   : > { %v3848_v12 = vpop.f32.mrf.mxu1 }
 0x585   : > { %5227 = vst [vmem:[%s6607_s19 + $0xb0] sm:$0xff] %v5176_v13   ;;  %v3849_v34 = vadd.f32 %v6762_v60, %v3848_v12 }
 0x587   : > { %v3899_v20 = vadd.f32 %v5061_v37, %v3849_v34 }
 0x589   : > { %v3947_v54 = vmax.f32 %v3899_v20, 0.0 }
 0x58c   : > { %v3850_v18 = vpop.f32.mrf.mxu1 }
 0x58d   : > { %v3851_v24 = vadd.f32 %v6762_v60, %v3850_v18 }
 0x58f   : > { %v3900_v36 = vadd.f32 %v5062_v38, %v3851_v24 }
 0x591   : > { %v3948_v19 = vmax.f32 %v3900_v36, 0.0 }
 0x593   : > { %v5181_v51 = vpack.c.bf16 %v3948_v19, %v3947_v54 }
 0x595   : > { %5228 = vst [vmem:[%s6607_s19 + $0xb8] sm:$0xff] %v5181_v51  }
 0x596   : > { %5455 = shalt.err (!%p5452_p13)
}
 0x597   : > { %s5521_s22 = smov 4  }
 0x598   : > { %5259 = dma.vmem_to_hbm [thread:$0]  (%p5622_p9), %s4062_s21, 3072, %s4064_s15, %s4046_s8, %s5519_s11, %s5519_s11, %s5521_s22  }
 0x599 PF: > { %s6927_s19 = sld [smem:[#allocation13_spill]]  ;;  %p5272_p0 = pnand %p4203_p12, %p5629_p11 }
 0x59a   : > { %s6929_s16 = sld [smem:[#allocation17_spill]] }
 0x59b   : > { %p5273_p1 = pneg %p5272_p0 }
 0x59f   : > { %s4078_s18 = sand.u32 1, %s6927_s19  }
 0x5a0   : > { %s4079_s27 = scalar_lea.sflag [#allocation5], %s4078_s18 }
 0x5a1   : > { %5489 = dma.done.wait (%p5273_p1), %s4079_s27, 3072  }
 0x5a2   : > { %5491 = vsyncadd (%p5273_p1), %s4079_s27, 4294964224  ;;  %s27_s10 = sadd.s32 1, %s6929_s16   ;;  %s6930_s1 = sld [smem:[#allocation14_spill]] }
 0x5a3   : > { %p24_p2 = scmp.ge.s32.totalorder %s27_s10, 4   ;;  %s6931_s29 = sld [smem:[#allocation20_spill]] }
 0x5a4   : > { %s6932_s30 = sld [smem:[#allocation16_spill]]  ;;  %s6934_s27 = smov %s5498_s28 }
 0x5a5   : > { %s6933_s9 = sld [smem:[#allocation18_spill]]  ;;  %26 = sbr.rel (!%p24_p2) target bundleno = 11 (0xb), region = 130 }
 0x5a8   : > { %s6935_s28 = smov %s6930_s1 }
 0x5aa   :  { %4085 = vsyncpa [#allocation4], 1 }
 0x5ab   :  { %4087 = vsyncpa [#allocation4 + $0x1], 1 }
 0x5ac   :  { %4088 = vsyncpa [#allocation7], 1 }
 0x5ad   :  { %4090 = vsyncpa [#allocation7 + $0x1], 1 }
 0x5ae   :  { %4091 = vsyncpa [#allocation5], 1 }
 0x5af   :  { %4093 = vsyncpa [#allocation5 + $0x1], 1 }

</bundles_post_ra>
